<compile_context>
chip_gen: v7x
topology: tpu7x:2x2x1
jax: 0.10.0
libtpu: 0.0.40
codegen_flags: <defaults>
</compile_context>

<pallas_src>
import functools

import jax
import jax.numpy as jnp
from jax import lax
from jax.experimental import pallas as pl
from jax.experimental.pallas import tpu as pltpu


LANE = 128  # hidden width is padded to this so all gate slabs are lane-dense


def _round_up(x, m):
    return ((x + m - 1) // m) * m


# ----------------------------------------------------------------------------
# Pallas kernel: one bidirectional LSTM layer, one time-chunk per grid step.
# Both directions share the grid step; h/c for both directions live in f32
# VMEM scratch and carry across the sequential grid.
# Gate-input gx = x @ W_ih^T + (b_ih + b_hh) is precomputed outside (stored in
# the compute dtype, bf16 by default). Gate column order is (i, f, o, g).
# ----------------------------------------------------------------------------
def _bilstm_chunk_kernel(gxf_ref, gxb_ref, whh_ref, h0_ref, c0_ref,
                         yf_ref, yb_ref, hn_ref, cn_ref,
                         h_sc, c_sc, *, chunk, hidden, t_real, t_pad, merged):
    c_idx = pl.program_id(0)
    H = hidden
    cdt = whh_ref.dtype                      # MXU operand dtype (bf16 or f32)

    @pl.when(c_idx == 0)
    def _():
        h_sc[...] = h0_ref[...]
        c_sc[...] = c0_ref[...]

    def cell(gates, c_prev):
        # gate order (i, f, o, g): one sigmoid over a contiguous (B, 3H) slab.
        sig = jax.nn.sigmoid(gates[:, 0:3 * H])
        i_g = sig[:, 0 * H:1 * H]
        f_g = sig[:, 1 * H:2 * H]
        o_g = sig[:, 2 * H:3 * H]
        g_g = jnp.tanh(gates[:, 3 * H:4 * H])
        c_new = f_g * c_prev + i_g * g_g
        h_new = o_g * jnp.tanh(c_new)
        return h_new, c_new

    base = c_idx * chunk
    has_tail = (t_real != t_pad)             # static: mask code only if padded

    def step(i, carry):
        h_f, c_f, h_b, c_b = carry
        j = chunk - 1 - i                    # backward walks the chunk reversed

        gx_f = gxf_ref[i].astype(jnp.float32)
        gx_b = gxb_ref[j].astype(jnp.float32)

        if merged:
            # One MXU issue for both directions via the block-diagonal weight.
            h_cat = jnp.concatenate([h_f.astype(cdt), h_b.astype(cdt)], axis=1)
            hh = jnp.dot(h_cat, whh_ref[...], preferred_element_type=jnp.float32)
            g_f = gx_f + hh[:, :4 * H]
            g_b = gx_b + hh[:, 4 * H:]
        else:
            g_f = gx_f + jnp.dot(h_f.astype(cdt), whh_ref[0:H, :],
                                 preferred_element_type=jnp.float32)
            g_b = gx_b + jnp.dot(h_b.astype(cdt), whh_ref[H:2 * H, :],
                                 preferred_element_type=jnp.float32)

        h_f_n, c_f_n = cell(g_f, c_f)
        h_b_n, c_b_n = cell(g_b, c_b)

        if has_tail:
            # Skip state updates on padded timesteps (exact 0/1 blend).
            m_f = ((base + i) < t_real).astype(jnp.float32)
            m_b = ((base + i) >= (t_pad - t_real)).astype(jnp.float32)
            h_f_n = m_f * h_f_n + (1.0 - m_f) * h_f
            c_f_n = m_f * c_f_n + (1.0 - m_f) * c_f
            h_b_n = m_b * h_b_n + (1.0 - m_b) * h_b
            c_b_n = m_b * c_b_n + (1.0 - m_b) * c_b

        yf_ref[i] = h_f_n.astype(yf_ref.dtype)   # forward output at local time i
        yb_ref[j] = h_b_n.astype(yb_ref.dtype)   # backward output, un-reversed slot
        return (h_f_n, c_f_n, h_b_n, c_b_n)

    init = (h_sc[0], c_sc[0], h_sc[1], c_sc[1])
    h_f, c_f, h_b, c_b = lax.fori_loop(0, chunk, step, init,
                                       unroll=min(chunk, 8))

    h_sc[0] = h_f
    c_sc[0] = c_f
    h_sc[1] = h_b
    c_sc[1] = c_b

    @pl.when(c_idx == pl.num_programs(0) - 1)
    def _():
        hn_ref[...] = h_sc[...]
        cn_ref[...] = c_sc[...]


def bilstm_layer(gx, whh, h0, c0, *, chunk, t_real, y_dtype):
    """One bidirectional LSTM layer given precomputed, direction-stacked gate inputs.

    gx:   (t_pad, B, 8Hp), layout [fwd 4Hp | bwd 4Hp], gate order (i,f,o,g),
          natural (un-reversed) time order, zero-padded along time.
    whh:  (2Hp, 8Hp) block-diagonal when merged (2Hp <= 256), else (2Hp, 4Hp)
          row-stacked [W_hh_f ; W_hh_b].
    h0, c0: (2, B, Hp) initial states, [fwd, bwd], f32.
    Returns y_fwd (t_pad,B,Hp), y_bwd (t_pad,B,Hp), h_N (2,B,Hp), c_N (2,B,Hp).
    """
    t_pad, B, G2 = gx.shape
    Hp = whh.shape[0] // 2
    G = 4 * Hp
    assert G2 == 2 * G and t_pad % chunk == 0
    nc = t_pad // chunk
    merged = (whh.shape[1] == 4 * whh.shape[0])   # block-diagonal representation?

    kernel = functools.partial(_bilstm_chunk_kernel, chunk=chunk, hidden=Hp,
                               t_real=t_real, t_pad=t_pad, merged=merged)

    grid_spec = pltpu.PrefetchScalarGridSpec(
        num_scalar_prefetch=0,
        grid=(nc,),
        in_specs=[
            # fwd gate-input chunk: fwd half of gx (last-axis block 0), forward time
            pl.BlockSpec((chunk, B, G), lambda c: (c, 0, 0)),
            # bwd gate-input chunk: bwd half (last-axis block 1); time reversal
            # done in the index_map (no HBM flip)
            pl.BlockSpec((chunk, B, G), lambda c: (nc - 1 - c, 0, 1)),
            pl.BlockSpec(whh.shape, lambda c: (0, 0)),       # W_hh (VMEM-resident)
            pl.BlockSpec((2, B, Hp), lambda c: (0, 0, 0)),   # h0 (both dirs)
            pl.BlockSpec((2, B, Hp), lambda c: (0, 0, 0)),   # c0 (both dirs)
        ],
        out_specs=[
            pl.BlockSpec((chunk, B, Hp), lambda c: (c, 0, 0)),           # y_fwd
            pl.BlockSpec((chunk, B, Hp), lambda c: (nc - 1 - c, 0, 0)),  # y_bwd
            pl.BlockSpec((2, B, Hp), lambda c: (0, 0, 0)),               # h_N
            pl.BlockSpec((2, B, Hp), lambda c: (0, 0, 0)),               # c_N
        ],
        scratch_shapes=[
            pltpu.VMEM((2, B, Hp), jnp.float32),             # h carry (fwd, bwd) f32
            pltpu.VMEM((2, B, Hp), jnp.float32),             # c carry (fwd, bwd) f32
        ],
    )

    # Explicit VMEM limit from a simple double-buffer estimate (review item).
    gx_b = jnp.dtype(gx.dtype).itemsize
    y_b = jnp.dtype(y_dtype).itemsize
    est = (2 * 2 * chunk * B * G * gx_b          # gxf + gxb, double-buffered
           + 2 * 2 * chunk * B * Hp * y_b        # y_fwd + y_bwd, double-buffered
           + 2 * whh.size * jnp.dtype(whh.dtype).itemsize   # resident weight (x2 bufs)
           + 10 * 2 * B * Hp * 4)                # h0/c0/hn/cn buffers + carries
    vmem_limit = int(min(max(2 * est, 32 * 1024 * 1024), 64 * 1024 * 1024))

    return pl.pallas_call(
        kernel,
        out_shape=(
            jax.ShapeDtypeStruct((t_pad, B, Hp), y_dtype),
            jax.ShapeDtypeStruct((t_pad, B, Hp), y_dtype),
            jax.ShapeDtypeStruct((2, B, Hp), jnp.float32),
            jax.ShapeDtypeStruct((2, B, Hp), jnp.float32),
        ),
        grid_spec=grid_spec,
        compiler_params=pltpu.CompilerParams(
            dimension_semantics=("arbitrary",),              # time recurrence is serial
            vmem_limit_bytes=vmem_limit),
        # gx is passed twice: the fwd/bwd halves are selected purely by the two
        # BlockSpecs above, so no extra HBM copies from XLA-side slicing.
    )(gx, gx, whh, h0, c0)


def _pick_chunk(T, B, Hp, gx_itemsize, target, budget_bytes=24 * 1024 * 1024):
    """Largest chunk <= target whose double-buffered gx/y streams fit the budget.
    T need not divide the chunk (tail is padded + masked in-kernel)."""
    chunk = max(1, min(target, T))

    def stream_bytes(c):
        return (2 * 2 * c * B * 4 * Hp * gx_itemsize     # gxf + gxb
                + 2 * 2 * c * B * Hp * gx_itemsize)      # y_fwd + y_bwd

    while chunk > 1 and stream_bytes(chunk) > budget_bytes:
        chunk = max(1, chunk // 2)
    return chunk


# ----------------------------------------------------------------------------
# BiEncoderRNN forward (stacked bidirectional LSTM), kernel-backed.
# ----------------------------------------------------------------------------
def bi_encoder_forward(kparams, x, hidden, cell_state, *, time_chunk=32):
    """kparams from prepare_kernel_params; x: (T,B,D); hidden/cell: (2L,B,H)."""
    T, B, _ = x.shape
    H = hidden.shape[-1]
    Hp = kparams[0]['whh'].shape[0] // 2
    compute_dtype = kparams[0]['whh'].dtype

    chunk = _pick_chunk(T, B, Hp, jnp.dtype(compute_dtype).itemsize, time_chunk)
    t_pad = _round_up(T, chunk)

    # Pad time once on the (small) input; padded steps are masked in-kernel.
    xp = x if t_pad == T else jnp.pad(x, ((0, t_pad - T), (0, 0), (0, 0)))
    # Pad hidden width to the lane-aligned Hp (padded units provably stay 0).
    if Hp != H:
        wpad = ((0, 0), (0, 0), (0, Hp - H))
        hidden = jnp.pad(hidden, wpad)
        cell_state = jnp.pad(cell_state, wpad)

    yf = yb = None
    h_finals, c_finals = [], []
    for layer, lp in enumerate(kparams):
        wih_cat = lp['wih_cat']          # (d_in, 8Hp): [fwd 4Hp | bwd 4Hp], (i,f,o,g)
        b_cat = lp['b_cat']              # (8Hp,) f32
        whh = lp['whh']                  # (2Hp, 8Hp) block-diag or (2Hp, 4Hp) stacked

        # Hoisted input projection: one tall MXU matmul over all t_pad*B rows and
        # both directions at once (bias folded in); result stored in compute_dtype
        # (bf16 by default) to halve its HBM round trip into the recurrent kernel.
        if layer == 0:
            gx = jnp.einsum('tbd,dg->tbg', xp.astype(compute_dtype), wih_cat,
                            preferred_element_type=jnp.float32) + b_cat
        else:
            # Consume previous layer's (y_fwd, y_bwd) via a split matmul --
            # no (t_pad, B, 2Hp) concat materialized between layers.
            gx = (jnp.einsum('tbh,hg->tbg', yf, wih_cat[:Hp],
                             preferred_element_type=jnp.float32)
                  + jnp.einsum('tbh,hg->tbg', yb, wih_cat[Hp:],
                               preferred_element_type=jnp.float32)
                  + b_cat)
        gx = gx.astype(compute_dtype)    # fed straight to pallas_call, never sliced

        h0 = hidden[2 * layer:2 * layer + 2]        # (2, B, Hp) = [fwd, bwd]
        c0 = cell_state[2 * layer:2 * layer + 2]

        yf, yb, hn, cn = bilstm_layer(gx, whh, h0, c0, chunk=chunk,
                                      t_real=T, y_dtype=compute_dtype)
        h_finals.append(hn)
        c_finals.append(cn)

    # Only the final module outputs are sliced back to real T / H and concatenated.
    output_enc = jnp.concatenate([yf[:T, :, :H], yb[:T, :, :H]],
                                 axis=-1).astype(jnp.float32)       # (T, B, 2H)
    hidden_enc = jnp.concatenate(h_finals, axis=0)[:, :, :H]        # (2L, B, H)
    cell_enc = jnp.concatenate(c_finals, axis=0)[:, :, :H]
    return output_enc, (hidden_enc, cell_enc)


# ----------------------------------------------------------------------------
# Parameter handling.
#  - init_params produces PyTorch-layout params: w_ih^T (d_in,4H), w_hh^T (H,4H),
#    bias = b_ih + b_hh (4H,), gate order (i, f, g, o).
#  - prepare_kernel_params reorders gates to (i, f, o, g), zero-pads hidden to a
#    lane multiple, stacks the two directions' input weights to (d_in, 8Hp), and
#    builds the (block-diagonal) recurrent weight.  MXU operands are stored in
#    compute_dtype (bf16 default, f32 accumulate in-kernel).
# ----------------------------------------------------------------------------
def init_params(key, input_dim, hidden_size, num_layers):
    k = 1.0 / jnp.sqrt(hidden_size)
    params = []
    for layer in range(num_layers):
        d_in = input_dim if layer == 0 else 2 * hidden_size
        layer_p = {}
        for dname in ('fwd', 'bwd'):
            key, k1, k2, k3, k4 = jax.random.split(key, 5)
            w_ih_t = jax.random.uniform(k1, (d_in, 4 * hidden_size),
                                        jnp.float32, -k, k)
            w_hh_t = jax.random.uniform(k2, (hidden_size, 4 * hidden_size),
                                        jnp.float32, -k, k)
            b_ih = jax.random.uniform(k3, (4 * hidden_size,), jnp.float32, -k, k)
            b_hh = jax.random.uniform(k4, (4 * hidden_size,), jnp.float32, -k, k)
            layer_p[dname] = (w_ih_t, w_hh_t, b_ih + b_hh)
        params.append(layer_p)
    return params


def _reorder_pad_gates(w, H, Hp, axis):
    """(i,f,g,o) -> (i,f,o,g) along `axis`; each gate block zero-padded H -> Hp."""
    i_, f_, g_, o_ = jnp.split(w, 4, axis=axis)
    blocks = [i_, f_, o_, g_]
    if Hp != H:
        pad = [(0, 0)] * w.ndim
        pad[axis] = (0, Hp - H)
        blocks = [jnp.pad(b, pad) for b in blocks]
    return jnp.concatenate(blocks, axis=axis)


def _pad_rows(w, H, Hp):
    return w if Hp == H else jnp.pad(w, ((0, Hp - H), (0, 0)))


def prepare_kernel_params(params, compute_dtype=jnp.bfloat16, lane=LANE):
    H = params[0]['fwd'][1].shape[0]
    Hp = _round_up(H, lane)
    merged = (2 * Hp) <= 256        # one MXU K-pass for both directions?
    kp = []
    for layer, layer_p in enumerate(params):
        w_ih_f, w_hh_f, b_f = layer_p['fwd']
        w_ih_b, w_hh_b, b_b = layer_p['bwd']

        def prep_wih(w):
            if layer > 0:           # rows are [y_fwd (H) | y_bwd (H)] -> pad halves
                w = jnp.concatenate([_pad_rows(w[:H], H, Hp),
                                     _pad_rows(w[H:], H, Hp)], axis=0)
            return _reorder_pad_gates(w, H, Hp, axis=1)

        wih_cat = jnp.concatenate([prep_wih(w_ih_f), prep_wih(w_ih_b)], axis=1)
        b_cat = jnp.concatenate([_reorder_pad_gates(b_f, H, Hp, 0),
                                 _reorder_pad_gates(b_b, H, Hp, 0)], axis=0)

        whh_f = _reorder_pad_gates(_pad_rows(w_hh_f, H, Hp), H, Hp, axis=1)
        whh_b = _reorder_pad_gates(_pad_rows(w_hh_b, H, Hp), H, Hp, axis=1)
        if merged:
            z = jnp.zeros((Hp, 4 * Hp), jnp.float32)
            whh = jnp.concatenate(
                [jnp.concatenate([whh_f, z], axis=1),
                 jnp.concatenate([z, whh_b], axis=1)], axis=0)   # (2Hp, 8Hp) block-diag
        else:
            whh = jnp.concatenate([whh_f, whh_b], axis=0)        # (2Hp, 4Hp) stacked

        kp.append(dict(wih_cat=wih_cat.astype(compute_dtype),
                       b_cat=b_cat,                               # tiny, keep f32
                       whh=whh.astype(compute_dtype)))
    return kp


# ----------------------------------------------------------------------------
# Pure-JAX reference (lax.scan, PyTorch gate order) for correctness check.
# ----------------------------------------------------------------------------
def _lstm_layer_dir_ref(x, w_ih_t, w_hh_t, bias, h0, c0):
    H = h0.shape[-1]

    def step(carry, x_t):
        h, c = carry
        gates = x_t @ w_ih_t + h @ w_hh_t + bias
        i_g = jax.nn.sigmoid(gates[:, 0 * H:1 * H])
        f_g = jax.nn.sigmoid(gates[:, 1 * H:2 * H])
        g_g = jnp.tanh(gates[:, 2 * H:3 * H])
        o_g = jax.nn.sigmoid(gates[:, 3 * H:4 * H])
        c_new = f_g * c + i_g * g_g
        h_new = o_g * jnp.tanh(c_new)
        return (h_new, c_new), h_new

    (hN, cN), ys = lax.scan(step, (h0, c0), x)
    return ys, hN, cN


def bi_encoder_forward_ref(params, x, hidden, cell_state):
    layer_in = x
    h_finals, c_finals = [], []
    for layer in range(len(params)):
        w_ih_f, w_hh_f, b_f = params[layer]['fwd']
        w_ih_b, w_hh_b, b_b = params[layer]['bwd']
        y_f, hN_f, cN_f = _lstm_layer_dir_ref(
            layer_in, w_ih_f, w_hh_f, b_f,
            hidden[2 * layer + 0], cell_state[2 * layer + 0])
        y_b_rev, hN_b, cN_b = _lstm_layer_dir_ref(
            layer_in[::-1], w_ih_b, w_hh_b, b_b,
            hidden[2 * layer + 1], cell_state[2 * layer + 1])
        layer_in = jnp.concatenate([y_f, y_b_rev[::-1]], axis=-1)
        h_finals += [hN_f, hN_b]
        c_finals += [cN_f, cN_b]
    return layer_in, (jnp.stack(h_finals, 0), jnp.stack(c_finals, 0))


if __name__ == "__main__":
    # Small shapes consistent with the module (seq-major bidirectional LSTM).
    T = 8          # sequence length
    B = 8          # batch size
    D = 16         # input (embedding) dim, stands in for glove_dim
    H = 32         # hidden_size
    L = 2          # layers_enc

    key = jax.random.PRNGKey(0)
    key, kx = jax.random.split(key)
    x = jax.random.normal(kx, (T, B, D), jnp.float32)
    params = init_params(key, D, H, L)

    # BiEncoderRNN.initHidden(train=True): zeros of shape (2*layers, B, H)
    hidden0 = jnp.zeros((2 * L, B, H), jnp.float32)
    cell0 = jnp.zeros((2 * L, B, H), jnp.float32)

    out_r, (h_r, c_r) = bi_encoder_forward_ref(params, x, hidden0, cell0)

    # --- 1) f32 compute path: strict parity with the PyTorch-layout reference ---
    kp_f32 = prepare_kernel_params(params, compute_dtype=jnp.float32)
    fwd_f32 = jax.jit(functools.partial(bi_encoder_forward, time_chunk=4))
    out, (h_enc, c_enc) = fwd_f32(kp_f32, x, hidden0, cell0)
    jax.block_until_ready((out, h_enc, c_enc))
    assert out.shape == (T, B, 2 * H)
    assert h_enc.shape == (2 * L, B, H) and c_enc.shape == (2 * L, B, H)
    assert jnp.allclose(out, out_r, atol=1e-4, rtol=1e-4)
    assert jnp.allclose(h_enc, h_r, atol=1e-4, rtol=1e-4)
    assert jnp.allclose(c_enc, c_r, atol=1e-4, rtol=1e-4)

    # --- 2) default bf16 gate-input / weight path + non-divisible time chunk ---
    # (time_chunk=3 with T=8 exercises the padded/masked tail; bf16 is an
    #  intentional accuracy/perf tradeoff -> looser tolerance.)
    kp_bf16 = prepare_kernel_params(params)                    # bf16 MXU operands
    fwd_bf16 = jax.jit(functools.partial(bi_encoder_forward, time_chunk=3))
    out2, (h2, c2) = fwd_bf16(kp_bf16, x, hidden0, cell0)
    jax.block_until_ready((out2, h2, c2))
    assert out2.shape == (T, B, 2 * H)
    assert jnp.allclose(out2, out_r, atol=5e-2, rtol=5e-2)
    assert jnp.allclose(h2, h_r, atol=5e-2, rtol=5e-2)
    assert jnp.allclose(c2, c_r, atol=5e-2, rtol=5e-2)

    print("KERNEL_OK")
</pallas_src>

<mosaic_0001>
module attributes {stable_mosaic.version = 11 : i64} {
  func.func @_bilstm_chunk_kernel(%arg0: i32, %arg1: memref<4x8x512xf32, #tpu.memory_space<vmem>>, %arg2: memref<4x8x512xf32, #tpu.memory_space<vmem>>, %arg3: memref<256x1024xf32, #tpu.memory_space<vmem>>, %arg4: memref<2x8x128xf32, #tpu.memory_space<vmem>>, %arg5: memref<2x8x128xf32, #tpu.memory_space<vmem>>, %arg6: memref<4x8x128xf32, #tpu.memory_space<vmem>>, %arg7: memref<4x8x128xf32, #tpu.memory_space<vmem>>, %arg8: memref<2x8x128xf32, #tpu.memory_space<vmem>>, %arg9: memref<2x8x128xf32, #tpu.memory_space<vmem>>, %arg10: memref<2x8x128xf32, #tpu.memory_space<vmem>>, %arg11: memref<2x8x128xf32, #tpu.memory_space<vmem>>) attributes {dimension_semantics = [#tpu.dimension_semantics<arbitrary>], iteration_bounds = array<i64: 2>, scalar_prefetch = 0 : i64, scratch_operands = 2 : i64, tpu.core_type = #tpu.core_type<tc>, window_params = [{transform_indices = @transform_0, window_bounds = array<i64: 4, 8, 512>}, {transform_indices = @transform_1, window_bounds = array<i64: 4, 8, 512>}, {pipeline_mode = #tpu.pipeline_mode<synchronous>, transform_indices = @transform_2, window_bounds = array<i64: 256, 1024>}, {pipeline_mode = #tpu.pipeline_mode<synchronous>, transform_indices = @transform_3, window_bounds = array<i64: 2, 8, 128>}, {pipeline_mode = #tpu.pipeline_mode<synchronous>, transform_indices = @transform_4, window_bounds = array<i64: 2, 8, 128>}, {transform_indices = @transform_5, window_bounds = array<i64: 4, 8, 128>}, {transform_indices = @transform_6, window_bounds = array<i64: 4, 8, 128>}, {pipeline_mode = #tpu.pipeline_mode<synchronous>, transform_indices = @transform_7, window_bounds = array<i64: 2, 8, 128>}, {pipeline_mode = #tpu.pipeline_mode<synchronous>, transform_indices = @transform_8, window_bounds = array<i64: 2, 8, 128>}]} {
    %c0_i32 = arith.constant 0 : i32
    %0 = arith.cmpi eq, %arg0, %c0_i32 : i32
    %1 = arith.extui %0 : i1 to i32
    %c0_i32_0 = arith.constant 0 : i32
    %2 = arith.cmpi ne, %1, %c0_i32_0 : i32
    scf.if %2 {
      %c0_81 = arith.constant 0 : index
      %c0_82 = arith.constant 0 : index
      %c0_83 = arith.constant 0 : index
      %242 = vector.load %arg4[%c0_81, %c0_82, %c0_83] : memref<2x8x128xf32, #tpu.memory_space<vmem>>, vector<2x8x128xf32>
      %c0_84 = arith.constant 0 : index
      %c0_85 = arith.constant 0 : index
      %c0_86 = arith.constant 0 : index
      %243 = vector.load %arg10[%c0_84, %c0_85, %c0_86] : memref<2x8x128xf32, #tpu.memory_space<vmem>>, vector<2x8x128xf32>
      tpu.vector_store %arg10[%c0_84, %c0_85, %c0_86], %242 {strides = array<i32>} : memref<2x8x128xf32, #tpu.memory_space<vmem>>, vector<2x8x128xf32>,
      %c0_87 = arith.constant 0 : index
      %c0_88 = arith.constant 0 : index
      %c0_89 = arith.constant 0 : index
      %244 = vector.load %arg5[%c0_87, %c0_88, %c0_89] : memref<2x8x128xf32, #tpu.memory_space<vmem>>, vector<2x8x128xf32>
      %c0_90 = arith.constant 0 : index
      %c0_91 = arith.constant 0 : index
      %c0_92 = arith.constant 0 : index
      %245 = vector.load %arg11[%c0_90, %c0_91, %c0_92] : memref<2x8x128xf32, #tpu.memory_space<vmem>>, vector<2x8x128xf32>
      tpu.vector_store %arg11[%c0_90, %c0_91, %c0_92], %244 {strides = array<i32>} : memref<2x8x128xf32, #tpu.memory_space<vmem>>, vector<2x8x128xf32>,
    } else {
    }
    %c0 = arith.constant 0 : index
    %c0_1 = arith.constant 0 : index
    %c0_2 = arith.constant 0 : index
    %3 = vector.load %arg10[%c0, %c0_1, %c0_2] : memref<2x8x128xf32, #tpu.memory_space<vmem>>, vector<1x8x128xf32>
    %4 = vector.shape_cast %3 : vector<1x8x128xf32> to vector<8x128xf32>
    %c0_3 = arith.constant 0 : index
    %c0_4 = arith.constant 0 : index
    %c0_5 = arith.constant 0 : index
    %5 = vector.load %arg11[%c0_3, %c0_4, %c0_5] : memref<2x8x128xf32, #tpu.memory_space<vmem>>, vector<1x8x128xf32>
    %6 = vector.shape_cast %5 : vector<1x8x128xf32> to vector<8x128xf32>
    %c1 = arith.constant 1 : index
    %c0_6 = arith.constant 0 : index
    %c0_7 = arith.constant 0 : index
    %7 = vector.load %arg10[%c1, %c0_6, %c0_7] : memref<2x8x128xf32, #tpu.memory_space<vmem>>, vector<1x8x128xf32>
    %8 = vector.shape_cast %7 : vector<1x8x128xf32> to vector<8x128xf32>
    %c1_8 = arith.constant 1 : index
    %c0_9 = arith.constant 0 : index
    %c0_10 = arith.constant 0 : index
    %9 = vector.load %arg11[%c1_8, %c0_9, %c0_10] : memref<2x8x128xf32, #tpu.memory_space<vmem>>, vector<1x8x128xf32>
    %10 = vector.shape_cast %9 : vector<1x8x128xf32> to vector<8x128xf32>
    %c0_i32_11 = arith.constant 0 : i32
    %c3_i32 = arith.constant 3 : i32
    %11 = arith.subi %c3_i32, %c0_i32_11 : i32
    %12 = arith.index_cast %c0_i32_11 : i32 to index
    %c0_12 = arith.constant 0 : index
    %c0_13 = arith.constant 0 : index
    %13 = vector.load %arg1[%12, %c0_12, %c0_13] : memref<4x8x512xf32, #tpu.memory_space<vmem>>, vector<1x8x512xf32>
    %14 = vector.shape_cast %13 : vector<1x8x512xf32> to vector<8x512xf32>
    %15 = arith.index_cast %11 : i32 to index
    %c0_14 = arith.constant 0 : index
    %c0_15 = arith.constant 0 : index
    %16 = vector.load %arg2[%15, %c0_14, %c0_15] : memref<4x8x512xf32, #tpu.memory_space<vmem>>, vector<1x8x512xf32>
    %17 = vector.shape_cast %16 : vector<1x8x512xf32> to vector<8x512xf32>
    %18 = tpu.concatenate %4, %8 in 1 : vector<8x128xf32>, vector<8x128xf32> -> vector<8x256xf32>
    %c0_16 = arith.constant 0 : index
    %c0_17 = arith.constant 0 : index
    %19 = vector.load %arg3[%c0_16, %c0_17] : memref<256x1024xf32, #tpu.memory_space<vmem>>, vector<256x1024xf32>
    %cst = arith.constant dense<0.000000e+00> : vector<8x1024xf32>
    %20 = tpu.matmul %18, %19, %cst {dimension_numbers = #tpu.dot_dimension_numbers<[1], [0], [0], [1], [0, 0, 1, 1], [], []>} : vector<8x256xf32>, vector<256x1024xf32>, vector<8x1024xf32> -> vector<8x1024xf32>
    %21 = vector.extract_strided_slice %20 {offsets = [0, 0], sizes = [8, 512], strides = [1, 1]} : vector<8x1024xf32> to vector<8x512xf32>
    %22 = arith.addf %14, %21 : vector<8x512xf32>
    %23 = vector.extract_strided_slice %20 {offsets = [0, 512], sizes = [8, 512], strides = [1, 1]} : vector<8x1024xf32> to vector<8x512xf32>
    %24 = arith.addf %17, %23 : vector<8x512xf32>
    %25 = vector.extract_strided_slice %22 {offsets = [0, 0], sizes = [8, 384], strides = [1, 1]} : vector<8x512xf32> to vector<8x384xf32>
    %26 = arith.negf %25 : vector<8x384xf32>
    %27 = math.exp %26 : vector<8x384xf32>
    %cst_18 = arith.constant 1.000000e+00 : f32
    %28 = vector.broadcast %cst_18 : f32 to vector<8x384xf32>
    %29 = arith.addf %28, %27 : vector<8x384xf32>
    %30 = arith.divf %28, %29 : vector<8x384xf32>
    %31 = vector.extract_strided_slice %30 {offsets = [0, 0], sizes = [8, 128], strides = [1, 1]} : vector<8x384xf32> to vector<8x128xf32>
    %32 = vector.extract_strided_slice %30 {offsets = [0, 128], sizes = [8, 128], strides = [1, 1]} : vector<8x384xf32> to vector<8x128xf32>
    %33 = vector.extract_strided_slice %30 {offsets = [0, 256], sizes = [8, 128], strides = [1, 1]} : vector<8x384xf32> to vector<8x128xf32>
    %34 = vector.extract_strided_slice %22 {offsets = [0, 384], sizes = [8, 128], strides = [1, 1]} : vector<8x512xf32> to vector<8x128xf32>
    %35 = math.tanh %34 : vector<8x128xf32>
    %36 = arith.mulf %32, %6 : vector<8x128xf32>
    %37 = arith.mulf %31, %35 : vector<8x128xf32>
    %38 = arith.addf %36, %37 : vector<8x128xf32>
    %39 = math.tanh %38 : vector<8x128xf32>
    %40 = arith.mulf %33, %39 : vector<8x128xf32>
    %41 = vector.extract_strided_slice %24 {offsets = [0, 0], sizes = [8, 384], strides = [1, 1]} : vector<8x512xf32> to vector<8x384xf32>
    %42 = arith.negf %41 : vector<8x384xf32>
    %43 = math.exp %42 : vector<8x384xf32>
    %cst_19 = arith.constant 1.000000e+00 : f32
    %44 = vector.broadcast %cst_19 : f32 to vector<8x384xf32>
    %45 = arith.addf %44, %43 : vector<8x384xf32>
    %46 = arith.divf %44, %45 : vector<8x384xf32>
    %47 = vector.extract_strided_slice %46 {offsets = [0, 0], sizes = [8, 128], strides = [1, 1]} : vector<8x384xf32> to vector<8x128xf32>
    %48 = vector.extract_strided_slice %46 {offsets = [0, 128], sizes = [8, 128], strides = [1, 1]} : vector<8x384xf32> to vector<8x128xf32>
    %49 = vector.extract_strided_slice %46 {offsets = [0, 256], sizes = [8, 128], strides = [1, 1]} : vector<8x384xf32> to vector<8x128xf32>
    %50 = vector.extract_strided_slice %24 {offsets = [0, 384], sizes = [8, 128], strides = [1, 1]} : vector<8x512xf32> to vector<8x128xf32>
    %51 = math.tanh %50 : vector<8x128xf32>
    %52 = arith.mulf %48, %10 : vector<8x128xf32>
    %53 = arith.mulf %47, %51 : vector<8x128xf32>
    %54 = arith.addf %52, %53 : vector<8x128xf32>
    %55 = math.tanh %54 : vector<8x128xf32>
    %56 = arith.mulf %49, %55 : vector<8x128xf32>
    %57 = arith.index_cast %c0_i32_11 : i32 to index
    %c0_20 = arith.constant 0 : index
    %c0_21 = arith.constant 0 : index
    %58 = vector.load %arg6[%57, %c0_20, %c0_21] : memref<4x8x128xf32, #tpu.memory_space<vmem>>, vector<1x8x128xf32>
    %59 = vector.shape_cast %58 : vector<1x8x128xf32> to vector<8x128xf32>
    %60 = vector.shape_cast %40 : vector<8x128xf32> to vector<1x8x128xf32>
    tpu.vector_store %arg6[%57, %c0_20, %c0_21], %60 {strides = array<i32>} : memref<4x8x128xf32, #tpu.memory_space<vmem>>, vector<1x8x128xf32>,
    %61 = arith.index_cast %11 : i32 to index
    %c0_22 = arith.constant 0 : index
    %c0_23 = arith.constant 0 : index
    %62 = vector.load %arg7[%61, %c0_22, %c0_23] : memref<4x8x128xf32, #tpu.memory_space<vmem>>, vector<1x8x128xf32>
    %63 = vector.shape_cast %62 : vector<1x8x128xf32> to vector<8x128xf32>
    %64 = vector.shape_cast %56 : vector<8x128xf32> to vector<1x8x128xf32>
    tpu.vector_store %arg7[%61, %c0_22, %c0_23], %64 {strides = array<i32>} : memref<4x8x128xf32, #tpu.memory_space<vmem>>, vector<1x8x128xf32>,
    %c1_i32 = arith.constant 1 : i32
    %c3_i32_24 = arith.constant 3 : i32
    %65 = arith.subi %c3_i32_24, %c1_i32 : i32
    %66 = arith.index_cast %c1_i32 : i32 to index
    %c0_25 = arith.constant 0 : index
    %c0_26 = arith.constant 0 : index
    %67 = vector.load %arg1[%66, %c0_25, %c0_26] : memref<4x8x512xf32, #tpu.memory_space<vmem>>, vector<1x8x512xf32>
    %68 = vector.shape_cast %67 : vector<1x8x512xf32> to vector<8x512xf32>
    %69 = arith.index_cast %65 : i32 to index
    %c0_27 = arith.constant 0 : index
    %c0_28 = arith.constant 0 : index
    %70 = vector.load %arg2[%69, %c0_27, %c0_28] : memref<4x8x512xf32, #tpu.memory_space<vmem>>, vector<1x8x512xf32>
    %71 = vector.shape_cast %70 : vector<1x8x512xf32> to vector<8x512xf32>
    %72 = tpu.concatenate %40, %56 in 1 : vector<8x128xf32>, vector<8x128xf32> -> vector<8x256xf32>
    %c0_29 = arith.constant 0 : index
    %c0_30 = arith.constant 0 : index
    %73 = vector.load %arg3[%c0_29, %c0_30] : memref<256x1024xf32, #tpu.memory_space<vmem>>, vector<256x1024xf32>
    %cst_31 = arith.constant dense<0.000000e+00> : vector<8x1024xf32>
    %74 = tpu.matmul %72, %73, %cst_31 {dimension_numbers = #tpu.dot_dimension_numbers<[1], [0], [0], [1], [0, 0, 1, 1], [], []>} : vector<8x256xf32>, vector<256x1024xf32>, vector<8x1024xf32> -> vector<8x1024xf32>
    %75 = vector.extract_strided_slice %74 {offsets = [0, 0], sizes = [8, 512], strides = [1, 1]} : vector<8x1024xf32> to vector<8x512xf32>
    %76 = arith.addf %68, %75 : vector<8x512xf32>
    %77 = vector.extract_strided_slice %74 {offsets = [0, 512], sizes = [8, 512], strides = [1, 1]} : vector<8x1024xf32> to vector<8x512xf32>
    %78 = arith.addf %71, %77 : vector<8x512xf32>
    %79 = vector.extract_strided_slice %76 {offsets = [0, 0], sizes = [8, 384], strides = [1, 1]} : vector<8x512xf32> to vector<8x384xf32>
    %80 = arith.negf %79 : vector<8x384xf32>
    %81 = math.exp %80 : vector<8x384xf32>
    %cst_32 = arith.constant 1.000000e+00 : f32
    %82 = vector.broadcast %cst_32 : f32 to vector<8x384xf32>
    %83 = arith.addf %82, %81 : vector<8x384xf32>
    %84 = arith.divf %82, %83 : vector<8x384xf32>
    %85 = vector.extract_strided_slice %84 {offsets = [0, 0], sizes = [8, 128], strides = [1, 1]} : vector<8x384xf32> to vector<8x128xf32>
    %86 = vector.extract_strided_slice %84 {offsets = [0, 128], sizes = [8, 128], strides = [1, 1]} : vector<8x384xf32> to vector<8x128xf32>
    %87 = vector.extract_strided_slice %84 {offsets = [0, 256], sizes = [8, 128], strides = [1, 1]} : vector<8x384xf32> to vector<8x128xf32>
    %88 = vector.extract_strided_slice %76 {offsets = [0, 384], sizes = [8, 128], strides = [1, 1]} : vector<8x512xf32> to vector<8x128xf32>
    %89 = math.tanh %88 : vector<8x128xf32>
    %90 = arith.mulf %86, %38 : vector<8x128xf32>
    %91 = arith.mulf %85, %89 : vector<8x128xf32>
    %92 = arith.addf %90, %91 : vector<8x128xf32>
    %93 = math.tanh %92 : vector<8x128xf32>
    %94 = arith.mulf %87, %93 : vector<8x128xf32>
    %95 = vector.extract_strided_slice %78 {offsets = [0, 0], sizes = [8, 384], strides = [1, 1]} : vector<8x512xf32> to vector<8x384xf32>
    %96 = arith.negf %95 : vector<8x384xf32>
    %97 = math.exp %96 : vector<8x384xf32>
    %cst_33 = arith.constant 1.000000e+00 : f32
    %98 = vector.broadcast %cst_33 : f32 to vector<8x384xf32>
    %99 = arith.addf %98, %97 : vector<8x384xf32>
    %100 = arith.divf %98, %99 : vector<8x384xf32>
    %101 = vector.extract_strided_slice %100 {offsets = [0, 0], sizes = [8, 128], strides = [1, 1]} : vector<8x384xf32> to vector<8x128xf32>
    %102 = vector.extract_strided_slice %100 {offsets = [0, 128], sizes = [8, 128], strides = [1, 1]} : vector<8x384xf32> to vector<8x128xf32>
    %103 = vector.extract_strided_slice %100 {offsets = [0, 256], sizes = [8, 128], strides = [1, 1]} : vector<8x384xf32> to vector<8x128xf32>
    %104 = vector.extract_strided_slice %78 {offsets = [0, 384], sizes = [8, 128], strides = [1, 1]} : vector<8x512xf32> to vector<8x128xf32>
    %105 = math.tanh %104 : vector<8x128xf32>
    %106 = arith.mulf %102, %54 : vector<8x128xf32>
    %107 = arith.mulf %101, %105 : vector<8x128xf32>
    %108 = arith.addf %106, %107 : vector<8x128xf32>
    %109 = math.tanh %108 : vector<8x128xf32>
    %110 = arith.mulf %103, %109 : vector<8x128xf32>
    %111 = arith.index_cast %c1_i32 : i32 to index
    %c0_34 = arith.constant 0 : index
    %c0_35 = arith.constant 0 : index
    %112 = vector.load %arg6[%111, %c0_34, %c0_35] : memref<4x8x128xf32, #tpu.memory_space<vmem>>, vector<1x8x128xf32>
    %113 = vector.shape_cast %112 : vector<1x8x128xf32> to vector<8x128xf32>
    %114 = vector.shape_cast %94 : vector<8x128xf32> to vector<1x8x128xf32>
    tpu.vector_store %arg6[%111, %c0_34, %c0_35], %114 {strides = array<i32>} : memref<4x8x128xf32, #tpu.memory_space<vmem>>, vector<1x8x128xf32>,
    %115 = arith.index_cast %65 : i32 to index
    %c0_36 = arith.constant 0 : index
    %c0_37 = arith.constant 0 : index
    %116 = vector.load %arg7[%115, %c0_36, %c0_37] : memref<4x8x128xf32, #tpu.memory_space<vmem>>, vector<1x8x128xf32>
    %117 = vector.shape_cast %116 : vector<1x8x128xf32> to vector<8x128xf32>
    %118 = vector.shape_cast %110 : vector<8x128xf32> to vector<1x8x128xf32>
    tpu.vector_store %arg7[%115, %c0_36, %c0_37], %118 {strides = array<i32>} : memref<4x8x128xf32, #tpu.memory_space<vmem>>, vector<1x8x128xf32>,
    %c2_i32 = arith.constant 2 : i32
    %c3_i32_38 = arith.constant 3 : i32
    %119 = arith.subi %c3_i32_38, %c2_i32 : i32
    %120 = arith.index_cast %c2_i32 : i32 to index
    %c0_39 = arith.constant 0 : index
    %c0_40 = arith.constant 0 : index
    %121 = vector.load %arg1[%120, %c0_39, %c0_40] : memref<4x8x512xf32, #tpu.memory_space<vmem>>, vector<1x8x512xf32>
    %122 = vector.shape_cast %121 : vector<1x8x512xf32> to vector<8x512xf32>
    %123 = arith.index_cast %119 : i32 to index
    %c0_41 = arith.constant 0 : index
    %c0_42 = arith.constant 0 : index
    %124 = vector.load %arg2[%123, %c0_41, %c0_42] : memref<4x8x512xf32, #tpu.memory_space<vmem>>, vector<1x8x512xf32>
    %125 = vector.shape_cast %124 : vector<1x8x512xf32> to vector<8x512xf32>
    %126 = tpu.concatenate %94, %110 in 1 : vector<8x128xf32>, vector<8x128xf32> -> vector<8x256xf32>
    %c0_43 = arith.constant 0 : index
    %c0_44 = arith.constant 0 : index
    %127 = vector.load %arg3[%c0_43, %c0_44] : memref<256x1024xf32, #tpu.memory_space<vmem>>, vector<256x1024xf32>
    %cst_45 = arith.constant dense<0.000000e+00> : vector<8x1024xf32>
    %128 = tpu.matmul %126, %127, %cst_45 {dimension_numbers = #tpu.dot_dimension_numbers<[1], [0], [0], [1], [0, 0, 1, 1], [], []>} : vector<8x256xf32>, vector<256x1024xf32>, vector<8x1024xf32> -> vector<8x1024xf32>
    %129 = vector.extract_strided_slice %128 {offsets = [0, 0], sizes = [8, 512], strides = [1, 1]} : vector<8x1024xf32> to vector<8x512xf32>
    %130 = arith.addf %122, %129 : vector<8x512xf32>
    %131 = vector.extract_strided_slice %128 {offsets = [0, 512], sizes = [8, 512], strides = [1, 1]} : vector<8x1024xf32> to vector<8x512xf32>
    %132 = arith.addf %125, %131 : vector<8x512xf32>
    %133 = vector.extract_strided_slice %130 {offsets = [0, 0], sizes = [8, 384], strides = [1, 1]} : vector<8x512xf32> to vector<8x384xf32>
    %134 = arith.negf %133 : vector<8x384xf32>
    %135 = math.exp %134 : vector<8x384xf32>
    %cst_46 = arith.constant 1.000000e+00 : f32
    %136 = vector.broadcast %cst_46 : f32 to vector<8x384xf32>
    %137 = arith.addf %136, %135 : vector<8x384xf32>
    %138 = arith.divf %136, %137 : vector<8x384xf32>
    %139 = vector.extract_strided_slice %138 {offsets = [0, 0], sizes = [8, 128], strides = [1, 1]} : vector<8x384xf32> to vector<8x128xf32>
    %140 = vector.extract_strided_slice %138 {offsets = [0, 128], sizes = [8, 128], strides = [1, 1]} : vector<8x384xf32> to vector<8x128xf32>
    %141 = vector.extract_strided_slice %138 {offsets = [0, 256], sizes = [8, 128], strides = [1, 1]} : vector<8x384xf32> to vector<8x128xf32>
    %142 = vector.extract_strided_slice %130 {offsets = [0, 384], sizes = [8, 128], strides = [1, 1]} : vector<8x512xf32> to vector<8x128xf32>
    %143 = math.tanh %142 : vector<8x128xf32>
    %144 = arith.mulf %140, %92 : vector<8x128xf32>
    %145 = arith.mulf %139, %143 : vector<8x128xf32>
    %146 = arith.addf %144, %145 : vector<8x128xf32>
    %147 = math.tanh %146 : vector<8x128xf32>
    %148 = arith.mulf %141, %147 : vector<8x128xf32>
    %149 = vector.extract_strided_slice %132 {offsets = [0, 0], sizes = [8, 384], strides = [1, 1]} : vector<8x512xf32> to vector<8x384xf32>
    %150 = arith.negf %149 : vector<8x384xf32>
    %151 = math.exp %150 : vector<8x384xf32>
    %cst_47 = arith.constant 1.000000e+00 : f32
    %152 = vector.broadcast %cst_47 : f32 to vector<8x384xf32>
    %153 = arith.addf %152, %151 : vector<8x384xf32>
    %154 = arith.divf %152, %153 : vector<8x384xf32>
    %155 = vector.extract_strided_slice %154 {offsets = [0, 0], sizes = [8, 128], strides = [1, 1]} : vector<8x384xf32> to vector<8x128xf32>
    %156 = vector.extract_strided_slice %154 {offsets = [0, 128], sizes = [8, 128], strides = [1, 1]} : vector<8x384xf32> to vector<8x128xf32>
    %157 = vector.extract_strided_slice %154 {offsets = [0, 256], sizes = [8, 128], strides = [1, 1]} : vector<8x384xf32> to vector<8x128xf32>
    %158 = vector.extract_strided_slice %132 {offsets = [0, 384], sizes = [8, 128], strides = [1, 1]} : vector<8x512xf32> to vector<8x128xf32>
    %159 = math.tanh %158 : vector<8x128xf32>
    %160 = arith.mulf %156, %108 : vector<8x128xf32>
    %161 = arith.mulf %155, %159 : vector<8x128xf32>
    %162 = arith.addf %160, %161 : vector<8x128xf32>
    %163 = math.tanh %162 : vector<8x128xf32>
    %164 = arith.mulf %157, %163 : vector<8x128xf32>
    %165 = arith.index_cast %c2_i32 : i32 to index
    %c0_48 = arith.constant 0 : index
    %c0_49 = arith.constant 0 : index
    %166 = vector.load %arg6[%165, %c0_48, %c0_49] : memref<4x8x128xf32, #tpu.memory_space<vmem>>, vector<1x8x128xf32>
    %167 = vector.shape_cast %166 : vector<1x8x128xf32> to vector<8x128xf32>
    %168 = vector.shape_cast %148 : vector<8x128xf32> to vector<1x8x128xf32>
    tpu.vector_store %arg6[%165, %c0_48, %c0_49], %168 {strides = array<i32>} : memref<4x8x128xf32, #tpu.memory_space<vmem>>, vector<1x8x128xf32>,
    %169 = arith.index_cast %119 : i32 to index
    %c0_50 = arith.constant 0 : index
    %c0_51 = arith.constant 0 : index
    %170 = vector.load %arg7[%169, %c0_50, %c0_51] : memref<4x8x128xf32, #tpu.memory_space<vmem>>, vector<1x8x128xf32>
    %171 = vector.shape_cast %170 : vector<1x8x128xf32> to vector<8x128xf32>
    %172 = vector.shape_cast %164 : vector<8x128xf32> to vector<1x8x128xf32>
    tpu.vector_store %arg7[%169, %c0_50, %c0_51], %172 {strides = array<i32>} : memref<4x8x128xf32, #tpu.memory_space<vmem>>, vector<1x8x128xf32>,
    %c3_i32_52 = arith.constant 3 : i32
    %c3_i32_53 = arith.constant 3 : i32
    %173 = arith.subi %c3_i32_53, %c3_i32_52 : i32
    %174 = arith.index_cast %c3_i32_52 : i32 to index
    %c0_54 = arith.constant 0 : index
    %c0_55 = arith.constant 0 : index
    %175 = vector.load %arg1[%174, %c0_54, %c0_55] : memref<4x8x512xf32, #tpu.memory_space<vmem>>, vector<1x8x512xf32>
    %176 = vector.shape_cast %175 : vector<1x8x512xf32> to vector<8x512xf32>
    %177 = arith.index_cast %173 : i32 to index
    %c0_56 = arith.constant 0 : index
    %c0_57 = arith.constant 0 : index
    %178 = vector.load %arg2[%177, %c0_56, %c0_57] : memref<4x8x512xf32, #tpu.memory_space<vmem>>, vector<1x8x512xf32>
    %179 = vector.shape_cast %178 : vector<1x8x512xf32> to vector<8x512xf32>
    %180 = tpu.concatenate %148, %164 in 1 : vector<8x128xf32>, vector<8x128xf32> -> vector<8x256xf32>
    %c0_58 = arith.constant 0 : index
    %c0_59 = arith.constant 0 : index
    %181 = vector.load %arg3[%c0_58, %c0_59] : memref<256x1024xf32, #tpu.memory_space<vmem>>, vector<256x1024xf32>
    %cst_60 = arith.constant dense<0.000000e+00> : vector<8x1024xf32>
    %182 = tpu.matmul %180, %181, %cst_60 {dimension_numbers = #tpu.dot_dimension_numbers<[1], [0], [0], [1], [0, 0, 1, 1], [], []>} : vector<8x256xf32>, vector<256x1024xf32>, vector<8x1024xf32> -> vector<8x1024xf32>
    %183 = vector.extract_strided_slice %182 {offsets = [0, 0], sizes = [8, 512], strides = [1, 1]} : vector<8x1024xf32> to vector<8x512xf32>
    %184 = arith.addf %176, %183 : vector<8x512xf32>
    %185 = vector.extract_strided_slice %182 {offsets = [0, 512], sizes = [8, 512], strides = [1, 1]} : vector<8x1024xf32> to vector<8x512xf32>
    %186 = arith.addf %179, %185 : vector<8x512xf32>
    %187 = vector.extract_strided_slice %184 {offsets = [0, 0], sizes = [8, 384], strides = [1, 1]} : vector<8x512xf32> to vector<8x384xf32>
    %188 = arith.negf %187 : vector<8x384xf32>
    %189 = math.exp %188 : vector<8x384xf32>
    %cst_61 = arith.constant 1.000000e+00 : f32
    %190 = vector.broadcast %cst_61 : f32 to vector<8x384xf32>
    %191 = arith.addf %190, %189 : vector<8x384xf32>
    %192 = arith.divf %190, %191 : vector<8x384xf32>
    %193 = vector.extract_strided_slice %192 {offsets = [0, 0], sizes = [8, 128], strides = [1, 1]} : vector<8x384xf32> to vector<8x128xf32>
    %194 = vector.extract_strided_slice %192 {offsets = [0, 128], sizes = [8, 128], strides = [1, 1]} : vector<8x384xf32> to vector<8x128xf32>
    %195 = vector.extract_strided_slice %192 {offsets = [0, 256], sizes = [8, 128], strides = [1, 1]} : vector<8x384xf32> to vector<8x128xf32>
    %196 = vector.extract_strided_slice %184 {offsets = [0, 384], sizes = [8, 128], strides = [1, 1]} : vector<8x512xf32> to vector<8x128xf32>
    %197 = math.tanh %196 : vector<8x128xf32>
    %198 = arith.mulf %194, %146 : vector<8x128xf32>
    %199 = arith.mulf %193, %197 : vector<8x128xf32>
    %200 = arith.addf %198, %199 : vector<8x128xf32>
    %201 = math.tanh %200 : vector<8x128xf32>
    %202 = arith.mulf %195, %201 : vector<8x128xf32>
    %203 = vector.extract_strided_slice %186 {offsets = [0, 0], sizes = [8, 384], strides = [1, 1]} : vector<8x512xf32> to vector<8x384xf32>
    %204 = arith.negf %203 : vector<8x384xf32>
    %205 = math.exp %204 : vector<8x384xf32>
    %cst_62 = arith.constant 1.000000e+00 : f32
    %206 = vector.broadcast %cst_62 : f32 to vector<8x384xf32>
    %207 = arith.addf %206, %205 : vector<8x384xf32>
    %208 = arith.divf %206, %207 : vector<8x384xf32>
    %209 = vector.extract_strided_slice %208 {offsets = [0, 0], sizes = [8, 128], strides = [1, 1]} : vector<8x384xf32> to vector<8x128xf32>
    %210 = vector.extract_strided_slice %208 {offsets = [0, 128], sizes = [8, 128], strides = [1, 1]} : vector<8x384xf32> to vector<8x128xf32>
    %211 = vector.extract_strided_slice %208 {offsets = [0, 256], sizes = [8, 128], strides = [1, 1]} : vector<8x384xf32> to vector<8x128xf32>
    %212 = vector.extract_strided_slice %186 {offsets = [0, 384], sizes = [8, 128], strides = [1, 1]} : vector<8x512xf32> to vector<8x128xf32>
    %213 = math.tanh %212 : vector<8x128xf32>
    %214 = arith.mulf %210, %162 : vector<8x128xf32>
    %215 = arith.mulf %209, %213 : vector<8x128xf32>
    %216 = arith.addf %214, %215 : vector<8x128xf32>
    %217 = math.tanh %216 : vector<8x128xf32>
    %218 = arith.mulf %211, %217 : vector<8x128xf32>
    %219 = arith.index_cast %c3_i32_52 : i32 to index
    %c0_63 = arith.constant 0 : index
    %c0_64 = arith.constant 0 : index
    %220 = vector.load %arg6[%219, %c0_63, %c0_64] : memref<4x8x128xf32, #tpu.memory_space<vmem>>, vector<1x8x128xf32>
    %221 = vector.shape_cast %220 : vector<1x8x128xf32> to vector<8x128xf32>
    %222 = vector.shape_cast %202 : vector<8x128xf32> to vector<1x8x128xf32>
    tpu.vector_store %arg6[%219, %c0_63, %c0_64], %222 {strides = array<i32>} : memref<4x8x128xf32, #tpu.memory_space<vmem>>, vector<1x8x128xf32>,
    %223 = arith.index_cast %173 : i32 to index
    %c0_65 = arith.constant 0 : index
    %c0_66 = arith.constant 0 : index
    %224 = vector.load %arg7[%223, %c0_65, %c0_66] : memref<4x8x128xf32, #tpu.memory_space<vmem>>, vector<1x8x128xf32>
    %225 = vector.shape_cast %224 : vector<1x8x128xf32> to vector<8x128xf32>
    %226 = vector.shape_cast %218 : vector<8x128xf32> to vector<1x8x128xf32>
    tpu.vector_store %arg7[%223, %c0_65, %c0_66], %226 {strides = array<i32>} : memref<4x8x128xf32, #tpu.memory_space<vmem>>, vector<1x8x128xf32>,
    %c4_i32 = arith.constant 4 : i32
    %c0_67 = arith.constant 0 : index
    %c0_68 = arith.constant 0 : index
    %c0_69 = arith.constant 0 : index
    %227 = vector.load %arg10[%c0_67, %c0_68, %c0_69] : memref<2x8x128xf32, #tpu.memory_space<vmem>>, vector<1x8x128xf32>
    %228 = vector.shape_cast %227 : vector<1x8x128xf32> to vector<8x128xf32>
    %229 = vector.shape_cast %202 : vector<8x128xf32> to vector<1x8x128xf32>
    tpu.vector_store %arg10[%c0_67, %c0_68, %c0_69], %229 {strides = array<i32>} : memref<2x8x128xf32, #tpu.memory_space<vmem>>, vector<1x8x128xf32>,
    %c0_70 = arith.constant 0 : index
    %c0_71 = arith.constant 0 : index
    %c0_72 = arith.constant 0 : index
    %230 = vector.load %arg11[%c0_70, %c0_71, %c0_72] : memref<2x8x128xf32, #tpu.memory_space<vmem>>, vector<1x8x128xf32>
    %231 = vector.shape_cast %230 : vector<1x8x128xf32> to vector<8x128xf32>
    %232 = vector.shape_cast %200 : vector<8x128xf32> to vector<1x8x128xf32>
    tpu.vector_store %arg11[%c0_70, %c0_71, %c0_72], %232 {strides = array<i32>} : memref<2x8x128xf32, #tpu.memory_space<vmem>>, vector<1x8x128xf32>,
    %c1_73 = arith.constant 1 : index
    %c0_74 = arith.constant 0 : index
    %c0_75 = arith.constant 0 : index
    %233 = vector.load %arg10[%c1_73, %c0_74, %c0_75] : memref<2x8x128xf32, #tpu.memory_space<vmem>>, vector<1x8x128xf32>
    %234 = vector.shape_cast %233 : vector<1x8x128xf32> to vector<8x128xf32>
    %235 = vector.shape_cast %218 : vector<8x128xf32> to vector<1x8x128xf32>
    tpu.vector_store %arg10[%c1_73, %c0_74, %c0_75], %235 {strides = array<i32>} : memref<2x8x128xf32, #tpu.memory_space<vmem>>, vector<1x8x128xf32>,
    %c1_76 = arith.constant 1 : index
    %c0_77 = arith.constant 0 : index
    %c0_78 = arith.constant 0 : index
    %236 = vector.load %arg11[%c1_76, %c0_77, %c0_78] : memref<2x8x128xf32, #tpu.memory_space<vmem>>, vector<1x8x128xf32>
    %237 = vector.shape_cast %236 : vector<1x8x128xf32> to vector<8x128xf32>
    %238 = vector.shape_cast %216 : vector<8x128xf32> to vector<1x8x128xf32>
    tpu.vector_store %arg11[%c1_76, %c0_77, %c0_78], %238 {strides = array<i32>} : memref<2x8x128xf32, #tpu.memory_space<vmem>>, vector<1x8x128xf32>,
    %c1_i32_79 = arith.constant 1 : i32
    %239 = arith.cmpi eq, %arg0, %c1_i32_79 : i32
    %240 = arith.extui %239 : i1 to i32
    %c0_i32_80 = arith.constant 0 : i32
    %241 = arith.cmpi ne, %240, %c0_i32_80 : i32
    scf.if %241 {
      %c0_81 = arith.constant 0 : index
      %c0_82 = arith.constant 0 : index
      %c0_83 = arith.constant 0 : index
      %242 = vector.load %arg10[%c0_81, %c0_82, %c0_83] : memref<2x8x128xf32, #tpu.memory_space<vmem>>, vector<2x8x128xf32>
      %c0_84 = arith.constant 0 : index
      %c0_85 = arith.constant 0 : index
      %c0_86 = arith.constant 0 : index
      %243 = vector.load %arg8[%c0_84, %c0_85, %c0_86] : memref<2x8x128xf32, #tpu.memory_space<vmem>>, vector<2x8x128xf32>
      tpu.vector_store %arg8[%c0_84, %c0_85, %c0_86], %242 {strides = array<i32>} : memref<2x8x128xf32, #tpu.memory_space<vmem>>, vector<2x8x128xf32>,
      %c0_87 = arith.constant 0 : index
      %c0_88 = arith.constant 0 : index
      %c0_89 = arith.constant 0 : index
      %244 = vector.load %arg11[%c0_87, %c0_88, %c0_89] : memref<2x8x128xf32, #tpu.memory_space<vmem>>, vector<2x8x128xf32>
      %c0_90 = arith.constant 0 : index
      %c0_91 = arith.constant 0 : index
      %c0_92 = arith.constant 0 : index
      %245 = vector.load %arg9[%c0_90, %c0_91, %c0_92] : memref<2x8x128xf32, #tpu.memory_space<vmem>>, vector<2x8x128xf32>
      tpu.vector_store %arg9[%c0_90, %c0_91, %c0_92], %244 {strides = array<i32>} : memref<2x8x128xf32, #tpu.memory_space<vmem>>, vector<2x8x128xf32>,
    } else {
    }
    return
  }
  func.func @transform_0(%arg0: i32) -> (i32, i32, i32) {
    %c0_i32 = arith.constant 0 : i32
    %c0_i32_0 = arith.constant 0 : i32
    %c0_i32_1 = arith.constant 0 : i32
    return %arg0, %c0_i32, %c0_i32_0 : i32, i32, i32
  }
  func.func @transform_1(%arg0: i32) -> (i32, i32, i32) {
    %c1_i32 = arith.constant 1 : i32
    %0 = arith.subi %c1_i32, %arg0 : i32
    %c0_i32 = arith.constant 0 : i32
    %c1_i32_0 = arith.constant 1 : i32
    %c0_i32_1 = arith.constant 0 : i32
    return %0, %c0_i32, %c1_i32_0 : i32, i32, i32
  }
  func.func @transform_2(%arg0: i32) -> (i32, i32) {
    %c0_i32 = arith.constant 0 : i32
    %c0_i32_0 = arith.constant 0 : i32
    %c0_i32_1 = arith.constant 0 : i32
    return %c0_i32, %c0_i32_0 : i32, i32
  }
  func.func @transform_3(%arg0: i32) -> (i32, i32, i32) {
    %c0_i32 = arith.constant 0 : i32
    %c0_i32_0 = arith.constant 0 : i32
    %c0_i32_1 = arith.constant 0 : i32
    %c0_i32_2 = arith.constant 0 : i32
    return %c0_i32, %c0_i32_0, %c0_i32_1 : i32, i32, i32
  }
  func.func @transform_4(%arg0: i32) -> (i32, i32, i32) {
    %c0_i32 = arith.constant 0 : i32
    %c0_i32_0 = arith.constant 0 : i32
    %c0_i32_1 = arith.constant 0 : i32
    %c0_i32_2 = arith.constant 0 : i32
    return %c0_i32, %c0_i32_0, %c0_i32_1 : i32, i32, i32
  }
  func.func @transform_5(%arg0: i32) -> (i32, i32, i32) {
    %c0_i32 = arith.constant 0 : i32
    %c0_i32_0 = arith.constant 0 : i32
    %c0_i32_1 = arith.constant 0 : i32
    return %arg0, %c0_i32, %c0_i32_0 : i32, i32, i32
  }
  func.func @transform_6(%arg0: i32) -> (i32, i32, i32) {
    %c1_i32 = arith.constant 1 : i32
    %0 = arith.subi %c1_i32, %arg0 : i32
    %c0_i32 = arith.constant 0 : i32
    %c0_i32_0 = arith.constant 0 : i32
    %c0_i32_1 = arith.constant 0 : i32
    return %0, %c0_i32, %c0_i32_0 : i32, i32, i32
  }
  func.func @transform_7(%arg0: i32) -> (i32, i32, i32) {
    %c0_i32 = arith.constant 0 : i32
    %c0_i32_0 = arith.constant 0 : i32
    %c0_i32_1 = arith.constant 0 : i32
    %c0_i32_2 = arith.constant 0 : i32
    return %c0_i32, %c0_i32_0, %c0_i32_1 : i32, i32, i32
  }
  func.func @transform_8(%arg0: i32) -> (i32, i32, i32) {
    %c0_i32 = arith.constant 0 : i32
    %c0_i32_0 = arith.constant 0 : i32
    %c0_i32_1 = arith.constant 0 : i32
    %c0_i32_2 = arith.constant 0 : i32
    return %c0_i32, %c0_i32_0, %c0_i32_1 : i32, i32, i32
  }
}

module attributes {stable_mosaic.version = 11 : i64} {
  func.func @_bilstm_chunk_kernel(%arg0: i32, %arg1: memref<4x8x512xf32, #tpu.memory_space<vmem>>, %arg2: memref<4x8x512xf32, #tpu.memory_space<vmem>>, %arg3: memref<256x1024xf32, #tpu.memory_space<vmem>>, %arg4: memref<2x8x128xf32, #tpu.memory_space<vmem>>, %arg5: memref<2x8x128xf32, #tpu.memory_space<vmem>>, %arg6: memref<4x8x128xf32, #tpu.memory_space<vmem>>, %arg7: memref<4x8x128xf32, #tpu.memory_space<vmem>>, %arg8: memref<2x8x128xf32, #tpu.memory_space<vmem>>, %arg9: memref<2x8x128xf32, #tpu.memory_space<vmem>>, %arg10: memref<2x8x128xf32, #tpu.memory_space<vmem>>, %arg11: memref<2x8x128xf32, #tpu.memory_space<vmem>>) attributes {dimension_semantics = [#tpu.dimension_semantics<arbitrary>], iteration_bounds = array<i64: 2>, scalar_prefetch = 0 : i64, scratch_operands = 2 : i64, tpu.core_type = #tpu.core_type<tc>, window_params = [{transform_indices = @transform_0, window_bounds = array<i64: 4, 8, 512>}, {transform_indices = @transform_1, window_bounds = array<i64: 4, 8, 512>}, {pipeline_mode = #tpu.pipeline_mode<synchronous>, transform_indices = @transform_2, window_bounds = array<i64: 256, 1024>}, {pipeline_mode = #tpu.pipeline_mode<synchronous>, transform_indices = @transform_3, window_bounds = array<i64: 2, 8, 128>}, {pipeline_mode = #tpu.pipeline_mode<synchronous>, transform_indices = @transform_4, window_bounds = array<i64: 2, 8, 128>}, {transform_indices = @transform_5, window_bounds = array<i64: 4, 8, 128>}, {transform_indices = @transform_6, window_bounds = array<i64: 4, 8, 128>}, {pipeline_mode = #tpu.pipeline_mode<synchronous>, transform_indices = @transform_7, window_bounds = array<i64: 2, 8, 128>}, {pipeline_mode = #tpu.pipeline_mode<synchronous>, transform_indices = @transform_8, window_bounds = array<i64: 2, 8, 128>}]} {
    %c0_i32 = arith.constant 0 : i32
    %0 = arith.cmpi eq, %arg0, %c0_i32 : i32
    %1 = arith.extui %0 : i1 to i32
    %c0_i32_0 = arith.constant 0 : i32
    %2 = arith.cmpi ne, %1, %c0_i32_0 : i32
    scf.if %2 {
      %c0_81 = arith.constant 0 : index
      %c0_82 = arith.constant 0 : index
      %c0_83 = arith.constant 0 : index
      %242 = vector.load %arg4[%c0_81, %c0_82, %c0_83] : memref<2x8x128xf32, #tpu.memory_space<vmem>>, vector<2x8x128xf32>
      %c0_84 = arith.constant 0 : index
      %c0_85 = arith.constant 0 : index
      %c0_86 = arith.constant 0 : index
      %243 = vector.load %arg10[%c0_84, %c0_85, %c0_86] : memref<2x8x128xf32, #tpu.memory_space<vmem>>, vector<2x8x128xf32>
      tpu.vector_store %arg10[%c0_84, %c0_85, %c0_86], %242 {strides = array<i32>} : memref<2x8x128xf32, #tpu.memory_space<vmem>>, vector<2x8x128xf32>,
      %c0_87 = arith.constant 0 : index
      %c0_88 = arith.constant 0 : index
      %c0_89 = arith.constant 0 : index
      %244 = vector.load %arg5[%c0_87, %c0_88, %c0_89] : memref<2x8x128xf32, #tpu.memory_space<vmem>>, vector<2x8x128xf32>
      %c0_90 = arith.constant 0 : index
      %c0_91 = arith.constant 0 : index
      %c0_92 = arith.constant 0 : index
      %245 = vector.load %arg11[%c0_90, %c0_91, %c0_92] : memref<2x8x128xf32, #tpu.memory_space<vmem>>, vector<2x8x128xf32>
      tpu.vector_store %arg11[%c0_90, %c0_91, %c0_92], %244 {strides = array<i32>} : memref<2x8x128xf32, #tpu.memory_space<vmem>>, vector<2x8x128xf32>,
    } else {
    }
    %c0 = arith.constant 0 : index
    %c0_1 = arith.constant 0 : index
    %c0_2 = arith.constant 0 : index
    %3 = vector.load %arg10[%c0, %c0_1, %c0_2] : memref<2x8x128xf32, #tpu.memory_space<vmem>>, vector<1x8x128xf32>
    %4 = vector.shape_cast %3 : vector<1x8x128xf32> to vector<8x128xf32>
    %c0_3 = arith.constant 0 : index
    %c0_4 = arith.constant 0 : index
    %c0_5 = arith.constant 0 : index
    %5 = vector.load %arg11[%c0_3, %c0_4, %c0_5] : memref<2x8x128xf32, #tpu.memory_space<vmem>>, vector<1x8x128xf32>
    %6 = vector.shape_cast %5 : vector<1x8x128xf32> to vector<8x128xf32>
    %c1 = arith.constant 1 : index
    %c0_6 = arith.constant 0 : index
    %c0_7 = arith.constant 0 : index
    %7 = vector.load %arg10[%c1, %c0_6, %c0_7] : memref<2x8x128xf32, #tpu.memory_space<vmem>>, vector<1x8x128xf32>
    %8 = vector.shape_cast %7 : vector<1x8x128xf32> to vector<8x128xf32>
    %c1_8 = arith.constant 1 : index
    %c0_9 = arith.constant 0 : index
    %c0_10 = arith.constant 0 : index
    %9 = vector.load %arg11[%c1_8, %c0_9, %c0_10] : memref<2x8x128xf32, #tpu.memory_space<vmem>>, vector<1x8x128xf32>
    %10 = vector.shape_cast %9 : vector<1x8x128xf32> to vector<8x128xf32>
    %c0_i32_11 = arith.constant 0 : i32
    %c3_i32 = arith.constant 3 : i32
    %11 = arith.subi %c3_i32, %c0_i32_11 : i32
    %12 = arith.index_cast %c0_i32_11 : i32 to index
    %c0_12 = arith.constant 0 : index
    %c0_13 = arith.constant 0 : index
    %13 = vector.load %arg1[%12, %c0_12, %c0_13] : memref<4x8x512xf32, #tpu.memory_space<vmem>>, vector<1x8x512xf32>
    %14 = vector.shape_cast %13 : vector<1x8x512xf32> to vector<8x512xf32>
    %15 = arith.index_cast %11 : i32 to index
    %c0_14 = arith.constant 0 : index
    %c0_15 = arith.constant 0 : index
    %16 = vector.load %arg2[%15, %c0_14, %c0_15] : memref<4x8x512xf32, #tpu.memory_space<vmem>>, vector<1x8x512xf32>
    %17 = vector.shape_cast %16 : vector<1x8x512xf32> to vector<8x512xf32>
    %18 = tpu.concatenate %4, %8 in 1 : vector<8x128xf32>, vector<8x128xf32> -> vector<8x256xf32>
    %c0_16 = arith.constant 0 : index
    %c0_17 = arith.constant 0 : index
    %19 = vector.load %arg3[%c0_16, %c0_17] : memref<256x1024xf32, #tpu.memory_space<vmem>>, vector<256x1024xf32>
    %cst = arith.constant dense<0.000000e+00> : vector<8x1024xf32>
    %20 = tpu.matmul %18, %19, %cst {dimension_numbers = #tpu.dot_dimension_numbers<[1], [0], [0], [1], [0, 0, 1, 1], [], []>} : vector<8x256xf32>, vector<256x1024xf32>, vector<8x1024xf32> -> vector<8x1024xf32>
    %21 = vector.extract_strided_slice %20 {offsets = [0, 0], sizes = [8, 512], strides = [1, 1]} : vector<8x1024xf32> to vector<8x512xf32>
    %22 = arith.addf %14, %21 : vector<8x512xf32>
    %23 = vector.extract_strided_slice %20 {offsets = [0, 512], sizes = [8, 512], strides = [1, 1]} : vector<8x1024xf32> to vector<8x512xf32>
    %24 = arith.addf %17, %23 : vector<8x512xf32>
    %25 = vector.extract_strided_slice %22 {offsets = [0, 0], sizes = [8, 384], strides = [1, 1]} : vector<8x512xf32> to vector<8x384xf32>
    %26 = arith.negf %25 : vector<8x384xf32>
    %27 = math.exp %26 : vector<8x384xf32>
    %cst_18 = arith.constant 1.000000e+00 : f32
    %28 = vector.broadcast %cst_18 : f32 to vector<8x384xf32>
    %29 = arith.addf %28, %27 : vector<8x384xf32>
    %30 = arith.divf %28, %29 : vector<8x384xf32>
    %31 = vector.extract_strided_slice %30 {offsets = [0, 0], sizes = [8, 128], strides = [1, 1]} : vector<8x384xf32> to vector<8x128xf32>
    %32 = vector.extract_strided_slice %30 {offsets = [0, 128], sizes = [8, 128], strides = [1, 1]} : vector<8x384xf32> to vector<8x128xf32>
    %33 = vector.extract_strided_slice %30 {offsets = [0, 256], sizes = [8, 128], strides = [1, 1]} : vector<8x384xf32> to vector<8x128xf32>
    %34 = vector.extract_strided_slice %22 {offsets = [0, 384], sizes = [8, 128], strides = [1, 1]} : vector<8x512xf32> to vector<8x128xf32>
    %35 = math.tanh %34 : vector<8x128xf32>
    %36 = arith.mulf %32, %6 : vector<8x128xf32>
    %37 = arith.mulf %31, %35 : vector<8x128xf32>
    %38 = arith.addf %36, %37 : vector<8x128xf32>
    %39 = math.tanh %38 : vector<8x128xf32>
    %40 = arith.mulf %33, %39 : vector<8x128xf32>
    %41 = vector.extract_strided_slice %24 {offsets = [0, 0], sizes = [8, 384], strides = [1, 1]} : vector<8x512xf32> to vector<8x384xf32>
    %42 = arith.negf %41 : vector<8x384xf32>
    %43 = math.exp %42 : vector<8x384xf32>
    %cst_19 = arith.constant 1.000000e+00 : f32
    %44 = vector.broadcast %cst_19 : f32 to vector<8x384xf32>
    %45 = arith.addf %44, %43 : vector<8x384xf32>
    %46 = arith.divf %44, %45 : vector<8x384xf32>
    %47 = vector.extract_strided_slice %46 {offsets = [0, 0], sizes = [8, 128], strides = [1, 1]} : vector<8x384xf32> to vector<8x128xf32>
    %48 = vector.extract_strided_slice %46 {offsets = [0, 128], sizes = [8, 128], strides = [1, 1]} : vector<8x384xf32> to vector<8x128xf32>
    %49 = vector.extract_strided_slice %46 {offsets = [0, 256], sizes = [8, 128], strides = [1, 1]} : vector<8x384xf32> to vector<8x128xf32>
    %50 = vector.extract_strided_slice %24 {offsets = [0, 384], sizes = [8, 128], strides = [1, 1]} : vector<8x512xf32> to vector<8x128xf32>
    %51 = math.tanh %50 : vector<8x128xf32>
    %52 = arith.mulf %48, %10 : vector<8x128xf32>
    %53 = arith.mulf %47, %51 : vector<8x128xf32>
    %54 = arith.addf %52, %53 : vector<8x128xf32>
    %55 = math.tanh %54 : vector<8x128xf32>
    %56 = arith.mulf %49, %55 : vector<8x128xf32>
    %57 = arith.index_cast %c0_i32_11 : i32 to index
    %c0_20 = arith.constant 0 : index
    %c0_21 = arith.constant 0 : index
    %58 = vector.load %arg6[%57, %c0_20, %c0_21] : memref<4x8x128xf32, #tpu.memory_space<vmem>>, vector<1x8x128xf32>
    %59 = vector.shape_cast %58 : vector<1x8x128xf32> to vector<8x128xf32>
    %60 = vector.shape_cast %40 : vector<8x128xf32> to vector<1x8x128xf32>
    tpu.vector_store %arg6[%57, %c0_20, %c0_21], %60 {strides = array<i32>} : memref<4x8x128xf32, #tpu.memory_space<vmem>>, vector<1x8x128xf32>,
    %61 = arith.index_cast %11 : i32 to index
    %c0_22 = arith.constant 0 : index
    %c0_23 = arith.constant 0 : index
    %62 = vector.load %arg7[%61, %c0_22, %c0_23] : memref<4x8x128xf32, #tpu.memory_space<vmem>>, vector<1x8x128xf32>
    %63 = vector.shape_cast %62 : vector<1x8x128xf32> to vector<8x128xf32>
    %64 = vector.shape_cast %56 : vector<8x128xf32> to vector<1x8x128xf32>
    tpu.vector_store %arg7[%61, %c0_22, %c0_23], %64 {strides = array<i32>} : memref<4x8x128xf32, #tpu.memory_space<vmem>>, vector<1x8x128xf32>,
    %c1_i32 = arith.constant 1 : i32
    %c3_i32_24 = arith.constant 3 : i32
    %65 = arith.subi %c3_i32_24, %c1_i32 : i32
    %66 = arith.index_cast %c1_i32 : i32 to index
    %c0_25 = arith.constant 0 : index
    %c0_26 = arith.constant 0 : index
    %67 = vector.load %arg1[%66, %c0_25, %c0_26] : memref<4x8x512xf32, #tpu.memory_space<vmem>>, vector<1x8x512xf32>
    %68 = vector.shape_cast %67 : vector<1x8x512xf32> to vector<8x512xf32>
    %69 = arith.index_cast %65 : i32 to index
    %c0_27 = arith.constant 0 : index
    %c0_28 = arith.constant 0 : index
    %70 = vector.load %arg2[%69, %c0_27, %c0_28] : memref<4x8x512xf32, #tpu.memory_space<vmem>>, vector<1x8x512xf32>
    %71 = vector.shape_cast %70 : vector<1x8x512xf32> to vector<8x512xf32>
    %72 = tpu.concatenate %40, %56 in 1 : vector<8x128xf32>, vector<8x128xf32> -> vector<8x256xf32>
    %c0_29 = arith.constant 0 : index
    %c0_30 = arith.constant 0 : index
    %73 = vector.load %arg3[%c0_29, %c0_30] : memref<256x1024xf32, #tpu.memory_space<vmem>>, vector<256x1024xf32>
    %cst_31 = arith.constant dense<0.000000e+00> : vector<8x1024xf32>
    %74 = tpu.matmul %72, %73, %cst_31 {dimension_numbers = #tpu.dot_dimension_numbers<[1], [0], [0], [1], [0, 0, 1, 1], [], []>} : vector<8x256xf32>, vector<256x1024xf32>, vector<8x1024xf32> -> vector<8x1024xf32>
    %75 = vector.extract_strided_slice %74 {offsets = [0, 0], sizes = [8, 512], strides = [1, 1]} : vector<8x1024xf32> to vector<8x512xf32>
    %76 = arith.addf %68, %75 : vector<8x512xf32>
    %77 = vector.extract_strided_slice %74 {offsets = [0, 512], sizes = [8, 512], strides = [1, 1]} : vector<8x1024xf32> to vector<8x512xf32>
    %78 = arith.addf %71, %77 : vector<8x512xf32>
    %79 = vector.extract_strided_slice %76 {offsets = [0, 0], sizes = [8, 384], strides = [1, 1]} : vector<8x512xf32> to vector<8x384xf32>
    %80 = arith.negf %79 : vector<8x384xf32>
    %81 = math.exp %80 : vector<8x384xf32>
    %cst_32 = arith.constant 1.000000e+00 : f32
    %82 = vector.broadcast %cst_32 : f32 to vector<8x384xf32>
    %83 = arith.addf %82, %81 : vector<8x384xf32>
    %84 = arith.divf %82, %83 : vector<8x384xf32>
    %85 = vector.extract_strided_slice %84 {offsets = [0, 0], sizes = [8, 128], strides = [1, 1]} : vector<8x384xf32> to vector<8x128xf32>
    %86 = vector.extract_strided_slice %84 {offsets = [0, 128], sizes = [8, 128], strides = [1, 1]} : vector<8x384xf32> to vector<8x128xf32>
    %87 = vector.extract_strided_slice %84 {offsets = [0, 256], sizes = [8, 128], strides = [1, 1]} : vector<8x384xf32> to vector<8x128xf32>
    %88 = vector.extract_strided_slice %76 {offsets = [0, 384], sizes = [8, 128], strides = [1, 1]} : vector<8x512xf32> to vector<8x128xf32>
    %89 = math.tanh %88 : vector<8x128xf32>
    %90 = arith.mulf %86, %38 : vector<8x128xf32>
    %91 = arith.mulf %85, %89 : vector<8x128xf32>
    %92 = arith.addf %90, %91 : vector<8x128xf32>
    %93 = math.tanh %92 : vector<8x128xf32>
    %94 = arith.mulf %87, %93 : vector<8x128xf32>
    %95 = vector.extract_strided_slice %78 {offsets = [0, 0], sizes = [8, 384], strides = [1, 1]} : vector<8x512xf32> to vector<8x384xf32>
    %96 = arith.negf %95 : vector<8x384xf32>
    %97 = math.exp %96 : vector<8x384xf32>
    %cst_33 = arith.constant 1.000000e+00 : f32
    %98 = vector.broadcast %cst_33 : f32 to vector<8x384xf32>
    %99 = arith.addf %98, %97 : vector<8x384xf32>
    %100 = arith.divf %98, %99 : vector<8x384xf32>
    %101 = vector.extract_strided_slice %100 {offsets = [0, 0], sizes = [8, 128], strides = [1, 1]} : vector<8x384xf32> to vector<8x128xf32>
    %102 = vector.extract_strided_slice %100 {offsets = [0, 128], sizes = [8, 128], strides = [1, 1]} : vector<8x384xf32> to vector<8x128xf32>
    %103 = vector.extract_strided_slice %100 {offsets = [0, 256], sizes = [8, 128], strides = [1, 1]} : vector<8x384xf32> to vector<8x128xf32>
    %104 = vector.extract_strided_slice %78 {offsets = [0, 384], sizes = [8, 128], strides = [1, 1]} : vector<8x512xf32> to vector<8x128xf32>
    %105 = math.tanh %104 : vector<8x128xf32>
    %106 = arith.mulf %102, %54 : vector<8x128xf32>
    %107 = arith.mulf %101, %105 : vector<8x128xf32>
    %108 = arith.addf %106, %107 : vector<8x128xf32>
    %109 = math.tanh %108 : vector<8x128xf32>
    %110 = arith.mulf %103, %109 : vector<8x128xf32>
    %111 = arith.index_cast %c1_i32 : i32 to index
    %c0_34 = arith.constant 0 : index
    %c0_35 = arith.constant 0 : index
    %112 = vector.load %arg6[%111, %c0_34, %c0_35] : memref<4x8x128xf32, #tpu.memory_space<vmem>>, vector<1x8x128xf32>
    %113 = vector.shape_cast %112 : vector<1x8x128xf32> to vector<8x128xf32>
    %114 = vector.shape_cast %94 : vector<8x128xf32> to vector<1x8x128xf32>
    tpu.vector_store %arg6[%111, %c0_34, %c0_35], %114 {strides = array<i32>} : memref<4x8x128xf32, #tpu.memory_space<vmem>>, vector<1x8x128xf32>,
    %115 = arith.index_cast %65 : i32 to index
    %c0_36 = arith.constant 0 : index
    %c0_37 = arith.constant 0 : index
    %116 = vector.load %arg7[%115, %c0_36, %c0_37] : memref<4x8x128xf32, #tpu.memory_space<vmem>>, vector<1x8x128xf32>
    %117 = vector.shape_cast %116 : vector<1x8x128xf32> to vector<8x128xf32>
    %118 = vector.shape_cast %110 : vector<8x128xf32> to vector<1x8x128xf32>
    tpu.vector_store %arg7[%115, %c0_36, %c0_37], %118 {strides = array<i32>} : memref<4x8x128xf32, #tpu.memory_space<vmem>>, vector<1x8x128xf32>,
    %c2_i32 = arith.constant 2 : i32
    %c3_i32_38 = arith.constant 3 : i32
    %119 = arith.subi %c3_i32_38, %c2_i32 : i32
    %120 = arith.index_cast %c2_i32 : i32 to index
    %c0_39 = arith.constant 0 : index
    %c0_40 = arith.constant 0 : index
    %121 = vector.load %arg1[%120, %c0_39, %c0_40] : memref<4x8x512xf32, #tpu.memory_space<vmem>>, vector<1x8x512xf32>
    %122 = vector.shape_cast %121 : vector<1x8x512xf32> to vector<8x512xf32>
    %123 = arith.index_cast %119 : i32 to index
    %c0_41 = arith.constant 0 : index
    %c0_42 = arith.constant 0 : index
    %124 = vector.load %arg2[%123, %c0_41, %c0_42] : memref<4x8x512xf32, #tpu.memory_space<vmem>>, vector<1x8x512xf32>
    %125 = vector.shape_cast %124 : vector<1x8x512xf32> to vector<8x512xf32>
    %126 = tpu.concatenate %94, %110 in 1 : vector<8x128xf32>, vector<8x128xf32> -> vector<8x256xf32>
    %c0_43 = arith.constant 0 : index
    %c0_44 = arith.constant 0 : index
    %127 = vector.load %arg3[%c0_43, %c0_44] : memref<256x1024xf32, #tpu.memory_space<vmem>>, vector<256x1024xf32>
    %cst_45 = arith.constant dense<0.000000e+00> : vector<8x1024xf32>
    %128 = tpu.matmul %126, %127, %cst_45 {dimension_numbers = #tpu.dot_dimension_numbers<[1], [0], [0], [1], [0, 0, 1, 1], [], []>} : vector<8x256xf32>, vector<256x1024xf32>, vector<8x1024xf32> -> vector<8x1024xf32>
    %129 = vector.extract_strided_slice %128 {offsets = [0, 0], sizes = [8, 512], strides = [1, 1]} : vector<8x1024xf32> to vector<8x512xf32>
    %130 = arith.addf %122, %129 : vector<8x512xf32>
    %131 = vector.extract_strided_slice %128 {offsets = [0, 512], sizes = [8, 512], strides = [1, 1]} : vector<8x1024xf32> to vector<8x512xf32>
    %132 = arith.addf %125, %131 : vector<8x512xf32>
    %133 = vector.extract_strided_slice %130 {offsets = [0, 0], sizes = [8, 384], strides = [1, 1]} : vector<8x512xf32> to vector<8x384xf32>
    %134 = arith.negf %133 : vector<8x384xf32>
    %135 = math.exp %134 : vector<8x384xf32>
    %cst_46 = arith.constant 1.000000e+00 : f32
    %136 = vector.broadcast %cst_46 : f32 to vector<8x384xf32>
    %137 = arith.addf %136, %135 : vector<8x384xf32>
    %138 = arith.divf %136, %137 : vector<8x384xf32>
    %139 = vector.extract_strided_slice %138 {offsets = [0, 0], sizes = [8, 128], strides = [1, 1]} : vector<8x384xf32> to vector<8x128xf32>
    %140 = vector.extract_strided_slice %138 {offsets = [0, 128], sizes = [8, 128], strides = [1, 1]} : vector<8x384xf32> to vector<8x128xf32>
    %141 = vector.extract_strided_slice %138 {offsets = [0, 256], sizes = [8, 128], strides = [1, 1]} : vector<8x384xf32> to vector<8x128xf32>
    %142 = vector.extract_strided_slice %130 {offsets = [0, 384], sizes = [8, 128], strides = [1, 1]} : vector<8x512xf32> to vector<8x128xf32>
    %143 = math.tanh %142 : vector<8x128xf32>
    %144 = arith.mulf %140, %92 : vector<8x128xf32>
    %145 = arith.mulf %139, %143 : vector<8x128xf32>
    %146 = arith.addf %144, %145 : vector<8x128xf32>
    %147 = math.tanh %146 : vector<8x128xf32>
    %148 = arith.mulf %141, %147 : vector<8x128xf32>
    %149 = vector.extract_strided_slice %132 {offsets = [0, 0], sizes = [8, 384], strides = [1, 1]} : vector<8x512xf32> to vector<8x384xf32>
    %150 = arith.negf %149 : vector<8x384xf32>
    %151 = math.exp %150 : vector<8x384xf32>
    %cst_47 = arith.constant 1.000000e+00 : f32
    %152 = vector.broadcast %cst_47 : f32 to vector<8x384xf32>
    %153 = arith.addf %152, %151 : vector<8x384xf32>
    %154 = arith.divf %152, %153 : vector<8x384xf32>
    %155 = vector.extract_strided_slice %154 {offsets = [0, 0], sizes = [8, 128], strides = [1, 1]} : vector<8x384xf32> to vector<8x128xf32>
    %156 = vector.extract_strided_slice %154 {offsets = [0, 128], sizes = [8, 128], strides = [1, 1]} : vector<8x384xf32> to vector<8x128xf32>
    %157 = vector.extract_strided_slice %154 {offsets = [0, 256], sizes = [8, 128], strides = [1, 1]} : vector<8x384xf32> to vector<8x128xf32>
    %158 = vector.extract_strided_slice %132 {offsets = [0, 384], sizes = [8, 128], strides = [1, 1]} : vector<8x512xf32> to vector<8x128xf32>
    %159 = math.tanh %158 : vector<8x128xf32>
    %160 = arith.mulf %156, %108 : vector<8x128xf32>
    %161 = arith.mulf %155, %159 : vector<8x128xf32>
    %162 = arith.addf %160, %161 : vector<8x128xf32>
    %163 = math.tanh %162 : vector<8x128xf32>
    %164 = arith.mulf %157, %163 : vector<8x128xf32>
    %165 = arith.index_cast %c2_i32 : i32 to index
    %c0_48 = arith.constant 0 : index
    %c0_49 = arith.constant 0 : index
    %166 = vector.load %arg6[%165, %c0_48, %c0_49] : memref<4x8x128xf32, #tpu.memory_space<vmem>>, vector<1x8x128xf32>
    %167 = vector.shape_cast %166 : vector<1x8x128xf32> to vector<8x128xf32>
    %168 = vector.shape_cast %148 : vector<8x128xf32> to vector<1x8x128xf32>
    tpu.vector_store %arg6[%165, %c0_48, %c0_49], %168 {strides = array<i32>} : memref<4x8x128xf32, #tpu.memory_space<vmem>>, vector<1x8x128xf32>,
    %169 = arith.index_cast %119 : i32 to index
    %c0_50 = arith.constant 0 : index
    %c0_51 = arith.constant 0 : index
    %170 = vector.load %arg7[%169, %c0_50, %c0_51] : memref<4x8x128xf32, #tpu.memory_space<vmem>>, vector<1x8x128xf32>
    %171 = vector.shape_cast %170 : vector<1x8x128xf32> to vector<8x128xf32>
    %172 = vector.shape_cast %164 : vector<8x128xf32> to vector<1x8x128xf32>
    tpu.vector_store %arg7[%169, %c0_50, %c0_51], %172 {strides = array<i32>} : memref<4x8x128xf32, #tpu.memory_space<vmem>>, vector<1x8x128xf32>,
    %c3_i32_52 = arith.constant 3 : i32
    %c3_i32_53 = arith.constant 3 : i32
    %173 = arith.subi %c3_i32_53, %c3_i32_52 : i32
    %174 = arith.index_cast %c3_i32_52 : i32 to index
    %c0_54 = arith.constant 0 : index
    %c0_55 = arith.constant 0 : index
    %175 = vector.load %arg1[%174, %c0_54, %c0_55] : memref<4x8x512xf32, #tpu.memory_space<vmem>>, vector<1x8x512xf32>
    %176 = vector.shape_cast %175 : vector<1x8x512xf32> to vector<8x512xf32>
    %177 = arith.index_cast %173 : i32 to index
    %c0_56 = arith.constant 0 : index
    %c0_57 = arith.constant 0 : index
    %178 = vector.load %arg2[%177, %c0_56, %c0_57] : memref<4x8x512xf32, #tpu.memory_space<vmem>>, vector<1x8x512xf32>
    %179 = vector.shape_cast %178 : vector<1x8x512xf32> to vector<8x512xf32>
    %180 = tpu.concatenate %148, %164 in 1 : vector<8x128xf32>, vector<8x128xf32> -> vector<8x256xf32>
    %c0_58 = arith.constant 0 : index
    %c0_59 = arith.constant 0 : index
    %181 = vector.load %arg3[%c0_58, %c0_59] : memref<256x1024xf32, #tpu.memory_space<vmem>>, vector<256x1024xf32>
    %cst_60 = arith.constant dense<0.000000e+00> : vector<8x1024xf32>
    %182 = tpu.matmul %180, %181, %cst_60 {dimension_numbers = #tpu.dot_dimension_numbers<[1], [0], [0], [1], [0, 0, 1, 1], [], []>} : vector<8x256xf32>, vector<256x1024xf32>, vector<8x1024xf32> -> vector<8x1024xf32>
    %183 = vector.extract_strided_slice %182 {offsets = [0, 0], sizes = [8, 512], strides = [1, 1]} : vector<8x1024xf32> to vector<8x512xf32>
    %184 = arith.addf %176, %183 : vector<8x512xf32>
    %185 = vector.extract_strided_slice %182 {offsets = [0, 512], sizes = [8, 512], strides = [1, 1]} : vector<8x1024xf32> to vector<8x512xf32>
    %186 = arith.addf %179, %185 : vector<8x512xf32>
    %187 = vector.extract_strided_slice %184 {offsets = [0, 0], sizes = [8, 384], strides = [1, 1]} : vector<8x512xf32> to vector<8x384xf32>
    %188 = arith.negf %187 : vector<8x384xf32>
    %189 = math.exp %188 : vector<8x384xf32>
    %cst_61 = arith.constant 1.000000e+00 : f32
    %190 = vector.broadcast %cst_61 : f32 to vector<8x384xf32>
    %191 = arith.addf %190, %189 : vector<8x384xf32>
    %192 = arith.divf %190, %191 : vector<8x384xf32>
    %193 = vector.extract_strided_slice %192 {offsets = [0, 0], sizes = [8, 128], strides = [1, 1]} : vector<8x384xf32> to vector<8x128xf32>
    %194 = vector.extract_strided_slice %192 {offsets = [0, 128], sizes = [8, 128], strides = [1, 1]} : vector<8x384xf32> to vector<8x128xf32>
    %195 = vector.extract_strided_slice %192 {offsets = [0, 256], sizes = [8, 128], strides = [1, 1]} : vector<8x384xf32> to vector<8x128xf32>
    %196 = vector.extract_strided_slice %184 {offsets = [0, 384], sizes = [8, 128], strides = [1, 1]} : vector<8x512xf32> to vector<8x128xf32>
    %197 = math.tanh %196 : vector<8x128xf32>
    %198 = arith.mulf %194, %146 : vector<8x128xf32>
    %199 = arith.mulf %193, %197 : vector<8x128xf32>
    %200 = arith.addf %198, %199 : vector<8x128xf32>
    %201 = math.tanh %200 : vector<8x128xf32>
    %202 = arith.mulf %195, %201 : vector<8x128xf32>
    %203 = vector.extract_strided_slice %186 {offsets = [0, 0], sizes = [8, 384], strides = [1, 1]} : vector<8x512xf32> to vector<8x384xf32>
    %204 = arith.negf %203 : vector<8x384xf32>
    %205 = math.exp %204 : vector<8x384xf32>
    %cst_62 = arith.constant 1.000000e+00 : f32
    %206 = vector.broadcast %cst_62 : f32 to vector<8x384xf32>
    %207 = arith.addf %206, %205 : vector<8x384xf32>
    %208 = arith.divf %206, %207 : vector<8x384xf32>
    %209 = vector.extract_strided_slice %208 {offsets = [0, 0], sizes = [8, 128], strides = [1, 1]} : vector<8x384xf32> to vector<8x128xf32>
    %210 = vector.extract_strided_slice %208 {offsets = [0, 128], sizes = [8, 128], strides = [1, 1]} : vector<8x384xf32> to vector<8x128xf32>
    %211 = vector.extract_strided_slice %208 {offsets = [0, 256], sizes = [8, 128], strides = [1, 1]} : vector<8x384xf32> to vector<8x128xf32>
    %212 = vector.extract_strided_slice %186 {offsets = [0, 384], sizes = [8, 128], strides = [1, 1]} : vector<8x512xf32> to vector<8x128xf32>
    %213 = math.tanh %212 : vector<8x128xf32>
    %214 = arith.mulf %210, %162 : vector<8x128xf32>
    %215 = arith.mulf %209, %213 : vector<8x128xf32>
    %216 = arith.addf %214, %215 : vector<8x128xf32>
    %217 = math.tanh %216 : vector<8x128xf32>
    %218 = arith.mulf %211, %217 : vector<8x128xf32>
    %219 = arith.index_cast %c3_i32_52 : i32 to index
    %c0_63 = arith.constant 0 : index
    %c0_64 = arith.constant 0 : index
    %220 = vector.load %arg6[%219, %c0_63, %c0_64] : memref<4x8x128xf32, #tpu.memory_space<vmem>>, vector<1x8x128xf32>
    %221 = vector.shape_cast %220 : vector<1x8x128xf32> to vector<8x128xf32>
    %222 = vector.shape_cast %202 : vector<8x128xf32> to vector<1x8x128xf32>
    tpu.vector_store %arg6[%219, %c0_63, %c0_64], %222 {strides = array<i32>} : memref<4x8x128xf32, #tpu.memory_space<vmem>>, vector<1x8x128xf32>,
    %223 = arith.index_cast %173 : i32 to index
    %c0_65 = arith.constant 0 : index
    %c0_66 = arith.constant 0 : index
    %224 = vector.load %arg7[%223, %c0_65, %c0_66] : memref<4x8x128xf32, #tpu.memory_space<vmem>>, vector<1x8x128xf32>
    %225 = vector.shape_cast %224 : vector<1x8x128xf32> to vector<8x128xf32>
    %226 = vector.shape_cast %218 : vector<8x128xf32> to vector<1x8x128xf32>
    tpu.vector_store %arg7[%223, %c0_65, %c0_66], %226 {strides = array<i32>} : memref<4x8x128xf32, #tpu.memory_space<vmem>>, vector<1x8x128xf32>,
    %c4_i32 = arith.constant 4 : i32
    %c0_67 = arith.constant 0 : index
    %c0_68 = arith.constant 0 : index
    %c0_69 = arith.constant 0 : index
    %227 = vector.load %arg10[%c0_67, %c0_68, %c0_69] : memref<2x8x128xf32, #tpu.memory_space<vmem>>, vector<1x8x128xf32>
    %228 = vector.shape_cast %227 : vector<1x8x128xf32> to vector<8x128xf32>
    %229 = vector.shape_cast %202 : vector<8x128xf32> to vector<1x8x128xf32>
    tpu.vector_store %arg10[%c0_67, %c0_68, %c0_69], %229 {strides = array<i32>} : memref<2x8x128xf32, #tpu.memory_space<vmem>>, vector<1x8x128xf32>,
    %c0_70 = arith.constant 0 : index
    %c0_71 = arith.constant 0 : index
    %c0_72 = arith.constant 0 : index
    %230 = vector.load %arg11[%c0_70, %c0_71, %c0_72] : memref<2x8x128xf32, #tpu.memory_space<vmem>>, vector<1x8x128xf32>
    %231 = vector.shape_cast %230 : vector<1x8x128xf32> to vector<8x128xf32>
    %232 = vector.shape_cast %200 : vector<8x128xf32> to vector<1x8x128xf32>
    tpu.vector_store %arg11[%c0_70, %c0_71, %c0_72], %232 {strides = array<i32>} : memref<2x8x128xf32, #tpu.memory_space<vmem>>, vector<1x8x128xf32>,
    %c1_73 = arith.constant 1 : index
    %c0_74 = arith.constant 0 : index
    %c0_75 = arith.constant 0 : index
    %233 = vector.load %arg10[%c1_73, %c0_74, %c0_75] : memref<2x8x128xf32, #tpu.memory_space<vmem>>, vector<1x8x128xf32>
    %234 = vector.shape_cast %233 : vector<1x8x128xf32> to vector<8x128xf32>
    %235 = vector.shape_cast %218 : vector<8x128xf32> to vector<1x8x128xf32>
    tpu.vector_store %arg10[%c1_73, %c0_74, %c0_75], %235 {strides = array<i32>} : memref<2x8x128xf32, #tpu.memory_space<vmem>>, vector<1x8x128xf32>,
    %c1_76 = arith.constant 1 : index
    %c0_77 = arith.constant 0 : index
    %c0_78 = arith.constant 0 : index
    %236 = vector.load %arg11[%c1_76, %c0_77, %c0_78] : memref<2x8x128xf32, #tpu.memory_space<vmem>>, vector<1x8x128xf32>
    %237 = vector.shape_cast %236 : vector<1x8x128xf32> to vector<8x128xf32>
    %238 = vector.shape_cast %216 : vector<8x128xf32> to vector<1x8x128xf32>
    tpu.vector_store %arg11[%c1_76, %c0_77, %c0_78], %238 {strides = array<i32>} : memref<2x8x128xf32, #tpu.memory_space<vmem>>, vector<1x8x128xf32>,
    %c1_i32_79 = arith.constant 1 : i32
    %239 = arith.cmpi eq, %arg0, %c1_i32_79 : i32
    %240 = arith.extui %239 : i1 to i32
    %c0_i32_80 = arith.constant 0 : i32
    %241 = arith.cmpi ne, %240, %c0_i32_80 : i32
    scf.if %241 {
      %c0_81 = arith.constant 0 : index
      %c0_82 = arith.constant 0 : index
      %c0_83 = arith.constant 0 : index
      %242 = vector.load %arg10[%c0_81, %c0_82, %c0_83] : memref<2x8x128xf32, #tpu.memory_space<vmem>>, vector<2x8x128xf32>
      %c0_84 = arith.constant 0 : index
      %c0_85 = arith.constant 0 : index
      %c0_86 = arith.constant 0 : index
      %243 = vector.load %arg8[%c0_84, %c0_85, %c0_86] : memref<2x8x128xf32, #tpu.memory_space<vmem>>, vector<2x8x128xf32>
      tpu.vector_store %arg8[%c0_84, %c0_85, %c0_86], %242 {strides = array<i32>} : memref<2x8x128xf32, #tpu.memory_space<vmem>>, vector<2x8x128xf32>,
      %c0_87 = arith.constant 0 : index
      %c0_88 = arith.constant 0 : index
      %c0_89 = arith.constant 0 : index
      %244 = vector.load %arg11[%c0_87, %c0_88, %c0_89] : memref<2x8x128xf32, #tpu.memory_space<vmem>>, vector<2x8x128xf32>
      %c0_90 = arith.constant 0 : index
      %c0_91 = arith.constant 0 : index
      %c0_92 = arith.constant 0 : index
      %245 = vector.load %arg9[%c0_90, %c0_91, %c0_92] : memref<2x8x128xf32, #tpu.memory_space<vmem>>, vector<2x8x128xf32>
      tpu.vector_store %arg9[%c0_90, %c0_91, %c0_92], %244 {strides = array<i32>} : memref<2x8x128xf32, #tpu.memory_space<vmem>>, vector<2x8x128xf32>,
    } else {
    }
    return
  }
  func.func @transform_0(%arg0: i32) -> (i32, i32, i32) {
    %c0_i32 = arith.constant 0 : i32
    %c0_i32_0 = arith.constant 0 : i32
    %c0_i32_1 = arith.constant 0 : i32
    return %arg0, %c0_i32, %c0_i32_0 : i32, i32, i32
  }
  func.func @transform_1(%arg0: i32) -> (i32, i32, i32) {
    %c1_i32 = arith.constant 1 : i32
    %0 = arith.subi %c1_i32, %arg0 : i32
    %c0_i32 = arith.constant 0 : i32
    %c1_i32_0 = arith.constant 1 : i32
    %c0_i32_1 = arith.constant 0 : i32
    return %0, %c0_i32, %c1_i32_0 : i32, i32, i32
  }
  func.func @transform_2(%arg0: i32) -> (i32, i32) {
    %c0_i32 = arith.constant 0 : i32
    %c0_i32_0 = arith.constant 0 : i32
    %c0_i32_1 = arith.constant 0 : i32
    return %c0_i32, %c0_i32_0 : i32, i32
  }
  func.func @transform_3(%arg0: i32) -> (i32, i32, i32) {
    %c0_i32 = arith.constant 0 : i32
    %c0_i32_0 = arith.constant 0 : i32
    %c0_i32_1 = arith.constant 0 : i32
    %c0_i32_2 = arith.constant 0 : i32
    return %c0_i32, %c0_i32_0, %c0_i32_1 : i32, i32, i32
  }
  func.func @transform_4(%arg0: i32) -> (i32, i32, i32) {
    %c0_i32 = arith.constant 0 : i32
    %c0_i32_0 = arith.constant 0 : i32
    %c0_i32_1 = arith.constant 0 : i32
    %c0_i32_2 = arith.constant 0 : i32
    return %c0_i32, %c0_i32_0, %c0_i32_1 : i32, i32, i32
  }
  func.func @transform_5(%arg0: i32) -> (i32, i32, i32) {
    %c0_i32 = arith.constant 0 : i32
    %c0_i32_0 = arith.constant 0 : i32
    %c0_i32_1 = arith.constant 0 : i32
    return %arg0, %c0_i32, %c0_i32_0 : i32, i32, i32
  }
  func.func @transform_6(%arg0: i32) -> (i32, i32, i32) {
    %c1_i32 = arith.constant 1 : i32
    %0 = arith.subi %c1_i32, %arg0 : i32
    %c0_i32 = arith.constant 0 : i32
    %c0_i32_0 = arith.constant 0 : i32
    %c0_i32_1 = arith.constant 0 : i32
    return %0, %c0_i32, %c0_i32_0 : i32, i32, i32
  }
  func.func @transform_7(%arg0: i32) -> (i32, i32, i32) {
    %c0_i32 = arith.constant 0 : i32
    %c0_i32_0 = arith.constant 0 : i32
    %c0_i32_1 = arith.constant 0 : i32
    %c0_i32_2 = arith.constant 0 : i32
    return %c0_i32, %c0_i32_0, %c0_i32_1 : i32, i32, i32
  }
  func.func @transform_8(%arg0: i32) -> (i32, i32, i32) {
    %c0_i32 = arith.constant 0 : i32
    %c0_i32_0 = arith.constant 0 : i32
    %c0_i32_1 = arith.constant 0 : i32
    %c0_i32_2 = arith.constant 0 : i32
    return %c0_i32, %c0_i32_0, %c0_i32_1 : i32, i32, i32
  }
}

</mosaic_0001>

<bundles_post_ra>
// kernel: bi_encoder_forward.3
= control target key start
LH: loop header
LB: loop body
LE: loop exit
PB: predicated region body
PF: predicated region fallthrough
CT: control target
= control target key end

     0   :  { %s4422_s27 = smov 0   ;;  %s4424_s28 = smov 0   ;;  %s7757_s0 = inlined_call_operand.vmem [shape: f32[8,8,1024], index: 0, kind: input, shape index: {}, may-alias: {0,1}]   ;;  %s7758_s1 = inlined_call_operand.vmem [shape: f32[8,8,1024], index: 1, kind: input, shape index: {}, may-alias: {0,1}]   ;;  %s7759_s2 = inlined_call_operand.vmem [shape: f32[256,1024], index: 2, kind: input, shape index: {}]   ;;  %s7760_s3 = inlined_call_operand.vmem [shape: f32[2,8,128], index: 3, kind: input, shape index: {}]   ;;  %s7761_s4 = inlined_call_operand.vmem [shape: f32[2,8,128], index: 4, kind: input, shape index: {}]   ;;  %s7762_s5 = inlined_call_operand.vmem [shape: f32[8,8,128], index: 5, kind: output, shape index: {0}]   ;;  %s7763_s6 = inlined_call_operand.vmem [shape: f32[8,8,128], index: 6, kind: output, shape index: {1}]   ;;  %s7764_s7 = inlined_call_operand.vmem [shape: f32[2,8,128], index: 7, kind: output, shape index: {2}]   ;;  %s7765_s8 = inlined_call_operand.vmem [shape: f32[2,8,128], index: 8, kind: output, shape index: {3}]  }
   0x1   :  { %s4426_s29 = smov 0   ;;  %s4428_s30 = smov 0  }
   0x2   :  { %s4430_s9 = smov 0  }
   0x3 LB: > { %s4448_s10 = sadd.s32 4294967295, %s4375_s9   ;;  %s4451_s11 = sadd.s32 1, %s4375_s9   ;;  %s4375_s9 = sphi %s4430_s9, %s7771_s9   ;;  %s4371_s30 = sphi %s4428_s30, %s7770_s30   ;;  %s4367_s29 = sphi %s4426_s29, %s7769_s29   ;;  %s4363_s28 = sphi %s4424_s28, %s7768_s28   ;;  %s4359_s27 = sphi %s4422_s27, %s7767_s27  }
   0x4   : > { %s23_s12 = ssub.s32 %s4375_s9, %s4451_s11  ;;  %s26_s13 = sadd.s32 1, %s4371_s30 }
   0x5   : > { %p24_p0 = scmp.eq.s32.totalorder %s23_s12, 0  ;;  %p33_p1 = scmp.ne.s32.totalorder %s4371_s30, %s4367_s29 }
   0x6   : > { %p34_p2 = scmp.eq.s32.totalorder %s4375_s9, 0  ;;  %s49_s14 = ssub.s32 1, %s4375_s9 }
   0x7   : > { %s4461_s15 = scalar_select %p24_p0, %s4371_s30, %s26_s13  }
   0x8   : > { %p35_p3 = por %p34_p2, %p33_p1  ;;  %s50_s16 = ssub.s32 1, %s4451_s11 }
   0x9   : > { %s51_s17 = ssub.s32 %s49_s14, %s50_s16  ;;  %s54_s18 = sadd.s32 1, %s4363_s28 }
   0xa   : > { %p52_p4 = scmp.eq.s32.totalorder %s51_s17, 0  ;;  %p61_p5 = scmp.ne.s32.totalorder %s4363_s28, %s4359_s27 }
   0xb   : > { %p3053_p7 = scmp.ge.s32.totalorder %s4375_s9, 2 }
   0xc   : > { %s4470_s19 = scalar_select %p52_p4, %s4363_s28, %s54_s18  }
   0xd   : > { %p4472_p6 = por %p61_p5, %p34_p2  ;;  %255 = sbr.rel (%p3053_p7) target bundleno = 44 (0x2c), region = 28 }
  0x14   : > { %258 = sbr.rel (!%p35_p3) target bundleno = 32 (0x20), region = 32  ;;  %s260_s21 = sand.u32 (%p35_p3), 1, %s4371_s30  }
  0x15   : > { %s3143_s22 = sshll.u32 (%p35_p3), %s4375_s9, 8  ;;  %s3054_s23 = sshll.u32 (%p35_p3), %s260_s21, 7 }
  0x16   : > { %s4482_s26 = scalar_lea.vmem (%p35_p3), %s7757_s0, %s3143_s22  ;;  %s262_s12 = scalar_lea.vmem (%p35_p3), [#allocation4], %s3054_s23 }
  0x17   : > { %v279_v0 = vld [vmem:[%s4482_s26] sm:$0xff] (%p35_p3)  ;;  %v281_v1 = vld [vmem:[%s4482_s26 + $0x8] sm:$0xff] (%p35_p3)  ;;  %v283_v2 = vld [vmem:[%s4482_s26 + $0x10] sm:$0xff] (%p35_p3) }
  0x18   : > { %280 = vst [vmem:[%s262_s12] sm:$0xff] (%p35_p3), %v279_v0  ;;  %282 = vst [vmem:[%s262_s12 + $0x8] sm:$0xff] (%p35_p3), %v281_v1  ;;  %v285_v3 = vld [vmem:[%s4482_s26 + $0x18] sm:$0xff] (%p35_p3)  ;;  %v287_v4 = vld [vmem:[%s4482_s26 + $0x40] sm:$0xff] (%p35_p3) }
  0x19   : > { %284 = vst [vmem:[%s262_s12 + $0x10] sm:$0xff] (%p35_p3), %v283_v2  ;;  %v289_v5 = vld [vmem:[%s4482_s26 + $0x48] sm:$0xff] (%p35_p3)  ;;  %286 = vst [vmem:[%s262_s12 + $0x18] sm:$0xff] (%p35_p3), %v285_v3  ;;  %v291_v6 = vld [vmem:[%s4482_s26 + $0x50] sm:$0xff] (%p35_p3) }
  0x1a   : > { %288 = vst [vmem:[%s262_s12 + $0x20] sm:$0xff] (%p35_p3), %v287_v4  ;;  %290 = vst [vmem:[%s262_s12 + $0x28] sm:$0xff] (%p35_p3), %v289_v5  ;;  %v293_v7 = vld [vmem:[%s4482_s26 + $0x58] sm:$0xff] (%p35_p3)  ;;  %v295_v8 = vld [vmem:[%s4482_s26 + $0x80] sm:$0xff] (%p35_p3) }
  0x1b   : > { %292 = vst [vmem:[%s262_s12 + $0x30] sm:$0xff] %v291_v6  ;;  %294 = vst [vmem:[%s262_s12 + $0x38] sm:$0xff] %v293_v7  ;;  %v297_v9 = vld [vmem:[%s4482_s26 + $0x88] sm:$0xff]  ;;  %v299_v10 = vld [vmem:[%s4482_s26 + $0x90] sm:$0xff] }
  0x1c   : > { %296 = vst [vmem:[%s262_s12 + $0x40] sm:$0xff] %v295_v8  ;;  %v301_v11 = vld [vmem:[%s4482_s26 + $0x98] sm:$0xff]  ;;  %298 = vst [vmem:[%s262_s12 + $0x48] sm:$0xff] %v297_v9  ;;  %v303_v12 = vld [vmem:[%s4482_s26 + $0xc0] sm:$0xff] }
  0x1d   : > { %300 = vst [vmem:[%s262_s12 + $0x50] sm:$0xff] %v299_v10  ;;  %302 = vst [vmem:[%s262_s12 + $0x58] sm:$0xff] %v301_v11  ;;  %v305_v13 = vld [vmem:[%s4482_s26 + $0xc8] sm:$0xff]  ;;  %v307_v14 = vld [vmem:[%s4482_s26 + $0xd0] sm:$0xff] }
  0x1e   : > { %304 = vst [vmem:[%s262_s12 + $0x60] sm:$0xff] %v303_v12  ;;  %306 = vst [vmem:[%s262_s12 + $0x68] sm:$0xff] %v305_v13  ;;  %v309_v15 = vld [vmem:[%s4482_s26 + $0xd8] sm:$0xff] }
  0x1f   : > { %308 = vst [vmem:[%s262_s12 + $0x70] sm:$0xff] %v307_v14  ;;  %310 = vst [vmem:[%s262_s12 + $0x78] sm:$0xff] %v309_v15 }
  0x20 PF: > { %316 = sbr.rel (!%p4472_p6) target bundleno = 44 (0x2c), region = 55  ;;  %s318_s13 = sand.u32 (%p4472_p6), 1, %s4363_s28  }
  0x21   : > { %s3144_s16 = sshll.u32 (%p4472_p6), %s49_s14, 8  ;;  %s3058_s17 = sshll.u32 (%p4472_p6), %s318_s13, 7 }
  0x22   : > { %s4508_s22 = scalar_lea.vmem (%p4472_p6), %s7758_s1, %s3144_s16  ;;  %s320_s20 = scalar_lea.vmem (%p4472_p6), [#allocation5], %s3058_s17 }
  0x23   : > { %v3061_v16 = vld [vmem:[%s4508_s22 + $0x20] sm:$0xff] (%p4472_p6)  ;;  %v3062_v17 = vld [vmem:[%s4508_s22 + $0x28] sm:$0xff] (%p4472_p6)  ;;  %v3063_v18 = vld [vmem:[%s4508_s22 + $0x30] sm:$0xff] (%p4472_p6) }
  0x24   : > { %340 = vst [vmem:[%s320_s20] sm:$0xff] (%p4472_p6), %v3061_v16  ;;  %342 = vst [vmem:[%s320_s20 + $0x8] sm:$0xff] (%p4472_p6), %v3062_v17  ;;  %v3064_v19 = vld [vmem:[%s4508_s22 + $0x38] sm:$0xff] (%p4472_p6)  ;;  %v3065_v20 = vld [vmem:[%s4508_s22 + $0x60] sm:$0xff] (%p4472_p6) }
  0x25   : > { %344 = vst [vmem:[%s320_s20 + $0x10] sm:$0xff] (%p4472_p6), %v3063_v18  ;;  %v3066_v21 = vld [vmem:[%s4508_s22 + $0x68] sm:$0xff] (%p4472_p6)  ;;  %346 = vst [vmem:[%s320_s20 + $0x18] sm:$0xff] (%p4472_p6), %v3064_v19  ;;  %v3067_v22 = vld [vmem:[%s4508_s22 + $0x70] sm:$0xff] (%p4472_p6) }
  0x26   : > { %348 = vst [vmem:[%s320_s20 + $0x20] sm:$0xff] (%p4472_p6), %v3065_v20  ;;  %350 = vst [vmem:[%s320_s20 + $0x28] sm:$0xff] (%p4472_p6), %v3066_v21  ;;  %v3068_v23 = vld [vmem:[%s4508_s22 + $0x78] sm:$0xff] (%p4472_p6)  ;;  %v3069_v24 = vld [vmem:[%s4508_s22 + $0xa0] sm:$0xff] (%p4472_p6) }
  0x27   : > { %352 = vst [vmem:[%s320_s20 + $0x30] sm:$0xff] %v3067_v22  ;;  %354 = vst [vmem:[%s320_s20 + $0x38] sm:$0xff] %v3068_v23  ;;  %v3070_v25 = vld [vmem:[%s4508_s22 + $0xa8] sm:$0xff]  ;;  %v3071_v26 = vld [vmem:[%s4508_s22 + $0xb0] sm:$0xff] }
  0x28   : > { %356 = vst [vmem:[%s320_s20 + $0x40] sm:$0xff] %v3069_v24  ;;  %v3072_v27 = vld [vmem:[%s4508_s22 + $0xb8] sm:$0xff]  ;;  %358 = vst [vmem:[%s320_s20 + $0x48] sm:$0xff] %v3070_v25  ;;  %v3073_v28 = vld [vmem:[%s4508_s22 + $0xe0] sm:$0xff] }
  0x29   : > { %360 = vst [vmem:[%s320_s20 + $0x50] sm:$0xff] %v3071_v26  ;;  %362 = vst [vmem:[%s320_s20 + $0x58] sm:$0xff] %v3072_v27  ;;  %v3074_v29 = vld [vmem:[%s4508_s22 + $0xe8] sm:$0xff]  ;;  %v3075_v30 = vld [vmem:[%s4508_s22 + $0xf0] sm:$0xff] }
  0x2a   : > { %364 = vst [vmem:[%s320_s20 + $0x60] sm:$0xff] %v3073_v28  ;;  %366 = vst [vmem:[%s320_s20 + $0x68] sm:$0xff] %v3074_v29  ;;  %v3076_v31 = vld [vmem:[%s4508_s22 + $0xf8] sm:$0xff] }
  0x2b   : > { %368 = vst [vmem:[%s320_s20 + $0x70] sm:$0xff] %v3075_v30  ;;  %370 = vst [vmem:[%s320_s20 + $0x78] sm:$0xff] %v3076_v31 }
  0x2c PF: > { %p3077_p8 = scmp.ge.s32.totalorder %s4375_s9, 1  ;;  %p375_p9 = scmp.lt.s32.totalorder %s4375_s9, 3 }
  0x2e   : > { %p376_p10 = pnand %p3077_p8, %p375_p9 }
  0x2f   : > { %s382_s14 = sand.u32 (!%p376_p10), 1, %s4367_s29   ;;  %s389_s23 = sand.u32 (!%p376_p10), 1, %s4359_s27  }
  0x30   : > { %379 = sbr.rel (%p376_p10) target bundleno = 1433 (0x599), region = 78  ;;  %s3078_s24 = sshll.u32 (!%p376_p10), %s382_s14, 7 }
  0x31   : > { %s3079_s25 = sshll.u32 (!%p376_p10), %s389_s23, 7  ;;  %s3080_s26 = sshll.u32 (!%p376_p10), %s4448_s10, 2 }
  0x32   : > { %s441_s12 = ssub.s32 (!%p376_p10), 1, %s4448_s10  ;;  %p436_p11 = scmp.lt.s32.totalorder (!%p376_p10), %s3080_s26, 7 }
  0x33   : > { %s3082_s13 = sshll.u32 (!%p376_p10), %s441_s12, 2  ;;  %s4542_s29 = scalar_lea.vmem (!%p376_p10), [#allocation4], %s3078_s24 }
  0x34   : > { %p443_p12 = scmp.lt.s32.totalorder (!%p376_p10), %s3082_s13, 7  ;;  %s4544_s14 = scalar_lea.vmem (!%p376_p10), [#allocation5], %s3079_s25 }
  0x35   : > { %p3084_p13 = scmp.ne.s32.totalorder (!%p376_p10), %s4448_s10, 0 }
  0x37   : > { %s7773_s26 = smov (!%p436_p11, %s3080_s26), 7  ;;  %s7775_s13 = smov (!%p443_p12, %s3082_s13), 7 }
  0x38   : > { %s3081_s16 = sshll.u32 %s7773_s26, 3  ;;  %s3083_s21 = sshll.u32 %s7775_s13, 3  ;;  %v453_v32 = vld [vmem:[%s7760_s3] sm:$0xff] (!%p3084_p13)  ;;  %v454_v33 = vld [vmem:[%s7760_s3 + $0x8] sm:$0xff] (!%p3084_p13) }
  0x39   : > { %s4535_s18 = scalar_lea.vmem %s7762_s5, %s3081_s16  ;;  %s4540_s27 = scalar_lea.vmem %s7763_s6, %s3083_s21  ;;  %v457_v34 = vld [vmem:[%s7761_s4] sm:$0xff] (!%p3084_p13)  ;;  %455 = vst [vmem:[#allocation2] sm:$0xff] (!%p3084_p13), %v453_v32  ;;  %456 = vst [vmem:[#allocation2 + $0x8] sm:$0xff] (!%p3084_p13), %v454_v33  ;;  %v458_v35 = vld [vmem:[%s7761_s4 + $0x8] sm:$0xff] (!%p3084_p13) }
  0x3a   : > { %452 = sbr.rel (%p3084_p13) target bundleno = 65 (0x41), region = 90  ;;  %459 = vst [vmem:[#allocation3] sm:$0xff] (!%p3084_p13), %v457_v34  ;;  %460 = vst [vmem:[#allocation3 + $0x8] sm:$0xff] (!%p3084_p13), %v458_v35 }
  0x41 PF: > { %v477_v36 = vld [vmem:[%s7759_s2 + $0x8] sm:$0xff]  ;;  %v476_v38 = vld [vmem:[%s7759_s2] sm:$0xff]  ;;  %v479_v54 = vld [vmem:[%s7759_s2 + $0x18] sm:$0xff]  ;;  %p3139_p0 = scmp.ne.s32.totalorder %s4448_s10, 1 }
  0x42   : > { %v485_v37 = vld [vmem:[%s7759_s2 + $0x48] sm:$0xff]  ;;  %v484_v40 = vld [vmem:[%s7759_s2 + $0x40] sm:$0xff]  ;;  %v487_v55 = vld [vmem:[%s7759_s2 + $0x58] sm:$0xff] }
  0x43   : > { %v3145_v39 = vpack.c.bf16 %v485_v37, %v477_v36  ;;  %v493_v41 = vld [vmem:[%s7759_s2 + $0x88] sm:$0xff]  ;;  %v3147_v43 = vpack.c.bf16 %v484_v40, %v476_v38  ;;  %v492_v45 = vld [vmem:[%s7759_s2 + $0x80] sm:$0xff]  ;;  %v3209_v57 = vpack.c.bf16 %v487_v55, %v479_v54  ;;  %v478_v58 = vld [vmem:[%s7759_s2 + $0x10] sm:$0xff] }
  0x44   : > { %v501_v42 = vld [vmem:[%s7759_s2 + $0xc8] sm:$0xff]  ;;  %v500_v46 = vld [vmem:[%s7759_s2 + $0xc0] sm:$0xff]  ;;  %v486_v59 = vld [vmem:[%s7759_s2 + $0x50] sm:$0xff] }
  0x45   : > { %v3149_v44 = vpack.c.bf16 %v501_v42, %v493_v41  ;;  %v509_v47 = vld [vmem:[%s7759_s2 + $0x108] sm:$0xff]  ;;  %3146 = vmatprep.subr.bf16.mxu0 %v3145_v39  ;;  %v3151_v49 = vpack.c.bf16 %v500_v46, %v492_v45  ;;  %v508_v50 = vld [vmem:[%s7759_s2 + $0x100] sm:$0xff]  ;;  %v3211_v60 = vpack.c.bf16 %v486_v59, %v478_v58  ;;  %3210 = vmatprep.subr.bf16.mxu1 %v3209_v57  ;;  %v495_v62 = vld [vmem:[%s7759_s2 + $0x98] sm:$0xff] }
  0x46   : > { %v517_v48 = vld [vmem:[%s7759_s2 + $0x148] sm:$0xff]  ;;  %3148 = vmatpush1.bf16.msra.mxu0 %v3147_v43  ;;  %v516_v51 = vld [vmem:[%s7759_s2 + $0x140] sm:$0xff]  ;;  %v503_v63 = vld [vmem:[%s7759_s2 + $0xd8] sm:$0xff] }
  0x47   : > { %3150 = vmatprep.subr.bf16.mxu0 %v3149_v44  ;;  %v3153_v52 = vpack.c.bf16 %v517_v48, %v509_v47  ;;  %v525_v53 = vld [vmem:[%s7759_s2 + $0x188] sm:$0xff]  ;;  %v3155_v61 = vpack.c.bf16 %v516_v51, %v508_v50  ;;  %v494_v0 = vld [vmem:[%s7759_s2 + $0x90] sm:$0xff]  ;;  %v524_v2 = vld [vmem:[%s7759_s2 + $0x180] sm:$0xff]  ;;  %3212 = vmatpush1.bf16.msra.mxu1 %v3211_v60  ;;  %v3213_v4 = vpack.c.bf16 %v503_v63, %v495_v62 }
  0x48   : > { %v533_v56 = vld [vmem:[%s7759_s2 + $0x1c8] sm:$0xff]  ;;  %v532_v3 = vld [vmem:[%s7759_s2 + $0x1c0] sm:$0xff]  ;;  %v502_v5 = vld [vmem:[%s7759_s2 + $0xd0] sm:$0xff] }
  0x49   : > { %v3157_v1 = vpack.c.bf16 %v533_v56, %v525_v53  ;;  %v541_v6 = vld [vmem:[%s7759_s2 + $0x208] sm:$0xff]  ;;  %v3215_v8 = vpack.c.bf16 %v502_v5, %v494_v0  ;;  %v511_v9 = vld [vmem:[%s7759_s2 + $0x118] sm:$0xff]  ;;  %3214 = vmatprep.subr.bf16.mxu1 %v3213_v4  ;;  %v510_v11 = vld [vmem:[%s7759_s2 + $0x110] sm:$0xff]  ;;  %v3159_v13 = vpack.c.bf16 %v532_v3, %v524_v2 }
  0x4a   : > { %3152 = vmatpush1.bf16.msra.mxu0 %v3151_v49  ;;  %v549_v7 = vld [vmem:[%s7759_s2 + $0x248] sm:$0xff]  ;;  %v519_v10 = vld [vmem:[%s7759_s2 + $0x158] sm:$0xff]  ;;  %v518_v12 = vld [vmem:[%s7759_s2 + $0x150] sm:$0xff] }
  0x4b   : > { %3154 = vmatprep.subr.bf16.mxu0 %v3153_v52  ;;  %v540_v14 = vld [vmem:[%s7759_s2 + $0x200] sm:$0xff]  ;;  %v3217_v16 = vpack.c.bf16 %v519_v10, %v511_v9  ;;  %v3161_v17 = vpack.c.bf16 %v549_v7, %v541_v6  ;;  %3216 = vmatpush1.bf16.msra.mxu1 %v3215_v8  ;;  %v557_v18 = vld [vmem:[%s7759_s2 + $0x288] sm:$0xff]  ;;  %v3219_v19 = vpack.c.bf16 %v518_v12, %v510_v11  ;;  %v527_v20 = vld [vmem:[%s7759_s2 + $0x198] sm:$0xff] }
  0x4c   : > { %v548_v15 = vld [vmem:[%s7759_s2 + $0x240] sm:$0xff]  ;;  %v535_v21 = vld [vmem:[%s7759_s2 + $0x1d8] sm:$0xff]  ;;  %v565_v22 = vld [vmem:[%s7759_s2 + $0x2c8] sm:$0xff] }
  0x4d   : > { %3218 = vmatprep.subr.bf16.mxu1 %v3217_v16  ;;  %v3221_v23 = vpack.c.bf16 %v535_v21, %v527_v20  ;;  %v526_v24 = vld [vmem:[%s7759_s2 + $0x190] sm:$0xff]  ;;  %v3163_v26 = vpack.c.bf16 %v548_v15, %v540_v14  ;;  %v543_v27 = vld [vmem:[%s7759_s2 + $0x218] sm:$0xff]  ;;  %v3165_v29 = vpack.c.bf16 %v565_v22, %v557_v18  ;;  %v556_v30 = vld [vmem:[%s7759_s2 + $0x280] sm:$0xff] }
  0x4e   : > { %3156 = vmatpush1.bf16.msra.mxu0 %v3155_v61  ;;  %v534_v25 = vld [vmem:[%s7759_s2 + $0x1d0] sm:$0xff]  ;;  %v551_v28 = vld [vmem:[%s7759_s2 + $0x258] sm:$0xff]  ;;  %v564_v31 = vld [vmem:[%s7759_s2 + $0x2c0] sm:$0xff] }
  0x4f   : > { %3158 = vmatprep.subr.bf16.mxu0 %v3157_v1  ;;  %3220 = vmatpush1.bf16.msra.mxu1 %v3219_v19  ;;  %v573_v32 = vld [vmem:[%s7759_s2 + $0x308] sm:$0xff]  ;;  %v3223_v33 = vpack.c.bf16 %v534_v25, %v526_v24  ;;  %v3225_v35 = vpack.c.bf16 %v551_v28, %v543_v27  ;;  %v542_v36 = vld [vmem:[%s7759_s2 + $0x210] sm:$0xff]  ;;  %v559_v38 = vld [vmem:[%s7759_s2 + $0x298] sm:$0xff]  ;;  %v3167_v40 = vpack.c.bf16 %v564_v31, %v556_v30 }
  0x50   : > { %v581_v34 = vld [vmem:[%s7759_s2 + $0x348] sm:$0xff]  ;;  %3222 = vmatprep.subr.bf16.mxu1 %v3221_v23  ;;  %v550_v37 = vld [vmem:[%s7759_s2 + $0x250] sm:$0xff]  ;;  %v567_v39 = vld [vmem:[%s7759_s2 + $0x2d8] sm:$0xff] }
  0x51   : > { %v3169_v41 = vpack.c.bf16 %v581_v34, %v573_v32  ;;  %v572_v42 = vld [vmem:[%s7759_s2 + $0x300] sm:$0xff]  ;;  %v589_v44 = vld [vmem:[%s7759_s2 + $0x388] sm:$0xff]  ;;  %v3227_v45 = vpack.c.bf16 %v550_v37, %v542_v36  ;;  %v3229_v47 = vpack.c.bf16 %v567_v39, %v559_v38  ;;  %v558_v48 = vld [vmem:[%s7759_s2 + $0x290] sm:$0xff] }
  0x52   : > { %3160 = vmatpush1.bf16.msra.mxu0 %v3159_v13  ;;  %v580_v43 = vld [vmem:[%s7759_s2 + $0x340] sm:$0xff]  ;;  %v597_v46 = vld [vmem:[%s7759_s2 + $0x3c8] sm:$0xff]  ;;  %v566_v49 = vld [vmem:[%s7759_s2 + $0x2d0] sm:$0xff] }
  0x53   : > { %3162 = vmatprep.subr.bf16.mxu0 %v3161_v17  ;;  %3224 = vmatpush1.bf16.msra.mxu1 %v3223_v33  ;;  %v575_v50 = vld [vmem:[%s7759_s2 + $0x318] sm:$0xff]  ;;  %v3171_v52 = vpack.c.bf16 %v580_v43, %v572_v42  ;;  %v3173_v53 = vpack.c.bf16 %v597_v46, %v589_v44  ;;  %v588_v54 = vld [vmem:[%s7759_s2 + $0x380] sm:$0xff]  ;;  %v605_v56 = vld [vmem:[%s7759_s2 + $0x408] sm:$0xff]  ;;  %v3231_v57 = vpack.c.bf16 %v566_v49, %v558_v48 }
  0x54   : > { %3226 = vmatprep.subr.bf16.mxu1 %v3225_v35  ;;  %v583_v51 = vld [vmem:[%s7759_s2 + $0x358] sm:$0xff]  ;;  %v596_v55 = vld [vmem:[%s7759_s2 + $0x3c0] sm:$0xff]  ;;  %v613_v58 = vld [vmem:[%s7759_s2 + $0x448] sm:$0xff] }
  0x55   : > { %v3233_v59 = vpack.c.bf16 %v583_v51, %v575_v50  ;;  %v574_v60 = vld [vmem:[%s7759_s2 + $0x310] sm:$0xff]  ;;  %v591_v62 = vld [vmem:[%s7759_s2 + $0x398] sm:$0xff]  ;;  %v3175_v0 = vpack.c.bf16 %v596_v55, %v588_v54  ;;  %v3177_v1 = vpack.c.bf16 %v613_v58, %v605_v56  ;;  %v604_v2 = vld [vmem:[%s7759_s2 + $0x400] sm:$0xff] }
  0x56   : > { %3164 = vmatpush1.bf16.msra.mxu0 %v3163_v26  ;;  %v582_v61 = vld [vmem:[%s7759_s2 + $0x350] sm:$0xff]  ;;  %v599_v63 = vld [vmem:[%s7759_s2 + $0x3d8] sm:$0xff]  ;;  %v612_v3 = vld [vmem:[%s7759_s2 + $0x440] sm:$0xff] }
  0x57   : > { %3166 = vmatprep.subr.bf16.mxu0 %v3165_v29  ;;  %3228 = vmatpush1.bf16.msra.mxu1 %v3227_v45  ;;  %v621_v4 = vld [vmem:[%s7759_s2 + $0x488] sm:$0xff]  ;;  %v3235_v5 = vpack.c.bf16 %v582_v61, %v574_v60  ;;  %v3237_v7 = vpack.c.bf16 %v599_v63, %v591_v62  ;;  %v590_v8 = vld [vmem:[%s7759_s2 + $0x390] sm:$0xff]  ;;  %v607_v10 = vld [vmem:[%s7759_s2 + $0x418] sm:$0xff]  ;;  %v3179_v12 = vpack.c.bf16 %v612_v3, %v604_v2 }
  0x58   : > { %3230 = vmatprep.subr.bf16.mxu1 %v3229_v47  ;;  %v629_v6 = vld [vmem:[%s7759_s2 + $0x4c8] sm:$0xff]  ;;  %v598_v9 = vld [vmem:[%s7759_s2 + $0x3d0] sm:$0xff]  ;;  %v615_v11 = vld [vmem:[%s7759_s2 + $0x458] sm:$0xff] }
  0x59   : > { %v3181_v13 = vpack.c.bf16 %v629_v6, %v621_v4  ;;  %v620_v14 = vld [vmem:[%s7759_s2 + $0x480] sm:$0xff]  ;;  %v637_v16 = vld [vmem:[%s7759_s2 + $0x508] sm:$0xff]  ;;  %v3239_v17 = vpack.c.bf16 %v598_v9, %v590_v8  ;;  %v3241_v19 = vpack.c.bf16 %v615_v11, %v607_v10  ;;  %v606_v20 = vld [vmem:[%s7759_s2 + $0x410] sm:$0xff] }
  0x5a   : > { %3168 = vmatpush1.bf16.msra.mxu0 %v3167_v40  ;;  %v628_v15 = vld [vmem:[%s7759_s2 + $0x4c0] sm:$0xff]  ;;  %v645_v18 = vld [vmem:[%s7759_s2 + $0x548] sm:$0xff]  ;;  %v614_v21 = vld [vmem:[%s7759_s2 + $0x450] sm:$0xff] }
  0x5b   : > { %3170 = vmatprep.subr.bf16.mxu0 %v3169_v41  ;;  %3232 = vmatpush1.bf16.msra.mxu1 %v3231_v57  ;;  %v623_v22 = vld [vmem:[%s7759_s2 + $0x498] sm:$0xff]  ;;  %v3183_v24 = vpack.c.bf16 %v628_v15, %v620_v14  ;;  %v636_v25 = vld [vmem:[%s7759_s2 + $0x500] sm:$0xff]  ;;  %v3185_v26 = vpack.c.bf16 %v645_v18, %v637_v16  ;;  %v653_v28 = vld [vmem:[%s7759_s2 + $0x588] sm:$0xff]  ;;  %v3243_v30 = vpack.c.bf16 %v614_v21, %v606_v20 }
  0x5c   : > { %3234 = vmatprep.subr.bf16.mxu1 %v3233_v59  ;;  %v631_v23 = vld [vmem:[%s7759_s2 + $0x4d8] sm:$0xff]  ;;  %v644_v27 = vld [vmem:[%s7759_s2 + $0x540] sm:$0xff]  ;;  %v661_v29 = vld [vmem:[%s7759_s2 + $0x5c8] sm:$0xff] }
  0x5d   : > { %v3245_v31 = vpack.c.bf16 %v631_v23, %v623_v22  ;;  %v622_v32 = vld [vmem:[%s7759_s2 + $0x490] sm:$0xff]  ;;  %v4817_v34 = vld [vmem:[#allocation2 + $0x8] sm:$0xff]  ;;  %v639_v35 = vld [vmem:[%s7759_s2 + $0x518] sm:$0xff]  ;;  %v3187_v37 = vpack.c.bf16 %v644_v27, %v636_v25  ;;  %v3189_v38 = vpack.c.bf16 %v661_v29, %v653_v28 }
  0x5e   : > { %3172 = vmatpush1.bf16.msra.mxu0 %v3171_v52  ;;  %v630_v33 = vld [vmem:[%s7759_s2 + $0x4d0] sm:$0xff]  ;;  %v647_v36 = vld [vmem:[%s7759_s2 + $0x558] sm:$0xff]  ;;  %796 = vmatprep.mubr.f32.mxu0 %v4817_v34  ;;  %v652_v39 = vld [vmem:[%s7759_s2 + $0x580] sm:$0xff] }
  0x5f   : > { %3174 = vmatprep.subr.bf16.mxu0 %v3173_v53  ;;  %3236 = vmatpush1.bf16.msra.mxu1 %v3235_v5  ;;  %v660_v40 = vld [vmem:[%s7759_s2 + $0x5c0] sm:$0xff]  ;;  %v669_v41 = vld [vmem:[%s7759_s2 + $0x608] sm:$0xff]  ;;  %v3247_v42 = vpack.c.bf16 %v630_v33, %v622_v32  ;;  %v3249_v44 = vpack.c.bf16 %v647_v36, %v639_v35  ;;  %v638_v45 = vld [vmem:[%s7759_s2 + $0x510] sm:$0xff] }
  0x60   : > { %3238 = vmatprep.subr.bf16.mxu1 %v3237_v7  ;;  %867 = vmatprep.mubr.f32.mxu1 %v4817_v34  ;;  %v677_v43 = vld [vmem:[%s7759_s2 + $0x648] sm:$0xff]  ;;  %v646_v46 = vld [vmem:[%s7759_s2 + $0x550] sm:$0xff]  ;;  %v655_v47 = vld [vmem:[%s7759_s2 + $0x598] sm:$0xff]  ;;  %v3191_v49 = vpack.c.bf16 %v660_v40, %v652_v39 }
  0x61   : > { %v663_v48 = vld [vmem:[%s7759_s2 + $0x5d8] sm:$0xff]  ;;  %v3193_v50 = vpack.c.bf16 %v677_v43, %v669_v41  ;;  %v668_v51 = vld [vmem:[%s7759_s2 + $0x600] sm:$0xff]  ;;  %v685_v53 = vld [vmem:[%s7759_s2 + $0x688] sm:$0xff]  ;;  %v3251_v54 = vpack.c.bf16 %v646_v46, %v638_v45 }
  0x62   : > { %3176 = vmatpush1.bf16.msra.mxu0 %v3175_v0  ;;  %v676_v52 = vld [vmem:[%s7759_s2 + $0x640] sm:$0xff]  ;;  %v693_v55 = vld [vmem:[%s7759_s2 + $0x6c8] sm:$0xff]  ;;  %v3253_v56 = vpack.c.bf16 %v663_v48, %v655_v47  ;;  %v654_v57 = vld [vmem:[%s7759_s2 + $0x590] sm:$0xff] }
  0x63   : > { %3178 = vmatprep.subr.bf16.mxu0 %v3177_v1  ;;  %3240 = vmatpush1.bf16.msra.mxu1 %v3239_v17  ;;  %v662_v58 = vld [vmem:[%s7759_s2 + $0x5d0] sm:$0xff]  ;;  %v671_v59 = vld [vmem:[%s7759_s2 + $0x618] sm:$0xff]  ;;  %v3195_v61 = vpack.c.bf16 %v676_v52, %v668_v51  ;;  %v3197_v62 = vpack.c.bf16 %v693_v55, %v685_v53  ;;  %v684_v63 = vld [vmem:[%s7759_s2 + $0x680] sm:$0xff] }
  0x64   : > { %3242 = vmatprep.subr.bf16.mxu1 %v3241_v19  ;;  %v679_v60 = vld [vmem:[%s7759_s2 + $0x658] sm:$0xff]  ;;  %v692_v0 = vld [vmem:[%s7759_s2 + $0x6c0] sm:$0xff]  ;;  %v701_v1 = vld [vmem:[%s7759_s2 + $0x708] sm:$0xff]  ;;  %v3255_v2 = vpack.c.bf16 %v662_v58, %v654_v57 }
  0x65   : > { %v709_v3 = vld [vmem:[%s7759_s2 + $0x748] sm:$0xff]  ;;  %v3257_v4 = vpack.c.bf16 %v679_v60, %v671_v59  ;;  %v670_v5 = vld [vmem:[%s7759_s2 + $0x610] sm:$0xff]  ;;  %v687_v7 = vld [vmem:[%s7759_s2 + $0x698] sm:$0xff]  ;;  %v3199_v9 = vpack.c.bf16 %v692_v0, %v684_v63 }
  0x66   : > { %3180 = vmatpush1.bf16.msra.mxu0 %v3179_v12  ;;  %v678_v6 = vld [vmem:[%s7759_s2 + $0x650] sm:$0xff]  ;;  %v695_v8 = vld [vmem:[%s7759_s2 + $0x6d8] sm:$0xff]  ;;  %v3201_v10 = vpack.c.bf16 %v709_v3, %v701_v1  ;;  %v700_v11 = vld [vmem:[%s7759_s2 + $0x700] sm:$0xff] }
  0x67   : > { %3182 = vmatprep.subr.bf16.mxu0 %v3181_v13  ;;  %3244 = vmatpush1.bf16.msra.mxu1 %v3243_v30  ;;  %v708_v12 = vld [vmem:[%s7759_s2 + $0x740] sm:$0xff]  ;;  %v717_v13 = vld [vmem:[%s7759_s2 + $0x788] sm:$0xff]  ;;  %v3259_v14 = vpack.c.bf16 %v678_v6, %v670_v5  ;;  %v3261_v16 = vpack.c.bf16 %v695_v8, %v687_v7  ;;  %v686_v17 = vld [vmem:[%s7759_s2 + $0x690] sm:$0xff] }
  0x68   : > { %3246 = vmatprep.subr.bf16.mxu1 %v3245_v31  ;;  %v725_v15 = vld [vmem:[%s7759_s2 + $0x7c8] sm:$0xff]  ;;  %v694_v18 = vld [vmem:[%s7759_s2 + $0x6d0] sm:$0xff]  ;;  %v703_v19 = vld [vmem:[%s7759_s2 + $0x718] sm:$0xff]  ;;  %v3203_v21 = vpack.c.bf16 %v708_v12, %v700_v11 }
  0x69   : > { %v711_v20 = vld [vmem:[%s7759_s2 + $0x758] sm:$0xff]  ;;  %v3205_v22 = vpack.c.bf16 %v725_v15, %v717_v13  ;;  %v716_v23 = vld [vmem:[%s7759_s2 + $0x780] sm:$0xff]  ;;  %v481_v25 = vld [vmem:[%s7759_s2 + $0x28] sm:$0xff] }
  0x6a   : > { %3184 = vmatpush1.bf16.msra.mxu0 %v3183_v24  ;;  %v724_v24 = vld [vmem:[%s7759_s2 + $0x7c0] sm:$0xff]  ;;  %v489_v27 = vld [vmem:[%s7759_s2 + $0x68] sm:$0xff]  ;;  %v3265_v28 = vpack.c.bf16 %v711_v20, %v703_v19  ;;  %v702_v29 = vld [vmem:[%s7759_s2 + $0x710] sm:$0xff] }
  0x6b   : > { %3186 = vmatprep.subr.bf16.mxu0 %v3185_v26  ;;  %3248 = vmatpush1.bf16.msra.mxu1 %v3247_v42  ;;  %v3263_v26 = vpack.c.bf16 %v694_v18, %v686_v17  ;;  %v710_v30 = vld [vmem:[%s7759_s2 + $0x750] sm:$0xff]  ;;  %v719_v31 = vld [vmem:[%s7759_s2 + $0x798] sm:$0xff]  ;;  %v3207_v33 = vpack.c.bf16 %v724_v24, %v716_v23  ;;  %v3273_v35 = vpack.c.bf16 %v489_v27, %v481_v25  ;;  %v480_v36 = vld [vmem:[%s7759_s2 + $0x20] sm:$0xff] }
  0x6c   : > { %3250 = vmatprep.subr.bf16.mxu1 %v3249_v44  ;;  %v727_v32 = vld [vmem:[%s7759_s2 + $0x7d8] sm:$0xff]  ;;  %v3267_v39 = vpack.c.bf16 %v710_v30, %v702_v29  ;;  %v505_v40 = vld [vmem:[%s7759_s2 + $0xe8] sm:$0xff]  ;;  %v718_v42 = vld [vmem:[%s7759_s2 + $0x790] sm:$0xff] }
  0x6d   : > { %v3269_v41 = vpack.c.bf16 %v727_v32, %v719_v31  ;;  %v726_v43 = vld [vmem:[%s7759_s2 + $0x7d0] sm:$0xff]  ;;  %v483_v44 = vld [vmem:[%s7759_s2 + $0x38] sm:$0xff]  ;;  %v4971_v46 = vld [vmem:[#allocation2] sm:$0xff] }
  0x6e   : > { %3188 = vmatpush1.bf16.msra.mxu0 %v3187_v37  ;;  %v488_v37 = vld [vmem:[%s7759_s2 + $0x60] sm:$0xff]  ;;  %v491_v45 = vld [vmem:[%s7759_s2 + $0x78] sm:$0xff]  ;;  %v513_v51 = vld [vmem:[%s7759_s2 + $0x128] sm:$0xff]  ;;  %v3271_v52 = vpack.c.bf16 %v726_v43, %v718_v42 }
  0x6f   : > { %3190 = vmatprep.subr.bf16.mxu0 %v3189_v38  ;;  %3252 = vmatpush1.bf16.msra.mxu1 %v3251_v54  ;;  %v497_v38 = vld [vmem:[%s7759_s2 + $0xa8] sm:$0xff]  ;;  %v3275_v47 = vpack.c.bf16 %v488_v37, %v480_v36  ;;  %v3337_v54 = vpack.c.bf16 %v491_v45, %v483_v44  ;;  %v482_v55 = vld [vmem:[%s7759_s2 + $0x30] sm:$0xff]  ;;  %v499_v57 = vld [vmem:[%s7759_s2 + $0xb8] sm:$0xff] }
  0x70   : > { %3254 = vmatprep.subr.bf16.mxu1 %v3253_v56  ;;  %v3277_v48 = vpack.c.bf16 %v505_v40, %v497_v38  ;;  %v521_v53 = vld [vmem:[%s7759_s2 + $0x168] sm:$0xff]  ;;  %v490_v56 = vld [vmem:[%s7759_s2 + $0x70] sm:$0xff]  ;;  %v507_v58 = vld [vmem:[%s7759_s2 + $0xf8] sm:$0xff] }
  0x71   : > { %v3281_v60 = vpack.c.bf16 %v521_v53, %v513_v51  ;;  %v529_v63 = vld [vmem:[%s7759_s2 + $0x1a8] sm:$0xff]  ;;  %v3339_v0 = vpack.c.bf16 %v490_v56, %v482_v55  ;;  %v498_v3 = vld [vmem:[%s7759_s2 + $0xb0] sm:$0xff]  ;;  %v515_v5 = vld [vmem:[%s7759_s2 + $0x138] sm:$0xff] }
  0x72   : > { %3192 = vmatpush1.bf16.msra.mxu0 %v3191_v49  ;;  %v496_v49 = vld [vmem:[%s7759_s2 + $0xa0] sm:$0xff]  ;;  %v537_v1 = vld [vmem:[%s7759_s2 + $0x1e8] sm:$0xff]  ;;  %v523_v6 = vld [vmem:[%s7759_s2 + $0x178] sm:$0xff] }
  0x73   : > { %3194 = vmatprep.subr.bf16.mxu0 %v3193_v50  ;;  %3256 = vmatpush1.bf16.msra.mxu1 %v3255_v2  ;;  %v504_v50 = vld [vmem:[%s7759_s2 + $0xe0] sm:$0xff]  ;;  %v3341_v2 = vpack.c.bf16 %v507_v58, %v499_v57  ;;  %v3285_v8 = vpack.c.bf16 %v537_v1, %v529_v63  ;;  %v545_v11 = vld [vmem:[%s7759_s2 + $0x228] sm:$0xff]  ;;  %v514_v15 = vld [vmem:[%s7759_s2 + $0x130] sm:$0xff] }
  0x74   : > { %3258 = vmatprep.subr.bf16.mxu1 %v3257_v4  ;;  %v3279_v59 = vpack.c.bf16 %v504_v50, %v496_v49  ;;  %v506_v4 = vld [vmem:[%s7759_s2 + $0xf0] sm:$0xff]  ;;  %v553_v13 = vld [vmem:[%s7759_s2 + $0x268] sm:$0xff]  ;;  %v531_v17 = vld [vmem:[%s7759_s2 + $0x1b8] sm:$0xff] }
  0x75   : > { %v3343_v12 = vpack.c.bf16 %v506_v4, %v498_v3  ;;  %v539_v18 = vld [vmem:[%s7759_s2 + $0x1f8] sm:$0xff]  ;;  %v3289_v20 = vpack.c.bf16 %v553_v13, %v545_v11  ;;  %v569_v24 = vld [vmem:[%s7759_s2 + $0x2e8] sm:$0xff]  ;;  %v538_v27 = vld [vmem:[%s7759_s2 + $0x1f0] sm:$0xff] }
  0x76   : > { %3196 = vmatpush1.bf16.msra.mxu0 %v3195_v61  ;;  %v512_v61 = vld [vmem:[%s7759_s2 + $0x120] sm:$0xff]  ;;  %v3349_v25 = vpack.c.bf16 %v539_v18, %v531_v17  ;;  %v555_v29 = vld [vmem:[%s7759_s2 + $0x278] sm:$0xff]  ;;  %v585_v37 = vld [vmem:[%s7759_s2 + $0x368] sm:$0xff] }
  0x77   : > { %3198 = vmatprep.subr.bf16.mxu0 %v3197_v62  ;;  %3260 = vmatpush1.bf16.msra.mxu1 %v3259_v14  ;;  %v520_v62 = vld [vmem:[%s7759_s2 + $0x160] sm:$0xff]  ;;  %v3345_v14 = vpack.c.bf16 %v523_v6, %v515_v5  ;;  %v554_v40 = vld [vmem:[%s7759_s2 + $0x270] sm:$0xff]  ;;  %v571_v42 = vld [vmem:[%s7759_s2 + $0x2f8] sm:$0xff] }
  0x78   : > { %3262 = vmatprep.subr.bf16.mxu1 %v3261_v16  ;;  %v3283_v7 = vpack.c.bf16 %v520_v62, %v512_v61  ;;  %v522_v16 = vld [vmem:[%s7759_s2 + $0x170] sm:$0xff]  ;;  %v560_v32 = vld [vmem:[%s7759_s2 + $0x2a0] sm:$0xff]  ;;  %v601_v50 = vld [vmem:[%s7759_s2 + $0x3e8] sm:$0xff] }
  0x79   : > { %v3347_v23 = vpack.c.bf16 %v522_v16, %v514_v15  ;;  %v576_v45 = vld [vmem:[%s7759_s2 + $0x320] sm:$0xff]  ;;  %v570_v53 = vld [vmem:[%s7759_s2 + $0x2f0] sm:$0xff]  ;;  %v587_v55 = vld [vmem:[%s7759_s2 + $0x378] sm:$0xff] }
  0x7a   : > { %3200 = vmatpush1.bf16.msra.mxu0 %v3199_v9  ;;  %v528_v9 = vld [vmem:[%s7759_s2 + $0x1a0] sm:$0xff]  ;;  %v617_v62 = vld [vmem:[%s7759_s2 + $0x468] sm:$0xff]  ;;  %v586_v1 = vld [vmem:[%s7759_s2 + $0x370] sm:$0xff] }
  0x7b   : > { %3202 = vmatprep.subr.bf16.mxu0 %v3201_v10  ;;  %3264 = vmatpush1.bf16.msra.mxu1 %v3263_v26  ;;  %v536_v10 = vld [vmem:[%s7759_s2 + $0x1e0] sm:$0xff]  ;;  %v530_v26 = vld [vmem:[%s7759_s2 + $0x1b0] sm:$0xff]  ;;  %v603_v3 = vld [vmem:[%s7759_s2 + $0x3f8] sm:$0xff] }
  0x7c   : > { %3266 = vmatprep.subr.bf16.mxu1 %v3265_v28  ;;  %v3287_v19 = vpack.c.bf16 %v536_v10, %v528_v9  ;;  %v547_v28 = vld [vmem:[%s7759_s2 + $0x238] sm:$0xff]  ;;  %v3351_v36 = vpack.c.bf16 %v538_v27, %v530_v26  ;;  %v592_v58 = vld [vmem:[%s7759_s2 + $0x3a0] sm:$0xff]  ;;  %v633_v10 = vld [vmem:[%s7759_s2 + $0x4e8] sm:$0xff] }
  0x7d   : > { %v3353_v38 = vpack.c.bf16 %v555_v29, %v547_v28  ;;  %v608_v6 = vld [vmem:[%s7759_s2 + $0x420] sm:$0xff]  ;;  %v602_v13 = vld [vmem:[%s7759_s2 + $0x3f0] sm:$0xff]  ;;  %v619_v15 = vld [vmem:[%s7759_s2 + $0x478] sm:$0xff] }
  0x7e   : > { %3204 = vmatpush1.bf16.msra.mxu0 %v3203_v21  ;;  %v544_v21 = vld [vmem:[%s7759_s2 + $0x220] sm:$0xff]  ;;  %v635_v26 = vld [vmem:[%s7759_s2 + $0x4f8] sm:$0xff] }
  0x7f   : > { %3206 = vmatprep.subr.bf16.mxu0 %v3205_v22  ;;  %3268 = vmatpush1.bf16.msra.mxu1 %v3267_v39  ;;  %v561_v22 = vld [vmem:[%s7759_s2 + $0x2a8] sm:$0xff]  ;;  %v546_v39 = vld [vmem:[%s7759_s2 + $0x230] sm:$0xff]  ;;  %v624_v18 = vld [vmem:[%s7759_s2 + $0x4a0] sm:$0xff] }
  0x80   : > { %3270 = vmatprep.subr.bf16.mxu1 %v3269_v41  ;;  %v3293_v31 = vpack.c.bf16 %v569_v24, %v561_v22  ;;  %v563_v41 = vld [vmem:[%s7759_s2 + $0x2b8] sm:$0xff]  ;;  %v3355_v49 = vpack.c.bf16 %v554_v40, %v546_v39  ;;  %v618_v24 = vld [vmem:[%s7759_s2 + $0x470] sm:$0xff]  ;;  %v640_v29 = vld [vmem:[%s7759_s2 + $0x520] sm:$0xff] }
  0x81   : > { %v3357_v51 = vpack.c.bf16 %v571_v42, %v563_v41  ;;  %v651_v39 = vld [vmem:[%s7759_s2 + $0x578] sm:$0xff]  ;;  %v656_v42 = vld [vmem:[%s7759_s2 + $0x5a0] sm:$0xff] }
  0x82   : > { %3208 = vmatpush1.bf16.msra.mxu0 %v3207_v33  ;;  %v568_v33 = vld [vmem:[%s7759_s2 + $0x2e0] sm:$0xff] }
  0x83   : > { %3274 = vmatprep.subr.bf16.mxu0 %v3273_v35  ;;  %3272 = vmatpush1.bf16.msra.mxu1 %v3271_v52  ;;  %v577_v35 = vld [vmem:[%s7759_s2 + $0x328] sm:$0xff]  ;;  %v3295_v43 = vpack.c.bf16 %v568_v33, %v560_v32  ;;  %v562_v52 = vld [vmem:[%s7759_s2 + $0x2b0] sm:$0xff] }
  0x84   : > { %3338 = vmatprep.subr.bf16.mxu1 %v3337_v54  ;;  %v3297_v44 = vpack.c.bf16 %v585_v37, %v577_v35  ;;  %v579_v54 = vld [vmem:[%s7759_s2 + $0x338] sm:$0xff]  ;;  %v3359_v61 = vpack.c.bf16 %v570_v53, %v562_v52  ;;  %v665_v33 = vld [vmem:[%s7759_s2 + $0x5e8] sm:$0xff]  ;;  %v634_v37 = vld [vmem:[%s7759_s2 + $0x4f0] sm:$0xff] }
  0x85   : > { %797 = vmatmul.mubr.f32.vlgmr.msra.gmra.mrb[0].mxu0 %v4971_v46  ;;  %v3361_v63 = vpack.c.bf16 %v587_v55, %v579_v54  ;;  %v667_v52 = vld [vmem:[%s7759_s2 + $0x5f8] sm:$0xff]  ;;  %v672_v55 = vld [vmem:[%s7759_s2 + $0x620] sm:$0xff] }
  0x86   : > { %3276 = vmatpush1.bf16.msra.mxu0 %v3275_v47  ;;  %938 = vmatprep.mubr.f32.mxu0 %v4817_v34  ;;  %v584_v47 = vld [vmem:[%s7759_s2 + $0x360] sm:$0xff] }
  0x87   : > { %3278 = vmatprep.subr.bf16.mxu0 %v3277_v48  ;;  %868 = vmatmul.mubr.f32.vlgmr.msra.gmra.mrb[0].mxu1 %v4971_v46  ;;  %v593_v48 = vld [vmem:[%s7759_s2 + $0x3a8] sm:$0xff]  ;;  %v3299_v56 = vpack.c.bf16 %v584_v47, %v576_v45 }
  0x88   : > { %3340 = vmatpush1.bf16.msra.mxu1 %v3339_v0  ;;  %1009 = vmatprep.mubr.f32.mxu1 %v4817_v34  ;;  %v552_v34 = vld [vmem:[%s7759_s2 + $0x260] sm:$0xff]  ;;  %v3301_v57 = vpack.c.bf16 %v601_v50, %v593_v48  ;;  %v578_v0 = vld [vmem:[%s7759_s2 + $0x330] sm:$0xff]  ;;  %v681_v47 = vld [vmem:[%s7759_s2 + $0x668] sm:$0xff] }
  0x89   : > { %3342 = vmatprep.subr.bf16.mxu1 %v3341_v2  ;;  %v3291_v30 = vpack.c.bf16 %v552_v34, %v544_v21  ;;  %v595_v2 = vld [vmem:[%s7759_s2 + $0x3b8] sm:$0xff]  ;;  %v3363_v9 = vpack.c.bf16 %v586_v1, %v578_v0  ;;  %v649_v34 = vld [vmem:[%s7759_s2 + $0x568] sm:$0xff]  ;;  %v650_v50 = vld [vmem:[%s7759_s2 + $0x570] sm:$0xff] }
  0x8a   : > { %3280 = vmatpush1.bf16.msra.mxu0 %v3279_v59  ;;  %v600_v59 = vld [vmem:[%s7759_s2 + $0x3e0] sm:$0xff]  ;;  %v3365_v11 = vpack.c.bf16 %v603_v3, %v595_v2  ;;  %v683_v0 = vld [vmem:[%s7759_s2 + $0x678] sm:$0xff] }
  0x8b   : > { %3282 = vmatprep.subr.bf16.mxu0 %v3281_v60  ;;  %v609_v60 = vld [vmem:[%s7759_s2 + $0x428] sm:$0xff]  ;;  %v3303_v4 = vpack.c.bf16 %v600_v59, %v592_v58  ;;  %v688_v3 = vld [vmem:[%s7759_s2 + $0x6a0] sm:$0xff] }
  0x8c   : > { %3344 = vmatpush1.bf16.msra.mxu1 %v3343_v12  ;;  %v3305_v5 = vpack.c.bf16 %v617_v62, %v609_v60  ;;  %v594_v12 = vld [vmem:[%s7759_s2 + $0x3b0] sm:$0xff]  ;;  %v697_v59 = vld [vmem:[%s7759_s2 + $0x6e8] sm:$0xff] }
  0x8d   : > { %3346 = vmatprep.subr.bf16.mxu1 %v3345_v14  ;;  %v611_v14 = vld [vmem:[%s7759_s2 + $0x438] sm:$0xff]  ;;  %v3367_v21 = vpack.c.bf16 %v602_v13, %v594_v12  ;;  %v666_v62 = vld [vmem:[%s7759_s2 + $0x5f0] sm:$0xff] }
  0x8e   : > { %3284 = vmatpush1.bf16.msra.mxu0 %v3283_v7  ;;  %v616_v7 = vld [vmem:[%s7759_s2 + $0x460] sm:$0xff]  ;;  %v3369_v22 = vpack.c.bf16 %v619_v15, %v611_v14  ;;  %v699_v12 = vld [vmem:[%s7759_s2 + $0x6f8] sm:$0xff] }
  0x8f   : > { %3286 = vmatprep.subr.bf16.mxu0 %v3285_v8  ;;  %v625_v8 = vld [vmem:[%s7759_s2 + $0x4a8] sm:$0xff]  ;;  %v3307_v16 = vpack.c.bf16 %v616_v7, %v608_v6  ;;  %v704_v15 = vld [vmem:[%s7759_s2 + $0x720] sm:$0xff] }
  0x90   : > { %3348 = vmatpush1.bf16.msra.mxu1 %v3347_v23  ;;  %v3309_v17 = vpack.c.bf16 %v633_v10, %v625_v8  ;;  %v610_v23 = vld [vmem:[%s7759_s2 + $0x430] sm:$0xff]  ;;  %v713_v7 = vld [vmem:[%s7759_s2 + $0x768] sm:$0xff] }
  0x91   : > { %3350 = vmatprep.subr.bf16.mxu1 %v3349_v25  ;;  %v627_v25 = vld [vmem:[%s7759_s2 + $0x4b8] sm:$0xff]  ;;  %v3371_v32 = vpack.c.bf16 %v618_v24, %v610_v23  ;;  %v682_v10 = vld [vmem:[%s7759_s2 + $0x670] sm:$0xff] }
  0x92   : > { %3288 = vmatpush1.bf16.msra.mxu0 %v3287_v19  ;;  %v632_v19 = vld [vmem:[%s7759_s2 + $0x4e0] sm:$0xff]  ;;  %v3373_v35 = vpack.c.bf16 %v635_v26, %v627_v25  ;;  %v715_v23 = vld [vmem:[%s7759_s2 + $0x778] sm:$0xff] }
  0x93   : > { %3290 = vmatprep.subr.bf16.mxu0 %v3289_v20  ;;  %v641_v20 = vld [vmem:[%s7759_s2 + $0x528] sm:$0xff]  ;;  %v3311_v27 = vpack.c.bf16 %v632_v19, %v624_v18  ;;  %v720_v26 = vld [vmem:[%s7759_s2 + $0x7a0] sm:$0xff] }
  0x94   : > { %3352 = vmatpush1.bf16.msra.mxu1 %v3351_v36  ;;  %v3313_v28 = vpack.c.bf16 %v649_v34, %v641_v20  ;;  %v626_v36 = vld [vmem:[%s7759_s2 + $0x4b0] sm:$0xff]  ;;  %v729_v19 = vld [vmem:[%s7759_s2 + $0x7e8] sm:$0xff] }
  0x95   : > { %3354 = vmatprep.subr.bf16.mxu1 %v3353_v38  ;;  %v643_v38 = vld [vmem:[%s7759_s2 + $0x538] sm:$0xff]  ;;  %v3375_v45 = vpack.c.bf16 %v634_v37, %v626_v36  ;;  %v698_v34 = vld [vmem:[%s7759_s2 + $0x6f0] sm:$0xff] }
  0x96   : > { %3292 = vmatpush1.bf16.msra.mxu0 %v3291_v30  ;;  %v648_v30 = vld [vmem:[%s7759_s2 + $0x560] sm:$0xff]  ;;  %v3377_v48 = vpack.c.bf16 %v651_v39, %v643_v38  ;;  %v722_v38 = vld [vmem:[%s7759_s2 + $0x7b0] sm:$0xff] }
  0x97   : > { %3294 = vmatprep.subr.bf16.mxu0 %v3293_v31  ;;  %v657_v31 = vld [vmem:[%s7759_s2 + $0x5a8] sm:$0xff]  ;;  %v3315_v40 = vpack.c.bf16 %v648_v30, %v640_v29  ;;  %v706_v30 = vld [vmem:[%s7759_s2 + $0x730] sm:$0xff] }
  0x98   : > { %3356 = vmatpush1.bf16.msra.mxu1 %v3355_v49  ;;  %v3317_v41 = vpack.c.bf16 %v665_v33, %v657_v31  ;;  %v642_v49 = vld [vmem:[%s7759_s2 + $0x530] sm:$0xff]  ;;  %v731_v33 = vld [vmem:[%s7759_s2 + $0x7f8] sm:$0xff] }
  0x99   : > { %3358 = vmatprep.subr.bf16.mxu1 %v3357_v51  ;;  %v659_v51 = vld [vmem:[%s7759_s2 + $0x5b8] sm:$0xff]  ;;  %v3379_v58 = vpack.c.bf16 %v650_v50, %v642_v49  ;;  %v714_v31 = vld [vmem:[%s7759_s2 + $0x770] sm:$0xff] }
  0x9a   : > { %3296 = vmatpush1.bf16.msra.mxu0 %v3295_v43  ;;  %v664_v43 = vld [vmem:[%s7759_s2 + $0x5e0] sm:$0xff]  ;;  %v3381_v60 = vpack.c.bf16 %v667_v52, %v659_v51  ;;  %v3395_v36 = vpack.c.bf16 %v714_v31, %v706_v30  ;;  %v730_v39 = vld [vmem:[%s7759_s2 + $0x7f0] sm:$0xff]  ;;  %v1102_v52 = vld [vmem:[%s7759_s2 + $0x88] sm:$0xff] }
  0x9b   : > { %3298 = vmatprep.subr.bf16.mxu0 %v3297_v44  ;;  %v673_v44 = vld [vmem:[%s7759_s2 + $0x628] sm:$0xff]  ;;  %v3319_v53 = vpack.c.bf16 %v664_v43, %v656_v42  ;;  %v1088_v43 = vld [vmem:[%s7759_s2 + $0x18] sm:$0xff]  ;;  %v1087_v50 = vld [vmem:[%s7759_s2 + $0x10] sm:$0xff] }
  0x9c   : > { %3360 = vmatpush1.bf16.msra.mxu1 %v3359_v61  ;;  %v3321_v54 = vpack.c.bf16 %v681_v47, %v673_v44  ;;  %v658_v61 = vld [vmem:[%s7759_s2 + $0x5b0] sm:$0xff]  ;;  %v1094_v42 = vld [vmem:[%s7759_s2 + $0x48] sm:$0xff]  ;;  %v1093_v47 = vld [vmem:[%s7759_s2 + $0x40] sm:$0xff] }
  0x9d   : > { %3362 = vmatprep.subr.bf16.mxu1 %v3361_v63  ;;  %v675_v63 = vld [vmem:[%s7759_s2 + $0x638] sm:$0xff]  ;;  %v3383_v6 = vpack.c.bf16 %v666_v62, %v658_v61  ;;  %v1095_v51 = vld [vmem:[%s7759_s2 + $0x50] sm:$0xff]  ;;  %v1149_v30 = vld [vmem:[%s7759_s2 + $0x200] sm:$0xff] }
  0x9e   : > { %3300 = vmatpush1.bf16.msra.mxu0 %v3299_v56  ;;  %v680_v56 = vld [vmem:[%s7759_s2 + $0x660] sm:$0xff]  ;;  %v3385_v8 = vpack.c.bf16 %v683_v0, %v675_v63  ;;  %v1103_v61 = vld [vmem:[%s7759_s2 + $0x90] sm:$0xff]  ;;  %v1118_v0 = vld [vmem:[%s7759_s2 + $0x108] sm:$0xff] }
  0x9f   : > { %3302 = vmatprep.subr.bf16.mxu0 %v3301_v57  ;;  %v689_v57 = vld [vmem:[%s7759_s2 + $0x6a8] sm:$0xff]  ;;  %v3323_v1 = vpack.c.bf16 %v680_v56, %v672_v55  ;;  %v1104_v55 = vld [vmem:[%s7759_s2 + $0x98] sm:$0xff]  ;;  %v1111_v63 = vld [vmem:[%s7759_s2 + $0xd0] sm:$0xff] }
  0xa0   : > { %3364 = vmatpush1.bf16.msra.mxu1 %v3363_v9  ;;  %v3325_v2 = vpack.c.bf16 %v697_v59, %v689_v57  ;;  %v674_v9 = vld [vmem:[%s7759_s2 + $0x630] sm:$0xff]  ;;  %v1112_v56 = vld [vmem:[%s7759_s2 + $0xd8] sm:$0xff]  ;;  %v1101_v59 = vld [vmem:[%s7759_s2 + $0x80] sm:$0xff] }
  0xa1   : > { %3366 = vmatprep.subr.bf16.mxu1 %v3365_v11  ;;  %v691_v11 = vld [vmem:[%s7759_s2 + $0x6b8] sm:$0xff]  ;;  %v3387_v18 = vpack.c.bf16 %v682_v10, %v674_v9  ;;  %v1119_v9 = vld [vmem:[%s7759_s2 + $0x110] sm:$0xff]  ;;  %v1157_v31 = vld [vmem:[%s7759_s2 + $0x240] sm:$0xff] }
  0xa2   : > { %3304 = vmatpush1.bf16.msra.mxu0 %v3303_v4  ;;  %v696_v4 = vld [vmem:[%s7759_s2 + $0x6e0] sm:$0xff]  ;;  %v3389_v20 = vpack.c.bf16 %v699_v12, %v691_v11  ;;  %v1127_v10 = vld [vmem:[%s7759_s2 + $0x150] sm:$0xff]  ;;  %v1134_v12 = vld [vmem:[%s7759_s2 + $0x188] sm:$0xff] }
  0xa3   : > { %3306 = vmatprep.subr.bf16.mxu0 %v3305_v5  ;;  %v705_v5 = vld [vmem:[%s7759_s2 + $0x728] sm:$0xff]  ;;  %v3327_v13 = vpack.c.bf16 %v696_v4, %v688_v3  ;;  %v1120_v4 = vld [vmem:[%s7759_s2 + $0x118] sm:$0xff] }
  0xa4   : > { %3368 = vmatpush1.bf16.msra.mxu1 %v3367_v21  ;;  %v3329_v14 = vpack.c.bf16 %v713_v7, %v705_v5  ;;  %v690_v21 = vld [vmem:[%s7759_s2 + $0x6b0] sm:$0xff]  ;;  %v1128_v5 = vld [vmem:[%s7759_s2 + $0x158] sm:$0xff] }
  0xa5   : > { %3370 = vmatprep.subr.bf16.mxu1 %v3369_v22  ;;  %v707_v22 = vld [vmem:[%s7759_s2 + $0x738] sm:$0xff]  ;;  %v3473_v7 = vpack.c.bf16 %v1128_v5, %v1120_v4 }
  0xa6   : > { %3308 = vmatpush1.bf16.msra.mxu0 %v3307_v16  ;;  %v712_v16 = vld [vmem:[%s7759_s2 + $0x760] sm:$0xff]  ;;  %v3393_v29 = vpack.c.bf16 %v715_v23, %v707_v22  ;;  %v1150_v22 = vld [vmem:[%s7759_s2 + $0x208] sm:$0xff] }
  0xa7   : > { %3310 = vmatprep.subr.bf16.mxu0 %v3309_v17  ;;  %v721_v17 = vld [vmem:[%s7759_s2 + $0x7a8] sm:$0xff]  ;;  %v3331_v24 = vpack.c.bf16 %v712_v16, %v704_v15  ;;  %v3475_v15 = vpack.c.bf16 %v1127_v10, %v1119_v9 }
  0xa8   : > { %3372 = vmatpush1.bf16.msra.mxu1 %v3371_v32  ;;  %v3333_v25 = vpack.c.bf16 %v729_v19, %v721_v17  ;;  %v723_v32 = vld [vmem:[%s7759_s2 + $0x7b8] sm:$0xff]  ;;  %v1141_v19 = vld [vmem:[%s7759_s2 + $0x1c0] sm:$0xff]  ;;  %v1158_v23 = vld [vmem:[%s7759_s2 + $0x248] sm:$0xff] }
  0xa9   : > { %3374 = vmatprep.subr.bf16.mxu1 %v3373_v35  ;;  %v3397_v37 = vpack.c.bf16 %v731_v33, %v723_v32  ;;  %v1144_v17 = vld [vmem:[%s7759_s2 + $0x1d8] sm:$0xff]  ;;  %v1151_v32 = vld [vmem:[%s7759_s2 + $0x210] sm:$0xff]  ;;  %v3419_v33 = vpack.c.bf16 %v1157_v31, %v1149_v30  ;;  %v1214_v9 = vld [vmem:[%s7759_s2 + $0x408] sm:$0xff] }
  0xaa   : > { %3312 = vmatpush1.bf16.msra.mxu0 %v3311_v27  ;;  %v728_v27 = vld [vmem:[%s7759_s2 + $0x7e0] sm:$0xff]  ;;  %v1222_v10 = vld [vmem:[%s7759_s2 + $0x448] sm:$0xff]  ;;  %v1239_v30 = vld [vmem:[%s7759_s2 + $0x4d0] sm:$0xff] }
  0xab   : > { %3314 = vmatprep.subr.bf16.mxu0 %v3313_v28  ;;  %v3391_v28 = vpack.c.bf16 %v698_v34, %v690_v21  ;;  %v3335_v35 = vpack.c.bf16 %v728_v27, %v720_v26  ;;  %v1135_v21 = vld [vmem:[%s7759_s2 + $0x190] sm:$0xff] }
  0xac   : > { %3376 = vmatpush1.bf16.msra.mxu1 %v3375_v45  ;;  %v1096_v45 = vld [vmem:[%s7759_s2 + $0x58] sm:$0xff]  ;;  %v1143_v34 = vld [vmem:[%s7759_s2 + $0x1d0] sm:$0xff] }
  0xad   : > { %3378 = vmatprep.subr.bf16.mxu1 %v3377_v48  ;;  %v3465_v48 = vpack.c.bf16 %v1096_v45, %v1088_v43  ;;  %v3479_v27 = vpack.c.bf16 %v1143_v34, %v1135_v21  ;;  %v1167_v45 = vld [vmem:[%s7759_s2 + $0x290] sm:$0xff]  ;;  %v1230_v21 = vld [vmem:[%s7759_s2 + $0x488] sm:$0xff] }
  0xae   : > { %3316 = vmatpush1.bf16.msra.mxu0 %v3315_v40  ;;  %v3399_v40 = vpack.c.bf16 %v730_v39, %v722_v38  ;;  %v1174_v38 = vld [vmem:[%s7759_s2 + $0x2c8] sm:$0xff]  ;;  %v1168_v39 = vld [vmem:[%s7759_s2 + $0x298] sm:$0xff] }
  0xaf   : > { %3318 = vmatprep.subr.bf16.mxu0 %v3317_v41  ;;  %v1086_v41 = vld [vmem:[%s7759_s2 + $0x8] sm:$0xff] }
  0xb0   : > { %3380 = vmatpush1.bf16.msra.mxu1 %v3379_v58  ;;  %v3401_v44 = vpack.c.bf16 %v1094_v42, %v1086_v41  ;;  %v3469_v58 = vpack.c.bf16 %v1112_v56, %v1104_v55  ;;  %v1176_v41 = vld [vmem:[%s7759_s2 + $0x2d8] sm:$0xff]  ;;  %v1165_v42 = vld [vmem:[%s7759_s2 + $0x280] sm:$0xff]  ;;  %v1238_v34 = vld [vmem:[%s7759_s2 + $0x4c8] sm:$0xff] }
  0xb1   : > { %3382 = vmatprep.subr.bf16.mxu1 %v3381_v60  ;;  %v1109_v60 = vld [vmem:[%s7759_s2 + $0xc0] sm:$0xff]  ;;  %v3485_v43 = vpack.c.bf16 %v1176_v41, %v1168_v39 }
  0xb2   : > { %3320 = vmatpush1.bf16.msra.mxu0 %v3319_v53  ;;  %v3467_v53 = vpack.c.bf16 %v1095_v51, %v1087_v50  ;;  %v3407_v62 = vpack.c.bf16 %v1109_v60, %v1101_v59  ;;  %v1190_v50 = vld [vmem:[%s7759_s2 + $0x348] sm:$0xff]  ;;  %v1184_v51 = vld [vmem:[%s7759_s2 + $0x318] sm:$0xff]  ;;  %v1189_v55 = vld [vmem:[%s7759_s2 + $0x340] sm:$0xff] }
  0xb3   : > { %3322 = vmatprep.subr.bf16.mxu0 %v3321_v54  ;;  %v1110_v54 = vld [vmem:[%s7759_s2 + $0xc8] sm:$0xff]  ;;  %v1191_v59 = vld [vmem:[%s7759_s2 + $0x350] sm:$0xff]  ;;  %v1253_v39 = vld [vmem:[%s7759_s2 + $0x540] sm:$0xff] }
  0xb4   : > { %3384 = vmatpush1.bf16.msra.mxu1 %v3383_v6  ;;  %v3405_v57 = vpack.c.bf16 %v1110_v54, %v1102_v52  ;;  %v1117_v6 = vld [vmem:[%s7759_s2 + $0x100] sm:$0xff] }
  0xb5   : > { %3386 = vmatprep.subr.bf16.mxu1 %v3385_v8  ;;  %v1125_v8 = vld [vmem:[%s7759_s2 + $0x140] sm:$0xff] }
  0xb6   : > { %3324 = vmatpush1.bf16.msra.mxu0 %v3323_v1  ;;  %v1126_v1 = vld [vmem:[%s7759_s2 + $0x148] sm:$0xff]  ;;  %v3411_v11 = vpack.c.bf16 %v1125_v8, %v1117_v6  ;;  %v1181_v54 = vld [vmem:[%s7759_s2 + $0x300] sm:$0xff]  ;;  %v1199_v6 = vld [vmem:[%s7759_s2 + $0x390] sm:$0xff] }
  0xb7   : > { %3326 = vmatprep.subr.bf16.mxu0 %v3325_v2  ;;  %v3471_v2 = vpack.c.bf16 %v1111_v63, %v1103_v61  ;;  %v3409_v3 = vpack.c.bf16 %v1126_v1, %v1118_v0  ;;  %v1198_v61 = vld [vmem:[%s7759_s2 + $0x388] sm:$0xff]  ;;  %v1200_v63 = vld [vmem:[%s7759_s2 + $0x398] sm:$0xff] }
  0xb8   : > { %3388 = vmatpush1.bf16.msra.mxu1 %v3387_v18  ;;  %v1133_v18 = vld [vmem:[%s7759_s2 + $0x180] sm:$0xff]  ;;  %v1208_v1 = vld [vmem:[%s7759_s2 + $0x3d8] sm:$0xff] }
  0xb9   : > { %3390 = vmatprep.subr.bf16.mxu1 %v3389_v20  ;;  %v3415_v26 = vpack.c.bf16 %v1141_v19, %v1133_v18  ;;  %v3493_v4 = vpack.c.bf16 %v1208_v1, %v1200_v63  ;;  %v1215_v18 = vld [vmem:[%s7759_s2 + $0x410] sm:$0xff]  ;;  %v1285_v63 = vld [vmem:[%s7759_s2 + $0x640] sm:$0xff] }
  0xba   : > { %3328 = vmatpush1.bf16.msra.mxu0 %v3327_v13  ;;  %v1142_v13 = vld [vmem:[%s7759_s2 + $0x1c8] sm:$0xff]  ;;  %v1223_v19 = vld [vmem:[%s7759_s2 + $0x450] sm:$0xff] }
  0xbb   : > { %3330 = vmatprep.subr.bf16.mxu0 %v3329_v14  ;;  %v1136_v14 = vld [vmem:[%s7759_s2 + $0x198] sm:$0xff]  ;;  %v3413_v16 = vpack.c.bf16 %v1142_v13, %v1134_v12  ;;  %v3433_v12 = vpack.c.bf16 %v1222_v10, %v1214_v9  ;;  %v1293_v10 = vld [vmem:[%s7759_s2 + $0x680] sm:$0xff] }
  0xbc   : > { %3392 = vmatpush1.bf16.msra.mxu1 %v3391_v28  ;;  %v3477_v20 = vpack.c.bf16 %v1144_v17, %v1136_v14  ;;  %v3417_v28 = vpack.c.bf16 %v1158_v23, %v1150_v22  ;;  %v1224_v13 = vld [vmem:[%s7759_s2 + $0x458] sm:$0xff]  ;;  %v1213_v14 = vld [vmem:[%s7759_s2 + $0x400] sm:$0xff]  ;;  %v3437_v23 = vpack.c.bf16 %v1238_v34, %v1230_v21 }
  0xbd   : > { %3394 = vmatprep.subr.bf16.mxu1 %v3393_v29  ;;  %v1232_v22 = vld [vmem:[%s7759_s2 + $0x498] sm:$0xff] }
  0xbe   : > { %3332 = vmatpush1.bf16.msra.mxu0 %v3331_v24  ;;  %v1152_v24 = vld [vmem:[%s7759_s2 + $0x218] sm:$0xff] }
  0xbf   : > { %3334 = vmatprep.subr.bf16.mxu0 %v3333_v25  ;;  %v1160_v25 = vld [vmem:[%s7759_s2 + $0x258] sm:$0xff] }
  0xc0   : > { %3396 = vmatpush1.bf16.msra.mxu1 %v3395_v36  ;;  %v3481_v29 = vpack.c.bf16 %v1160_v25, %v1152_v24  ;;  %v1240_v24 = vld [vmem:[%s7759_s2 + $0x4d8] sm:$0xff]  ;;  %v1229_v25 = vld [vmem:[%s7759_s2 + $0x480] sm:$0xff] }
  0xc1   : > { %3398 = vmatprep.subr.bf16.mxu1 %v3397_v37  ;;  %v1166_v37 = vld [vmem:[%s7759_s2 + $0x288] sm:$0xff]  ;;  %v1304_v9 = vld [vmem:[%s7759_s2 + $0x6d8] sm:$0xff] }
  0xc2   : > { %3336 = vmatpush1.bf16.msra.mxu0 %v3335_v35  ;;  %v1159_v35 = vld [vmem:[%s7759_s2 + $0x250] sm:$0xff] }
  0xc3   : > { %3402 = vmatprep.subr.bf16.mxu0 %v3401_v44  ;;  %v3483_v36 = vpack.c.bf16 %v1159_v35, %v1151_v32  ;;  %v1173_v44 = vld [vmem:[%s7759_s2 + $0x2c0] sm:$0xff]  ;;  %v1246_v32 = vld [vmem:[%s7759_s2 + $0x508] sm:$0xff]  ;;  %v1248_v35 = vld [vmem:[%s7759_s2 + $0x518] sm:$0xff] }
  0xc4   : > { %3400 = vmatpush1.bf16.msra.mxu1 %v3399_v40  ;;  %v3421_v40 = vpack.c.bf16 %v1174_v38, %v1166_v37  ;;  %v1256_v37 = vld [vmem:[%s7759_s2 + $0x558] sm:$0xff]  ;;  %v1245_v38 = vld [vmem:[%s7759_s2 + $0x500] sm:$0xff] }
  0xc5   : > { %939 = vmatmul.mubr.f32.vlgmr.msra.gmra.mrb[2].mxu0 %v4971_v46  ;;  %3466 = vmatprep.subr.bf16.mxu1 %v3465_v48  ;;  %v3443_v41 = vpack.c.bf16 %v1253_v39, %v1245_v38  ;;  %v1335_v38 = vld [vmem:[%s7759_s2 + $0x7d0] sm:$0xff] }
  0xc7   : > { %1010 = vmatmul.mubr.f32.vlgmr.msra.gmra.mrb[2].mxu1 %v4971_v46  ;;  %v1085_v46 = vld [vmem:[%s7759_s2] sm:$0xff] }
  0xc8   : > { %v3403_v49 = vpack.c.bf16 %v1093_v47, %v1085_v46  ;;  %3468 = vmatpush1.bf16.msra.mxu1 %v3467_v53  ;;  %v1175_v46 = vld [vmem:[%s7759_s2 + $0x2d0] sm:$0xff]  ;;  %v3423_v47 = vpack.c.bf16 %v1173_v44, %v1165_v42  ;;  %v1192_v53 = vld [vmem:[%s7759_s2 + $0x358] sm:$0xff] }
  0xc9   : > { %3470 = vmatprep.subr.bf16.mxu1 %v3469_v58  ;;  %v3487_v48 = vpack.c.bf16 %v1175_v46, %v1167_v45  ;;  %v3489_v56 = vpack.c.bf16 %v1192_v53, %v1184_v51  ;;  %v1183_v58 = vld [vmem:[%s7759_s2 + $0x310] sm:$0xff]  ;;  %v1262_v45 = vld [vmem:[%s7759_s2 + $0x588] sm:$0xff]  ;;  %v1269_v51 = vld [vmem:[%s7759_s2 + $0x5c0] sm:$0xff] }
  0xca   : > { %3404 = vmatpush1.bf16.msra.mxu0 %v3403_v49  ;;  %v1182_v49 = vld [vmem:[%s7759_s2 + $0x308] sm:$0xff]  ;;  %v3491_v60 = vpack.c.bf16 %v1191_v59, %v1183_v58  ;;  %v1247_v42 = vld [vmem:[%s7759_s2 + $0x510] sm:$0xff]  ;;  %v1280_v59 = vld [vmem:[%s7759_s2 + $0x618] sm:$0xff] }
  0xcb   : > { %3406 = vmatprep.subr.bf16.mxu0 %v3405_v57  ;;  %v3425_v52 = vpack.c.bf16 %v1190_v50, %v1182_v49  ;;  %v3427_v57 = vpack.c.bf16 %v1189_v55, %v1181_v54  ;;  %v1270_v46 = vld [vmem:[%s7759_s2 + $0x5c8] sm:$0xff]  ;;  %v1272_v49 = vld [vmem:[%s7759_s2 + $0x5d8] sm:$0xff]  ;;  %v1261_v50 = vld [vmem:[%s7759_s2 + $0x580] sm:$0xff] }
  0xcc   : > { %3472 = vmatpush1.bf16.msra.mxu1 %v3471_v2  ;;  %v1197_v2 = vld [vmem:[%s7759_s2 + $0x380] sm:$0xff]  ;;  %v3447_v53 = vpack.c.bf16 %v1269_v51, %v1261_v50  ;;  %v1263_v54 = vld [vmem:[%s7759_s2 + $0x590] sm:$0xff]  ;;  %v1286_v58 = vld [vmem:[%s7759_s2 + $0x648] sm:$0xff] }
  0xcd   : > { %3474 = vmatprep.subr.bf16.mxu1 %v3473_v7  ;;  %v1207_v7 = vld [vmem:[%s7759_s2 + $0x3d0] sm:$0xff] }
  0xce   : > { %3408 = vmatpush1.bf16.msra.mxu0 %v3407_v62  ;;  %v1206_v62 = vld [vmem:[%s7759_s2 + $0x3c8] sm:$0xff]  ;;  %v3495_v8 = vpack.c.bf16 %v1207_v7, %v1199_v6  ;;  %v1271_v55 = vld [vmem:[%s7759_s2 + $0x5d0] sm:$0xff]  ;;  %v1296_v7 = vld [vmem:[%s7759_s2 + $0x698] sm:$0xff] }
  0xcf   : > { %3410 = vmatprep.subr.bf16.mxu0 %v3409_v3  ;;  %v3429_v0 = vpack.c.bf16 %v1206_v62, %v1198_v61  ;;  %v1205_v3 = vld [vmem:[%s7759_s2 + $0x3c0] sm:$0xff]  ;;  %v1288_v61 = vld [vmem:[%s7759_s2 + $0x658] sm:$0xff]  ;;  %v1302_v6 = vld [vmem:[%s7759_s2 + $0x6c8] sm:$0xff] }
  0xd0   : > { %3476 = vmatpush1.bf16.msra.mxu1 %v3475_v15  ;;  %v3431_v5 = vpack.c.bf16 %v1205_v3, %v1197_v2  ;;  %v1221_v15 = vld [vmem:[%s7759_s2 + $0x440] sm:$0xff]  ;;  %v1279_v2 = vld [vmem:[%s7759_s2 + $0x610] sm:$0xff] }
  0xd1   : > { %3478 = vmatprep.subr.bf16.mxu1 %v3477_v20  ;;  %v3435_v17 = vpack.c.bf16 %v1221_v15, %v1213_v14  ;;  %v3499_v20 = vpack.c.bf16 %v1223_v19, %v1215_v18  ;;  %v1277_v62 = vld [vmem:[%s7759_s2 + $0x600] sm:$0xff]  ;;  %v1287_v3 = vld [vmem:[%s7759_s2 + $0x650] sm:$0xff]  ;;  %v1318_v18 = vld [vmem:[%s7759_s2 + $0x748] sm:$0xff] }
  0xd2   : > { %3412 = vmatpush1.bf16.msra.mxu0 %v3411_v11  ;;  %v1216_v11 = vld [vmem:[%s7759_s2 + $0x418] sm:$0xff]  ;;  %v3451_v1 = vpack.c.bf16 %v1285_v63, %v1277_v62  ;;  %v1295_v14 = vld [vmem:[%s7759_s2 + $0x690] sm:$0xff] }
  0xd3   : > { %3414 = vmatprep.subr.bf16.mxu0 %v3413_v16  ;;  %v3497_v16 = vpack.c.bf16 %v1224_v13, %v1216_v11  ;;  %v1301_v11 = vld [vmem:[%s7759_s2 + $0x6c0] sm:$0xff]  ;;  %v1303_v15 = vld [vmem:[%s7759_s2 + $0x6d0] sm:$0xff]  ;;  %v1312_v19 = vld [vmem:[%s7759_s2 + $0x718] sm:$0xff] }
  0xd4   : > { %3480 = vmatpush1.bf16.msra.mxu1 %v3479_v27  ;;  %v3501_v27 = vpack.c.bf16 %v1240_v24, %v1232_v22  ;;  %v3455_v13 = vpack.c.bf16 %v1301_v11, %v1293_v10  ;;  %v1309_v22 = vld [vmem:[%s7759_s2 + $0x700] sm:$0xff]  ;;  %v1311_v24 = vld [vmem:[%s7759_s2 + $0x710] sm:$0xff] }
  0xd5   : > { %3482 = vmatprep.subr.bf16.mxu1 %v3481_v29  ;;  %v1231_v29 = vld [vmem:[%s7759_s2 + $0x490] sm:$0xff] }
  0xd6   : > { %3416 = vmatpush1.bf16.msra.mxu0 %v3415_v26  ;;  %v1237_v26 = vld [vmem:[%s7759_s2 + $0x4c0] sm:$0xff]  ;;  %v3503_v31 = vpack.c.bf16 %v1239_v30, %v1231_v29 }
  0xd7   : > { %3418 = vmatprep.subr.bf16.mxu0 %v3417_v28  ;;  %v3439_v28 = vpack.c.bf16 %v1237_v26, %v1229_v25  ;;  %v1319_v26 = vld [vmem:[%s7759_s2 + $0x750] sm:$0xff] }
  0xd8   : > { %3484 = vmatpush1.bf16.msra.mxu1 %v3483_v36  ;;  %v3523_v29 = vpack.c.bf16 %v1319_v26, %v1311_v24 }
  0xd9   : > { %3486 = vmatprep.subr.bf16.mxu1 %v3485_v43  ;;  %v1255_v43 = vld [vmem:[%s7759_s2 + $0x550] sm:$0xff] }
  0xda   : > { %3420 = vmatpush1.bf16.msra.mxu0 %v3419_v33  ;;  %v1254_v33 = vld [vmem:[%s7759_s2 + $0x548] sm:$0xff]  ;;  %v3507_v44 = vpack.c.bf16 %v1255_v43, %v1247_v42  ;;  %v1092_v43 = vld [vmem:[%s7759_s2 + $0x38] sm:$0xff] }
  0xdb   : > { %3422 = vmatprep.subr.bf16.mxu0 %v3421_v40  ;;  %v3441_v36 = vpack.c.bf16 %v1254_v33, %v1246_v32  ;;  %v3505_v40 = vpack.c.bf16 %v1256_v37, %v1248_v35  ;;  %v1336_v32 = vld [vmem:[%s7759_s2 + $0x7d8] sm:$0xff]  ;;  %v1325_v33 = vld [vmem:[%s7759_s2 + $0x780] sm:$0xff]  ;;  %v1327_v37 = vld [vmem:[%s7759_s2 + $0x790] sm:$0xff] }
  0xdc   : > { %3488 = vmatpush1.bf16.msra.mxu1 %v3487_v48  ;;  %v3445_v48 = vpack.c.bf16 %v1270_v46, %v1262_v45  ;;  %v1098_v42 = vld [vmem:[%s7759_s2 + $0x68] sm:$0xff]  ;;  %v1100_v45 = vld [vmem:[%s7759_s2 + $0x78] sm:$0xff] }
  0xdd   : > { %3490 = vmatprep.subr.bf16.mxu1 %v3489_v56  ;;  %v3511_v56 = vpack.c.bf16 %v1271_v55, %v1263_v54  ;;  %v3593_v46 = vpack.c.bf16 %v1100_v45, %v1092_v43  ;;  %v469_v55 = vld [vmem:[%s4542_s29 + $0x10] sm:$0xff] }
  0xde   : > { %3424 = vmatpush1.bf16.msra.mxu0 %v3423_v47  ;;  %v1264_v47 = vld [vmem:[%s7759_s2 + $0x598] sm:$0xff]  ;;  %v1091_v45 = vld [vmem:[%s7759_s2 + $0x30] sm:$0xff] }
  0xdf   : > { %3426 = vmatprep.subr.bf16.mxu0 %v3425_v52  ;;  %v3509_v52 = vpack.c.bf16 %v1272_v49, %v1264_v47  ;;  %v467_v47 = vld [vmem:[%s4542_s29] sm:$0xff] }
  0xe0   : > { %3492 = vmatpush1.bf16.msra.mxu1 %v3491_v60 }
  0xe1   : > { %3494 = vmatprep.subr.bf16.mxu1 %v3493_v4  ;;  %v3515_v4 = vpack.c.bf16 %v1287_v3, %v1279_v2 }
  0xe2   : > { %3428 = vmatpush1.bf16.msra.mxu0 %v3427_v57  ;;  %v1278_v57 = vld [vmem:[%s7759_s2 + $0x608] sm:$0xff] }
  0xe3   : > { %3430 = vmatprep.subr.bf16.mxu0 %v3429_v0  ;;  %v3449_v60 = vpack.c.bf16 %v1286_v58, %v1278_v57  ;;  %v3513_v0 = vpack.c.bf16 %v1288_v61, %v1280_v59  ;;  %v470_v59 = vld [vmem:[%s4542_s29 + $0x18] sm:$0xff] }
  0xe4   : > { %3496 = vmatpush1.bf16.msra.mxu1 %v3495_v8 }
  0xe5   : > { %3498 = vmatprep.subr.bf16.mxu1 %v3497_v16  ;;  %v1310_v16 = vld [vmem:[%s7759_s2 + $0x708] sm:$0xff] }
  0xe6   : > { %3432 = vmatpush1.bf16.msra.mxu0 %v3431_v5  ;;  %v1294_v5 = vld [vmem:[%s7759_s2 + $0x688] sm:$0xff]  ;;  %v3457_v21 = vpack.c.bf16 %v1318_v18, %v1310_v16 }
  0xe7   : > { %3434 = vmatprep.subr.bf16.mxu0 %v3433_v12  ;;  %v3453_v8 = vpack.c.bf16 %v1302_v6, %v1294_v5  ;;  %v3517_v12 = vpack.c.bf16 %v1304_v9, %v1296_v7 }
  0xe8   : > { %3500 = vmatpush1.bf16.msra.mxu1 %v3499_v20  ;;  %v1320_v20 = vld [vmem:[%s7759_s2 + $0x758] sm:$0xff] }
  0xe9   : > { %3502 = vmatprep.subr.bf16.mxu1 %v3501_v27  ;;  %v3521_v34 = vpack.c.bf16 %v1320_v20, %v1312_v19  ;;  %v1326_v27 = vld [vmem:[%s7759_s2 + $0x788] sm:$0xff] }
  0xea   : > { %3436 = vmatpush1.bf16.msra.mxu0 %v3435_v17  ;;  %v3519_v17 = vpack.c.bf16 %v1303_v15, %v1295_v14  ;;  %v3085_v14 = vld [vmem:[%s4544_s14 + $0x60] sm:$0xff]  ;;  %v3086_v15 = vld [vmem:[%s4544_s14 + $0x68] sm:$0xff] }
  0xeb   : > { %3438 = vmatprep.subr.bf16.mxu0 %v3437_v23  ;;  %v1317_v23 = vld [vmem:[%s7759_s2 + $0x740] sm:$0xff] }
  0xec   : > { %3504 = vmatpush1.bf16.msra.mxu1 %v3503_v31  ;;  %v3459_v25 = vpack.c.bf16 %v1317_v23, %v1309_v22  ;;  %v1328_v31 = vld [vmem:[%s7759_s2 + $0x798] sm:$0xff] }
  0xed   : > { %3506 = vmatprep.subr.bf16.mxu1 %v3505_v40  ;;  %v3525_v35 = vpack.c.bf16 %v1336_v32, %v1328_v31  ;;  %v3527_v40 = vpack.c.bf16 %v1335_v38, %v1327_v37 }
  0xee   : > { %3440 = vmatpush1.bf16.msra.mxu0 %v3439_v28  ;;  %v1334_v28 = vld [vmem:[%s7759_s2 + $0x7c8] sm:$0xff] }
  0xef   : > { %3442 = vmatprep.subr.bf16.mxu0 %v3441_v36  ;;  %v3461_v30 = vpack.c.bf16 %v1334_v28, %v1326_v27  ;;  %v1333_v36 = vld [vmem:[%s7759_s2 + $0x7c0] sm:$0xff] }
  0xf0   : > { %3508 = vmatpush1.bf16.msra.mxu1 %v3507_v44  ;;  %v3463_v39 = vpack.c.bf16 %v1333_v36, %v1325_v33 }
  0xf1   : > { %3510 = vmatprep.subr.bf16.mxu1 %v3509_v52 }
  0xf2   : > { %3444 = vmatpush1.bf16.msra.mxu0 %v3443_v41  ;;  %v1090_v41 = vld [vmem:[%s7759_s2 + $0x28] sm:$0xff] }
  0xf3   : > { %3446 = vmatprep.subr.bf16.mxu0 %v3445_v48  ;;  %v3529_v44 = vpack.c.bf16 %v1098_v42, %v1090_v41  ;;  %v468_v48 = vld [vmem:[%s4542_s29 + $0x8] sm:$0xff]  ;;  %v1089_v42 = vld [vmem:[%s7759_s2 + $0x20] sm:$0xff] }
  0xf4   : > { %3512 = vmatpush1.bf16.msra.mxu1 %v3511_v56 }
  0xf5   : > { %3514 = vmatprep.subr.bf16.mxu1 %v3513_v0 }
  0xf6   : > { %3448 = vmatpush1.bf16.msra.mxu0 %v3447_v53 }
  0xf7   : > { %3450 = vmatprep.subr.bf16.mxu0 %v3449_v60 }
  0xf8   : > { %3516 = vmatpush1.bf16.msra.mxu1 %v3515_v4  ;;  %v462_v4 = vld [vmem:[#allocation3] sm:$0xff] }
  0xf9   : > { %3518 = vmatprep.subr.bf16.mxu1 %v3517_v12 }
  0xfa   : > { %3452 = vmatpush1.bf16.msra.mxu0 %v3451_v1 }
  0xfb   : > { %3454 = vmatprep.subr.bf16.mxu0 %v3453_v8 }
  0xfc   : > { %3520 = vmatpush1.bf16.msra.mxu1 %v3519_v17 }
  0xfd   : > { %3522 = vmatprep.subr.bf16.mxu1 %v3521_v34  ;;  %v3087_v34 = vld [vmem:[%s4544_s14 + $0x70] sm:$0xff] }
  0xfe   : > { %3456 = vmatpush1.bf16.msra.mxu0 %v3455_v13 }
  0xff   : > { %3458 = vmatprep.subr.bf16.mxu0 %v3457_v21 }
 0x100   : > { %3524 = vmatpush1.bf16.msra.mxu1 %v3523_v29 }
 0x101   : > { %3526 = vmatprep.subr.bf16.mxu1 %v3525_v35  ;;  %v466_v35 = vld [vmem:[#allocation3 + $0x8] sm:$0xff] }
 0x102   : > { %3460 = vmatpush1.bf16.msra.mxu0 %v3459_v25  ;;  %v3088_v25 = vld [vmem:[%s4544_s14 + $0x78] sm:$0xff] }
 0x103   : > { %3462 = vmatprep.subr.bf16.mxu0 %v3461_v30 }
 0x104   : > { %3528 = vmatpush1.bf16.msra.mxu1 %v3527_v40 }
 0x105   : > { %3594 = vmatprep.subr.bf16.mxu1 %v3593_v46  ;;  %v1099_v46 = vld [vmem:[%s7759_s2 + $0x70] sm:$0xff] }
 0x106   : > { %3464 = vmatpush1.bf16.msra.mxu0 %v3463_v39 }
 0x107   : > { %3530 = vmatprep.subr.bf16.mxu0 %v3529_v44  ;;  %v1097_v44 = vld [vmem:[%s7759_s2 + $0x60] sm:$0xff] }
 0x158   : > { %v798_v49 = vpop.f32.mrb[0].mxu0 }
 0x159   : > { %v1016_v50 = vadd.f32 %v798_v49, %v467_v47  ;;  %v800_v51 = vpop.f32.mrb[1].mxu0  ;;  %v1106_v47 = vld [vmem:[%s7759_s2 + $0xa8] sm:$0xff] }
 0x15a   : > { %v1017_v52 = vadd.f32 %v800_v51, %v468_v48  ;;  %v869_v56 = vpop.f32.mrb[0].mxu1  ;;  %v1114_v49 = vld [vmem:[%s7759_s2 + $0xe8] sm:$0xff]  ;;  %v1116_v51 = vld [vmem:[%s7759_s2 + $0xf8] sm:$0xff] }
 0x15b   : > { %v3089_v53 = vmul.f32 -1.442695, %v1016_v50  ;;  %v871_v57 = vpop.f32.mrb[1].mxu1  ;;  %v1018_v58 = vadd.f32 %v869_v56, %v469_v55  ;;  %v1108_v50 = vld [vmem:[%s7759_s2 + $0xb8] sm:$0xff]  ;;  %v1105_v55 = vld [vmem:[%s7759_s2 + $0xa0] sm:$0xff] }
 0x15c   : > { %v3090_v54 = vmul.f32 -1.442695, %v1017_v52  ;;  %v1019_v61 = vadd.f32 %v871_v57, %v470_v59  ;;  %v1113_v56 = vld [vmem:[%s7759_s2 + $0xe0] sm:$0xff]  ;;  %v1107_v57 = vld [vmem:[%s7759_s2 + $0xb0] sm:$0xff]  ;;  %v1122_v59 = vld [vmem:[%s7759_s2 + $0x128] sm:$0xff] }
 0x15d   : > { %4209 = vpow2.f32 %v3089_v53  ;;  %v3091_v60 = vmul.f32 -1.442695, %v1018_v58  ;;  %v3531_v53 = vpack.c.bf16 %v1097_v44, %v1089_v42  ;;  %v1115_v58 = vld [vmem:[%s7759_s2 + $0xf0] sm:$0xff]  ;;  %v1169_v42 = vld [vmem:[%s7759_s2 + $0x2a0] sm:$0xff] }
 0x15e   : > { %4211 = vpow2.f32 %v3090_v54  ;;  %v3595_v54 = vpack.c.bf16 %v1099_v46, %v1091_v45  ;;  %v1171_v46 = vld [vmem:[%s7759_s2 + $0x2b0] sm:$0xff] }
 0x15f   : > { %4213 = vpow2.f32 %v3091_v60  ;;  %v3533_v60 = vpack.c.bf16 %v1114_v49, %v1106_v47  ;;  %v1179_v47 = vld [vmem:[%s7759_s2 + $0x2f0] sm:$0xff]  ;;  %v1194_v49 = vld [vmem:[%s7759_s2 + $0x368] sm:$0xff] }
 0x160   : > { %4215 = vtanh.f32 %v1019_v61  ;;  %v3597_v61 = vpack.c.bf16 %v1116_v51, %v1108_v50  ;;  %v1188_v50 = vld [vmem:[%s7759_s2 + $0x338] sm:$0xff] }
 0x161   : > { %v1196_v51 = vld [vmem:[%s7759_s2 + $0x378] sm:$0xff] }
 0x167   : > { %v4210_v62 = vpop.eup %4209 }
 0x168   : > { %v4212_v63 = vpop.eup %4211  ;;  %v1033_v0 = vadd.f32 1.0, %v4210_v62  ;;  %v1130_v62 = vld [vmem:[%s7759_s2 + $0x168] sm:$0xff] }
 0x169   : > { %v1034_v1 = vadd.f32 1.0, %v4212_v63  ;;  %v4214_v2 = vpop.eup %4213  ;;  %v1124_v63 = vld [vmem:[%s7759_s2 + $0x138] sm:$0xff] }
 0x16a   : > { %4217 = vrcp.f32 %v1033_v0  ;;  %v4216_v3 = vpop.eup %4215  ;;  %v1035_v6 = vadd.f32 1.0, %v4214_v2  ;;  %v1132_v0 = vld [vmem:[%s7759_s2 + $0x178] sm:$0xff]  ;;  %v3599_v2 = vpack.c.bf16 %v1115_v58, %v1107_v57  ;;  %v3617_v57 = vpack.c.bf16 %v1196_v51, %v1188_v50  ;;  %v1187_v58 = vld [vmem:[%s7759_s2 + $0x330] sm:$0xff] }
 0x16b   : > { %4219 = vrcp.f32 %v1034_v1  ;;  %v3535_v1 = vpack.c.bf16 %v1113_v56, %v1105_v55  ;;  %v1193_v55 = vld [vmem:[%s7759_s2 + $0x360] sm:$0xff]  ;;  %v1276_v50 = vld [vmem:[%s7759_s2 + $0x5f8] sm:$0xff] }
 0x16c   : > { %4221 = vrcp.f32 %v1035_v6  ;;  %v3601_v6 = vpack.c.bf16 %v1132_v0, %v1124_v63  ;;  %v1212_v63 = vld [vmem:[%s7759_s2 + $0x3f8] sm:$0xff] }
 0x174   : > { %v4218_v5 = vpop.eup %4217 }
 0x175   : > { %v4220_v7 = vpop.eup %4219  ;;  %v1044_v8 = vmul.f32 %v4218_v5, %v4216_v3  ;;  %v1121_v3 = vld [vmem:[%s7759_s2 + $0x120] sm:$0xff]  ;;  %v3537_v5 = vpack.c.bf16 %v1130_v62, %v1122_v59  ;;  %v1195_v59 = vld [vmem:[%s7759_s2 + $0x370] sm:$0xff]  ;;  %v1204_v62 = vld [vmem:[%s7759_s2 + $0x3b8] sm:$0xff] }
 0x176   : > { %v1043_v9 = vmul.f32 %v4220_v7, %v462_v4  ;;  %v4222_v11 = vpop.eup %4221  ;;  %v1129_v4 = vld [vmem:[%s7759_s2 + $0x160] sm:$0xff]  ;;  %v1123_v7 = vld [vmem:[%s7759_s2 + $0x130] sm:$0xff] }
 0x178   : > { %v5739_v10 = vadd.f32 %v1044_v8, %v1043_v9  ;;  %v1131_v8 = vld [vmem:[%s7759_s2 + $0x170] sm:$0xff]  ;;  %v1138_v9 = vld [vmem:[%s7759_s2 + $0x1a8] sm:$0xff] }
 0x17a   : > { %4223 = vtanh.f32 %v5739_v10 }
 0x184   : > { %v4224_v12 = vpop.eup %4223 }
 0x185   : > { %v5742_v13 = vmul.f32 %v4224_v12, %v4222_v11  ;;  %v1146_v11 = vld [vmem:[%s7759_s2 + $0x1e8] sm:$0xff]  ;;  %v1140_v12 = vld [vmem:[%s7759_s2 + $0x1b8] sm:$0xff] }
 0x187   : > { %1072 = vst [vmem:[%s4535_s18] sm:$0xff] %v5742_v13 }
 0x198   : > { %v940_v16 = vpop.f32.mrb[2].mxu0 }
 0x199   : > { %v1020_v17 = vadd.f32 %v3085_v14, %v940_v16  ;;  %v942_v18 = vpop.f32.mrb[3].mxu0  ;;  %v1148_v14 = vld [vmem:[%s7759_s2 + $0x1f8] sm:$0xff]  ;;  %v3603_v16 = vpack.c.bf16 %v1131_v8, %v1123_v7  ;;  %v1211_v7 = vld [vmem:[%s7759_s2 + $0x3f0] sm:$0xff]  ;;  %v1218_v8 = vld [vmem:[%s7759_s2 + $0x428] sm:$0xff] }
 0x19a   : > { %v1021_v19 = vadd.f32 %v3086_v15, %v942_v18  ;;  %v1011_v22 = vpop.f32.mrb[2].mxu1  ;;  %v3539_v15 = vpack.c.bf16 %v1129_v4, %v1121_v3  ;;  %v1145_v18 = vld [vmem:[%s7759_s2 + $0x1e0] sm:$0xff] }
 0x19b   : > { %v3092_v20 = vmul.f32 -1.442695, %v1020_v17  ;;  %v1013_v23 = vpop.f32.mrb[3].mxu1  ;;  %v1022_v24 = vadd.f32 %v3087_v34, %v1011_v22  ;;  %v1137_v17 = vld [vmem:[%s7759_s2 + $0x1a0] sm:$0xff]  ;;  %v1147_v34 = vld [vmem:[%s7759_s2 + $0x1f0] sm:$0xff]  ;;  %v1154_v22 = vld [vmem:[%s7759_s2 + $0x228] sm:$0xff] }
 0x19c   : > { %v3093_v21 = vmul.f32 -1.442695, %v1021_v19  ;;  %v1023_v27 = vadd.f32 %v3088_v25, %v1013_v23  ;;  %v3541_v19 = vpack.c.bf16 %v1146_v11, %v1138_v9  ;;  %v1162_v23 = vld [vmem:[%s7759_s2 + $0x268] sm:$0xff]  ;;  %v1164_v25 = vld [vmem:[%s7759_s2 + $0x278] sm:$0xff]  ;;  %v1209_v3 = vld [vmem:[%s7759_s2 + $0x3e0] sm:$0xff] }
 0x19d   : > { %4225 = vpow2.f32 %v3092_v20  ;;  %v3094_v26 = vmul.f32 -1.442695, %v1022_v24  ;;  %v3605_v20 = vpack.c.bf16 %v1148_v14, %v1140_v12  ;;  %v1156_v24 = vld [vmem:[%s7759_s2 + $0x238] sm:$0xff]  ;;  %v1226_v9 = vld [vmem:[%s7759_s2 + $0x468] sm:$0xff] }
 0x19e   : > { %4227 = vpow2.f32 %v3093_v21  ;;  %v1139_v21 = vld [vmem:[%s7759_s2 + $0x1b0] sm:$0xff]  ;;  %v1220_v11 = vld [vmem:[%s7759_s2 + $0x438] sm:$0xff] }
 0x19f   : > { %4229 = vpow2.f32 %v3094_v26  ;;  %v3543_v26 = vpack.c.bf16 %v1145_v18, %v1137_v17  ;;  %v1228_v12 = vld [vmem:[%s7759_s2 + $0x478] sm:$0xff]  ;;  %v1225_v17 = vld [vmem:[%s7759_s2 + $0x460] sm:$0xff]  ;;  %v3561_v18 = vpack.c.bf16 %v1226_v9, %v1218_v8  ;;  %v1306_v8 = vld [vmem:[%s7759_s2 + $0x6e8] sm:$0xff] }
 0x1a0   : > { %4231 = vtanh.f32 %v1023_v27  ;;  %v3607_v27 = vpack.c.bf16 %v1147_v34, %v1139_v21  ;;  %v1227_v21 = vld [vmem:[%s7759_s2 + $0x470] sm:$0xff]  ;;  %v1234_v34 = vld [vmem:[%s7759_s2 + $0x4a8] sm:$0xff]  ;;  %v1300_v9 = vld [vmem:[%s7759_s2 + $0x6b8] sm:$0xff] }
 0x1a7   : > { %v4226_v28 = vpop.eup %4225 }
 0x1a8   : > { %v4228_v29 = vpop.eup %4227  ;;  %v1057_v30 = vadd.f32 1.0, %v4226_v28  ;;  %v1153_v28 = vld [vmem:[%s7759_s2 + $0x220] sm:$0xff] }
 0x1a9   : > { %v1058_v31 = vadd.f32 1.0, %v4228_v29  ;;  %v4230_v32 = vpop.eup %4229  ;;  %v1161_v29 = vld [vmem:[%s7759_s2 + $0x260] sm:$0xff] }
 0x1aa   : > { %4233 = vrcp.f32 %v1057_v30  ;;  %v4232_v33 = vpop.eup %4231  ;;  %v1059_v37 = vadd.f32 1.0, %v4230_v32  ;;  %v3545_v30 = vpack.c.bf16 %v1162_v23, %v1154_v22  ;;  %v1155_v32 = vld [vmem:[%s7759_s2 + $0x230] sm:$0xff]  ;;  %v1242_v22 = vld [vmem:[%s7759_s2 + $0x4e8] sm:$0xff]  ;;  %v1236_v23 = vld [vmem:[%s7759_s2 + $0x4b8] sm:$0xff] }
 0x1ab   : > { %4235 = vrcp.f32 %v1058_v31  ;;  %v3609_v31 = vpack.c.bf16 %v1164_v25, %v1156_v24  ;;  %v1244_v24 = vld [vmem:[%s7759_s2 + $0x4f8] sm:$0xff] }
 0x1ac   : > { %4237 = vrcp.f32 %v1059_v37  ;;  %v1172_v37 = vld [vmem:[%s7759_s2 + $0x2b8] sm:$0xff] }
 0x1b4   : > { %v4234_v36 = vpop.eup %4233 }
 0x1b5   : > { %v4236_v38 = vpop.eup %4235  ;;  %v1068_v39 = vmul.f32 %v4234_v36, %v4232_v33  ;;  %v1163_v33 = vld [vmem:[%s7759_s2 + $0x270] sm:$0xff]  ;;  %v1178_v36 = vld [vmem:[%s7759_s2 + $0x2e8] sm:$0xff] }
 0x1b6   : > { %v1067_v40 = vmul.f32 %v4236_v38, %v466_v35  ;;  %v4238_v43 = vpop.eup %4237  ;;  %v1170_v35 = vld [vmem:[%s7759_s2 + $0x2a8] sm:$0xff]  ;;  %v1180_v38 = vld [vmem:[%s7759_s2 + $0x2f8] sm:$0xff] }
 0x1b7   : > { %v3549_v44 = vpack.c.bf16 %v1178_v36, %v1170_v35  ;;  %v3613_v45 = vpack.c.bf16 %v1180_v38, %v1172_v37  ;;  %v1258_v35 = vld [vmem:[%s7759_s2 + $0x568] sm:$0xff]  ;;  %v1252_v36 = vld [vmem:[%s7759_s2 + $0x538] sm:$0xff] }
 0x1b8   : > { %v5750_v41 = vadd.f32 %v1068_v39, %v1067_v40  ;;  %v3547_v39 = vpack.c.bf16 %v1161_v29, %v1153_v28  ;;  %v3611_v40 = vpack.c.bf16 %v1163_v33, %v1155_v32  ;;  %v1241_v28 = vld [vmem:[%s7759_s2 + $0x4e0] sm:$0xff]  ;;  %v3565_v29 = vpack.c.bf16 %v1242_v22, %v1234_v34  ;;  %v1243_v32 = vld [vmem:[%s7759_s2 + $0x4f0] sm:$0xff]  ;;  %v1250_v33 = vld [vmem:[%s7759_s2 + $0x528] sm:$0xff] }
 0x1b9   : > { %v1260_v37 = vld [vmem:[%s7759_s2 + $0x578] sm:$0xff]  ;;  %v1322_v34 = vld [vmem:[%s7759_s2 + $0x768] sm:$0xff] }
 0x1ba   : > { %4239 = vtanh.f32 %v5750_v41  ;;  %v1316_v22 = vld [vmem:[%s7759_s2 + $0x738] sm:$0xff] }
 0x1c4   : > { %v4240_v48 = vpop.eup %4239 }
 0x1c5   : > { %v1071_v52 = vmul.f32 %v4240_v48, %v4238_v43  ;;  %v1177_v43 = vld [vmem:[%s7759_s2 + $0x2e0] sm:$0xff]  ;;  %v1186_v48 = vld [vmem:[%s7759_s2 + $0x328] sm:$0xff] }
 0x1c6   : > { %v3553_v56 = vpack.c.bf16 %v1194_v49, %v1186_v48  ;;  %v1274_v48 = vld [vmem:[%s7759_s2 + $0x5e8] sm:$0xff]  ;;  %v1268_v49 = vld [vmem:[%s7759_s2 + $0x5b8] sm:$0xff] }
 0x1c7   : > { %3095 = vst [vmem:[%s4540_s27 + $0x18] sm:$0xff] %v1071_v52  ;;  %1405 = vmatprep.mubr.f32.mxu0 %v1071_v52  ;;  %1476 = vmatprep.mubr.f32.mxu1 %v1071_v52 }
 0x1c8   : > { %1406 = vmatmul.mubr.f32.vlgmr.msra.gmra.mrb[4].mxu0 %v5742_v13  ;;  %1477 = vmatmul.mubr.f32.vlgmr.msra.gmra.mrb[4].mxu1 %v5742_v13 }
 0x1c9   : > { %3532 = vmatpush1.bf16.msra.mxu0 %v3531_v53  ;;  %3596 = vmatpush1.bf16.msra.mxu1 %v3595_v54  ;;  %v3615_v53 = vpack.c.bf16 %v1179_v47, %v1171_v46  ;;  %v1185_v54 = vld [vmem:[%s7759_s2 + $0x320] sm:$0xff]  ;;  %v1259_v46 = vld [vmem:[%s7759_s2 + $0x570] sm:$0xff]  ;;  %v1266_v47 = vld [vmem:[%s7759_s2 + $0x5a8] sm:$0xff] }
 0x1ca   : > { %1547 = vmatprep.mubr.f32.mxu0 %v1071_v52  ;;  %1618 = vmatprep.mubr.f32.mxu1 %v1071_v52  ;;  %v3551_v52 = vpack.c.bf16 %v1177_v43, %v1169_v42  ;;  %v3555_v0 = vpack.c.bf16 %v1193_v55, %v1185_v54  ;;  %v1257_v42 = vld [vmem:[%s7759_s2 + $0x560] sm:$0xff]  ;;  %v3569_v43 = vpack.c.bf16 %v1258_v35, %v1250_v33  ;;  %v1338_v33 = vld [vmem:[%s7759_s2 + $0x7e8] sm:$0xff]  ;;  %v1332_v35 = vld [vmem:[%s7759_s2 + $0x7b8] sm:$0xff] }
 0x1cb   : > { %3534 = vmatprep.subr.bf16.mxu0 %v3533_v60  ;;  %3598 = vmatprep.subr.bf16.mxu1 %v3597_v61  ;;  %v1202_v60 = vld [vmem:[%s7759_s2 + $0x3a8] sm:$0xff]  ;;  %v1273_v54 = vld [vmem:[%s7759_s2 + $0x5e0] sm:$0xff]  ;;  %v3573_v55 = vpack.c.bf16 %v1274_v48, %v1266_v47 }
 0x1cc   : > { %v1210_v61 = vld [vmem:[%s7759_s2 + $0x3e8] sm:$0xff] }
 0x1cd   : > { %3536 = vmatpush1.bf16.msra.mxu0 %v3535_v1  ;;  %3600 = vmatpush1.bf16.msra.mxu1 %v3599_v2  ;;  %v3619_v1 = vpack.c.bf16 %v1195_v59, %v1187_v58  ;;  %v1201_v2 = vld [vmem:[%s7759_s2 + $0x3a0] sm:$0xff]  ;;  %v3557_v4 = vpack.c.bf16 %v1210_v61, %v1202_v60  ;;  %v1275_v58 = vld [vmem:[%s7759_s2 + $0x5f0] sm:$0xff]  ;;  %v1282_v59 = vld [vmem:[%s7759_s2 + $0x628] sm:$0xff] }
 0x1ce   : > { %3538 = vmatprep.subr.bf16.mxu0 %v3537_v5  ;;  %3602 = vmatprep.subr.bf16.mxu1 %v3601_v6  ;;  %v3621_v5 = vpack.c.bf16 %v1212_v63, %v1204_v62  ;;  %v1203_v6 = vld [vmem:[%s7759_s2 + $0x3b0] sm:$0xff]  ;;  %v3559_v14 = vpack.c.bf16 %v1209_v3, %v1201_v2  ;;  %v1290_v60 = vld [vmem:[%s7759_s2 + $0x668] sm:$0xff]  ;;  %v1284_v61 = vld [vmem:[%s7759_s2 + $0x638] sm:$0xff] }
 0x1cf   : > { %v1292_v62 = vld [vmem:[%s7759_s2 + $0x678] sm:$0xff]  ;;  %v1289_v2 = vld [vmem:[%s7759_s2 + $0x660] sm:$0xff]  ;;  %v3577_v3 = vpack.c.bf16 %v1290_v60, %v1282_v59  ;;  %v1696_v48 = vld [vmem:[%s7759_s2 + $0x8] sm:$0xff] }
 0x1d0   : > { %v1720_v60 = vld [vmem:[%s7759_s2 + $0xc8] sm:$0xff] }
 0x1d1   : > { %3540 = vmatpush1.bf16.msra.mxu0 %v3539_v15  ;;  %3604 = vmatpush1.bf16.msra.mxu1 %v3603_v16  ;;  %v3623_v15 = vpack.c.bf16 %v1211_v7, %v1203_v6  ;;  %v1217_v16 = vld [vmem:[%s7759_s2 + $0x420] sm:$0xff]  ;;  %v1291_v6 = vld [vmem:[%s7759_s2 + $0x670] sm:$0xff]  ;;  %v1298_v7 = vld [vmem:[%s7759_s2 + $0x6a8] sm:$0xff] }
 0x1d2   : > { %3542 = vmatprep.subr.bf16.mxu0 %v3541_v19  ;;  %3606 = vmatprep.subr.bf16.mxu1 %v3605_v20  ;;  %v3625_v19 = vpack.c.bf16 %v1228_v12, %v1220_v11  ;;  %v1219_v20 = vld [vmem:[%s7759_s2 + $0x430] sm:$0xff]  ;;  %v3563_v25 = vpack.c.bf16 %v1225_v17, %v1217_v16  ;;  %v1308_v11 = vld [vmem:[%s7759_s2 + $0x6f8] sm:$0xff]  ;;  %v1305_v16 = vld [vmem:[%s7759_s2 + $0x6e0] sm:$0xff]  ;;  %v3581_v17 = vpack.c.bf16 %v1306_v8, %v1298_v7 }
 0x1d3   : > { %v1736_v7 = vld [vmem:[%s7759_s2 + $0x148] sm:$0xff] }
 0x1d5   : > { %3544 = vmatpush1.bf16.msra.mxu0 %v3543_v26  ;;  %3608 = vmatpush1.bf16.msra.mxu1 %v3607_v27  ;;  %v3627_v26 = vpack.c.bf16 %v1227_v21, %v1219_v20  ;;  %v1233_v27 = vld [vmem:[%s7759_s2 + $0x4a0] sm:$0xff]  ;;  %v1307_v20 = vld [vmem:[%s7759_s2 + $0x6f0] sm:$0xff]  ;;  %v1314_v21 = vld [vmem:[%s7759_s2 + $0x728] sm:$0xff] }
 0x1d6   : > { %3546 = vmatprep.subr.bf16.mxu0 %v3545_v30  ;;  %3610 = vmatprep.subr.bf16.mxu1 %v3609_v31  ;;  %v3629_v30 = vpack.c.bf16 %v1244_v24, %v1236_v23  ;;  %v1235_v31 = vld [vmem:[%s7759_s2 + $0x4b0] sm:$0xff]  ;;  %v3567_v38 = vpack.c.bf16 %v1241_v28, %v1233_v27  ;;  %v1324_v23 = vld [vmem:[%s7759_s2 + $0x778] sm:$0xff]  ;;  %v1321_v27 = vld [vmem:[%s7759_s2 + $0x760] sm:$0xff]  ;;  %v3585_v28 = vpack.c.bf16 %v1322_v34, %v1314_v21 }
 0x1d7   : > { %v1752_v21 = vld [vmem:[%s7759_s2 + $0x1c8] sm:$0xff]  ;;  %v1746_v34 = vld [vmem:[%s7759_s2 + $0x198] sm:$0xff] }
 0x1d9   : > { %3548 = vmatpush1.bf16.msra.mxu0 %v3547_v39  ;;  %3612 = vmatpush1.bf16.msra.mxu1 %v3611_v40  ;;  %v3631_v39 = vpack.c.bf16 %v1243_v32, %v1235_v31  ;;  %v1249_v40 = vld [vmem:[%s7759_s2 + $0x520] sm:$0xff]  ;;  %v1323_v31 = vld [vmem:[%s7759_s2 + $0x770] sm:$0xff]  ;;  %v1330_v32 = vld [vmem:[%s7759_s2 + $0x7a8] sm:$0xff] }
 0x1da   : > { %3550 = vmatprep.subr.bf16.mxu0 %v3549_v44  ;;  %3614 = vmatprep.subr.bf16.mxu1 %v3613_v45  ;;  %v3633_v44 = vpack.c.bf16 %v1260_v37, %v1252_v36  ;;  %v1251_v45 = vld [vmem:[%s7759_s2 + $0x530] sm:$0xff]  ;;  %v3571_v51 = vpack.c.bf16 %v1257_v42, %v1249_v40  ;;  %v1340_v36 = vld [vmem:[%s7759_s2 + $0x7f8] sm:$0xff]  ;;  %v3589_v40 = vpack.c.bf16 %v1338_v33, %v1330_v32 }
 0x1db   : > { %v3653_v42 = vpack.c.bf16 %v1340_v36, %v1332_v35  ;;  %v1762_v32 = vld [vmem:[%s7759_s2 + $0x218] sm:$0xff] }
 0x1dc   : > { %v1770_v33 = vld [vmem:[%s7759_s2 + $0x258] sm:$0xff] }
 0x1dd   : > { %3552 = vmatpush1.bf16.msra.mxu0 %v3551_v52  ;;  %3616 = vmatpush1.bf16.msra.mxu1 %v3615_v53  ;;  %v3635_v52 = vpack.c.bf16 %v1259_v46, %v1251_v45  ;;  %v1265_v53 = vld [vmem:[%s7759_s2 + $0x5a0] sm:$0xff]  ;;  %v1339_v45 = vld [vmem:[%s7759_s2 + $0x7f0] sm:$0xff] }
 0x1de   : > { %3554 = vmatprep.subr.bf16.mxu0 %v3553_v56  ;;  %3618 = vmatprep.subr.bf16.mxu1 %v3617_v57  ;;  %v3637_v56 = vpack.c.bf16 %v1276_v50, %v1268_v49  ;;  %v1267_v57 = vld [vmem:[%s7759_s2 + $0x5b0] sm:$0xff]  ;;  %v3575_v63 = vpack.c.bf16 %v1273_v54, %v1265_v53  ;;  %v1704_v49 = vld [vmem:[%s7759_s2 + $0x48] sm:$0xff]  ;;  %v1698_v50 = vld [vmem:[%s7759_s2 + $0x18] sm:$0xff] }
 0x1df   : > { %v1703_v53 = vld [vmem:[%s7759_s2 + $0x40] sm:$0xff] }
 0x1e1   : > { %3556 = vmatpush1.bf16.msra.mxu0 %v3555_v0  ;;  %3620 = vmatpush1.bf16.msra.mxu1 %v3619_v1  ;;  %v3639_v0 = vpack.c.bf16 %v1275_v58, %v1267_v57  ;;  %v1281_v1 = vld [vmem:[%s7759_s2 + $0x620] sm:$0xff]  ;;  %v1705_v57 = vld [vmem:[%s7759_s2 + $0x50] sm:$0xff]  ;;  %v1712_v58 = vld [vmem:[%s7759_s2 + $0x88] sm:$0xff] }
 0x1e2   : > { %3558 = vmatprep.subr.bf16.mxu0 %v3557_v4  ;;  %3622 = vmatprep.subr.bf16.mxu1 %v3621_v5  ;;  %v3641_v4 = vpack.c.bf16 %v1292_v62, %v1284_v61  ;;  %v1283_v5 = vld [vmem:[%s7759_s2 + $0x630] sm:$0xff]  ;;  %v3579_v12 = vpack.c.bf16 %v1289_v2, %v1281_v1  ;;  %v1714_v61 = vld [vmem:[%s7759_s2 + $0x98] sm:$0xff]  ;;  %v1711_v1 = vld [vmem:[%s7759_s2 + $0x80] sm:$0xff] }
 0x1e3   : > { %v1722_v62 = vld [vmem:[%s7759_s2 + $0xd8] sm:$0xff]  ;;  %v1719_v2 = vld [vmem:[%s7759_s2 + $0xc0] sm:$0xff] }
 0x1e5   : > { %3560 = vmatpush1.bf16.msra.mxu0 %v3559_v14  ;;  %3624 = vmatpush1.bf16.msra.mxu1 %v3623_v15  ;;  %v3643_v14 = vpack.c.bf16 %v1291_v6, %v1283_v5  ;;  %v1297_v15 = vld [vmem:[%s7759_s2 + $0x6a0] sm:$0xff]  ;;  %v1721_v5 = vld [vmem:[%s7759_s2 + $0xd0] sm:$0xff]  ;;  %v1728_v6 = vld [vmem:[%s7759_s2 + $0x108] sm:$0xff] }
 0x1e6   : > { %3562 = vmatprep.subr.bf16.mxu0 %v3561_v18  ;;  %3626 = vmatprep.subr.bf16.mxu1 %v3625_v19  ;;  %v3645_v18 = vpack.c.bf16 %v1308_v11, %v1300_v9  ;;  %v1299_v19 = vld [vmem:[%s7759_s2 + $0x6b0] sm:$0xff]  ;;  %v3583_v24 = vpack.c.bf16 %v1305_v16, %v1297_v15  ;;  %v3665_v9 = vpack.c.bf16 %v1736_v7, %v1728_v6  ;;  %v1730_v11 = vld [vmem:[%s7759_s2 + $0x118] sm:$0xff]  ;;  %v1735_v16 = vld [vmem:[%s7759_s2 + $0x140] sm:$0xff] }
 0x1e7   : > { %v1816_v6 = vld [vmem:[%s7759_s2 + $0x3c8] sm:$0xff]  ;;  %v1810_v7 = vld [vmem:[%s7759_s2 + $0x398] sm:$0xff] }
 0x1e9   : > { %3564 = vmatpush1.bf16.msra.mxu0 %v3563_v25  ;;  %3628 = vmatpush1.bf16.msra.mxu1 %v3627_v26  ;;  %v3647_v25 = vpack.c.bf16 %v1307_v20, %v1299_v19  ;;  %v1313_v26 = vld [vmem:[%s7759_s2 + $0x720] sm:$0xff]  ;;  %v1744_v20 = vld [vmem:[%s7759_s2 + $0x188] sm:$0xff] }
 0x1ea   : > { %3566 = vmatprep.subr.bf16.mxu0 %v3565_v29  ;;  %3630 = vmatprep.subr.bf16.mxu1 %v3629_v30  ;;  %v3649_v29 = vpack.c.bf16 %v1324_v23, %v1316_v22  ;;  %v1315_v30 = vld [vmem:[%s7759_s2 + $0x730] sm:$0xff]  ;;  %v3587_v37 = vpack.c.bf16 %v1321_v27, %v1313_v26  ;;  %v3669_v23 = vpack.c.bf16 %v1752_v21, %v1744_v20  ;;  %v1751_v26 = vld [vmem:[%s7759_s2 + $0x1c0] sm:$0xff]  ;;  %v1832_v20 = vld [vmem:[%s7759_s2 + $0x448] sm:$0xff] }
 0x1eb   : > { %v1826_v21 = vld [vmem:[%s7759_s2 + $0x418] sm:$0xff] }
 0x1ed   : > { %3568 = vmatpush1.bf16.msra.mxu0 %v3567_v38  ;;  %3632 = vmatpush1.bf16.msra.mxu1 %v3631_v39  ;;  %v3651_v38 = vpack.c.bf16 %v1323_v31, %v1315_v30  ;;  %v1329_v39 = vld [vmem:[%s7759_s2 + $0x7a0] sm:$0xff]  ;;  %v1760_v30 = vld [vmem:[%s7759_s2 + $0x208] sm:$0xff] }
 0x1ee   : > { %3570 = vmatprep.subr.bf16.mxu0 %v3569_v43  ;;  %3634 = vmatprep.subr.bf16.mxu1 %v3633_v44  ;;  %v1337_v43 = vld [vmem:[%s7759_s2 + $0x7e0] sm:$0xff]  ;;  %v1331_v44 = vld [vmem:[%s7759_s2 + $0x7b0] sm:$0xff]  ;;  %v1768_v31 = vld [vmem:[%s7759_s2 + $0x248] sm:$0xff] }
 0x1ef   : > { %v3591_v46 = vpack.c.bf16 %v1337_v43, %v1329_v39  ;;  %v3655_v47 = vpack.c.bf16 %v1339_v45, %v1331_v44  ;;  %v1759_v39 = vld [vmem:[%s7759_s2 + $0x200] sm:$0xff]  ;;  %v1769_v44 = vld [vmem:[%s7759_s2 + $0x250] sm:$0xff] }
 0x1f1   : > { %3572 = vmatpush1.bf16.msra.mxu0 %v3571_v51  ;;  %3636 = vmatpush1.bf16.msra.mxu1 %v3635_v52  ;;  %v3657_v51 = vpack.c.bf16 %v1704_v49, %v1696_v48  ;;  %v1706_v52 = vld [vmem:[%s7759_s2 + $0x58] sm:$0xff] }
 0x1f2   : > { %3574 = vmatprep.subr.bf16.mxu0 %v3573_v55  ;;  %3638 = vmatprep.subr.bf16.mxu1 %v3637_v56  ;;  %v3721_v54 = vpack.c.bf16 %v1706_v52, %v1698_v50  ;;  %v1697_v56 = vld [vmem:[%s7759_s2 + $0x10] sm:$0xff]  ;;  %v1778_v48 = vld [vmem:[%s7759_s2 + $0x298] sm:$0xff]  ;;  %v1775_v52 = vld [vmem:[%s7759_s2 + $0x280] sm:$0xff] }
 0x1f3   : > { %v3723_v59 = vpack.c.bf16 %v1705_v57, %v1697_v56  ;;  %v1786_v50 = vld [vmem:[%s7759_s2 + $0x2d8] sm:$0xff]  ;;  %v1792_v57 = vld [vmem:[%s7759_s2 + $0x308] sm:$0xff] }
 0x1f5   : > { %3576 = vmatpush1.bf16.msra.mxu0 %v3575_v63  ;;  %3640 = vmatpush1.bf16.msra.mxu1 %v3639_v0  ;;  %v3661_v63 = vpack.c.bf16 %v1720_v60, %v1712_v58  ;;  %v3725_v0 = vpack.c.bf16 %v1722_v62, %v1714_v61  ;;  %v1800_v58 = vld [vmem:[%s7759_s2 + $0x348] sm:$0xff]  ;;  %v1802_v61 = vld [vmem:[%s7759_s2 + $0x358] sm:$0xff]  ;;  %v1791_v62 = vld [vmem:[%s7759_s2 + $0x300] sm:$0xff] }
 0x1f6   : > { %3578 = vmatprep.subr.bf16.mxu0 %v3577_v3  ;;  %3642 = vmatprep.subr.bf16.mxu1 %v3641_v4  ;;  %v1713_v3 = vld [vmem:[%s7759_s2 + $0x90] sm:$0xff]  ;;  %v3663_v4 = vpack.c.bf16 %v1719_v2, %v1711_v1  ;;  %v3681_v60 = vpack.c.bf16 %v1800_v58, %v1792_v57  ;;  %v1874_v57 = vld [vmem:[%s7759_s2 + $0x598] sm:$0xff] }
 0x1f7   : > { %v3727_v8 = vpack.c.bf16 %v1721_v5, %v1713_v3  ;;  %v1793_v2 = vld [vmem:[%s7759_s2 + $0x310] sm:$0xff]  ;;  %v1808_v5 = vld [vmem:[%s7759_s2 + $0x388] sm:$0xff] }
 0x1f8   : > { %v1801_v3 = vld [vmem:[%s7759_s2 + $0x350] sm:$0xff] }
 0x1f9   : > { %3580 = vmatpush1.bf16.msra.mxu0 %v3579_v12  ;;  %3644 = vmatpush1.bf16.msra.mxu1 %v3643_v14  ;;  %v1738_v12 = vld [vmem:[%s7759_s2 + $0x158] sm:$0xff]  ;;  %v1727_v14 = vld [vmem:[%s7759_s2 + $0x100] sm:$0xff] }
 0x1fa   : > { %3582 = vmatprep.subr.bf16.mxu0 %v3581_v17  ;;  %3646 = vmatprep.subr.bf16.mxu1 %v3645_v18  ;;  %v3729_v15 = vpack.c.bf16 %v1738_v12, %v1730_v11  ;;  %v1729_v17 = vld [vmem:[%s7759_s2 + $0x110] sm:$0xff]  ;;  %v3667_v19 = vpack.c.bf16 %v1735_v16, %v1727_v14  ;;  %v1807_v11 = vld [vmem:[%s7759_s2 + $0x380] sm:$0xff] }
 0x1fb   : > { %v1737_v18 = vld [vmem:[%s7759_s2 + $0x150] sm:$0xff]  ;;  %v1815_v12 = vld [vmem:[%s7759_s2 + $0x3c0] sm:$0xff] }
 0x1fc   : > { %v3731_v22 = vpack.c.bf16 %v1737_v18, %v1729_v17  ;;  %v1809_v16 = vld [vmem:[%s7759_s2 + $0x390] sm:$0xff] }
 0x1fd   : > { %3584 = vmatpush1.bf16.msra.mxu0 %v3583_v24  ;;  %3648 = vmatpush1.bf16.msra.mxu1 %v3647_v25  ;;  %v1754_v24 = vld [vmem:[%s7759_s2 + $0x1d8] sm:$0xff]  ;;  %v1743_v25 = vld [vmem:[%s7759_s2 + $0x180] sm:$0xff]  ;;  %v1817_v17 = vld [vmem:[%s7759_s2 + $0x3d0] sm:$0xff] }
 0x1fe   : > { %3586 = vmatprep.subr.bf16.mxu0 %v3585_v28  ;;  %3650 = vmatprep.subr.bf16.mxu1 %v3649_v29  ;;  %v3733_v27 = vpack.c.bf16 %v1754_v24, %v1746_v34  ;;  %v1745_v28 = vld [vmem:[%s7759_s2 + $0x190] sm:$0xff]  ;;  %v3671_v35 = vpack.c.bf16 %v1751_v26, %v1743_v25  ;;  %v3751_v18 = vpack.c.bf16 %v1817_v17, %v1809_v16  ;;  %v1831_v24 = vld [vmem:[%s7759_s2 + $0x440] sm:$0xff]  ;;  %v1904_v17 = vld [vmem:[%s7759_s2 + $0x688] sm:$0xff] }
 0x1ff   : > { %v1753_v29 = vld [vmem:[%s7759_s2 + $0x1d0] sm:$0xff] }
 0x200   : > { %v3735_v36 = vpack.c.bf16 %v1753_v29, %v1745_v28  ;;  %v1833_v28 = vld [vmem:[%s7759_s2 + $0x450] sm:$0xff] }
 0x201   : > { %3588 = vmatpush1.bf16.msra.mxu0 %v3587_v37  ;;  %3652 = vmatpush1.bf16.msra.mxu1 %v3651_v38  ;;  %v3673_v37 = vpack.c.bf16 %v1768_v31, %v1760_v30  ;;  %v3737_v38 = vpack.c.bf16 %v1770_v33, %v1762_v32  ;;  %v1840_v30 = vld [vmem:[%s7759_s2 + $0x488] sm:$0xff]  ;;  %v1842_v32 = vld [vmem:[%s7759_s2 + $0x498] sm:$0xff] }
 0x202   : > { %3590 = vmatprep.subr.bf16.mxu0 %v3589_v40  ;;  %3654 = vmatprep.subr.bf16.mxu1 %v3653_v42  ;;  %v1767_v40 = vld [vmem:[%s7759_s2 + $0x240] sm:$0xff]  ;;  %v1761_v42 = vld [vmem:[%s7759_s2 + $0x210] sm:$0xff]  ;;  %v1848_v31 = vld [vmem:[%s7759_s2 + $0x4c8] sm:$0xff] }
 0x203   : > { %v3675_v43 = vpack.c.bf16 %v1767_v40, %v1759_v39  ;;  %v3739_v45 = vpack.c.bf16 %v1769_v44, %v1761_v42  ;;  %v3693_v33 = vpack.c.bf16 %v1848_v31, %v1840_v30  ;;  %v1841_v40 = vld [vmem:[%s7759_s2 + $0x490] sm:$0xff]  ;;  %v1856_v44 = vld [vmem:[%s7759_s2 + $0x508] sm:$0xff]  ;;  %v1922_v30 = vld [vmem:[%s7759_s2 + $0x718] sm:$0xff] }
 0x204   : > { %v1849_v42 = vld [vmem:[%s7759_s2 + $0x4d0] sm:$0xff]  ;;  %v1930_v31 = vld [vmem:[%s7759_s2 + $0x758] sm:$0xff] }
 0x205   : > { %3592 = vmatpush1.bf16.msra.mxu0 %v3591_v46  ;;  %3656 = vmatpush1.bf16.msra.mxu1 %v3655_v47  ;;  %v1776_v46 = vld [vmem:[%s7759_s2 + $0x288] sm:$0xff] }
 0x206   : > { %3658 = vmatprep.subr.bf16.mxu0 %v3657_v51  ;;  %3722 = vmatprep.subr.bf16.mxu1 %v3721_v54  ;;  %v1784_v47 = vld [vmem:[%s7759_s2 + $0x2c8] sm:$0xff]  ;;  %v3741_v51 = vpack.c.bf16 %v1786_v50, %v1778_v48  ;;  %v1866_v48 = vld [vmem:[%s7759_s2 + $0x558] sm:$0xff]  ;;  %v1863_v50 = vld [vmem:[%s7759_s2 + $0x540] sm:$0xff] }
 0x207   : > { %v3677_v49 = vpack.c.bf16 %v1784_v47, %v1776_v46  ;;  %v1858_v46 = vld [vmem:[%s7759_s2 + $0x518] sm:$0xff] }
 0x208   : > { %1548 = vmatmul.mubr.f32.vlgmr.msra.gmra.mrb[6].mxu0 %v5742_v13  ;;  %1619 = vmatmul.mubr.f32.vlgmr.msra.gmra.mrb[6].mxu1 %v5742_v13  ;;  %v1695_v13 = vld [vmem:[%s7759_s2] sm:$0xff] }
 0x209   : > { %v3659_v55 = vpack.c.bf16 %v1703_v53, %v1695_v13  ;;  %3724 = vmatpush1.bf16.msra.mxu1 %v3723_v59  ;;  %v1783_v13 = vld [vmem:[%s7759_s2 + $0x2c0] sm:$0xff]  ;;  %v1777_v53 = vld [vmem:[%s7759_s2 + $0x290] sm:$0xff]  ;;  %v1794_v59 = vld [vmem:[%s7759_s2 + $0x318] sm:$0xff] }
 0x20a   : > { %3726 = vmatprep.subr.bf16.mxu1 %v3725_v0  ;;  %v3679_v54 = vpack.c.bf16 %v1783_v13, %v1775_v52  ;;  %v3745_v0 = vpack.c.bf16 %v1802_v61, %v1794_v59  ;;  %v1857_v13 = vld [vmem:[%s7759_s2 + $0x510] sm:$0xff]  ;;  %v1882_v59 = vld [vmem:[%s7759_s2 + $0x5d8] sm:$0xff]  ;;  %v1879_v61 = vld [vmem:[%s7759_s2 + $0x5c0] sm:$0xff] }
 0x20b   : > { %3660 = vmatpush1.bf16.msra.mxu0 %v3659_v55  ;;  %v1785_v55 = vld [vmem:[%s7759_s2 + $0x2d0] sm:$0xff] }
 0x20c   : > { %3662 = vmatprep.subr.bf16.mxu0 %v3661_v63  ;;  %v3743_v56 = vpack.c.bf16 %v1785_v55, %v1777_v53  ;;  %v1799_v63 = vld [vmem:[%s7759_s2 + $0x340] sm:$0xff]  ;;  %v1865_v53 = vld [vmem:[%s7759_s2 + $0x550] sm:$0xff]  ;;  %v1872_v55 = vld [vmem:[%s7759_s2 + $0x588] sm:$0xff] }
 0x20d   : > { %3728 = vmatpush1.bf16.msra.mxu1 %v3727_v8  ;;  %v3683_v1 = vpack.c.bf16 %v1799_v63, %v1791_v62  ;;  %v3685_v8 = vpack.c.bf16 %v1816_v6, %v1808_v5  ;;  %v3765_v62 = vpack.c.bf16 %v1882_v59, %v1874_v57  ;;  %v1890_v5 = vld [vmem:[%s7759_s2 + $0x618] sm:$0xff]  ;;  %v3096_v59 = vld [vmem:[%s4542_s29 + $0x20] sm:$0xff] }
 0x20e   : > { %3730 = vmatprep.subr.bf16.mxu1 %v3729_v15  ;;  %v3687_v15 = vpack.c.bf16 %v1815_v12, %v1807_v11  ;;  %v1710_v57 = vld [vmem:[%s7759_s2 + $0x78] sm:$0xff] }
 0x20f   : > { %3664 = vmatpush1.bf16.msra.mxu0 %v3663_v4  ;;  %v3747_v4 = vpack.c.bf16 %v1801_v3, %v1793_v2  ;;  %v1888_v3 = vld [vmem:[%s7759_s2 + $0x608] sm:$0xff] }
 0x210   : > { %3666 = vmatprep.subr.bf16.mxu0 %v3665_v9  ;;  %v1818_v9 = vld [vmem:[%s7759_s2 + $0x3d8] sm:$0xff] }
 0x211   : > { %3732 = vmatpush1.bf16.msra.mxu1 %v3731_v22  ;;  %v3749_v14 = vpack.c.bf16 %v1818_v9, %v1810_v7  ;;  %v1834_v22 = vld [vmem:[%s7759_s2 + $0x458] sm:$0xff]  ;;  %v1895_v9 = vld [vmem:[%s7759_s2 + $0x640] sm:$0xff] }
 0x212   : > { %3734 = vmatprep.subr.bf16.mxu1 %v3733_v27  ;;  %v3753_v25 = vpack.c.bf16 %v1834_v22, %v1826_v21  ;;  %v1825_v27 = vld [vmem:[%s7759_s2 + $0x410] sm:$0xff]  ;;  %v1898_v7 = vld [vmem:[%s7759_s2 + $0x658] sm:$0xff]  ;;  %v1911_v22 = vld [vmem:[%s7759_s2 + $0x6c0] sm:$0xff] }
 0x213   : > { %3668 = vmatpush1.bf16.msra.mxu0 %v3667_v19  ;;  %v1824_v19 = vld [vmem:[%s7759_s2 + $0x408] sm:$0xff]  ;;  %v3755_v29 = vpack.c.bf16 %v1833_v28, %v1825_v27  ;;  %v3769_v11 = vpack.c.bf16 %v1898_v7, %v1890_v5  ;;  %v1914_v21 = vld [vmem:[%s7759_s2 + $0x6d8] sm:$0xff]  ;;  %v3098_v5 = vld [vmem:[%s4542_s29 + $0x30] sm:$0xff] }
 0x214   : > { %3670 = vmatprep.subr.bf16.mxu0 %v3669_v23  ;;  %v3689_v34 = vpack.c.bf16 %v1832_v20, %v1824_v19  ;;  %v1823_v23 = vld [vmem:[%s7759_s2 + $0x400] sm:$0xff]  ;;  %v1906_v19 = vld [vmem:[%s7759_s2 + $0x698] sm:$0xff]  ;;  %v1920_v27 = vld [vmem:[%s7759_s2 + $0x708] sm:$0xff] }
 0x215   : > { %3736 = vmatpush1.bf16.msra.mxu1 %v3735_v36  ;;  %v3691_v26 = vpack.c.bf16 %v1831_v24, %v1823_v23  ;;  %v1839_v36 = vld [vmem:[%s7759_s2 + $0x480] sm:$0xff]  ;;  %v3773_v23 = vpack.c.bf16 %v1914_v21, %v1906_v19  ;;  %v3099_v7 = vld [vmem:[%s4542_s29 + $0x38] sm:$0xff] }
 0x216   : > { %3738 = vmatprep.subr.bf16.mxu1 %v3737_v38 }
 0x217   : > { %3672 = vmatpush1.bf16.msra.mxu0 %v3671_v35  ;;  %v1850_v35 = vld [vmem:[%s7759_s2 + $0x4d8] sm:$0xff] }
 0x218   : > { %3674 = vmatprep.subr.bf16.mxu0 %v3673_v37  ;;  %v1847_v37 = vld [vmem:[%s7759_s2 + $0x4c0] sm:$0xff]  ;;  %v3757_v38 = vpack.c.bf16 %v1850_v35, %v1842_v32 }
 0x219   : > { %3740 = vmatpush1.bf16.msra.mxu1 %v3739_v45  ;;  %v3695_v39 = vpack.c.bf16 %v1847_v37, %v1839_v36  ;;  %v1864_v45 = vld [vmem:[%s7759_s2 + $0x548] sm:$0xff]  ;;  %v1919_v35 = vld [vmem:[%s7759_s2 + $0x700] sm:$0xff]  ;;  %v1921_v37 = vld [vmem:[%s7759_s2 + $0x710] sm:$0xff] }
 0x21a   : > { %3742 = vmatprep.subr.bf16.mxu1 %v3741_v51  ;;  %v3697_v47 = vpack.c.bf16 %v1864_v45, %v1856_v44  ;;  %v3761_v51 = vpack.c.bf16 %v1866_v48, %v1858_v46  ;;  %v1927_v36 = vld [vmem:[%s7759_s2 + $0x740] sm:$0xff]  ;;  %v1938_v45 = vld [vmem:[%s7759_s2 + $0x798] sm:$0xff] }
 0x21b   : > { %3676 = vmatpush1.bf16.msra.mxu0 %v3675_v43  ;;  %v3759_v43 = vpack.c.bf16 %v1849_v42, %v1841_v40  ;;  %v1936_v40 = vld [vmem:[%s7759_s2 + $0x788] sm:$0xff]  ;;  %v1946_v46 = vld [vmem:[%s7759_s2 + $0x7d8] sm:$0xff] }
 0x21c   : > { %3678 = vmatprep.subr.bf16.mxu0 %v3677_v49  ;;  %v1855_v49 = vld [vmem:[%s7759_s2 + $0x500] sm:$0xff]  ;;  %v1944_v42 = vld [vmem:[%s7759_s2 + $0x7c8] sm:$0xff]  ;;  %v3781_v48 = vpack.c.bf16 %v1946_v46, %v1938_v45 }
 0x21d   : > { %3744 = vmatpush1.bf16.msra.mxu1 %v3743_v56  ;;  %v3699_v52 = vpack.c.bf16 %v1863_v50, %v1855_v49  ;;  %v1880_v56 = vld [vmem:[%s7759_s2 + $0x5c8] sm:$0xff]  ;;  %v3717_v44 = vpack.c.bf16 %v1944_v42, %v1936_v40  ;;  %v1943_v49 = vld [vmem:[%s7759_s2 + $0x7c0] sm:$0xff]  ;;  %v1937_v50 = vld [vmem:[%s7759_s2 + $0x790] sm:$0xff] }
 0x21e   : > { %3746 = vmatprep.subr.bf16.mxu1 %v3745_v0  ;;  %v3701_v58 = vpack.c.bf16 %v1880_v56, %v1872_v55  ;;  %v1873_v0 = vld [vmem:[%s7759_s2 + $0x590] sm:$0xff]  ;;  %v1702_v55 = vld [vmem:[%s7759_s2 + $0x38] sm:$0xff] }
 0x21f   : > { %3680 = vmatpush1.bf16.msra.mxu0 %v3679_v54  ;;  %v3763_v54 = vpack.c.bf16 %v1865_v53, %v1857_v13  ;;  %v1700_v53 = vld [vmem:[%s7759_s2 + $0x28] sm:$0xff] }
 0x220   : > { %3682 = vmatprep.subr.bf16.mxu0 %v3681_v60  ;;  %v1871_v60 = vld [vmem:[%s7759_s2 + $0x580] sm:$0xff] }
 0x221   : > { %3748 = vmatpush1.bf16.msra.mxu1 %v3747_v4  ;;  %v3703_v63 = vpack.c.bf16 %v1879_v61, %v1871_v60  ;;  %v1896_v4 = vld [vmem:[%s7759_s2 + $0x648] sm:$0xff] }
 0x222   : > { %3750 = vmatprep.subr.bf16.mxu1 %v3749_v14  ;;  %v3705_v6 = vpack.c.bf16 %v1896_v4, %v1888_v3  ;;  %v1889_v14 = vld [vmem:[%s7759_s2 + $0x610] sm:$0xff]  ;;  %v3097_v60 = vld [vmem:[%s4542_s29 + $0x28] sm:$0xff] }
 0x223   : > { %3684 = vmatpush1.bf16.msra.mxu0 %v3683_v1  ;;  %v1881_v1 = vld [vmem:[%s7759_s2 + $0x5d0] sm:$0xff] }
 0x224   : > { %3686 = vmatprep.subr.bf16.mxu0 %v3685_v8  ;;  %v3767_v2 = vpack.c.bf16 %v1881_v1, %v1873_v0  ;;  %v1887_v8 = vld [vmem:[%s7759_s2 + $0x600] sm:$0xff] }
 0x225   : > { %3752 = vmatpush1.bf16.msra.mxu1 %v3751_v18  ;;  %v3707_v12 = vpack.c.bf16 %v1895_v9, %v1887_v8  ;;  %v1912_v18 = vld [vmem:[%s7759_s2 + $0x6c8] sm:$0xff] }
 0x226   : > { %3754 = vmatprep.subr.bf16.mxu1 %v3753_v25  ;;  %v3709_v20 = vpack.c.bf16 %v1912_v18, %v1904_v17  ;;  %v1905_v25 = vld [vmem:[%s7759_s2 + $0x690] sm:$0xff] }
 0x227   : > { %3688 = vmatpush1.bf16.msra.mxu0 %v3687_v15  ;;  %v1897_v15 = vld [vmem:[%s7759_s2 + $0x650] sm:$0xff] }
 0x228   : > { %3690 = vmatprep.subr.bf16.mxu0 %v3689_v34  ;;  %v3771_v16 = vpack.c.bf16 %v1897_v15, %v1889_v14  ;;  %v1903_v34 = vld [vmem:[%s7759_s2 + $0x680] sm:$0xff] }
 0x229   : > { %3756 = vmatpush1.bf16.msra.mxu1 %v3755_v29  ;;  %v3711_v24 = vpack.c.bf16 %v1911_v22, %v1903_v34  ;;  %v1928_v29 = vld [vmem:[%s7759_s2 + $0x748] sm:$0xff] }
 0x22a   : > { %3758 = vmatprep.subr.bf16.mxu1 %v3757_v38  ;;  %v3713_v32 = vpack.c.bf16 %v1928_v29, %v1920_v27  ;;  %v3715_v38 = vpack.c.bf16 %v1927_v36, %v1919_v35  ;;  %v3101_v27 = vld [vmem:[%s4544_s14 + $0x48] sm:$0xff]  ;;  %v3102_v36 = vld [vmem:[%s4544_s14 + $0x50] sm:$0xff] }
 0x22b   : > { %3692 = vmatpush1.bf16.msra.mxu0 %v3691_v26  ;;  %v1913_v26 = vld [vmem:[%s7759_s2 + $0x6d0] sm:$0xff] }
 0x22c   : > { %3694 = vmatprep.subr.bf16.mxu0 %v3693_v33  ;;  %v3775_v28 = vpack.c.bf16 %v1913_v26, %v1905_v25  ;;  %v3777_v33 = vpack.c.bf16 %v1930_v31, %v1922_v30  ;;  %v3100_v26 = vld [vmem:[%s4544_s14 + $0x40] sm:$0xff] }
 0x22d   : > { %3760 = vmatpush1.bf16.msra.mxu1 %v3759_v43 }
 0x22e   : > { %3762 = vmatprep.subr.bf16.mxu1 %v3761_v51  ;;  %v1945_v51 = vld [vmem:[%s7759_s2 + $0x7d0] sm:$0xff] }
 0x22f   : > { %3696 = vmatpush1.bf16.msra.mxu0 %v3695_v39  ;;  %v1929_v39 = vld [vmem:[%s7759_s2 + $0x750] sm:$0xff]  ;;  %v3783_v13 = vpack.c.bf16 %v1945_v51, %v1937_v50 }
 0x230   : > { %3698 = vmatprep.subr.bf16.mxu0 %v3697_v47  ;;  %v3779_v43 = vpack.c.bf16 %v1929_v39, %v1921_v37  ;;  %v1935_v47 = vld [vmem:[%s7759_s2 + $0x780] sm:$0xff] }
 0x231   : > { %3764 = vmatpush1.bf16.msra.mxu1 %v3763_v54  ;;  %v1708_v54 = vld [vmem:[%s7759_s2 + $0x68] sm:$0xff] }
 0x232   : > { %3766 = vmatprep.subr.bf16.mxu1 %v3765_v62  ;;  %v3785_v56 = vpack.c.bf16 %v1708_v54, %v1700_v53  ;;  %v1699_v53 = vld [vmem:[%s7759_s2 + $0x20] sm:$0xff] }
 0x233   : > { %3700 = vmatpush1.bf16.msra.mxu0 %v3699_v52  ;;  %v3719_v52 = vpack.c.bf16 %v1943_v49, %v1935_v47  ;;  %v1707_v54 = vld [vmem:[%s7759_s2 + $0x60] sm:$0xff] }
 0x234   : > { %3702 = vmatprep.subr.bf16.mxu0 %v3701_v58  ;;  %v3849_v58 = vpack.c.bf16 %v1710_v57, %v1702_v55  ;;  %v1701_v55 = vld [vmem:[%s7759_s2 + $0x30] sm:$0xff]  ;;  %v1716_v57 = vld [vmem:[%s7759_s2 + $0xa8] sm:$0xff] }
 0x235   : > { %3768 = vmatpush1.bf16.msra.mxu1 %v3767_v2 }
 0x236   : > { %3770 = vmatprep.subr.bf16.mxu1 %v3769_v11 }
 0x237   : > { %3704 = vmatpush1.bf16.msra.mxu0 %v3703_v63 }
 0x238   : > { %3706 = vmatprep.subr.bf16.mxu0 %v3705_v6 }
 0x239   : > { %3772 = vmatpush1.bf16.msra.mxu1 %v3771_v16 }
 0x23a   : > { %3774 = vmatprep.subr.bf16.mxu1 %v3773_v23 }
 0x23b   : > { %3708 = vmatpush1.bf16.msra.mxu0 %v3707_v12 }
 0x23c   : > { %3710 = vmatprep.subr.bf16.mxu0 %v3709_v20 }
 0x23d   : > { %3776 = vmatpush1.bf16.msra.mxu1 %v3775_v28 }
 0x23e   : > { %3778 = vmatprep.subr.bf16.mxu1 %v3777_v33 }
 0x23f   : > { %3712 = vmatpush1.bf16.msra.mxu0 %v3711_v24 }
 0x240   : > { %3714 = vmatprep.subr.bf16.mxu0 %v3713_v32 }
 0x241   : > { %3780 = vmatpush1.bf16.msra.mxu1 %v3779_v43 }
 0x242   : > { %3782 = vmatprep.subr.bf16.mxu1 %v3781_v48 }
 0x243   : > { %3716 = vmatpush1.bf16.msra.mxu0 %v3715_v38  ;;  %v3103_v38 = vld [vmem:[%s4544_s14 + $0x58] sm:$0xff] }
 0x244   : > { %3718 = vmatprep.subr.bf16.mxu0 %v3717_v44 }
 0x245   : > { %3784 = vmatpush1.bf16.msra.mxu1 %v3783_v13 }
 0x246   : > { %3850 = vmatprep.subr.bf16.mxu1 %v3849_v58 }
 0x247   : > { %3720 = vmatpush1.bf16.msra.mxu0 %v3719_v52 }
 0x248   : > { %3786 = vmatprep.subr.bf16.mxu0 %v3785_v56 }
 0x29b   : > { %v1407_v61 = vpop.f32.mrb[4].mxu0  ;;  %v1478_v62 = vpop.f32.mrb[4].mxu1 }
 0x29c   : > { %v1625_v63 = vadd.f32 %v3096_v59, %v1407_v61  ;;  %v1409_v0 = vpop.f32.mrb[5].mxu0  ;;  %v1480_v1 = vpop.f32.mrb[5].mxu1  ;;  %v1627_v6 = vadd.f32 %v3098_v5, %v1478_v62  ;;  %v1724_v59 = vld [vmem:[%s7759_s2 + $0xe8] sm:$0xff]  ;;  %v1726_v61 = vld [vmem:[%s7759_s2 + $0xf8] sm:$0xff] }
 0x29d   : > { %v1626_v2 = vadd.f32 %v3097_v60, %v1409_v0  ;;  %v1628_v8 = vadd.f32 %v3099_v7, %v1480_v1  ;;  %v1718_v60 = vld [vmem:[%s7759_s2 + $0xb8] sm:$0xff]  ;;  %v1715_v1 = vld [vmem:[%s7759_s2 + $0xa0] sm:$0xff]  ;;  %v1732_v5 = vld [vmem:[%s7759_s2 + $0x128] sm:$0xff] }
 0x29e   : > { %v3104_v3 = vmul.f32 -1.442695, %v1625_v63  ;;  %v3106_v9 = vmul.f32 -1.442695, %v1627_v6  ;;  %v3787_v63 = vpack.c.bf16 %v1707_v54, %v1699_v53  ;;  %v3789_v6 = vpack.c.bf16 %v1724_v59, %v1716_v57  ;;  %v1779_v53 = vld [vmem:[%s7759_s2 + $0x2a0] sm:$0xff]  ;;  %v1789_v57 = vld [vmem:[%s7759_s2 + $0x2f0] sm:$0xff] }
 0x29f   : > { %v3105_v4 = vmul.f32 -1.442695, %v1626_v2  ;;  %v1723_v2 = vld [vmem:[%s7759_s2 + $0xe0] sm:$0xff]  ;;  %v3853_v7 = vpack.c.bf16 %v1726_v61, %v1718_v60  ;;  %v1804_v59 = vld [vmem:[%s7759_s2 + $0x368] sm:$0xff]  ;;  %v1798_v60 = vld [vmem:[%s7759_s2 + $0x338] sm:$0xff] }
 0x2a0   : > { %4241 = vpow2.f32 %v3104_v3  ;;  %v1717_v3 = vld [vmem:[%s7759_s2 + $0xb0] sm:$0xff]  ;;  %v1787_v54 = vld [vmem:[%s7759_s2 + $0x2e0] sm:$0xff]  ;;  %v1806_v61 = vld [vmem:[%s7759_s2 + $0x378] sm:$0xff] }
 0x2a1   : > { %4243 = vpow2.f32 %v3105_v4  ;;  %v1725_v4 = vld [vmem:[%s7759_s2 + $0xf0] sm:$0xff] }
 0x2a2   : > { %4245 = vtanh.f32 %v1628_v8  ;;  %v1740_v8 = vld [vmem:[%s7759_s2 + $0x168] sm:$0xff] }
 0x2a3   : > { %4247 = vpow2.f32 %v3106_v9  ;;  %v1734_v9 = vld [vmem:[%s7759_s2 + $0x138] sm:$0xff] }
 0x2aa   : > { %v4242_v11 = vpop.eup %4241 }
 0x2ab   : > { %v1642_v12 = vadd.f32 1.0, %v4242_v11  ;;  %v4244_v14 = vpop.eup %4243  ;;  %v1742_v11 = vld [vmem:[%s7759_s2 + $0x178] sm:$0xff] }
 0x2ac   : > { %v1643_v15 = vadd.f32 1.0, %v4244_v14  ;;  %v4246_v16 = vpop.eup %4245  ;;  %v3855_v14 = vpack.c.bf16 %v1725_v4, %v1717_v3  ;;  %v3873_v3 = vpack.c.bf16 %v1806_v61, %v1798_v60  ;;  %v1797_v4 = vld [vmem:[%s7759_s2 + $0x330] sm:$0xff]  ;;  %v1886_v60 = vld [vmem:[%s7759_s2 + $0x5f8] sm:$0xff] }
 0x2ad   : > { %4249 = vrcp.f32 %v1642_v12  ;;  %v4248_v17 = vpop.eup %4247  ;;  %v3791_v12 = vpack.c.bf16 %v1723_v2, %v1715_v1  ;;  %v1803_v1 = vld [vmem:[%s7759_s2 + $0x360] sm:$0xff] }
 0x2ae   : > { %4251 = vrcp.f32 %v1643_v15  ;;  %v1644_v21 = vadd.f32 1.0, %v4248_v17  ;;  %v1731_v15 = vld [vmem:[%s7759_s2 + $0x120] sm:$0xff]  ;;  %v3793_v17 = vpack.c.bf16 %v1740_v8, %v1732_v5  ;;  %v1805_v5 = vld [vmem:[%s7759_s2 + $0x370] sm:$0xff]  ;;  %v1814_v8 = vld [vmem:[%s7759_s2 + $0x3b8] sm:$0xff] }
 0x2b0   : > { %4253 = vrcp.f32 %v1644_v21  ;;  %v1748_v21 = vld [vmem:[%s7759_s2 + $0x1a8] sm:$0xff] }
 0x2b7   : > { %v4250_v18 = vpop.eup %4249 }
 0x2b8   : > { %v1653_v19 = vmul.f32 %v4250_v18, %v4246_v16  ;;  %v4252_v20 = vpop.eup %4251  ;;  %v1739_v16 = vld [vmem:[%s7759_s2 + $0x160] sm:$0xff]  ;;  %v3857_v18 = vpack.c.bf16 %v1742_v11, %v1734_v9  ;;  %v1822_v9 = vld [vmem:[%s7759_s2 + $0x3f8] sm:$0xff] }
 0x2b9   : > { %v1652_v34 = vmul.f32 %v4252_v20, %v5739_v10  ;;  %v1741_v20 = vld [vmem:[%s7759_s2 + $0x170] sm:$0xff] }
 0x2ba   : > { %v4254_v23 = vpop.eup %4253 }
 0x2bb   : > { %v6531_v22 = vadd.f32 %v1653_v19, %v1652_v34  ;;  %v1733_v19 = vld [vmem:[%s7759_s2 + $0x130] sm:$0xff]  ;;  %v1756_v34 = vld [vmem:[%s7759_s2 + $0x1e8] sm:$0xff] }
 0x2bd   : > { %4255 = vtanh.f32 %v6531_v22 }
 0x2c7   : > { %v4256_v24 = vpop.eup %4255 }
 0x2c8   : > { %v6534_v25 = vmul.f32 %v4256_v24, %v4254_v23  ;;  %v1750_v23 = vld [vmem:[%s7759_s2 + $0x1b8] sm:$0xff] }
 0x2c9   : > { %v1758_v24 = vld [vmem:[%s7759_s2 + $0x1f8] sm:$0xff] }
 0x2ca   : > { %3110 = vst [vmem:[%s4535_s18 + $0x8] sm:$0xff] %v6534_v25 }
 0x2db   : > { %v1549_v28 = vpop.f32.mrb[6].mxu0  ;;  %v1620_v29 = vpop.f32.mrb[6].mxu1 }
 0x2dc   : > { %v1629_v30 = vadd.f32 %v3100_v26, %v1549_v28  ;;  %v1551_v31 = vpop.f32.mrb[7].mxu0  ;;  %v1622_v10 = vpop.f32.mrb[7].mxu1  ;;  %v1631_v37 = vadd.f32 %v3102_v36, %v1620_v29  ;;  %v3795_v26 = vpack.c.bf16 %v1739_v16, %v1731_v15  ;;  %v1747_v28 = vld [vmem:[%s7759_s2 + $0x1a0] sm:$0xff]  ;;  %v1766_v36 = vld [vmem:[%s7759_s2 + $0x238] sm:$0xff] }
 0x2dd   : > { %v1630_v32 = vadd.f32 %v3101_v27, %v1551_v31  ;;  %v1632_v39 = vadd.f32 %v3103_v38, %v1622_v10  ;;  %v3859_v27 = vpack.c.bf16 %v1741_v20, %v1733_v19  ;;  %v1755_v29 = vld [vmem:[%s7759_s2 + $0x1e0] sm:$0xff]  ;;  %v3861_v31 = vpack.c.bf16 %v1758_v24, %v1750_v23  ;;  %v1749_v10 = vld [vmem:[%s7759_s2 + $0x1b0] sm:$0xff]  ;;  %v1828_v20 = vld [vmem:[%s7759_s2 + $0x428] sm:$0xff] }
 0x2de   : > { %v3107_v33 = vmul.f32 -1.442695, %v1629_v30  ;;  %v3109_v40 = vmul.f32 -1.442695, %v1631_v37  ;;  %v3797_v30 = vpack.c.bf16 %v1756_v34, %v1748_v21  ;;  %v1774_v37 = vld [vmem:[%s7759_s2 + $0x278] sm:$0xff]  ;;  %v3799_v38 = vpack.c.bf16 %v1755_v29, %v1747_v28  ;;  %v1819_v15 = vld [vmem:[%s7759_s2 + $0x3e0] sm:$0xff] }
 0x2df   : > { %v3108_v35 = vmul.f32 -1.442695, %v1630_v32  ;;  %v1757_v32 = vld [vmem:[%s7759_s2 + $0x1f0] sm:$0xff]  ;;  %v1836_v21 = vld [vmem:[%s7759_s2 + $0x468] sm:$0xff]  ;;  %v1830_v34 = vld [vmem:[%s7759_s2 + $0x438] sm:$0xff] }
 0x2e0   : > { %4257 = vpow2.f32 %v3107_v33  ;;  %v1764_v33 = vld [vmem:[%s7759_s2 + $0x228] sm:$0xff]  ;;  %v1821_v19 = vld [vmem:[%s7759_s2 + $0x3f0] sm:$0xff]  ;;  %v1838_v23 = vld [vmem:[%s7759_s2 + $0x478] sm:$0xff]  ;;  %v3817_v29 = vpack.c.bf16 %v1836_v21, %v1828_v20 }
 0x2e1   : > { %4259 = vpow2.f32 %v3108_v35  ;;  %v1772_v35 = vld [vmem:[%s7759_s2 + $0x268] sm:$0xff]  ;;  %v1835_v28 = vld [vmem:[%s7759_s2 + $0x460] sm:$0xff]  ;;  %v1910_v21 = vld [vmem:[%s7759_s2 + $0x6b8] sm:$0xff] }
 0x2e2   : > { %4261 = vtanh.f32 %v1632_v39  ;;  %v3863_v39 = vpack.c.bf16 %v1757_v32, %v1749_v10  ;;  %v1837_v10 = vld [vmem:[%s7759_s2 + $0x470] sm:$0xff]  ;;  %v1844_v32 = vld [vmem:[%s7759_s2 + $0x4a8] sm:$0xff] }
 0x2e3   : > { %4263 = vpow2.f32 %v3109_v40  ;;  %v1763_v40 = vld [vmem:[%s7759_s2 + $0x220] sm:$0xff]  ;;  %v1916_v20 = vld [vmem:[%s7759_s2 + $0x6e8] sm:$0xff] }
 0x2ea   : > { %v4258_v42 = vpop.eup %4257 }
 0x2eb   : > { %v1666_v43 = vadd.f32 1.0, %v4258_v42  ;;  %v4260_v44 = vpop.eup %4259  ;;  %v1771_v42 = vld [vmem:[%s7759_s2 + $0x260] sm:$0xff] }
 0x2ec   : > { %v1667_v45 = vadd.f32 1.0, %v4260_v44  ;;  %v4262_v46 = vpop.eup %4261  ;;  %v3865_v44 = vpack.c.bf16 %v1774_v37, %v1766_v36  ;;  %v1854_v36 = vld [vmem:[%s7759_s2 + $0x4f8] sm:$0xff] }
 0x2ed   : > { %4265 = vrcp.f32 %v1666_v43  ;;  %v4264_v47 = vpop.eup %4263  ;;  %v3801_v43 = vpack.c.bf16 %v1772_v35, %v1764_v33  ;;  %v1852_v33 = vld [vmem:[%s7759_s2 + $0x4e8] sm:$0xff]  ;;  %v1846_v35 = vld [vmem:[%s7759_s2 + $0x4b8] sm:$0xff] }
 0x2ee   : > { %4267 = vrcp.f32 %v1667_v45  ;;  %v1668_v51 = vadd.f32 1.0, %v4264_v47  ;;  %v1765_v45 = vld [vmem:[%s7759_s2 + $0x230] sm:$0xff]  ;;  %v1780_v47 = vld [vmem:[%s7759_s2 + $0x2a8] sm:$0xff] }
 0x2f0   : > { %4269 = vrcp.f32 %v1668_v51  ;;  %v3803_v51 = vpack.c.bf16 %v1771_v42, %v1763_v40  ;;  %v1851_v40 = vld [vmem:[%s7759_s2 + $0x4e0] sm:$0xff]  ;;  %v3821_v42 = vpack.c.bf16 %v1852_v33, %v1844_v32  ;;  %v1932_v32 = vld [vmem:[%s7759_s2 + $0x768] sm:$0xff]  ;;  %v1926_v33 = vld [vmem:[%s7759_s2 + $0x738] sm:$0xff] }
 0x2f7   : > { %v4266_v48 = vpop.eup %4265 }
 0x2f8   : > { %v1677_v49 = vmul.f32 %v4266_v48, %v4262_v46  ;;  %v4268_v50 = vpop.eup %4267  ;;  %v1773_v46 = vld [vmem:[%s7759_s2 + $0x270] sm:$0xff]  ;;  %v1788_v48 = vld [vmem:[%s7759_s2 + $0x2e8] sm:$0xff] }
 0x2f9   : > { %v1676_v52 = vmul.f32 %v4268_v50, %v5750_v41  ;;  %v1709_v41 = vld [vmem:[%s7759_s2 + $0x70] sm:$0xff]  ;;  %v1790_v50 = vld [vmem:[%s7759_s2 + $0x2f8] sm:$0xff] }
 0x2fa   : > { %v4270_v56 = vpop.eup %4269  ;;  %v3851_v0 = vpack.c.bf16 %v1709_v41, %v1701_v55  ;;  %v3805_v55 = vpack.c.bf16 %v1788_v48, %v1780_v47  ;;  %v1868_v47 = vld [vmem:[%s7759_s2 + $0x568] sm:$0xff]  ;;  %v1862_v48 = vld [vmem:[%s7759_s2 + $0x538] sm:$0xff] }
 0x2fb   : > { %v6543_v13 = vadd.f32 %v1677_v49, %v1676_v52  ;;  %v1782_v49 = vld [vmem:[%s7759_s2 + $0x2b8] sm:$0xff]  ;;  %v3867_v52 = vpack.c.bf16 %v1773_v46, %v1765_v45  ;;  %v1853_v45 = vld [vmem:[%s7759_s2 + $0x4f0] sm:$0xff]  ;;  %v1860_v46 = vld [vmem:[%s7759_s2 + $0x528] sm:$0xff] }
 0x2fc   : > { %v3869_v41 = vpack.c.bf16 %v1790_v50, %v1782_v49  ;;  %v1870_v49 = vld [vmem:[%s7759_s2 + $0x578] sm:$0xff] }
 0x2fd   : > { %4271 = vtanh.f32 %v6543_v13 }
 0x307   : > { %v4272_v58 = vpop.eup %4271 }
 0x308   : > { %v1680_v62 = vmul.f32 %v4272_v58, %v4270_v56  ;;  %v1781_v56 = vld [vmem:[%s7759_s2 + $0x2b0] sm:$0xff]  ;;  %v1796_v58 = vld [vmem:[%s7759_s2 + $0x328] sm:$0xff] }
 0x309   : > { %v3809_v2 = vpack.c.bf16 %v1804_v59, %v1796_v58  ;;  %v1884_v58 = vld [vmem:[%s7759_s2 + $0x5e8] sm:$0xff]  ;;  %v1878_v59 = vld [vmem:[%s7759_s2 + $0x5b8] sm:$0xff] }
 0x30a   : > { %3111 = vst [vmem:[%s4540_s27 + $0x10] sm:$0xff] %v1680_v62  ;;  %2015 = vmatprep.mubr.f32.mxu0 %v1680_v62  ;;  %2086 = vmatprep.mubr.f32.mxu1 %v1680_v62 }
 0x30b   : > { %2016 = vmatmul.mubr.f32.vlgmr.msra.gmra.mrb[8].mxu0 %v6534_v25  ;;  %2087 = vmatmul.mubr.f32.vlgmr.msra.gmra.mrb[8].mxu1 %v6534_v25 }
 0x30c   : > { %3788 = vmatpush1.bf16.msra.mxu0 %v3787_v63  ;;  %3852 = vmatpush1.bf16.msra.mxu1 %v3851_v0  ;;  %v3871_v63 = vpack.c.bf16 %v1789_v57, %v1781_v56  ;;  %v1795_v0 = vld [vmem:[%s7759_s2 + $0x320] sm:$0xff]  ;;  %v1869_v56 = vld [vmem:[%s7759_s2 + $0x570] sm:$0xff]  ;;  %v1876_v57 = vld [vmem:[%s7759_s2 + $0x5a8] sm:$0xff] }
 0x30d   : > { %2157 = vmatprep.mubr.f32.mxu0 %v1680_v62  ;;  %2228 = vmatprep.mubr.f32.mxu1 %v1680_v62  ;;  %v3807_v62 = vpack.c.bf16 %v1787_v54, %v1779_v53  ;;  %v3811_v11 = vpack.c.bf16 %v1803_v1, %v1795_v0  ;;  %v1867_v53 = vld [vmem:[%s7759_s2 + $0x560] sm:$0xff]  ;;  %v3825_v54 = vpack.c.bf16 %v1868_v47, %v1860_v46  ;;  %v1948_v46 = vld [vmem:[%s7759_s2 + $0x7e8] sm:$0xff]  ;;  %v1942_v47 = vld [vmem:[%s7759_s2 + $0x7b8] sm:$0xff] }
 0x30e   : > { %3790 = vmatprep.subr.bf16.mxu0 %v3789_v6  ;;  %3854 = vmatprep.subr.bf16.mxu1 %v3853_v7  ;;  %v1812_v6 = vld [vmem:[%s7759_s2 + $0x3a8] sm:$0xff]  ;;  %v1883_v0 = vld [vmem:[%s7759_s2 + $0x5e0] sm:$0xff]  ;;  %v3829_v1 = vpack.c.bf16 %v1884_v58, %v1876_v57 }
 0x30f   : > { %v1820_v7 = vld [vmem:[%s7759_s2 + $0x3e8] sm:$0xff] }
 0x310   : > { %3792 = vmatpush1.bf16.msra.mxu0 %v3791_v12  ;;  %3856 = vmatpush1.bf16.msra.mxu1 %v3855_v14  ;;  %v3875_v12 = vpack.c.bf16 %v1805_v5, %v1797_v4  ;;  %v1811_v14 = vld [vmem:[%s7759_s2 + $0x3a0] sm:$0xff]  ;;  %v3813_v16 = vpack.c.bf16 %v1820_v7, %v1812_v6  ;;  %v1885_v4 = vld [vmem:[%s7759_s2 + $0x5f0] sm:$0xff]  ;;  %v1892_v5 = vld [vmem:[%s7759_s2 + $0x628] sm:$0xff] }
 0x311   : > { %3794 = vmatprep.subr.bf16.mxu0 %v3793_v17  ;;  %3858 = vmatprep.subr.bf16.mxu1 %v3857_v18  ;;  %v3877_v17 = vpack.c.bf16 %v1822_v9, %v1814_v8  ;;  %v1813_v18 = vld [vmem:[%s7759_s2 + $0x3b0] sm:$0xff]  ;;  %v3815_v24 = vpack.c.bf16 %v1819_v15, %v1811_v14  ;;  %v1900_v6 = vld [vmem:[%s7759_s2 + $0x668] sm:$0xff]  ;;  %v1894_v7 = vld [vmem:[%s7759_s2 + $0x638] sm:$0xff] }
 0x312   : > { %v1902_v8 = vld [vmem:[%s7759_s2 + $0x678] sm:$0xff]  ;;  %v1899_v14 = vld [vmem:[%s7759_s2 + $0x660] sm:$0xff]  ;;  %v3833_v15 = vpack.c.bf16 %v1900_v6, %v1892_v5  ;;  %v2305_v58 = vld [vmem:[%s7759_s2 + $0x8] sm:$0xff] }
 0x313   : > { %v2329_v6 = vld [vmem:[%s7759_s2 + $0xc8] sm:$0xff] }
 0x314   : > { %3796 = vmatpush1.bf16.msra.mxu0 %v3795_v26  ;;  %3860 = vmatpush1.bf16.msra.mxu1 %v3859_v27  ;;  %v3879_v26 = vpack.c.bf16 %v1821_v19, %v1813_v18  ;;  %v1827_v27 = vld [vmem:[%s7759_s2 + $0x420] sm:$0xff]  ;;  %v1901_v18 = vld [vmem:[%s7759_s2 + $0x670] sm:$0xff]  ;;  %v1908_v19 = vld [vmem:[%s7759_s2 + $0x6a8] sm:$0xff] }
 0x315   : > { %3798 = vmatprep.subr.bf16.mxu0 %v3797_v30  ;;  %3862 = vmatprep.subr.bf16.mxu1 %v3861_v31  ;;  %v3881_v30 = vpack.c.bf16 %v1838_v23, %v1830_v34  ;;  %v1829_v31 = vld [vmem:[%s7759_s2 + $0x430] sm:$0xff]  ;;  %v3819_v37 = vpack.c.bf16 %v1835_v28, %v1827_v27  ;;  %v1918_v34 = vld [vmem:[%s7759_s2 + $0x6f8] sm:$0xff]  ;;  %v1915_v27 = vld [vmem:[%s7759_s2 + $0x6e0] sm:$0xff]  ;;  %v3837_v28 = vpack.c.bf16 %v1916_v20, %v1908_v19 }
 0x316   : > { %v2345_v19 = vld [vmem:[%s7759_s2 + $0x148] sm:$0xff] }
 0x318   : > { %3800 = vmatpush1.bf16.msra.mxu0 %v3799_v38  ;;  %3864 = vmatpush1.bf16.msra.mxu1 %v3863_v39  ;;  %v3883_v38 = vpack.c.bf16 %v1837_v10, %v1829_v31  ;;  %v1843_v39 = vld [vmem:[%s7759_s2 + $0x4a0] sm:$0xff]  ;;  %v1917_v31 = vld [vmem:[%s7759_s2 + $0x6f0] sm:$0xff]  ;;  %v1924_v10 = vld [vmem:[%s7759_s2 + $0x728] sm:$0xff] }
 0x319   : > { %3802 = vmatprep.subr.bf16.mxu0 %v3801_v43  ;;  %3866 = vmatprep.subr.bf16.mxu1 %v3865_v44  ;;  %v3885_v43 = vpack.c.bf16 %v1854_v36, %v1846_v35  ;;  %v1845_v44 = vld [vmem:[%s7759_s2 + $0x4b0] sm:$0xff]  ;;  %v3823_v50 = vpack.c.bf16 %v1851_v40, %v1843_v39  ;;  %v1934_v35 = vld [vmem:[%s7759_s2 + $0x778] sm:$0xff]  ;;  %v1931_v39 = vld [vmem:[%s7759_s2 + $0x760] sm:$0xff]  ;;  %v3841_v40 = vpack.c.bf16 %v1932_v32, %v1924_v10 }
 0x31a   : > { %v2361_v10 = vld [vmem:[%s7759_s2 + $0x1c8] sm:$0xff]  ;;  %v2355_v32 = vld [vmem:[%s7759_s2 + $0x198] sm:$0xff] }
 0x31c   : > { %3804 = vmatpush1.bf16.msra.mxu0 %v3803_v51  ;;  %3868 = vmatpush1.bf16.msra.mxu1 %v3867_v52  ;;  %v3887_v51 = vpack.c.bf16 %v1853_v45, %v1845_v44  ;;  %v1859_v52 = vld [vmem:[%s7759_s2 + $0x520] sm:$0xff]  ;;  %v1933_v44 = vld [vmem:[%s7759_s2 + $0x770] sm:$0xff]  ;;  %v1940_v45 = vld [vmem:[%s7759_s2 + $0x7a8] sm:$0xff] }
 0x31d   : > { %3806 = vmatprep.subr.bf16.mxu0 %v3805_v55  ;;  %3870 = vmatprep.subr.bf16.mxu1 %v3869_v41  ;;  %v3889_v55 = vpack.c.bf16 %v1870_v49, %v1862_v48  ;;  %v1861_v41 = vld [vmem:[%s7759_s2 + $0x530] sm:$0xff]  ;;  %v3827_v61 = vpack.c.bf16 %v1867_v53, %v1859_v52  ;;  %v1950_v48 = vld [vmem:[%s7759_s2 + $0x7f8] sm:$0xff]  ;;  %v3845_v52 = vpack.c.bf16 %v1948_v46, %v1940_v45 }
 0x31e   : > { %v3909_v53 = vpack.c.bf16 %v1950_v48, %v1942_v47  ;;  %v2371_v45 = vld [vmem:[%s7759_s2 + $0x218] sm:$0xff] }
 0x31f   : > { %v2379_v46 = vld [vmem:[%s7759_s2 + $0x258] sm:$0xff] }
 0x320   : > { %3808 = vmatpush1.bf16.msra.mxu0 %v3807_v62  ;;  %3872 = vmatpush1.bf16.msra.mxu1 %v3871_v63  ;;  %v3891_v62 = vpack.c.bf16 %v1869_v56, %v1861_v41  ;;  %v1875_v63 = vld [vmem:[%s7759_s2 + $0x5a0] sm:$0xff]  ;;  %v1949_v41 = vld [vmem:[%s7759_s2 + $0x7f0] sm:$0xff] }
 0x321   : > { %3810 = vmatprep.subr.bf16.mxu0 %v3809_v2  ;;  %3874 = vmatprep.subr.bf16.mxu1 %v3873_v3  ;;  %v3893_v2 = vpack.c.bf16 %v1886_v60, %v1878_v59  ;;  %v1877_v3 = vld [vmem:[%s7759_s2 + $0x5b0] sm:$0xff]  ;;  %v3831_v9 = vpack.c.bf16 %v1883_v0, %v1875_v63  ;;  %v2313_v59 = vld [vmem:[%s7759_s2 + $0x48] sm:$0xff]  ;;  %v2307_v60 = vld [vmem:[%s7759_s2 + $0x18] sm:$0xff] }
 0x322   : > { %v2312_v63 = vld [vmem:[%s7759_s2 + $0x40] sm:$0xff] }
 0x324   : > { %3812 = vmatpush1.bf16.msra.mxu0 %v3811_v11  ;;  %3876 = vmatpush1.bf16.msra.mxu1 %v3875_v12  ;;  %v3895_v11 = vpack.c.bf16 %v1885_v4, %v1877_v3  ;;  %v1891_v12 = vld [vmem:[%s7759_s2 + $0x620] sm:$0xff]  ;;  %v2314_v3 = vld [vmem:[%s7759_s2 + $0x50] sm:$0xff]  ;;  %v2321_v4 = vld [vmem:[%s7759_s2 + $0x88] sm:$0xff] }
 0x325   : > { %3814 = vmatprep.subr.bf16.mxu0 %v3813_v16  ;;  %3878 = vmatprep.subr.bf16.mxu1 %v3877_v17  ;;  %v3897_v16 = vpack.c.bf16 %v1902_v8, %v1894_v7  ;;  %v1893_v17 = vld [vmem:[%s7759_s2 + $0x630] sm:$0xff]  ;;  %v3835_v23 = vpack.c.bf16 %v1899_v14, %v1891_v12  ;;  %v2323_v7 = vld [vmem:[%s7759_s2 + $0x98] sm:$0xff]  ;;  %v2320_v12 = vld [vmem:[%s7759_s2 + $0x80] sm:$0xff] }
 0x326   : > { %v2331_v8 = vld [vmem:[%s7759_s2 + $0xd8] sm:$0xff]  ;;  %v2328_v14 = vld [vmem:[%s7759_s2 + $0xc0] sm:$0xff] }
 0x328   : > { %3816 = vmatpush1.bf16.msra.mxu0 %v3815_v24  ;;  %3880 = vmatpush1.bf16.msra.mxu1 %v3879_v26  ;;  %v3899_v24 = vpack.c.bf16 %v1901_v18, %v1893_v17  ;;  %v1907_v26 = vld [vmem:[%s7759_s2 + $0x6a0] sm:$0xff]  ;;  %v2330_v17 = vld [vmem:[%s7759_s2 + $0xd0] sm:$0xff]  ;;  %v2337_v18 = vld [vmem:[%s7759_s2 + $0x108] sm:$0xff] }
 0x329   : > { %3818 = vmatprep.subr.bf16.mxu0 %v3817_v29  ;;  %3882 = vmatprep.subr.bf16.mxu1 %v3881_v30  ;;  %v3901_v29 = vpack.c.bf16 %v1918_v34, %v1910_v21  ;;  %v1909_v30 = vld [vmem:[%s7759_s2 + $0x6b0] sm:$0xff]  ;;  %v3839_v36 = vpack.c.bf16 %v1915_v27, %v1907_v26  ;;  %v3921_v21 = vpack.c.bf16 %v2345_v19, %v2337_v18  ;;  %v2339_v34 = vld [vmem:[%s7759_s2 + $0x118] sm:$0xff]  ;;  %v2344_v27 = vld [vmem:[%s7759_s2 + $0x140] sm:$0xff] }
 0x32a   : > { %v2425_v18 = vld [vmem:[%s7759_s2 + $0x3c8] sm:$0xff]  ;;  %v2419_v19 = vld [vmem:[%s7759_s2 + $0x398] sm:$0xff] }
 0x32c   : > { %3820 = vmatpush1.bf16.msra.mxu0 %v3819_v37  ;;  %3884 = vmatpush1.bf16.msra.mxu1 %v3883_v38  ;;  %v3903_v37 = vpack.c.bf16 %v1917_v31, %v1909_v30  ;;  %v1923_v38 = vld [vmem:[%s7759_s2 + $0x720] sm:$0xff]  ;;  %v2353_v31 = vld [vmem:[%s7759_s2 + $0x188] sm:$0xff] }
 0x32d   : > { %3822 = vmatprep.subr.bf16.mxu0 %v3821_v42  ;;  %3886 = vmatprep.subr.bf16.mxu1 %v3885_v43  ;;  %v3905_v42 = vpack.c.bf16 %v1934_v35, %v1926_v33  ;;  %v1925_v43 = vld [vmem:[%s7759_s2 + $0x730] sm:$0xff]  ;;  %v3843_v49 = vpack.c.bf16 %v1931_v39, %v1923_v38  ;;  %v3925_v35 = vpack.c.bf16 %v2361_v10, %v2353_v31  ;;  %v2360_v38 = vld [vmem:[%s7759_s2 + $0x1c0] sm:$0xff]  ;;  %v2441_v31 = vld [vmem:[%s7759_s2 + $0x448] sm:$0xff] }
 0x32e   : > { %v2435_v10 = vld [vmem:[%s7759_s2 + $0x418] sm:$0xff] }
 0x330   : > { %3824 = vmatpush1.bf16.msra.mxu0 %v3823_v50  ;;  %3888 = vmatpush1.bf16.msra.mxu1 %v3887_v51  ;;  %v3907_v50 = vpack.c.bf16 %v1933_v44, %v1925_v43  ;;  %v1939_v51 = vld [vmem:[%s7759_s2 + $0x7a0] sm:$0xff]  ;;  %v2369_v43 = vld [vmem:[%s7759_s2 + $0x208] sm:$0xff] }
 0x331   : > { %3826 = vmatprep.subr.bf16.mxu0 %v3825_v54  ;;  %3890 = vmatprep.subr.bf16.mxu1 %v3889_v55  ;;  %v1947_v54 = vld [vmem:[%s7759_s2 + $0x7e0] sm:$0xff]  ;;  %v1941_v55 = vld [vmem:[%s7759_s2 + $0x7b0] sm:$0xff]  ;;  %v2377_v44 = vld [vmem:[%s7759_s2 + $0x248] sm:$0xff] }
 0x332   : > { %v3847_v56 = vpack.c.bf16 %v1947_v54, %v1939_v51  ;;  %v3911_v57 = vpack.c.bf16 %v1949_v41, %v1941_v55  ;;  %v2368_v51 = vld [vmem:[%s7759_s2 + $0x200] sm:$0xff]  ;;  %v2378_v55 = vld [vmem:[%s7759_s2 + $0x250] sm:$0xff] }
 0x334   : > { %3828 = vmatpush1.bf16.msra.mxu0 %v3827_v61  ;;  %3892 = vmatpush1.bf16.msra.mxu1 %v3891_v62  ;;  %v3913_v61 = vpack.c.bf16 %v2313_v59, %v2305_v58  ;;  %v2315_v62 = vld [vmem:[%s7759_s2 + $0x58] sm:$0xff] }
 0x335   : > { %3830 = vmatprep.subr.bf16.mxu0 %v3829_v1  ;;  %3894 = vmatprep.subr.bf16.mxu1 %v3893_v2  ;;  %v3977_v0 = vpack.c.bf16 %v2315_v62, %v2307_v60  ;;  %v2306_v2 = vld [vmem:[%s7759_s2 + $0x10] sm:$0xff]  ;;  %v2387_v58 = vld [vmem:[%s7759_s2 + $0x298] sm:$0xff]  ;;  %v2384_v62 = vld [vmem:[%s7759_s2 + $0x280] sm:$0xff] }
 0x336   : > { %v3979_v5 = vpack.c.bf16 %v2314_v3, %v2306_v2  ;;  %v2395_v60 = vld [vmem:[%s7759_s2 + $0x2d8] sm:$0xff]  ;;  %v2401_v3 = vld [vmem:[%s7759_s2 + $0x308] sm:$0xff] }
 0x338   : > { %3832 = vmatpush1.bf16.msra.mxu0 %v3831_v9  ;;  %3896 = vmatpush1.bf16.msra.mxu1 %v3895_v11  ;;  %v3917_v9 = vpack.c.bf16 %v2329_v6, %v2321_v4  ;;  %v3981_v11 = vpack.c.bf16 %v2331_v8, %v2323_v7  ;;  %v2409_v4 = vld [vmem:[%s7759_s2 + $0x348] sm:$0xff]  ;;  %v2411_v7 = vld [vmem:[%s7759_s2 + $0x358] sm:$0xff]  ;;  %v2400_v8 = vld [vmem:[%s7759_s2 + $0x300] sm:$0xff] }
 0x339   : > { %3834 = vmatprep.subr.bf16.mxu0 %v3833_v15  ;;  %3898 = vmatprep.subr.bf16.mxu1 %v3897_v16  ;;  %v2322_v15 = vld [vmem:[%s7759_s2 + $0x90] sm:$0xff]  ;;  %v3919_v16 = vpack.c.bf16 %v2328_v14, %v2320_v12  ;;  %v3937_v6 = vpack.c.bf16 %v2409_v4, %v2401_v3  ;;  %v2483_v3 = vld [vmem:[%s7759_s2 + $0x598] sm:$0xff] }
 0x33a   : > { %v3983_v20 = vpack.c.bf16 %v2330_v17, %v2322_v15  ;;  %v2402_v14 = vld [vmem:[%s7759_s2 + $0x310] sm:$0xff]  ;;  %v2417_v17 = vld [vmem:[%s7759_s2 + $0x388] sm:$0xff] }
 0x33b   : > { %v2410_v15 = vld [vmem:[%s7759_s2 + $0x350] sm:$0xff] }
 0x33c   : > { %3836 = vmatpush1.bf16.msra.mxu0 %v3835_v23  ;;  %3900 = vmatpush1.bf16.msra.mxu1 %v3899_v24  ;;  %v2347_v23 = vld [vmem:[%s7759_s2 + $0x158] sm:$0xff]  ;;  %v2336_v24 = vld [vmem:[%s7759_s2 + $0x100] sm:$0xff] }
 0x33d   : > { %3838 = vmatprep.subr.bf16.mxu0 %v3837_v28  ;;  %3902 = vmatprep.subr.bf16.mxu1 %v3901_v29  ;;  %v3985_v26 = vpack.c.bf16 %v2347_v23, %v2339_v34  ;;  %v2338_v28 = vld [vmem:[%s7759_s2 + $0x110] sm:$0xff]  ;;  %v3923_v30 = vpack.c.bf16 %v2344_v27, %v2336_v24  ;;  %v2416_v34 = vld [vmem:[%s7759_s2 + $0x380] sm:$0xff] }
 0x33e   : > { %v2346_v29 = vld [vmem:[%s7759_s2 + $0x150] sm:$0xff]  ;;  %v2424_v23 = vld [vmem:[%s7759_s2 + $0x3c0] sm:$0xff] }
 0x33f   : > { %v3987_v33 = vpack.c.bf16 %v2346_v29, %v2338_v28  ;;  %v2418_v27 = vld [vmem:[%s7759_s2 + $0x390] sm:$0xff] }
 0x340   : > { %3840 = vmatpush1.bf16.msra.mxu0 %v3839_v36  ;;  %3904 = vmatpush1.bf16.msra.mxu1 %v3903_v37  ;;  %v2363_v36 = vld [vmem:[%s7759_s2 + $0x1d8] sm:$0xff]  ;;  %v2352_v37 = vld [vmem:[%s7759_s2 + $0x180] sm:$0xff]  ;;  %v2426_v28 = vld [vmem:[%s7759_s2 + $0x3d0] sm:$0xff] }
 0x341   : > { %3842 = vmatprep.subr.bf16.mxu0 %v3841_v40  ;;  %3906 = vmatprep.subr.bf16.mxu1 %v3905_v42  ;;  %v3989_v39 = vpack.c.bf16 %v2363_v36, %v2355_v32  ;;  %v2354_v40 = vld [vmem:[%s7759_s2 + $0x190] sm:$0xff]  ;;  %v3927_v47 = vpack.c.bf16 %v2360_v38, %v2352_v37  ;;  %v4007_v29 = vpack.c.bf16 %v2426_v28, %v2418_v27  ;;  %v2440_v36 = vld [vmem:[%s7759_s2 + $0x440] sm:$0xff]  ;;  %v2513_v28 = vld [vmem:[%s7759_s2 + $0x688] sm:$0xff] }
 0x342   : > { %v2362_v42 = vld [vmem:[%s7759_s2 + $0x1d0] sm:$0xff] }
 0x343   : > { %v3991_v48 = vpack.c.bf16 %v2362_v42, %v2354_v40  ;;  %v2442_v40 = vld [vmem:[%s7759_s2 + $0x450] sm:$0xff] }
 0x344   : > { %3844 = vmatpush1.bf16.msra.mxu0 %v3843_v49  ;;  %3908 = vmatpush1.bf16.msra.mxu1 %v3907_v50  ;;  %v3929_v49 = vpack.c.bf16 %v2377_v44, %v2369_v43  ;;  %v3993_v50 = vpack.c.bf16 %v2379_v46, %v2371_v45  ;;  %v2449_v43 = vld [vmem:[%s7759_s2 + $0x488] sm:$0xff]  ;;  %v2451_v45 = vld [vmem:[%s7759_s2 + $0x498] sm:$0xff] }
 0x345   : > { %3846 = vmatprep.subr.bf16.mxu0 %v3845_v52  ;;  %3910 = vmatprep.subr.bf16.mxu1 %v3909_v53  ;;  %v2376_v52 = vld [vmem:[%s7759_s2 + $0x240] sm:$0xff]  ;;  %v2370_v53 = vld [vmem:[%s7759_s2 + $0x210] sm:$0xff]  ;;  %v2457_v44 = vld [vmem:[%s7759_s2 + $0x4c8] sm:$0xff] }
 0x346   : > { %v3931_v54 = vpack.c.bf16 %v2376_v52, %v2368_v51  ;;  %v3995_v41 = vpack.c.bf16 %v2378_v55, %v2370_v53  ;;  %v3949_v46 = vpack.c.bf16 %v2457_v44, %v2449_v43  ;;  %v2450_v52 = vld [vmem:[%s7759_s2 + $0x490] sm:$0xff]  ;;  %v2465_v55 = vld [vmem:[%s7759_s2 + $0x508] sm:$0xff]  ;;  %v2531_v43 = vld [vmem:[%s7759_s2 + $0x718] sm:$0xff] }
 0x347   : > { %v2458_v53 = vld [vmem:[%s7759_s2 + $0x4d0] sm:$0xff]  ;;  %v2539_v44 = vld [vmem:[%s7759_s2 + $0x758] sm:$0xff] }
 0x348   : > { %3848 = vmatpush1.bf16.msra.mxu0 %v3847_v56  ;;  %3912 = vmatpush1.bf16.msra.mxu1 %v3911_v57  ;;  %v2385_v56 = vld [vmem:[%s7759_s2 + $0x288] sm:$0xff] }
 0x349   : > { %3914 = vmatprep.subr.bf16.mxu0 %v3913_v61  ;;  %3978 = vmatprep.subr.bf16.mxu1 %v3977_v0  ;;  %v2393_v57 = vld [vmem:[%s7759_s2 + $0x2c8] sm:$0xff]  ;;  %v3997_v61 = vpack.c.bf16 %v2395_v60, %v2387_v58  ;;  %v2475_v58 = vld [vmem:[%s7759_s2 + $0x558] sm:$0xff]  ;;  %v2472_v60 = vld [vmem:[%s7759_s2 + $0x540] sm:$0xff] }
 0x34a   : > { %v3933_v59 = vpack.c.bf16 %v2393_v57, %v2385_v56  ;;  %v2467_v56 = vld [vmem:[%s7759_s2 + $0x518] sm:$0xff] }
 0x34b   : > { %2158 = vmatmul.mubr.f32.vlgmr.msra.gmra.mrb[10].mxu0 %v6534_v25  ;;  %2229 = vmatmul.mubr.f32.vlgmr.msra.gmra.mrb[10].mxu1 %v6534_v25  ;;  %v2304_v25 = vld [vmem:[%s7759_s2] sm:$0xff] }
 0x34c   : > { %v3915_v1 = vpack.c.bf16 %v2312_v63, %v2304_v25  ;;  %3980 = vmatpush1.bf16.msra.mxu1 %v3979_v5  ;;  %v2392_v25 = vld [vmem:[%s7759_s2 + $0x2c0] sm:$0xff]  ;;  %v2386_v63 = vld [vmem:[%s7759_s2 + $0x290] sm:$0xff]  ;;  %v2403_v5 = vld [vmem:[%s7759_s2 + $0x318] sm:$0xff] }
 0x34d   : > { %3982 = vmatprep.subr.bf16.mxu1 %v3981_v11  ;;  %v3935_v0 = vpack.c.bf16 %v2392_v25, %v2384_v62  ;;  %v4001_v11 = vpack.c.bf16 %v2411_v7, %v2403_v5  ;;  %v2466_v25 = vld [vmem:[%s7759_s2 + $0x510] sm:$0xff]  ;;  %v2491_v5 = vld [vmem:[%s7759_s2 + $0x5d8] sm:$0xff]  ;;  %v2488_v7 = vld [vmem:[%s7759_s2 + $0x5c0] sm:$0xff] }
 0x34e   : > { %3916 = vmatpush1.bf16.msra.mxu0 %v3915_v1  ;;  %v2394_v1 = vld [vmem:[%s7759_s2 + $0x2d0] sm:$0xff] }
 0x34f   : > { %3918 = vmatprep.subr.bf16.mxu0 %v3917_v9  ;;  %v3999_v2 = vpack.c.bf16 %v2394_v1, %v2386_v63  ;;  %v2408_v9 = vld [vmem:[%s7759_s2 + $0x340] sm:$0xff]  ;;  %v2474_v63 = vld [vmem:[%s7759_s2 + $0x550] sm:$0xff]  ;;  %v2481_v1 = vld [vmem:[%s7759_s2 + $0x588] sm:$0xff] }
 0x350   : > { %3984 = vmatpush1.bf16.msra.mxu1 %v3983_v20  ;;  %v3939_v12 = vpack.c.bf16 %v2408_v9, %v2400_v8  ;;  %v3941_v20 = vpack.c.bf16 %v2425_v18, %v2417_v17  ;;  %v4021_v8 = vpack.c.bf16 %v2491_v5, %v2483_v3  ;;  %v2499_v17 = vld [vmem:[%s7759_s2 + $0x618] sm:$0xff]  ;;  %v3112_v5 = vld [vmem:[%s4542_s29 + $0x40] sm:$0xff] }
 0x351   : > { %3986 = vmatprep.subr.bf16.mxu1 %v3985_v26  ;;  %v3943_v26 = vpack.c.bf16 %v2424_v23, %v2416_v34  ;;  %v2319_v3 = vld [vmem:[%s7759_s2 + $0x78] sm:$0xff] }
 0x352   : > { %3920 = vmatpush1.bf16.msra.mxu0 %v3919_v16  ;;  %v4003_v16 = vpack.c.bf16 %v2410_v15, %v2402_v14  ;;  %v2497_v15 = vld [vmem:[%s7759_s2 + $0x608] sm:$0xff] }
 0x353   : > { %3922 = vmatprep.subr.bf16.mxu0 %v3921_v21  ;;  %v2427_v21 = vld [vmem:[%s7759_s2 + $0x3d8] sm:$0xff] }
 0x354   : > { %3988 = vmatpush1.bf16.msra.mxu1 %v3987_v33  ;;  %v4005_v24 = vpack.c.bf16 %v2427_v21, %v2419_v19  ;;  %v2443_v33 = vld [vmem:[%s7759_s2 + $0x458] sm:$0xff]  ;;  %v2504_v21 = vld [vmem:[%s7759_s2 + $0x640] sm:$0xff] }
 0x355   : > { %3990 = vmatprep.subr.bf16.mxu1 %v3989_v39  ;;  %v4009_v37 = vpack.c.bf16 %v2443_v33, %v2435_v10  ;;  %v2434_v39 = vld [vmem:[%s7759_s2 + $0x410] sm:$0xff]  ;;  %v2507_v19 = vld [vmem:[%s7759_s2 + $0x658] sm:$0xff]  ;;  %v2520_v33 = vld [vmem:[%s7759_s2 + $0x6c0] sm:$0xff] }
 0x356   : > { %3924 = vmatpush1.bf16.msra.mxu0 %v3923_v30  ;;  %v2433_v30 = vld [vmem:[%s7759_s2 + $0x408] sm:$0xff]  ;;  %v4011_v42 = vpack.c.bf16 %v2442_v40, %v2434_v39  ;;  %v4025_v34 = vpack.c.bf16 %v2507_v19, %v2499_v17  ;;  %v2523_v10 = vld [vmem:[%s7759_s2 + $0x6d8] sm:$0xff]  ;;  %v3114_v17 = vld [vmem:[%s4542_s29 + $0x50] sm:$0xff] }
 0x357   : > { %3926 = vmatprep.subr.bf16.mxu0 %v3925_v35  ;;  %v3945_v32 = vpack.c.bf16 %v2441_v31, %v2433_v30  ;;  %v2432_v35 = vld [vmem:[%s7759_s2 + $0x400] sm:$0xff]  ;;  %v2515_v30 = vld [vmem:[%s7759_s2 + $0x698] sm:$0xff]  ;;  %v2529_v39 = vld [vmem:[%s7759_s2 + $0x708] sm:$0xff] }
 0x358   : > { %3992 = vmatpush1.bf16.msra.mxu1 %v3991_v48  ;;  %v3947_v38 = vpack.c.bf16 %v2440_v36, %v2432_v35  ;;  %v2448_v48 = vld [vmem:[%s7759_s2 + $0x480] sm:$0xff]  ;;  %v4029_v35 = vpack.c.bf16 %v2523_v10, %v2515_v30  ;;  %v3115_v19 = vld [vmem:[%s4542_s29 + $0x58] sm:$0xff] }
 0x359   : > { %3994 = vmatprep.subr.bf16.mxu1 %v3993_v50 }
 0x35a   : > { %3928 = vmatpush1.bf16.msra.mxu0 %v3927_v47  ;;  %v2459_v47 = vld [vmem:[%s7759_s2 + $0x4d8] sm:$0xff] }
 0x35b   : > { %3930 = vmatprep.subr.bf16.mxu0 %v3929_v49  ;;  %v2456_v49 = vld [vmem:[%s7759_s2 + $0x4c0] sm:$0xff]  ;;  %v4013_v50 = vpack.c.bf16 %v2459_v47, %v2451_v45 }
 0x35c   : > { %3996 = vmatpush1.bf16.msra.mxu1 %v3995_v41  ;;  %v3951_v51 = vpack.c.bf16 %v2456_v49, %v2448_v48  ;;  %v2473_v41 = vld [vmem:[%s7759_s2 + $0x548] sm:$0xff]  ;;  %v2528_v47 = vld [vmem:[%s7759_s2 + $0x700] sm:$0xff]  ;;  %v2530_v49 = vld [vmem:[%s7759_s2 + $0x710] sm:$0xff] }
 0x35d   : > { %3998 = vmatprep.subr.bf16.mxu1 %v3997_v61  ;;  %v3953_v57 = vpack.c.bf16 %v2473_v41, %v2465_v55  ;;  %v4017_v61 = vpack.c.bf16 %v2475_v58, %v2467_v56  ;;  %v2536_v48 = vld [vmem:[%s7759_s2 + $0x740] sm:$0xff]  ;;  %v2547_v41 = vld [vmem:[%s7759_s2 + $0x798] sm:$0xff] }
 0x35e   : > { %3932 = vmatpush1.bf16.msra.mxu0 %v3931_v54  ;;  %v4015_v54 = vpack.c.bf16 %v2458_v53, %v2450_v52  ;;  %v2545_v52 = vld [vmem:[%s7759_s2 + $0x788] sm:$0xff]  ;;  %v2555_v56 = vld [vmem:[%s7759_s2 + $0x7d8] sm:$0xff] }
 0x35f   : > { %3934 = vmatprep.subr.bf16.mxu0 %v3933_v59  ;;  %v2464_v59 = vld [vmem:[%s7759_s2 + $0x500] sm:$0xff]  ;;  %v2553_v53 = vld [vmem:[%s7759_s2 + $0x7c8] sm:$0xff]  ;;  %v4037_v58 = vpack.c.bf16 %v2555_v56, %v2547_v41 }
 0x360   : > { %4000 = vmatpush1.bf16.msra.mxu1 %v3999_v2  ;;  %v3955_v62 = vpack.c.bf16 %v2472_v60, %v2464_v59  ;;  %v2489_v2 = vld [vmem:[%s7759_s2 + $0x5c8] sm:$0xff]  ;;  %v3973_v55 = vpack.c.bf16 %v2553_v53, %v2545_v52  ;;  %v2552_v59 = vld [vmem:[%s7759_s2 + $0x7c0] sm:$0xff]  ;;  %v2546_v60 = vld [vmem:[%s7759_s2 + $0x790] sm:$0xff] }
 0x361   : > { %4002 = vmatprep.subr.bf16.mxu1 %v4001_v11  ;;  %v3957_v4 = vpack.c.bf16 %v2489_v2, %v2481_v1  ;;  %v2482_v11 = vld [vmem:[%s7759_s2 + $0x590] sm:$0xff]  ;;  %v2311_v1 = vld [vmem:[%s7759_s2 + $0x38] sm:$0xff] }
 0x362   : > { %3936 = vmatpush1.bf16.msra.mxu0 %v3935_v0  ;;  %v4019_v0 = vpack.c.bf16 %v2474_v63, %v2466_v25  ;;  %v2309_v63 = vld [vmem:[%s7759_s2 + $0x28] sm:$0xff] }
 0x363   : > { %3938 = vmatprep.subr.bf16.mxu0 %v3937_v6  ;;  %v2480_v6 = vld [vmem:[%s7759_s2 + $0x580] sm:$0xff] }
 0x364   : > { %4004 = vmatpush1.bf16.msra.mxu1 %v4003_v16  ;;  %v3959_v9 = vpack.c.bf16 %v2488_v7, %v2480_v6  ;;  %v2505_v16 = vld [vmem:[%s7759_s2 + $0x648] sm:$0xff] }
 0x365   : > { %4006 = vmatprep.subr.bf16.mxu1 %v4005_v24  ;;  %v3961_v18 = vpack.c.bf16 %v2505_v16, %v2497_v15  ;;  %v2498_v24 = vld [vmem:[%s7759_s2 + $0x610] sm:$0xff]  ;;  %v3113_v6 = vld [vmem:[%s4542_s29 + $0x48] sm:$0xff] }
 0x366   : > { %3940 = vmatpush1.bf16.msra.mxu0 %v3939_v12  ;;  %v2490_v12 = vld [vmem:[%s7759_s2 + $0x5d0] sm:$0xff] }
 0x367   : > { %3942 = vmatprep.subr.bf16.mxu0 %v3941_v20  ;;  %v4023_v14 = vpack.c.bf16 %v2490_v12, %v2482_v11  ;;  %v2496_v20 = vld [vmem:[%s7759_s2 + $0x600] sm:$0xff] }
 0x368   : > { %4008 = vmatpush1.bf16.msra.mxu1 %v4007_v29  ;;  %v3963_v23 = vpack.c.bf16 %v2504_v21, %v2496_v20  ;;  %v2521_v29 = vld [vmem:[%s7759_s2 + $0x6c8] sm:$0xff] }
 0x369   : > { %4010 = vmatprep.subr.bf16.mxu1 %v4009_v37  ;;  %v3965_v31 = vpack.c.bf16 %v2521_v29, %v2513_v28  ;;  %v2514_v37 = vld [vmem:[%s7759_s2 + $0x690] sm:$0xff] }
 0x36a   : > { %3944 = vmatpush1.bf16.msra.mxu0 %v3943_v26  ;;  %v2506_v26 = vld [vmem:[%s7759_s2 + $0x650] sm:$0xff] }
 0x36b   : > { %3946 = vmatprep.subr.bf16.mxu0 %v3945_v32  ;;  %v4027_v27 = vpack.c.bf16 %v2506_v26, %v2498_v24  ;;  %v2512_v32 = vld [vmem:[%s7759_s2 + $0x680] sm:$0xff] }
 0x36c   : > { %4012 = vmatpush1.bf16.msra.mxu1 %v4011_v42  ;;  %v3967_v36 = vpack.c.bf16 %v2520_v33, %v2512_v32  ;;  %v2537_v42 = vld [vmem:[%s7759_s2 + $0x748] sm:$0xff] }
 0x36d   : > { %4014 = vmatprep.subr.bf16.mxu1 %v4013_v50  ;;  %v3969_v45 = vpack.c.bf16 %v2537_v42, %v2529_v39  ;;  %v3971_v50 = vpack.c.bf16 %v2536_v48, %v2528_v47  ;;  %v3117_v39 = vld [vmem:[%s4544_s14 + $0x28] sm:$0xff]  ;;  %v3118_v48 = vld [vmem:[%s4544_s14 + $0x30] sm:$0xff] }
 0x36e   : > { %3948 = vmatpush1.bf16.msra.mxu0 %v3947_v38  ;;  %v2522_v38 = vld [vmem:[%s7759_s2 + $0x6d0] sm:$0xff] }
 0x36f   : > { %3950 = vmatprep.subr.bf16.mxu0 %v3949_v46  ;;  %v4031_v40 = vpack.c.bf16 %v2522_v38, %v2514_v37  ;;  %v4033_v46 = vpack.c.bf16 %v2539_v44, %v2531_v43  ;;  %v3116_v38 = vld [vmem:[%s4544_s14 + $0x20] sm:$0xff] }
 0x370   : > { %4016 = vmatpush1.bf16.msra.mxu1 %v4015_v54 }
 0x371   : > { %4018 = vmatprep.subr.bf16.mxu1 %v4017_v61  ;;  %v2554_v61 = vld [vmem:[%s7759_s2 + $0x7d0] sm:$0xff] }
 0x372   : > { %3952 = vmatpush1.bf16.msra.mxu0 %v3951_v51  ;;  %v2538_v51 = vld [vmem:[%s7759_s2 + $0x750] sm:$0xff]  ;;  %v4039_v25 = vpack.c.bf16 %v2554_v61, %v2546_v60 }
 0x373   : > { %3954 = vmatprep.subr.bf16.mxu0 %v3953_v57  ;;  %v4035_v54 = vpack.c.bf16 %v2538_v51, %v2530_v49  ;;  %v2544_v57 = vld [vmem:[%s7759_s2 + $0x780] sm:$0xff] }
 0x374   : > { %4020 = vmatpush1.bf16.msra.mxu1 %v4019_v0  ;;  %v2317_v0 = vld [vmem:[%s7759_s2 + $0x68] sm:$0xff] }
 0x375   : > { %4022 = vmatprep.subr.bf16.mxu1 %v4021_v8  ;;  %v4041_v2 = vpack.c.bf16 %v2317_v0, %v2309_v63  ;;  %v2308_v63 = vld [vmem:[%s7759_s2 + $0x20] sm:$0xff] }
 0x376   : > { %3956 = vmatpush1.bf16.msra.mxu0 %v3955_v62  ;;  %v3975_v62 = vpack.c.bf16 %v2552_v59, %v2544_v57  ;;  %v2316_v0 = vld [vmem:[%s7759_s2 + $0x60] sm:$0xff] }
 0x377   : > { %3958 = vmatprep.subr.bf16.mxu0 %v3957_v4  ;;  %v4105_v4 = vpack.c.bf16 %v2319_v3, %v2311_v1  ;;  %v2310_v1 = vld [vmem:[%s7759_s2 + $0x30] sm:$0xff]  ;;  %v2325_v3 = vld [vmem:[%s7759_s2 + $0xa8] sm:$0xff] }
 0x378   : > { %4024 = vmatpush1.bf16.msra.mxu1 %v4023_v14 }
 0x379   : > { %4026 = vmatprep.subr.bf16.mxu1 %v4025_v34 }
 0x37a   : > { %3960 = vmatpush1.bf16.msra.mxu0 %v3959_v9 }
 0x37b   : > { %3962 = vmatprep.subr.bf16.mxu0 %v3961_v18 }
 0x37c   : > { %4028 = vmatpush1.bf16.msra.mxu1 %v4027_v27 }
 0x37d   : > { %4030 = vmatprep.subr.bf16.mxu1 %v4029_v35 }
 0x37e   : > { %3964 = vmatpush1.bf16.msra.mxu0 %v3963_v23 }
 0x37f   : > { %3966 = vmatprep.subr.bf16.mxu0 %v3965_v31 }
 0x380   : > { %4032 = vmatpush1.bf16.msra.mxu1 %v4031_v40 }
 0x381   : > { %4034 = vmatprep.subr.bf16.mxu1 %v4033_v46 }
 0x382   : > { %3968 = vmatpush1.bf16.msra.mxu0 %v3967_v36 }
 0x383   : > { %3970 = vmatprep.subr.bf16.mxu0 %v3969_v45 }
 0x384   : > { %4036 = vmatpush1.bf16.msra.mxu1 %v4035_v54 }
 0x385   : > { %4038 = vmatprep.subr.bf16.mxu1 %v4037_v58 }
 0x386   : > { %3972 = vmatpush1.bf16.msra.mxu0 %v3971_v50  ;;  %v3119_v50 = vld [vmem:[%s4544_s14 + $0x38] sm:$0xff] }
 0x387   : > { %3974 = vmatprep.subr.bf16.mxu0 %v3973_v55 }
 0x388   : > { %4040 = vmatpush1.bf16.msra.mxu1 %v4039_v25 }
 0x389   : > { %4106 = vmatprep.subr.bf16.mxu1 %v4105_v4 }
 0x38a   : > { %3976 = vmatpush1.bf16.msra.mxu0 %v3975_v62 }
 0x38b   : > { %4042 = vmatprep.subr.bf16.mxu0 %v4041_v2 }
 0x3de   : > { %v2017_v7 = vpop.f32.mrb[8].mxu0  ;;  %v2088_v8 = vpop.f32.mrb[8].mxu1 }
 0x3df   : > { %v2235_v9 = vadd.f32 %v3112_v5, %v2017_v7  ;;  %v2019_v11 = vpop.f32.mrb[9].mxu0  ;;  %v2090_v12 = vpop.f32.mrb[9].mxu1  ;;  %v2237_v18 = vadd.f32 %v3114_v17, %v2088_v8  ;;  %v2333_v5 = vld [vmem:[%s7759_s2 + $0xe8] sm:$0xff]  ;;  %v2335_v7 = vld [vmem:[%s7759_s2 + $0xf8] sm:$0xff] }
 0x3e0   : > { %v2236_v14 = vadd.f32 %v3113_v6, %v2019_v11  ;;  %v2238_v20 = vadd.f32 %v3115_v19, %v2090_v12  ;;  %v2327_v6 = vld [vmem:[%s7759_s2 + $0xb8] sm:$0xff]  ;;  %v2324_v12 = vld [vmem:[%s7759_s2 + $0xa0] sm:$0xff]  ;;  %v2341_v17 = vld [vmem:[%s7759_s2 + $0x128] sm:$0xff] }
 0x3e1   : > { %v3120_v15 = vmul.f32 -1.442695, %v2235_v9  ;;  %v3122_v21 = vmul.f32 -1.442695, %v2237_v18  ;;  %v4043_v9 = vpack.c.bf16 %v2316_v0, %v2308_v63  ;;  %v4045_v18 = vpack.c.bf16 %v2333_v5, %v2325_v3  ;;  %v2388_v63 = vld [vmem:[%s7759_s2 + $0x2a0] sm:$0xff]  ;;  %v2398_v3 = vld [vmem:[%s7759_s2 + $0x2f0] sm:$0xff] }
 0x3e2   : > { %v3121_v16 = vmul.f32 -1.442695, %v2236_v14  ;;  %v2332_v14 = vld [vmem:[%s7759_s2 + $0xe0] sm:$0xff]  ;;  %v4109_v19 = vpack.c.bf16 %v2335_v7, %v2327_v6  ;;  %v2413_v5 = vld [vmem:[%s7759_s2 + $0x368] sm:$0xff]  ;;  %v2407_v6 = vld [vmem:[%s7759_s2 + $0x338] sm:$0xff] }
 0x3e3   : > { %4273 = vpow2.f32 %v3120_v15  ;;  %v2326_v15 = vld [vmem:[%s7759_s2 + $0xb0] sm:$0xff]  ;;  %v2396_v0 = vld [vmem:[%s7759_s2 + $0x2e0] sm:$0xff]  ;;  %v2415_v7 = vld [vmem:[%s7759_s2 + $0x378] sm:$0xff] }
 0x3e4   : > { %4275 = vpow2.f32 %v3121_v16  ;;  %v2334_v16 = vld [vmem:[%s7759_s2 + $0xf0] sm:$0xff] }
 0x3e5   : > { %4277 = vtanh.f32 %v2238_v20  ;;  %v2349_v20 = vld [vmem:[%s7759_s2 + $0x168] sm:$0xff] }
 0x3e6   : > { %4279 = vpow2.f32 %v3122_v21  ;;  %v2343_v21 = vld [vmem:[%s7759_s2 + $0x138] sm:$0xff] }
 0x3ed   : > { %v4274_v34 = vpop.eup %4273 }
 0x3ee   : > { %v2252_v23 = vadd.f32 1.0, %v4274_v34  ;;  %v4276_v24 = vpop.eup %4275  ;;  %v2351_v34 = vld [vmem:[%s7759_s2 + $0x178] sm:$0xff] }
 0x3ef   : > { %v2253_v26 = vadd.f32 1.0, %v4276_v24  ;;  %v4278_v27 = vpop.eup %4277  ;;  %v4111_v24 = vpack.c.bf16 %v2334_v16, %v2326_v15  ;;  %v4129_v15 = vpack.c.bf16 %v2415_v7, %v2407_v6  ;;  %v2406_v16 = vld [vmem:[%s7759_s2 + $0x330] sm:$0xff]  ;;  %v2495_v6 = vld [vmem:[%s7759_s2 + $0x5f8] sm:$0xff] }
 0x3f0   : > { %4281 = vrcp.f32 %v2252_v23  ;;  %v4280_v28 = vpop.eup %4279  ;;  %v4047_v23 = vpack.c.bf16 %v2332_v14, %v2324_v12  ;;  %v2412_v12 = vld [vmem:[%s7759_s2 + $0x360] sm:$0xff] }
 0x3f1   : > { %4283 = vrcp.f32 %v2253_v26  ;;  %v2254_v10 = vadd.f32 1.0, %v4280_v28  ;;  %v2340_v26 = vld [vmem:[%s7759_s2 + $0x120] sm:$0xff]  ;;  %v4049_v28 = vpack.c.bf16 %v2349_v20, %v2341_v17  ;;  %v2414_v17 = vld [vmem:[%s7759_s2 + $0x370] sm:$0xff]  ;;  %v2423_v20 = vld [vmem:[%s7759_s2 + $0x3b8] sm:$0xff] }
 0x3f3   : > { %4285 = vrcp.f32 %v2254_v10  ;;  %v2357_v10 = vld [vmem:[%s7759_s2 + $0x1a8] sm:$0xff] }
 0x3fa   : > { %v4282_v29 = vpop.eup %4281 }
 0x3fb   : > { %v2263_v30 = vmul.f32 %v4282_v29, %v4278_v27  ;;  %v4284_v31 = vpop.eup %4283  ;;  %v2348_v27 = vld [vmem:[%s7759_s2 + $0x160] sm:$0xff]  ;;  %v4113_v29 = vpack.c.bf16 %v2351_v34, %v2343_v21  ;;  %v2431_v21 = vld [vmem:[%s7759_s2 + $0x3f8] sm:$0xff] }
 0x3fc   : > { %v2262_v32 = vmul.f32 %v4284_v31, %v6531_v22  ;;  %v2350_v31 = vld [vmem:[%s7759_s2 + $0x170] sm:$0xff] }
 0x3fd   : > { %v4286_v35 = vpop.eup %4285 }
 0x3fe   : > { %v7324_v33 = vadd.f32 %v2263_v30, %v2262_v32  ;;  %v2342_v30 = vld [vmem:[%s7759_s2 + $0x130] sm:$0xff]  ;;  %v2365_v32 = vld [vmem:[%s7759_s2 + $0x1e8] sm:$0xff] }
 0x400   : > { %4287 = vtanh.f32 %v7324_v33 }
 0x40a   : > { %v4288_v36 = vpop.eup %4287 }
 0x40b   : > { %v7327_v37 = vmul.f32 %v4288_v36, %v4286_v35  ;;  %v2359_v35 = vld [vmem:[%s7759_s2 + $0x1b8] sm:$0xff] }
 0x40c   : > { %v2367_v36 = vld [vmem:[%s7759_s2 + $0x1f8] sm:$0xff] }
 0x40d   : > { %3126 = vst [vmem:[%s4535_s18 + $0x10] sm:$0xff] %v7327_v37 }
 0x41e   : > { %v2159_v40 = vpop.f32.mrb[10].mxu0  ;;  %v2230_v42 = vpop.f32.mrb[10].mxu1 }
 0x41f   : > { %v2239_v43 = vadd.f32 %v3116_v38, %v2159_v40  ;;  %v2161_v44 = vpop.f32.mrb[11].mxu0  ;;  %v2232_v22 = vpop.f32.mrb[11].mxu1  ;;  %v2241_v49 = vadd.f32 %v3118_v48, %v2230_v42  ;;  %v4051_v38 = vpack.c.bf16 %v2348_v27, %v2340_v26  ;;  %v2356_v40 = vld [vmem:[%s7759_s2 + $0x1a0] sm:$0xff]  ;;  %v2375_v48 = vld [vmem:[%s7759_s2 + $0x238] sm:$0xff] }
 0x420   : > { %v2240_v45 = vadd.f32 %v3117_v39, %v2161_v44  ;;  %v2242_v51 = vadd.f32 %v3119_v50, %v2232_v22  ;;  %v4115_v39 = vpack.c.bf16 %v2350_v31, %v2342_v30  ;;  %v2364_v42 = vld [vmem:[%s7759_s2 + $0x1e0] sm:$0xff]  ;;  %v4117_v44 = vpack.c.bf16 %v2367_v36, %v2359_v35  ;;  %v2358_v22 = vld [vmem:[%s7759_s2 + $0x1b0] sm:$0xff]  ;;  %v2437_v31 = vld [vmem:[%s7759_s2 + $0x428] sm:$0xff] }
 0x421   : > { %v3123_v46 = vmul.f32 -1.442695, %v2239_v43  ;;  %v3125_v52 = vmul.f32 -1.442695, %v2241_v49  ;;  %v4053_v43 = vpack.c.bf16 %v2365_v32, %v2357_v10  ;;  %v2383_v49 = vld [vmem:[%s7759_s2 + $0x278] sm:$0xff]  ;;  %v4055_v50 = vpack.c.bf16 %v2364_v42, %v2356_v40  ;;  %v2428_v26 = vld [vmem:[%s7759_s2 + $0x3e0] sm:$0xff] }
 0x422   : > { %v3124_v47 = vmul.f32 -1.442695, %v2240_v45  ;;  %v2366_v45 = vld [vmem:[%s7759_s2 + $0x1f0] sm:$0xff]  ;;  %v2445_v10 = vld [vmem:[%s7759_s2 + $0x468] sm:$0xff]  ;;  %v2439_v32 = vld [vmem:[%s7759_s2 + $0x438] sm:$0xff] }
 0x423   : > { %4289 = vpow2.f32 %v3123_v46  ;;  %v2373_v46 = vld [vmem:[%s7759_s2 + $0x228] sm:$0xff]  ;;  %v2430_v30 = vld [vmem:[%s7759_s2 + $0x3f0] sm:$0xff]  ;;  %v2447_v35 = vld [vmem:[%s7759_s2 + $0x478] sm:$0xff]  ;;  %v4073_v42 = vpack.c.bf16 %v2445_v10, %v2437_v31 }
 0x424   : > { %4291 = vpow2.f32 %v3124_v47  ;;  %v2381_v47 = vld [vmem:[%s7759_s2 + $0x268] sm:$0xff]  ;;  %v2444_v40 = vld [vmem:[%s7759_s2 + $0x460] sm:$0xff]  ;;  %v2519_v10 = vld [vmem:[%s7759_s2 + $0x6b8] sm:$0xff] }
 0x425   : > { %4293 = vtanh.f32 %v2242_v51  ;;  %v4119_v51 = vpack.c.bf16 %v2366_v45, %v2358_v22  ;;  %v2446_v22 = vld [vmem:[%s7759_s2 + $0x470] sm:$0xff]  ;;  %v2453_v45 = vld [vmem:[%s7759_s2 + $0x4a8] sm:$0xff] }
 0x426   : > { %4295 = vpow2.f32 %v3125_v52  ;;  %v2372_v52 = vld [vmem:[%s7759_s2 + $0x220] sm:$0xff]  ;;  %v2525_v31 = vld [vmem:[%s7759_s2 + $0x6e8] sm:$0xff] }
 0x42d   : > { %v4290_v53 = vpop.eup %4289 }
 0x42e   : > { %v2276_v54 = vadd.f32 1.0, %v4290_v53  ;;  %v4292_v55 = vpop.eup %4291  ;;  %v2380_v53 = vld [vmem:[%s7759_s2 + $0x260] sm:$0xff] }
 0x42f   : > { %v2277_v41 = vadd.f32 1.0, %v4292_v55  ;;  %v4294_v56 = vpop.eup %4293  ;;  %v4121_v55 = vpack.c.bf16 %v2383_v49, %v2375_v48  ;;  %v2463_v48 = vld [vmem:[%s7759_s2 + $0x4f8] sm:$0xff] }
 0x430   : > { %4297 = vrcp.f32 %v2276_v54  ;;  %v4296_v57 = vpop.eup %4295  ;;  %v4057_v54 = vpack.c.bf16 %v2381_v47, %v2373_v46  ;;  %v2461_v46 = vld [vmem:[%s7759_s2 + $0x4e8] sm:$0xff]  ;;  %v2455_v47 = vld [vmem:[%s7759_s2 + $0x4b8] sm:$0xff] }
 0x431   : > { %4299 = vrcp.f32 %v2277_v41  ;;  %v2278_v61 = vadd.f32 1.0, %v4296_v57  ;;  %v2374_v41 = vld [vmem:[%s7759_s2 + $0x230] sm:$0xff]  ;;  %v2389_v57 = vld [vmem:[%s7759_s2 + $0x2a8] sm:$0xff] }
 0x433   : > { %4301 = vrcp.f32 %v2278_v61  ;;  %v4059_v61 = vpack.c.bf16 %v2380_v53, %v2372_v52  ;;  %v2460_v52 = vld [vmem:[%s7759_s2 + $0x4e0] sm:$0xff]  ;;  %v4077_v53 = vpack.c.bf16 %v2461_v46, %v2453_v45  ;;  %v2541_v45 = vld [vmem:[%s7759_s2 + $0x768] sm:$0xff]  ;;  %v2535_v46 = vld [vmem:[%s7759_s2 + $0x738] sm:$0xff] }
 0x43a   : > { %v4298_v58 = vpop.eup %4297 }
 0x43b   : > { %v2287_v59 = vmul.f32 %v4298_v58, %v4294_v56  ;;  %v4300_v60 = vpop.eup %4299  ;;  %v2382_v56 = vld [vmem:[%s7759_s2 + $0x270] sm:$0xff]  ;;  %v2397_v58 = vld [vmem:[%s7759_s2 + $0x2e8] sm:$0xff] }
 0x43c   : > { %v2286_v62 = vmul.f32 %v4300_v60, %v6543_v13  ;;  %v2318_v13 = vld [vmem:[%s7759_s2 + $0x70] sm:$0xff]  ;;  %v2399_v60 = vld [vmem:[%s7759_s2 + $0x2f8] sm:$0xff] }
 0x43d   : > { %v4302_v2 = vpop.eup %4301  ;;  %v4107_v11 = vpack.c.bf16 %v2318_v13, %v2310_v1  ;;  %v4061_v1 = vpack.c.bf16 %v2397_v58, %v2389_v57  ;;  %v2477_v57 = vld [vmem:[%s7759_s2 + $0x568] sm:$0xff]  ;;  %v2471_v58 = vld [vmem:[%s7759_s2 + $0x538] sm:$0xff] }
 0x43e   : > { %v7336_v25 = vadd.f32 %v2287_v59, %v2286_v62  ;;  %v2391_v59 = vld [vmem:[%s7759_s2 + $0x2b8] sm:$0xff]  ;;  %v4123_v62 = vpack.c.bf16 %v2382_v56, %v2374_v41  ;;  %v2462_v41 = vld [vmem:[%s7759_s2 + $0x4f0] sm:$0xff]  ;;  %v2469_v56 = vld [vmem:[%s7759_s2 + $0x528] sm:$0xff] }
 0x43f   : > { %v4125_v13 = vpack.c.bf16 %v2399_v60, %v2391_v59  ;;  %v2479_v59 = vld [vmem:[%s7759_s2 + $0x578] sm:$0xff] }
 0x440   : > { %4303 = vtanh.f32 %v7336_v25 }
 0x44a   : > { %v4304_v4 = vpop.eup %4303 }
 0x44b   : > { %v2290_v8 = vmul.f32 %v4304_v4, %v4302_v2  ;;  %v2390_v2 = vld [vmem:[%s7759_s2 + $0x2b0] sm:$0xff]  ;;  %v2405_v4 = vld [vmem:[%s7759_s2 + $0x328] sm:$0xff] }
 0x44c   : > { %v4065_v14 = vpack.c.bf16 %v2413_v5, %v2405_v4  ;;  %v2493_v4 = vld [vmem:[%s7759_s2 + $0x5e8] sm:$0xff]  ;;  %v2487_v5 = vld [vmem:[%s7759_s2 + $0x5b8] sm:$0xff] }
 0x44d   : > { %3127 = vst [vmem:[%s4540_s27 + $0x8] sm:$0xff] %v2290_v8  ;;  %2624 = vmatprep.mubr.f32.mxu0 %v2290_v8  ;;  %2695 = vmatprep.mubr.f32.mxu1 %v2290_v8 }
 0x44e   : > { %2625 = vmatmul.mubr.f32.vlgmr.msra.gmra.mrb[12].mxu0 %v7327_v37  ;;  %2696 = vmatmul.mubr.f32.vlgmr.msra.gmra.mrb[12].mxu1 %v7327_v37 }
 0x44f   : > { %4044 = vmatpush1.bf16.msra.mxu0 %v4043_v9  ;;  %4108 = vmatpush1.bf16.msra.mxu1 %v4107_v11  ;;  %v4127_v9 = vpack.c.bf16 %v2398_v3, %v2390_v2  ;;  %v2404_v11 = vld [vmem:[%s7759_s2 + $0x320] sm:$0xff]  ;;  %v2478_v2 = vld [vmem:[%s7759_s2 + $0x570] sm:$0xff]  ;;  %v2485_v3 = vld [vmem:[%s7759_s2 + $0x5a8] sm:$0xff] }
 0x450   : > { %2766 = vmatprep.mubr.f32.mxu0 %v2290_v8  ;;  %2837 = vmatprep.mubr.f32.mxu1 %v2290_v8  ;;  %v4063_v8 = vpack.c.bf16 %v2396_v0, %v2388_v63  ;;  %v4067_v34 = vpack.c.bf16 %v2412_v12, %v2404_v11  ;;  %v2476_v63 = vld [vmem:[%s7759_s2 + $0x560] sm:$0xff]  ;;  %v4081_v0 = vpack.c.bf16 %v2477_v57, %v2469_v56  ;;  %v2557_v56 = vld [vmem:[%s7759_s2 + $0x7e8] sm:$0xff]  ;;  %v2551_v57 = vld [vmem:[%s7759_s2 + $0x7b8] sm:$0xff] }
 0x451   : > { %4046 = vmatprep.subr.bf16.mxu0 %v4045_v18  ;;  %4110 = vmatprep.subr.bf16.mxu1 %v4109_v19  ;;  %v2421_v18 = vld [vmem:[%s7759_s2 + $0x3a8] sm:$0xff]  ;;  %v2492_v11 = vld [vmem:[%s7759_s2 + $0x5e0] sm:$0xff]  ;;  %v4085_v12 = vpack.c.bf16 %v2493_v4, %v2485_v3 }
 0x452   : > { %v2429_v19 = vld [vmem:[%s7759_s2 + $0x3e8] sm:$0xff]  ;;  %v3128_v4 = vld [vmem:[%s4542_s29 + $0x60] sm:$0xff] }
 0x453   : > { %4048 = vmatpush1.bf16.msra.mxu0 %v4047_v23  ;;  %4112 = vmatpush1.bf16.msra.mxu1 %v4111_v24  ;;  %v4131_v23 = vpack.c.bf16 %v2414_v17, %v2406_v16  ;;  %v2420_v24 = vld [vmem:[%s7759_s2 + $0x3a0] sm:$0xff]  ;;  %v4069_v27 = vpack.c.bf16 %v2429_v19, %v2421_v18  ;;  %v2494_v16 = vld [vmem:[%s7759_s2 + $0x5f0] sm:$0xff]  ;;  %v2501_v17 = vld [vmem:[%s7759_s2 + $0x628] sm:$0xff] }
 0x454   : > { %4050 = vmatprep.subr.bf16.mxu0 %v4049_v28  ;;  %4114 = vmatprep.subr.bf16.mxu1 %v4113_v29  ;;  %v4133_v28 = vpack.c.bf16 %v2431_v21, %v2423_v20  ;;  %v2422_v29 = vld [vmem:[%s7759_s2 + $0x3b0] sm:$0xff]  ;;  %v4071_v36 = vpack.c.bf16 %v2428_v26, %v2420_v24  ;;  %v2509_v18 = vld [vmem:[%s7759_s2 + $0x668] sm:$0xff]  ;;  %v2503_v19 = vld [vmem:[%s7759_s2 + $0x638] sm:$0xff] }
 0x455   : > { %v2511_v20 = vld [vmem:[%s7759_s2 + $0x678] sm:$0xff]  ;;  %v2508_v24 = vld [vmem:[%s7759_s2 + $0x660] sm:$0xff]  ;;  %v4089_v26 = vpack.c.bf16 %v2509_v18, %v2501_v17 }
 0x456   : > { %v3131_v18 = vld [vmem:[%s4542_s29 + $0x78] sm:$0xff] }
 0x457   : > { %4052 = vmatpush1.bf16.msra.mxu0 %v4051_v38  ;;  %4116 = vmatpush1.bf16.msra.mxu1 %v4115_v39  ;;  %v4135_v38 = vpack.c.bf16 %v2430_v30, %v2422_v29  ;;  %v2436_v39 = vld [vmem:[%s7759_s2 + $0x420] sm:$0xff]  ;;  %v2510_v29 = vld [vmem:[%s7759_s2 + $0x670] sm:$0xff]  ;;  %v2517_v30 = vld [vmem:[%s7759_s2 + $0x6a8] sm:$0xff] }
 0x458   : > { %4054 = vmatprep.subr.bf16.mxu0 %v4053_v43  ;;  %4118 = vmatprep.subr.bf16.mxu1 %v4117_v44  ;;  %v4137_v43 = vpack.c.bf16 %v2447_v35, %v2439_v32  ;;  %v2438_v44 = vld [vmem:[%s7759_s2 + $0x430] sm:$0xff]  ;;  %v4075_v49 = vpack.c.bf16 %v2444_v40, %v2436_v39  ;;  %v2527_v32 = vld [vmem:[%s7759_s2 + $0x6f8] sm:$0xff]  ;;  %v2524_v39 = vld [vmem:[%s7759_s2 + $0x6e0] sm:$0xff]  ;;  %v4093_v40 = vpack.c.bf16 %v2525_v31, %v2517_v30 }
 0x45b   : > { %4056 = vmatpush1.bf16.msra.mxu0 %v4055_v50  ;;  %4120 = vmatpush1.bf16.msra.mxu1 %v4119_v51  ;;  %v4139_v50 = vpack.c.bf16 %v2446_v22, %v2438_v44  ;;  %v2452_v51 = vld [vmem:[%s7759_s2 + $0x4a0] sm:$0xff]  ;;  %v2526_v44 = vld [vmem:[%s7759_s2 + $0x6f0] sm:$0xff]  ;;  %v2533_v22 = vld [vmem:[%s7759_s2 + $0x728] sm:$0xff] }
 0x45c   : > { %4058 = vmatprep.subr.bf16.mxu0 %v4057_v54  ;;  %4122 = vmatprep.subr.bf16.mxu1 %v4121_v55  ;;  %v4141_v54 = vpack.c.bf16 %v2463_v48, %v2455_v47  ;;  %v2454_v55 = vld [vmem:[%s7759_s2 + $0x4b0] sm:$0xff]  ;;  %v4079_v60 = vpack.c.bf16 %v2460_v52, %v2452_v51  ;;  %v2543_v47 = vld [vmem:[%s7759_s2 + $0x778] sm:$0xff]  ;;  %v2540_v51 = vld [vmem:[%s7759_s2 + $0x760] sm:$0xff]  ;;  %v4097_v52 = vpack.c.bf16 %v2541_v45, %v2533_v22 }
 0x45f   : > { %4060 = vmatpush1.bf16.msra.mxu0 %v4059_v61  ;;  %4124 = vmatpush1.bf16.msra.mxu1 %v4123_v62  ;;  %v4143_v61 = vpack.c.bf16 %v2462_v41, %v2454_v55  ;;  %v2468_v62 = vld [vmem:[%s7759_s2 + $0x520] sm:$0xff]  ;;  %v2542_v55 = vld [vmem:[%s7759_s2 + $0x770] sm:$0xff]  ;;  %v2549_v41 = vld [vmem:[%s7759_s2 + $0x7a8] sm:$0xff] }
 0x460   : > { %4062 = vmatprep.subr.bf16.mxu0 %v4061_v1  ;;  %4126 = vmatprep.subr.bf16.mxu1 %v4125_v13  ;;  %v4145_v1 = vpack.c.bf16 %v2479_v59, %v2471_v58  ;;  %v2470_v13 = vld [vmem:[%s7759_s2 + $0x530] sm:$0xff]  ;;  %v4083_v7 = vpack.c.bf16 %v2476_v63, %v2468_v62  ;;  %v2559_v58 = vld [vmem:[%s7759_s2 + $0x7f8] sm:$0xff]  ;;  %v4101_v62 = vpack.c.bf16 %v2557_v56, %v2549_v41 }
 0x461   : > { %v4165_v63 = vpack.c.bf16 %v2559_v58, %v2551_v57 }
 0x463   : > { %4064 = vmatpush1.bf16.msra.mxu0 %v4063_v8  ;;  %4128 = vmatpush1.bf16.msra.mxu1 %v4127_v9  ;;  %v4147_v8 = vpack.c.bf16 %v2478_v2, %v2470_v13  ;;  %v2484_v9 = vld [vmem:[%s7759_s2 + $0x5a0] sm:$0xff]  ;;  %v2558_v13 = vld [vmem:[%s7759_s2 + $0x7f0] sm:$0xff] }
 0x464   : > { %4066 = vmatprep.subr.bf16.mxu0 %v4065_v14  ;;  %4130 = vmatprep.subr.bf16.mxu1 %v4129_v15  ;;  %v4149_v14 = vpack.c.bf16 %v2495_v6, %v2487_v5  ;;  %v2486_v15 = vld [vmem:[%s7759_s2 + $0x5b0] sm:$0xff]  ;;  %v4087_v21 = vpack.c.bf16 %v2492_v11, %v2484_v9  ;;  %v3129_v5 = vld [vmem:[%s4542_s29 + $0x68] sm:$0xff] }
 0x467   : > { %4068 = vmatpush1.bf16.msra.mxu0 %v4067_v34  ;;  %4132 = vmatpush1.bf16.msra.mxu1 %v4131_v23  ;;  %v4151_v34 = vpack.c.bf16 %v2494_v16, %v2486_v15  ;;  %v2500_v23 = vld [vmem:[%s7759_s2 + $0x620] sm:$0xff]  ;;  %v3130_v16 = vld [vmem:[%s4542_s29 + $0x70] sm:$0xff] }
 0x468   : > { %4070 = vmatprep.subr.bf16.mxu0 %v4069_v27  ;;  %4134 = vmatprep.subr.bf16.mxu1 %v4133_v28  ;;  %v4153_v27 = vpack.c.bf16 %v2511_v20, %v2503_v19  ;;  %v2502_v28 = vld [vmem:[%s7759_s2 + $0x630] sm:$0xff]  ;;  %v4091_v35 = vpack.c.bf16 %v2508_v24, %v2500_v23 }
 0x46b   : > { %4072 = vmatpush1.bf16.msra.mxu0 %v4071_v36  ;;  %4136 = vmatpush1.bf16.msra.mxu1 %v4135_v38  ;;  %v4155_v36 = vpack.c.bf16 %v2510_v29, %v2502_v28  ;;  %v2516_v38 = vld [vmem:[%s7759_s2 + $0x6a0] sm:$0xff] }
 0x46c   : > { %4074 = vmatprep.subr.bf16.mxu0 %v4073_v42  ;;  %4138 = vmatprep.subr.bf16.mxu1 %v4137_v43  ;;  %v4157_v42 = vpack.c.bf16 %v2527_v32, %v2519_v10  ;;  %v2518_v43 = vld [vmem:[%s7759_s2 + $0x6b0] sm:$0xff]  ;;  %v4095_v48 = vpack.c.bf16 %v2524_v39, %v2516_v38  ;;  %v2300_v38 = vld [vmem:[%s4544_s14] sm:$0xff]  ;;  %v2301_v39 = vld [vmem:[%s4544_s14 + $0x8] sm:$0xff] }
 0x46f   : > { %4076 = vmatpush1.bf16.msra.mxu0 %v4075_v49  ;;  %4140 = vmatpush1.bf16.msra.mxu1 %v4139_v50  ;;  %v4159_v49 = vpack.c.bf16 %v2526_v44, %v2518_v43  ;;  %v2532_v50 = vld [vmem:[%s7759_s2 + $0x720] sm:$0xff] }
 0x470   : > { %4078 = vmatprep.subr.bf16.mxu0 %v4077_v53  ;;  %4142 = vmatprep.subr.bf16.mxu1 %v4141_v54  ;;  %v4161_v53 = vpack.c.bf16 %v2543_v47, %v2535_v46  ;;  %v2534_v54 = vld [vmem:[%s7759_s2 + $0x730] sm:$0xff]  ;;  %v4099_v59 = vpack.c.bf16 %v2540_v51, %v2532_v50 }
 0x471   : > { %v2302_v47 = vld [vmem:[%s4544_s14 + $0x10] sm:$0xff] }
 0x473   : > { %4080 = vmatpush1.bf16.msra.mxu0 %v4079_v60  ;;  %4144 = vmatpush1.bf16.msra.mxu1 %v4143_v61  ;;  %v4163_v60 = vpack.c.bf16 %v2542_v55, %v2534_v54  ;;  %v2548_v61 = vld [vmem:[%s7759_s2 + $0x7a0] sm:$0xff] }
 0x474   : > { %4082 = vmatprep.subr.bf16.mxu0 %v4081_v0  ;;  %4146 = vmatprep.subr.bf16.mxu1 %v4145_v1  ;;  %v2556_v0 = vld [vmem:[%s7759_s2 + $0x7e0] sm:$0xff]  ;;  %v2550_v1 = vld [vmem:[%s7759_s2 + $0x7b0] sm:$0xff] }
 0x475   : > { %v4103_v2 = vpack.c.bf16 %v2556_v0, %v2548_v61  ;;  %v4167_v3 = vpack.c.bf16 %v2558_v13, %v2550_v1 }
 0x477   : > { %4084 = vmatpush1.bf16.msra.mxu0 %v4083_v7  ;;  %4148 = vmatpush1.bf16.msra.mxu1 %v4147_v8 }
 0x478   : > { %4086 = vmatprep.subr.bf16.mxu0 %v4085_v12  ;;  %4150 = vmatprep.subr.bf16.mxu1 %v4149_v14 }
 0x47b   : > { %4088 = vmatpush1.bf16.msra.mxu0 %v4087_v21  ;;  %4152 = vmatpush1.bf16.msra.mxu1 %v4151_v34 }
 0x47c   : > { %4090 = vmatprep.subr.bf16.mxu0 %v4089_v26  ;;  %4154 = vmatprep.subr.bf16.mxu1 %v4153_v27 }
 0x47f   : > { %4092 = vmatpush1.bf16.msra.mxu0 %v4091_v35  ;;  %4156 = vmatpush1.bf16.msra.mxu1 %v4155_v36 }
 0x480   : > { %4094 = vmatprep.subr.bf16.mxu0 %v4093_v40  ;;  %4158 = vmatprep.subr.bf16.mxu1 %v4157_v42 }
 0x483   : > { %4096 = vmatpush1.bf16.msra.mxu0 %v4095_v48  ;;  %4160 = vmatpush1.bf16.msra.mxu1 %v4159_v49  ;;  %v2303_v49 = vld [vmem:[%s4544_s14 + $0x18] sm:$0xff] }
 0x484   : > { %4098 = vmatprep.subr.bf16.mxu0 %v4097_v52  ;;  %4162 = vmatprep.subr.bf16.mxu1 %v4161_v53 }
 0x487   : > { %4100 = vmatpush1.bf16.msra.mxu0 %v4099_v59  ;;  %4164 = vmatpush1.bf16.msra.mxu1 %v4163_v60 }
 0x488   : > { %4102 = vmatprep.subr.bf16.mxu0 %v4101_v62  ;;  %4166 = vmatprep.subr.bf16.mxu1 %v4165_v63 }
 0x48b   : > { %4104 = vmatpush1.bf16.msra.mxu0 %v4103_v2  ;;  %4168 = vmatpush1.bf16.msra.mxu1 %v4167_v3 }
 0x48e   : > { %2767 = vmatmul.mubr.f32.vlgmr.msra.gmra.mrb[14].mxu0 %v7327_v37  ;;  %2838 = vmatmul.mubr.f32.vlgmr.msra.gmra.mrb[14].mxu1 %v7327_v37 }
 0x521   : > { %v2626_v6 = vpop.f32.mrb[12].mxu0  ;;  %v2697_v7 = vpop.f32.mrb[12].mxu1 }
 0x522   : > { %v2844_v8 = vadd.f32 %v3128_v4, %v2626_v6  ;;  %v2628_v9 = vpop.f32.mrb[13].mxu0  ;;  %v2699_v11 = vpop.f32.mrb[13].mxu1  ;;  %v2846_v17 = vadd.f32 %v3130_v16, %v2697_v7 }
 0x523   : > { %v2845_v12 = vadd.f32 %v3129_v5, %v2628_v9  ;;  %v2847_v19 = vadd.f32 %v3131_v18, %v2699_v11 }
 0x524   : > { %v3132_v14 = vmul.f32 -1.442695, %v2844_v8  ;;  %v3134_v20 = vmul.f32 -1.442695, %v2846_v17 }
 0x525   : > { %v3133_v15 = vmul.f32 -1.442695, %v2845_v12 }
 0x526   : > { %4305 = vpow2.f32 %v3132_v14 }
 0x527   : > { %4307 = vpow2.f32 %v3133_v15 }
 0x528   : > { %4309 = vtanh.f32 %v2847_v19 }
 0x529   : > { %4311 = vpow2.f32 %v3134_v20 }
 0x530   : > { %v4306_v21 = vpop.eup %4305 }
 0x531   : > { %v2861_v34 = vadd.f32 1.0, %v4306_v21  ;;  %v4308_v37 = vpop.eup %4307 }
 0x532   : > { %v2862_v23 = vadd.f32 1.0, %v4308_v37  ;;  %v4310_v24 = vpop.eup %4309 }
 0x533   : > { %4313 = vrcp.f32 %v2861_v34  ;;  %v4312_v26 = vpop.eup %4311 }
 0x534   : > { %4315 = vrcp.f32 %v2862_v23  ;;  %v2863_v30 = vadd.f32 1.0, %v4312_v26 }
 0x536   : > { %4317 = vrcp.f32 %v2863_v30 }
 0x53d   : > { %v4314_v27 = vpop.eup %4313 }
 0x53e   : > { %v2872_v28 = vmul.f32 %v4314_v27, %v4310_v24  ;;  %v4316_v29 = vpop.eup %4315 }
 0x53f   : > { %v2871_v31 = vmul.f32 %v4316_v29, %v7324_v33 }
 0x540   : > { %v4318_v32 = vpop.eup %4317 }
 0x541   : > { %v2873_v10 = vadd.f32 %v2872_v28, %v2871_v31 }
 0x543   : > { %4319 = vtanh.f32 %v2873_v10  ;;  %2904 = vst [vmem:[#allocation3] sm:$0xff] %v2873_v10 }
 0x54a   : > { %v2915_v3 = vld [vmem:[#allocation3] sm:$0xff] (!%p3139_p0) }
 0x54b   : > { %2917 = vst [vmem:[%s7765_s8] sm:$0xff] (!%p3139_p0), %v2915_v3 }
 0x54d   : > { %v4320_v35 = vpop.eup %4319 }
 0x54e   : > { %v2875_v36 = vmul.f32 %v4320_v35, %v4318_v32 }
 0x550   : > { %3138 = vst [vmem:[%s4535_s18 + $0x18] sm:$0xff] %v2875_v36  ;;  %2903 = vst [vmem:[#allocation2] sm:$0xff] %v2875_v36 }
 0x557   : > { %v2911_v13 = vld [vmem:[#allocation2] sm:$0xff] (!%p3139_p0) }
 0x558   : > { %2913 = vst [vmem:[%s7764_s7] sm:$0xff] (!%p3139_p0), %v2911_v13 }
 0x561   : > { %v2768_v40 = vpop.f32.mrb[14].mxu0  ;;  %v2839_v42 = vpop.f32.mrb[14].mxu1 }
 0x562   : > { %v2848_v43 = vadd.f32 %v2768_v40, %v2300_v38  ;;  %v2770_v44 = vpop.f32.mrb[15].mxu0  ;;  %v2841_v22 = vpop.f32.mrb[15].mxu1  ;;  %v2850_v48 = vadd.f32 %v2839_v42, %v2302_v47 }
 0x563   : > { %v2849_v45 = vadd.f32 %v2770_v44, %v2301_v39  ;;  %v2851_v50 = vadd.f32 %v2841_v22, %v2303_v49 }
 0x564   : > { %v3135_v33 = vmul.f32 -1.442695, %v2848_v43  ;;  %v3137_v51 = vmul.f32 -1.442695, %v2850_v48 }
 0x565   : > { %v3136_v46 = vmul.f32 -1.442695, %v2849_v45 }
 0x566   : > { %4321 = vpow2.f32 %v3135_v33 }
 0x567   : > { %4323 = vpow2.f32 %v3136_v46 }
 0x568   : > { %4325 = vtanh.f32 %v2851_v50 }
 0x569   : > { %4327 = vpow2.f32 %v3137_v51 }
 0x570   : > { %v4322_v52 = vpop.eup %4321 }
 0x571   : > { %v2885_v53 = vadd.f32 1.0, %v4322_v52  ;;  %v4324_v54 = vpop.eup %4323 }
 0x572   : > { %v2886_v55 = vadd.f32 1.0, %v4324_v54  ;;  %v4326_v41 = vpop.eup %4325 }
 0x573   : > { %4329 = vrcp.f32 %v2885_v53  ;;  %v4328_v56 = vpop.eup %4327 }
 0x574   : > { %4331 = vrcp.f32 %v2886_v55  ;;  %v2887_v60 = vadd.f32 1.0, %v4328_v56 }
 0x576   : > { %4333 = vrcp.f32 %v2887_v60 }
 0x57d   : > { %v4330_v57 = vpop.eup %4329 }
 0x57e   : > { %v2896_v58 = vmul.f32 %v4330_v57, %v4326_v41  ;;  %v4332_v59 = vpop.eup %4331 }
 0x57f   : > { %v2895_v61 = vmul.f32 %v4332_v59, %v7336_v25 }
 0x580   : > { %v4334_v63 = vpop.eup %4333 }
 0x581   : > { %v2897_v62 = vadd.f32 %v2896_v58, %v2895_v61 }
 0x583   : > { %4335 = vtanh.f32 %v2897_v62  ;;  %2906 = vst [vmem:[#allocation3 + $0x8] sm:$0xff] %v2897_v62 }
 0x58a   : > { %2910 = sbr.rel (%p3139_p0) target bundleno = 1433 (0x599), region = 94  ;;  %v2916_v25 = vld [vmem:[#allocation3 + $0x8] sm:$0xff] (!%p3139_p0) }
 0x58b   : > { %2918 = vst [vmem:[%s7765_s8 + $0x8] sm:$0xff] (!%p3139_p0), %v2916_v25 }
 0x58d   : > { %v4336_v0 = vpop.eup %4335 }
 0x58e   : > { %v2899_v1 = vmul.f32 %v4336_v0, %v4334_v63 }
 0x590   : > { %2902 = vst [vmem:[%s4540_s27] sm:$0xff] %v2899_v1  ;;  %2905 = vst [vmem:[#allocation2 + $0x8] sm:$0xff] %v2899_v1 }
 0x597   : > { %v2912_v2 = vld [vmem:[#allocation2 + $0x8] sm:$0xff] }
 0x598   : > { %2914 = vst [vmem:[%s7764_s7 + $0x8] sm:$0xff] %v2912_v2 }
 0x599 PF: > { %p16_p1 = scmp.ge.s32.totalorder %s4451_s11, 4   ;;  %s7767_s27 = smov %s4363_s28 }
 0x59a   : > { %s7768_s28 = smov %s4470_s19  ;;  %s7769_s29 = smov %s4371_s30 }
 0x59b   : > { %s7770_s30 = smov %s4461_s15  ;;  %s7771_s9 = smov %s4451_s11 }
 0x59c   :  { %18 = sbr.rel (!%p16_p1) target bundleno = 3 (0x3), region = 179 }

// kernel: bi_encoder_forward.2
= control target key start
LH: loop header
LB: loop body
LE: loop exit
PB: predicated region body
PF: predicated region fallthrough
CT: control target
= control target key end

     0   :  { %14 = vsyncpa [#allocation7], 0  ;;  %s4499_s27 = smov 0   ;;  %s4501_s28 = smov 0   ;;  %s4805_s0 = inlined_call_operand.vmem [shape: f32[8,8,1024], index: 0, kind: input, shape index: {}, may-alias: {0,1}]   ;;  %s4806_s1 = inlined_call_operand.vmem [shape: f32[8,8,1024], index: 1, kind: input, shape index: {}, may-alias: {0,1}]   ;;  %s4807_s2 = inlined_call_operand.hbm [shape: f32[256,1024], index: 2, kind: input, shape index: {}]   ;;  %s4808_s3 = inlined_call_operand.vmem [shape: f32[2,8,128], index: 3, kind: input, shape index: {}]   ;;  %s4809_s4 = inlined_call_operand.vmem [shape: f32[2,8,128], index: 4, kind: input, shape index: {}]   ;;  %s4810_s5 = inlined_call_operand.vmem [shape: f32[8,8,128], index: 5, kind: output, shape index: {0}]   ;;  %s4811_s6 = inlined_call_operand.vmem [shape: f32[8,8,128], index: 6, kind: output, shape index: {1}]   ;;  %s4812_s7 = inlined_call_operand.vmem [shape: f32[2,8,128], index: 7, kind: output, shape index: {2}]   ;;  %s4813_s8 = inlined_call_operand.vmem [shape: f32[2,8,128], index: 8, kind: output, shape index: {3}]  }
   0x1   :  { %s4503_s29 = smov 0   ;;  %s4505_s30 = smov 0  }
   0x2   :  { %s4507_s9 = smov 0  }
   0x3 LB: > { %s4525_s10 = sadd.s32 4294967295, %s4449_s9   ;;  %s4528_s11 = sadd.s32 1, %s4449_s9   ;;  %s4449_s9 = sphi %s4507_s9, %s4836_s9   ;;  %s4445_s30 = sphi %s4505_s30, %s4835_s30   ;;  %s4441_s29 = sphi %s4503_s29, %s4834_s29   ;;  %s4437_s28 = sphi %s4501_s28, %s4833_s28   ;;  %s4433_s27 = sphi %s4499_s27, %s4832_s27  }
   0x4   : > { %s24_s12 = ssub.s32 %s4449_s9, %s4528_s11  ;;  %s27_s13 = sadd.s32 1, %s4445_s30 }
   0x5   : > { %p25_p0 = scmp.eq.s32.totalorder %s24_s12, 0  ;;  %p34_p1 = scmp.ne.s32.totalorder %s4445_s30, %s4441_s29 }
   0x6   : > { %p35_p2 = scmp.eq.s32.totalorder %s4449_s9, 0  ;;  %s4814_s14 = ssub.s32 1, %s4449_s9 }
   0x7   : > { %s4538_s15 = scalar_select %p25_p0, %s4445_s30, %s27_s13  }
   0x8   : > { %p4540_p3 = por %p35_p2, %p34_p1  ;;  %s51_s17 = ssub.s32 1, %s4528_s11 }
   0x9   : > { %4817 = sst [smem:[#allocation9_spill]] %s4538_s15  ;;  %s52_s18 = ssub.s32 %s4814_s14, %s51_s17 }
   0xa   : > { %s4818_s16 = scalar_select %p4540_p3, 1, 0 }
   0xb   : > { %s55_s19 = sadd.s32 1, %s4437_s28  ;;  %p53_p4 = scmp.eq.s32.totalorder %s52_s18, 0 }
   0xc   : > { %p62_p5 = scmp.ne.s32.totalorder %s4437_s28, %s4433_s27  ;;  %p3079_p6 = scmp.ge.s32.totalorder %s4449_s9, 1 }
   0xd   : > { %p238_p7 = scmp.lt.s32.totalorder %s4449_s9, 3  ;;  %p4815_p11 = scmp.eq.s32.totalorder %s4525_s10, 0 }
   0xe   : > { %s4553_s20 = scalar_select %p53_p4, %s4437_s28, %s55_s19  }
   0xf   : > { %p4555_p8 = por %p62_p5, %p35_p2  ;;  %p4559_p9 = pnand %p3079_p6, %p238_p7 }
  0x10   : > { %4819 = sst [smem:[#allocation10_spill]] %s4553_s20  ;;  %s4451_s23 = smov [#allocation6]  }
  0x11   : > { %s4820_s21 = scalar_select %p4555_p8, 1, 0 }
  0x12   : > { %s4821_s22 = scalar_select %p4559_p9, 1, 0 }
  0x13   : > { %p4202_p12 = pneg %p4559_p9  ;;  %s250_s24 = sshll.u32 %s4451_s23, 4  ;;  %s251_s24 = int_to_ptr.vmem [resolvable:$true] %s250_s24 }
  0x14   : > { %s4379_s13 = scalar_lea.hbm %s4807_s2, 32768 }
  0x15   : > { %p4569_p13 = pnand %p4815_p11, %p4202_p12  ;;  %p4380_p0 = scmp.ne.s32.totalorder %s4807_s2, %s4379_s13 }
  0x16   : > { %p4386_p5 = scmp.lt.u32.totalorder %s4379_s13, %s4807_s2 }
  0x17   : > { %p4381_p1 = pneg %p4569_p13 }
  0x19   : > { %p4382_p2 = pnand %p4381_p1, %p4380_p0 }
  0x1b   : > { %p4383_p4 = pneg %p4382_p2 }
  0x1d   : > { %p4388_p6 = pnand %p4386_p5, %p4383_p4 }
  0x1f   : > { %4391 = shalt.err (!%p4388_p6)
}
  0x20   : > { %s4392_s14 = scalar_lea.vmem %s251_s24, 32768  ;;  %p4400_p11 = scmp.lt.s32.totalorder %s251_s24, %s251_s24 }
  0x21   : > { %p4393_p7 = scmp.ne.s32.totalorder %s251_s24, %s4392_s14  ;;  %p4401_p9 = scmp.lt.s32.totalorder %s4392_s14, %s4392_s14 }
  0x23   : > { %p4395_p12 = pnand %p4393_p7, %p4381_p1  ;;  %p4402_p8 = por %p4401_p9, %p4400_p11 }
  0x25   : > { %p4396_p10 = pneg %p4395_p12 }
  0x27   : > { %p4403_p3 = pnand %p4402_p8, %p4396_p10 }
  0x29   : > { %4406 = shalt.err (!%p4403_p3)
}
  0x2a   : > { %s4452_s26 = smov 1024   ;;  %s4453_s12 = smov 64  }
  0x2b   : > { %4205 = dma.hbm_to_vmem [thread:$0]  (!%p4569_p13), %s4807_s2, 32768, %s251_s24, [#allocation7], %s4452_s26, %s4452_s26, %s4453_s12  }
  0x2c   : > { %p3081_p0 = scmp.ge.s32.totalorder %s4449_s9, 2 }
  0x2d   : > { %p4823_p2 = scmp.ne.s32.totalorder (!%p3081_p0), %s4818_s16, 0 }
  0x2e   : > { %266 = sbr.rel (%p3081_p0) target bundleno = 78 (0x4e), region = 28 }
  0x35   : > { %269 = sbr.rel (!%p4823_p2) target bundleno = 65 (0x41), region = 32  ;;  %s271_s14 = sand.u32 (%p4823_p2), 1, %s4445_s30  }
  0x36   : > { %s3172_s13 = sshll.u32 (%p4823_p2), %s4449_s9, 8  ;;  %s3082_s19 = sshll.u32 (%p4823_p2), %s271_s14, 7 }
  0x37   : > { %s4597_s20 = scalar_lea.vmem (%p4823_p2), %s4805_s0, %s3172_s13  ;;  %s273_s16 = scalar_lea.vmem (%p4823_p2), [#allocation4], %s3082_s19 }
  0x38   : > { %v290_v0 = vld [vmem:[%s4597_s20] sm:$0xff] (%p4823_p2)  ;;  %v292_v1 = vld [vmem:[%s4597_s20 + $0x8] sm:$0xff] (%p4823_p2)  ;;  %v294_v2 = vld [vmem:[%s4597_s20 + $0x10] sm:$0xff] (%p4823_p2) }
  0x39   : > { %291 = vst [vmem:[%s273_s16] sm:$0xff] (%p4823_p2), %v290_v0  ;;  %293 = vst [vmem:[%s273_s16 + $0x8] sm:$0xff] (%p4823_p2), %v292_v1  ;;  %v296_v3 = vld [vmem:[%s4597_s20 + $0x18] sm:$0xff] (%p4823_p2)  ;;  %v298_v4 = vld [vmem:[%s4597_s20 + $0x40] sm:$0xff] (%p4823_p2) }
  0x3a   : > { %295 = vst [vmem:[%s273_s16 + $0x10] sm:$0xff] (%p4823_p2), %v294_v2  ;;  %v300_v5 = vld [vmem:[%s4597_s20 + $0x48] sm:$0xff] (%p4823_p2)  ;;  %297 = vst [vmem:[%s273_s16 + $0x18] sm:$0xff] (%p4823_p2), %v296_v3  ;;  %v302_v6 = vld [vmem:[%s4597_s20 + $0x50] sm:$0xff] (%p4823_p2) }
  0x3b   : > { %299 = vst [vmem:[%s273_s16 + $0x20] sm:$0xff] (%p4823_p2), %v298_v4  ;;  %301 = vst [vmem:[%s273_s16 + $0x28] sm:$0xff] (%p4823_p2), %v300_v5  ;;  %v304_v7 = vld [vmem:[%s4597_s20 + $0x58] sm:$0xff] (%p4823_p2)  ;;  %v306_v8 = vld [vmem:[%s4597_s20 + $0x80] sm:$0xff] (%p4823_p2) }
  0x3c   : > { %303 = vst [vmem:[%s273_s16 + $0x30] sm:$0xff] %v302_v6  ;;  %305 = vst [vmem:[%s273_s16 + $0x38] sm:$0xff] %v304_v7  ;;  %v308_v9 = vld [vmem:[%s4597_s20 + $0x88] sm:$0xff]  ;;  %v310_v10 = vld [vmem:[%s4597_s20 + $0x90] sm:$0xff] }
  0x3d   : > { %307 = vst [vmem:[%s273_s16 + $0x40] sm:$0xff] %v306_v8  ;;  %v312_v11 = vld [vmem:[%s4597_s20 + $0x98] sm:$0xff]  ;;  %309 = vst [vmem:[%s273_s16 + $0x48] sm:$0xff] %v308_v9  ;;  %v314_v12 = vld [vmem:[%s4597_s20 + $0xc0] sm:$0xff] }
  0x3e   : > { %311 = vst [vmem:[%s273_s16 + $0x50] sm:$0xff] %v310_v10  ;;  %313 = vst [vmem:[%s273_s16 + $0x58] sm:$0xff] %v312_v11  ;;  %v316_v13 = vld [vmem:[%s4597_s20 + $0xc8] sm:$0xff]  ;;  %v318_v14 = vld [vmem:[%s4597_s20 + $0xd0] sm:$0xff] }
  0x3f   : > { %315 = vst [vmem:[%s273_s16 + $0x60] sm:$0xff] %v314_v12  ;;  %317 = vst [vmem:[%s273_s16 + $0x68] sm:$0xff] %v316_v13  ;;  %v320_v15 = vld [vmem:[%s4597_s20 + $0xd8] sm:$0xff] }
  0x40   : > { %319 = vst [vmem:[%s273_s16 + $0x70] sm:$0xff] %v318_v14  ;;  %321 = vst [vmem:[%s273_s16 + $0x78] sm:$0xff] %v320_v15 }
  0x41 PF: > { %p4824_p3 = scmp.ne.s32.totalorder %s4820_s21, 0 }
  0x42   : > { %s329_s15 = sand.u32 (%p4824_p3), 1, %s4437_s28   ;;  %s4825_s24 = ssub.s32 (%p4824_p3), 1, %s4449_s9 }
  0x43   : > { %327 = sbr.rel (!%p4824_p3) target bundleno = 78 (0x4e), region = 55  ;;  %s3173_s25 = sshll.u32 (%p4824_p3), %s4825_s24, 8 }
  0x44   : > { %s3086_s26 = sshll.u32 (%p4824_p3), %s329_s15, 7  ;;  %s4623_s18 = scalar_lea.vmem (%p4824_p3), %s4806_s1, %s3173_s25 }
  0x45   : > { %v3089_v16 = vld [vmem:[%s4623_s18 + $0x20] sm:$0xff] (%p4824_p3)  ;;  %v3090_v17 = vld [vmem:[%s4623_s18 + $0x28] sm:$0xff] (%p4824_p3)  ;;  %v3091_v18 = vld [vmem:[%s4623_s18 + $0x30] sm:$0xff] (%p4824_p3)  ;;  %s331_s9 = scalar_lea.vmem (%p4824_p3), [#allocation5], %s3086_s26 }
  0x46   : > { %351 = vst [vmem:[%s331_s9] sm:$0xff] (%p4824_p3), %v3089_v16  ;;  %353 = vst [vmem:[%s331_s9 + $0x8] sm:$0xff] (%p4824_p3), %v3090_v17  ;;  %v3092_v19 = vld [vmem:[%s4623_s18 + $0x38] sm:$0xff] (%p4824_p3)  ;;  %v3093_v20 = vld [vmem:[%s4623_s18 + $0x60] sm:$0xff] (%p4824_p3) }
  0x47   : > { %355 = vst [vmem:[%s331_s9 + $0x10] sm:$0xff] (%p4824_p3), %v3091_v18  ;;  %v3094_v21 = vld [vmem:[%s4623_s18 + $0x68] sm:$0xff] (%p4824_p3)  ;;  %357 = vst [vmem:[%s331_s9 + $0x18] sm:$0xff] (%p4824_p3), %v3092_v19  ;;  %v3095_v22 = vld [vmem:[%s4623_s18 + $0x70] sm:$0xff] (%p4824_p3) }
  0x48   : > { %359 = vst [vmem:[%s331_s9 + $0x20] sm:$0xff] (%p4824_p3), %v3093_v20  ;;  %361 = vst [vmem:[%s331_s9 + $0x28] sm:$0xff] (%p4824_p3), %v3094_v21  ;;  %v3096_v23 = vld [vmem:[%s4623_s18 + $0x78] sm:$0xff] (%p4824_p3)  ;;  %v3097_v24 = vld [vmem:[%s4623_s18 + $0xa0] sm:$0xff] (%p4824_p3) }
  0x49   : > { %363 = vst [vmem:[%s331_s9 + $0x30] sm:$0xff] (%p4824_p3), %v3095_v22  ;;  %365 = vst [vmem:[%s331_s9 + $0x38] sm:$0xff] (%p4824_p3), %v3096_v23  ;;  %v3098_v25 = vld [vmem:[%s4623_s18 + $0xa8] sm:$0xff] (%p4824_p3)  ;;  %v3099_v26 = vld [vmem:[%s4623_s18 + $0xb0] sm:$0xff] (%p4824_p3) }
  0x4a   : > { %367 = vst [vmem:[%s331_s9 + $0x40] sm:$0xff] %v3097_v24  ;;  %v3100_v27 = vld [vmem:[%s4623_s18 + $0xb8] sm:$0xff]  ;;  %369 = vst [vmem:[%s331_s9 + $0x48] sm:$0xff] %v3098_v25  ;;  %v3101_v28 = vld [vmem:[%s4623_s18 + $0xe0] sm:$0xff] }
  0x4b   : > { %371 = vst [vmem:[%s331_s9 + $0x50] sm:$0xff] %v3099_v26  ;;  %373 = vst [vmem:[%s331_s9 + $0x58] sm:$0xff] %v3100_v27  ;;  %v3102_v29 = vld [vmem:[%s4623_s18 + $0xe8] sm:$0xff]  ;;  %v3103_v30 = vld [vmem:[%s4623_s18 + $0xf0] sm:$0xff] }
  0x4c   : > { %375 = vst [vmem:[%s331_s9 + $0x60] sm:$0xff] %v3101_v28  ;;  %377 = vst [vmem:[%s331_s9 + $0x68] sm:$0xff] %v3102_v29  ;;  %v3104_v31 = vld [vmem:[%s4623_s18 + $0xf8] sm:$0xff] }
  0x4d   : > { %379 = vst [vmem:[%s331_s9 + $0x70] sm:$0xff] %v3103_v30  ;;  %381 = vst [vmem:[%s331_s9 + $0x78] sm:$0xff] %v3104_v31 }
  0x4e PF: > { %p4826_p8 = scmp.ne.s32.totalorder %s4821_s22, 0 }
  0x4f   : > { %s393_s20 = sand.u32 (!%p4826_p8), 1, %s4441_s29   ;;  %s400_s21 = sand.u32 (!%p4826_p8), 1, %s4433_s27  }
  0x50   : > { %390 = sbr.rel (%p4826_p8) target bundleno = 1469 (0x5bd), region = 78  ;;  %s3106_s14 = sshll.u32 (!%p4826_p8), %s393_s20, 7 }
  0x51   : > { %s3107_s13 = sshll.u32 (!%p4826_p8), %s400_s21, 7  ;;  %s4645_s19 = scalar_lea.vmem (!%p4826_p8), [#allocation4], %s3106_s14 }
  0x52   : > { %s4647_s23 = scalar_lea.vmem (!%p4826_p8), [#allocation5], %s3107_s13  ;;  %p4827_p9 = scmp.eq.s32.totalorder (!%p4826_p8), %s4525_s10, 0 }
  0x57   : > { %4428 = dma.done.wait (%p4827_p9), [#allocation7], 32768   ;;  %p4828_p10 = pmov %p4827_p9 }
  0x58   : > { %s3109_s22 = sshll.u32 %s4525_s10, 2  ;;  %s456_s16 = ssub.s32 1, %s4525_s10 }
  0x59   : > { %4430 = vsyncadd (%p4828_p10), [#allocation7], 4294934528  ;;  %p451_p11 = scmp.lt.s32.totalorder %s3109_s22, 7  ;;  %s3111_s15 = sshll.u32 %s456_s16, 2 }
  0x5a   : > { %p458_p13 = scmp.lt.s32.totalorder %s3111_s15, 7  ;;  %p4829_p1 = scmp.ne.s32.totalorder %s4525_s10, 0 }
  0x5b   : > { %s4838_s22 = smov (!%p451_p11, %s3109_s22), 7  ;;  %v468_v32 = vld [vmem:[%s4808_s3] sm:$0xff] (!%p4829_p1)  ;;  %v469_v33 = vld [vmem:[%s4808_s3 + $0x8] sm:$0xff] (!%p4829_p1) }
  0x5c   : > { %s4840_s15 = smov (!%p458_p13, %s3111_s15), 7  ;;  %s3110_s27 = sshll.u32 %s4838_s22, 3  ;;  %v472_v34 = vld [vmem:[%s4809_s4] sm:$0xff] (!%p4829_p1)  ;;  %470 = vst [vmem:[#allocation2] sm:$0xff] (!%p4829_p1), %v468_v32  ;;  %471 = vst [vmem:[#allocation2 + $0x8] sm:$0xff] (!%p4829_p1), %v469_v33  ;;  %v473_v35 = vld [vmem:[%s4809_s4 + $0x8] sm:$0xff] (!%p4829_p1) }
  0x5d   : > { %s4658_s25 = scalar_lea.vmem %s4810_s5, %s3110_s27  ;;  %s3112_s26 = sshll.u32 %s4840_s15, 3  ;;  %474 = vst [vmem:[#allocation3] sm:$0xff] (!%p4829_p1), %v472_v34  ;;  %475 = vst [vmem:[#allocation3 + $0x8] sm:$0xff] (!%p4829_p1), %v473_v35 }
  0x5e   : > { %s4663_s18 = scalar_lea.vmem %s4811_s6, %s3112_s26  ;;  %467 = sbr.rel (%p4829_p1) target bundleno = 101 (0x65), region = 94 }
  0x65 PF: > { %v492_v36 = vld [vmem:[#allocation6 + $0x8] sm:$0xff]  ;;  %v491_v38 = vld [vmem:[#allocation6] sm:$0xff]  ;;  %v494_v54 = vld [vmem:[#allocation6 + $0x18] sm:$0xff]  ;;  %p3168_p4 = scmp.ne.s32.totalorder %s4525_s10, 1 }
  0x66   : > { %v500_v37 = vld [vmem:[#allocation6 + $0x48] sm:$0xff]  ;;  %v499_v40 = vld [vmem:[#allocation6 + $0x40] sm:$0xff]  ;;  %v502_v55 = vld [vmem:[#allocation6 + $0x58] sm:$0xff] }
  0x67   : > { %v3174_v39 = vpack.c.bf16 %v500_v37, %v492_v36  ;;  %v508_v41 = vld [vmem:[#allocation6 + $0x88] sm:$0xff]  ;;  %v3176_v43 = vpack.c.bf16 %v499_v40, %v491_v38  ;;  %v507_v45 = vld [vmem:[#allocation6 + $0x80] sm:$0xff]  ;;  %v3238_v57 = vpack.c.bf16 %v502_v55, %v494_v54  ;;  %v493_v58 = vld [vmem:[#allocation6 + $0x10] sm:$0xff] }
  0x68   : > { %v516_v42 = vld [vmem:[#allocation6 + $0xc8] sm:$0xff]  ;;  %v515_v46 = vld [vmem:[#allocation6 + $0xc0] sm:$0xff]  ;;  %v501_v59 = vld [vmem:[#allocation6 + $0x50] sm:$0xff] }
  0x69   : > { %v3178_v44 = vpack.c.bf16 %v516_v42, %v508_v41  ;;  %v524_v47 = vld [vmem:[#allocation6 + $0x108] sm:$0xff]  ;;  %3175 = vmatprep.subr.bf16.mxu0 %v3174_v39  ;;  %v3180_v49 = vpack.c.bf16 %v515_v46, %v507_v45  ;;  %v523_v50 = vld [vmem:[#allocation6 + $0x100] sm:$0xff]  ;;  %v3240_v60 = vpack.c.bf16 %v501_v59, %v493_v58  ;;  %3239 = vmatprep.subr.bf16.mxu1 %v3238_v57  ;;  %v510_v62 = vld [vmem:[#allocation6 + $0x98] sm:$0xff] }
  0x6a   : > { %v532_v48 = vld [vmem:[#allocation6 + $0x148] sm:$0xff]  ;;  %3177 = vmatpush1.bf16.msra.mxu0 %v3176_v43  ;;  %v531_v51 = vld [vmem:[#allocation6 + $0x140] sm:$0xff]  ;;  %v518_v63 = vld [vmem:[#allocation6 + $0xd8] sm:$0xff] }
  0x6b   : > { %3179 = vmatprep.subr.bf16.mxu0 %v3178_v44  ;;  %v3182_v52 = vpack.c.bf16 %v532_v48, %v524_v47  ;;  %v540_v53 = vld [vmem:[#allocation6 + $0x188] sm:$0xff]  ;;  %v3184_v61 = vpack.c.bf16 %v531_v51, %v523_v50  ;;  %v509_v0 = vld [vmem:[#allocation6 + $0x90] sm:$0xff]  ;;  %v539_v2 = vld [vmem:[#allocation6 + $0x180] sm:$0xff]  ;;  %3241 = vmatpush1.bf16.msra.mxu1 %v3240_v60  ;;  %v3242_v4 = vpack.c.bf16 %v518_v63, %v510_v62 }
  0x6c   : > { %v548_v56 = vld [vmem:[#allocation6 + $0x1c8] sm:$0xff]  ;;  %v547_v3 = vld [vmem:[#allocation6 + $0x1c0] sm:$0xff]  ;;  %v517_v5 = vld [vmem:[#allocation6 + $0xd0] sm:$0xff] }
  0x6d   : > { %v3186_v1 = vpack.c.bf16 %v548_v56, %v540_v53  ;;  %v556_v6 = vld [vmem:[#allocation6 + $0x208] sm:$0xff]  ;;  %v3244_v8 = vpack.c.bf16 %v517_v5, %v509_v0  ;;  %v526_v9 = vld [vmem:[#allocation6 + $0x118] sm:$0xff]  ;;  %3243 = vmatprep.subr.bf16.mxu1 %v3242_v4  ;;  %v525_v11 = vld [vmem:[#allocation6 + $0x110] sm:$0xff]  ;;  %v3188_v13 = vpack.c.bf16 %v547_v3, %v539_v2 }
  0x6e   : > { %3181 = vmatpush1.bf16.msra.mxu0 %v3180_v49  ;;  %v564_v7 = vld [vmem:[#allocation6 + $0x248] sm:$0xff]  ;;  %v534_v10 = vld [vmem:[#allocation6 + $0x158] sm:$0xff]  ;;  %v533_v12 = vld [vmem:[#allocation6 + $0x150] sm:$0xff] }
  0x6f   : > { %3183 = vmatprep.subr.bf16.mxu0 %v3182_v52  ;;  %v555_v14 = vld [vmem:[#allocation6 + $0x200] sm:$0xff]  ;;  %v3246_v16 = vpack.c.bf16 %v534_v10, %v526_v9  ;;  %v3190_v17 = vpack.c.bf16 %v564_v7, %v556_v6  ;;  %3245 = vmatpush1.bf16.msra.mxu1 %v3244_v8  ;;  %v572_v18 = vld [vmem:[#allocation6 + $0x288] sm:$0xff]  ;;  %v3248_v19 = vpack.c.bf16 %v533_v12, %v525_v11  ;;  %v542_v20 = vld [vmem:[#allocation6 + $0x198] sm:$0xff] }
  0x70   : > { %v563_v15 = vld [vmem:[#allocation6 + $0x240] sm:$0xff]  ;;  %v550_v21 = vld [vmem:[#allocation6 + $0x1d8] sm:$0xff]  ;;  %v580_v22 = vld [vmem:[#allocation6 + $0x2c8] sm:$0xff] }
  0x71   : > { %3247 = vmatprep.subr.bf16.mxu1 %v3246_v16  ;;  %v3250_v23 = vpack.c.bf16 %v550_v21, %v542_v20  ;;  %v541_v24 = vld [vmem:[#allocation6 + $0x190] sm:$0xff]  ;;  %v3192_v26 = vpack.c.bf16 %v563_v15, %v555_v14  ;;  %v558_v27 = vld [vmem:[#allocation6 + $0x218] sm:$0xff]  ;;  %v3194_v29 = vpack.c.bf16 %v580_v22, %v572_v18  ;;  %v571_v30 = vld [vmem:[#allocation6 + $0x280] sm:$0xff] }
  0x72   : > { %3185 = vmatpush1.bf16.msra.mxu0 %v3184_v61  ;;  %v549_v25 = vld [vmem:[#allocation6 + $0x1d0] sm:$0xff]  ;;  %v566_v28 = vld [vmem:[#allocation6 + $0x258] sm:$0xff]  ;;  %v579_v31 = vld [vmem:[#allocation6 + $0x2c0] sm:$0xff] }
  0x73   : > { %3187 = vmatprep.subr.bf16.mxu0 %v3186_v1  ;;  %3249 = vmatpush1.bf16.msra.mxu1 %v3248_v19  ;;  %v588_v32 = vld [vmem:[#allocation6 + $0x308] sm:$0xff]  ;;  %v3252_v33 = vpack.c.bf16 %v549_v25, %v541_v24  ;;  %v3254_v35 = vpack.c.bf16 %v566_v28, %v558_v27  ;;  %v557_v36 = vld [vmem:[#allocation6 + $0x210] sm:$0xff]  ;;  %v574_v38 = vld [vmem:[#allocation6 + $0x298] sm:$0xff]  ;;  %v3196_v40 = vpack.c.bf16 %v579_v31, %v571_v30 }
  0x74   : > { %v596_v34 = vld [vmem:[#allocation6 + $0x348] sm:$0xff]  ;;  %3251 = vmatprep.subr.bf16.mxu1 %v3250_v23  ;;  %v565_v37 = vld [vmem:[#allocation6 + $0x250] sm:$0xff]  ;;  %v582_v39 = vld [vmem:[#allocation6 + $0x2d8] sm:$0xff] }
  0x75   : > { %v3198_v41 = vpack.c.bf16 %v596_v34, %v588_v32  ;;  %v587_v42 = vld [vmem:[#allocation6 + $0x300] sm:$0xff]  ;;  %v604_v44 = vld [vmem:[#allocation6 + $0x388] sm:$0xff]  ;;  %v3256_v45 = vpack.c.bf16 %v565_v37, %v557_v36  ;;  %v3258_v47 = vpack.c.bf16 %v582_v39, %v574_v38  ;;  %v573_v48 = vld [vmem:[#allocation6 + $0x290] sm:$0xff] }
  0x76   : > { %3189 = vmatpush1.bf16.msra.mxu0 %v3188_v13  ;;  %v595_v43 = vld [vmem:[#allocation6 + $0x340] sm:$0xff]  ;;  %v612_v46 = vld [vmem:[#allocation6 + $0x3c8] sm:$0xff]  ;;  %v581_v49 = vld [vmem:[#allocation6 + $0x2d0] sm:$0xff] }
  0x77   : > { %3191 = vmatprep.subr.bf16.mxu0 %v3190_v17  ;;  %3253 = vmatpush1.bf16.msra.mxu1 %v3252_v33  ;;  %v590_v50 = vld [vmem:[#allocation6 + $0x318] sm:$0xff]  ;;  %v3200_v52 = vpack.c.bf16 %v595_v43, %v587_v42  ;;  %v3202_v53 = vpack.c.bf16 %v612_v46, %v604_v44  ;;  %v603_v54 = vld [vmem:[#allocation6 + $0x380] sm:$0xff]  ;;  %v620_v56 = vld [vmem:[#allocation6 + $0x408] sm:$0xff]  ;;  %v3260_v57 = vpack.c.bf16 %v581_v49, %v573_v48 }
  0x78   : > { %3255 = vmatprep.subr.bf16.mxu1 %v3254_v35  ;;  %v598_v51 = vld [vmem:[#allocation6 + $0x358] sm:$0xff]  ;;  %v611_v55 = vld [vmem:[#allocation6 + $0x3c0] sm:$0xff]  ;;  %v628_v58 = vld [vmem:[#allocation6 + $0x448] sm:$0xff] }
  0x79   : > { %v3262_v59 = vpack.c.bf16 %v598_v51, %v590_v50  ;;  %v589_v60 = vld [vmem:[#allocation6 + $0x310] sm:$0xff]  ;;  %v606_v62 = vld [vmem:[#allocation6 + $0x398] sm:$0xff]  ;;  %v3204_v0 = vpack.c.bf16 %v611_v55, %v603_v54  ;;  %v3206_v1 = vpack.c.bf16 %v628_v58, %v620_v56  ;;  %v619_v2 = vld [vmem:[#allocation6 + $0x400] sm:$0xff] }
  0x7a   : > { %3193 = vmatpush1.bf16.msra.mxu0 %v3192_v26  ;;  %v597_v61 = vld [vmem:[#allocation6 + $0x350] sm:$0xff]  ;;  %v614_v63 = vld [vmem:[#allocation6 + $0x3d8] sm:$0xff]  ;;  %v627_v3 = vld [vmem:[#allocation6 + $0x440] sm:$0xff] }
  0x7b   : > { %3195 = vmatprep.subr.bf16.mxu0 %v3194_v29  ;;  %3257 = vmatpush1.bf16.msra.mxu1 %v3256_v45  ;;  %v636_v4 = vld [vmem:[#allocation6 + $0x488] sm:$0xff]  ;;  %v3264_v5 = vpack.c.bf16 %v597_v61, %v589_v60  ;;  %v3266_v7 = vpack.c.bf16 %v614_v63, %v606_v62  ;;  %v605_v8 = vld [vmem:[#allocation6 + $0x390] sm:$0xff]  ;;  %v622_v10 = vld [vmem:[#allocation6 + $0x418] sm:$0xff]  ;;  %v3208_v12 = vpack.c.bf16 %v627_v3, %v619_v2 }
  0x7c   : > { %3259 = vmatprep.subr.bf16.mxu1 %v3258_v47  ;;  %v644_v6 = vld [vmem:[#allocation6 + $0x4c8] sm:$0xff]  ;;  %v613_v9 = vld [vmem:[#allocation6 + $0x3d0] sm:$0xff]  ;;  %v630_v11 = vld [vmem:[#allocation6 + $0x458] sm:$0xff] }
  0x7d   : > { %v3210_v13 = vpack.c.bf16 %v644_v6, %v636_v4  ;;  %v635_v14 = vld [vmem:[#allocation6 + $0x480] sm:$0xff]  ;;  %v652_v16 = vld [vmem:[#allocation6 + $0x508] sm:$0xff]  ;;  %v3268_v17 = vpack.c.bf16 %v613_v9, %v605_v8  ;;  %v3270_v19 = vpack.c.bf16 %v630_v11, %v622_v10  ;;  %v621_v20 = vld [vmem:[#allocation6 + $0x410] sm:$0xff] }
  0x7e   : > { %3197 = vmatpush1.bf16.msra.mxu0 %v3196_v40  ;;  %v643_v15 = vld [vmem:[#allocation6 + $0x4c0] sm:$0xff]  ;;  %v660_v18 = vld [vmem:[#allocation6 + $0x548] sm:$0xff]  ;;  %v629_v21 = vld [vmem:[#allocation6 + $0x450] sm:$0xff] }
  0x7f   : > { %3199 = vmatprep.subr.bf16.mxu0 %v3198_v41  ;;  %3261 = vmatpush1.bf16.msra.mxu1 %v3260_v57  ;;  %v638_v22 = vld [vmem:[#allocation6 + $0x498] sm:$0xff]  ;;  %v3212_v24 = vpack.c.bf16 %v643_v15, %v635_v14  ;;  %v651_v25 = vld [vmem:[#allocation6 + $0x500] sm:$0xff]  ;;  %v3214_v26 = vpack.c.bf16 %v660_v18, %v652_v16  ;;  %v668_v28 = vld [vmem:[#allocation6 + $0x588] sm:$0xff]  ;;  %v3272_v30 = vpack.c.bf16 %v629_v21, %v621_v20 }
  0x80   : > { %3263 = vmatprep.subr.bf16.mxu1 %v3262_v59  ;;  %v646_v23 = vld [vmem:[#allocation6 + $0x4d8] sm:$0xff]  ;;  %v659_v27 = vld [vmem:[#allocation6 + $0x540] sm:$0xff]  ;;  %v676_v29 = vld [vmem:[#allocation6 + $0x5c8] sm:$0xff] }
  0x81   : > { %v3274_v31 = vpack.c.bf16 %v646_v23, %v638_v22  ;;  %v637_v32 = vld [vmem:[#allocation6 + $0x490] sm:$0xff]  ;;  %v4679_v34 = vld [vmem:[#allocation2 + $0x8] sm:$0xff]  ;;  %v654_v35 = vld [vmem:[#allocation6 + $0x518] sm:$0xff]  ;;  %v3216_v37 = vpack.c.bf16 %v659_v27, %v651_v25  ;;  %v3218_v38 = vpack.c.bf16 %v676_v29, %v668_v28 }
  0x82   : > { %3201 = vmatpush1.bf16.msra.mxu0 %v3200_v52  ;;  %v645_v33 = vld [vmem:[#allocation6 + $0x4d0] sm:$0xff]  ;;  %v662_v36 = vld [vmem:[#allocation6 + $0x558] sm:$0xff]  ;;  %811 = vmatprep.mubr.f32.mxu0 %v4679_v34  ;;  %v667_v39 = vld [vmem:[#allocation6 + $0x580] sm:$0xff] }
  0x83   : > { %3203 = vmatprep.subr.bf16.mxu0 %v3202_v53  ;;  %3265 = vmatpush1.bf16.msra.mxu1 %v3264_v5  ;;  %v675_v40 = vld [vmem:[#allocation6 + $0x5c0] sm:$0xff]  ;;  %v684_v41 = vld [vmem:[#allocation6 + $0x608] sm:$0xff]  ;;  %v3276_v42 = vpack.c.bf16 %v645_v33, %v637_v32  ;;  %v3278_v44 = vpack.c.bf16 %v662_v36, %v654_v35  ;;  %v653_v45 = vld [vmem:[#allocation6 + $0x510] sm:$0xff] }
  0x84   : > { %3267 = vmatprep.subr.bf16.mxu1 %v3266_v7  ;;  %882 = vmatprep.mubr.f32.mxu1 %v4679_v34  ;;  %v692_v43 = vld [vmem:[#allocation6 + $0x648] sm:$0xff]  ;;  %v661_v46 = vld [vmem:[#allocation6 + $0x550] sm:$0xff]  ;;  %v670_v47 = vld [vmem:[#allocation6 + $0x598] sm:$0xff]  ;;  %v3220_v49 = vpack.c.bf16 %v675_v40, %v667_v39 }
  0x85   : > { %v678_v48 = vld [vmem:[#allocation6 + $0x5d8] sm:$0xff]  ;;  %v3222_v50 = vpack.c.bf16 %v692_v43, %v684_v41  ;;  %v683_v51 = vld [vmem:[#allocation6 + $0x600] sm:$0xff]  ;;  %v700_v53 = vld [vmem:[#allocation6 + $0x688] sm:$0xff]  ;;  %v3280_v54 = vpack.c.bf16 %v661_v46, %v653_v45 }
  0x86   : > { %3205 = vmatpush1.bf16.msra.mxu0 %v3204_v0  ;;  %v691_v52 = vld [vmem:[#allocation6 + $0x640] sm:$0xff]  ;;  %v708_v55 = vld [vmem:[#allocation6 + $0x6c8] sm:$0xff]  ;;  %v3282_v56 = vpack.c.bf16 %v678_v48, %v670_v47  ;;  %v669_v57 = vld [vmem:[#allocation6 + $0x590] sm:$0xff] }
  0x87   : > { %3207 = vmatprep.subr.bf16.mxu0 %v3206_v1  ;;  %3269 = vmatpush1.bf16.msra.mxu1 %v3268_v17  ;;  %v677_v58 = vld [vmem:[#allocation6 + $0x5d0] sm:$0xff]  ;;  %v686_v59 = vld [vmem:[#allocation6 + $0x618] sm:$0xff]  ;;  %v3224_v61 = vpack.c.bf16 %v691_v52, %v683_v51  ;;  %v3226_v62 = vpack.c.bf16 %v708_v55, %v700_v53  ;;  %v699_v63 = vld [vmem:[#allocation6 + $0x680] sm:$0xff] }
  0x88   : > { %3271 = vmatprep.subr.bf16.mxu1 %v3270_v19  ;;  %v694_v60 = vld [vmem:[#allocation6 + $0x658] sm:$0xff]  ;;  %v707_v0 = vld [vmem:[#allocation6 + $0x6c0] sm:$0xff]  ;;  %v716_v1 = vld [vmem:[#allocation6 + $0x708] sm:$0xff]  ;;  %v3284_v2 = vpack.c.bf16 %v677_v58, %v669_v57 }
  0x89   : > { %v724_v3 = vld [vmem:[#allocation6 + $0x748] sm:$0xff]  ;;  %v3286_v4 = vpack.c.bf16 %v694_v60, %v686_v59  ;;  %v685_v5 = vld [vmem:[#allocation6 + $0x610] sm:$0xff]  ;;  %v702_v7 = vld [vmem:[#allocation6 + $0x698] sm:$0xff]  ;;  %v3228_v9 = vpack.c.bf16 %v707_v0, %v699_v63 }
  0x8a   : > { %3209 = vmatpush1.bf16.msra.mxu0 %v3208_v12  ;;  %v693_v6 = vld [vmem:[#allocation6 + $0x650] sm:$0xff]  ;;  %v710_v8 = vld [vmem:[#allocation6 + $0x6d8] sm:$0xff]  ;;  %v3230_v10 = vpack.c.bf16 %v724_v3, %v716_v1  ;;  %v715_v11 = vld [vmem:[#allocation6 + $0x700] sm:$0xff] }
  0x8b   : > { %3211 = vmatprep.subr.bf16.mxu0 %v3210_v13  ;;  %3273 = vmatpush1.bf16.msra.mxu1 %v3272_v30  ;;  %v723_v12 = vld [vmem:[#allocation6 + $0x740] sm:$0xff]  ;;  %v732_v13 = vld [vmem:[#allocation6 + $0x788] sm:$0xff]  ;;  %v3288_v14 = vpack.c.bf16 %v693_v6, %v685_v5  ;;  %v3290_v16 = vpack.c.bf16 %v710_v8, %v702_v7  ;;  %v701_v17 = vld [vmem:[#allocation6 + $0x690] sm:$0xff] }
  0x8c   : > { %3275 = vmatprep.subr.bf16.mxu1 %v3274_v31  ;;  %v740_v15 = vld [vmem:[#allocation6 + $0x7c8] sm:$0xff]  ;;  %v709_v18 = vld [vmem:[#allocation6 + $0x6d0] sm:$0xff]  ;;  %v718_v19 = vld [vmem:[#allocation6 + $0x718] sm:$0xff]  ;;  %v3232_v21 = vpack.c.bf16 %v723_v12, %v715_v11 }
  0x8d   : > { %v726_v20 = vld [vmem:[#allocation6 + $0x758] sm:$0xff]  ;;  %v3234_v22 = vpack.c.bf16 %v740_v15, %v732_v13  ;;  %v731_v23 = vld [vmem:[#allocation6 + $0x780] sm:$0xff]  ;;  %v496_v25 = vld [vmem:[#allocation6 + $0x28] sm:$0xff] }
  0x8e   : > { %3213 = vmatpush1.bf16.msra.mxu0 %v3212_v24  ;;  %v739_v24 = vld [vmem:[#allocation6 + $0x7c0] sm:$0xff]  ;;  %v504_v27 = vld [vmem:[#allocation6 + $0x68] sm:$0xff]  ;;  %v3294_v28 = vpack.c.bf16 %v726_v20, %v718_v19  ;;  %v717_v29 = vld [vmem:[#allocation6 + $0x710] sm:$0xff] }
  0x8f   : > { %3215 = vmatprep.subr.bf16.mxu0 %v3214_v26  ;;  %3277 = vmatpush1.bf16.msra.mxu1 %v3276_v42  ;;  %v3292_v26 = vpack.c.bf16 %v709_v18, %v701_v17  ;;  %v725_v30 = vld [vmem:[#allocation6 + $0x750] sm:$0xff]  ;;  %v734_v31 = vld [vmem:[#allocation6 + $0x798] sm:$0xff]  ;;  %v3236_v33 = vpack.c.bf16 %v739_v24, %v731_v23  ;;  %v3302_v35 = vpack.c.bf16 %v504_v27, %v496_v25  ;;  %v495_v36 = vld [vmem:[#allocation6 + $0x20] sm:$0xff] }
  0x90   : > { %3279 = vmatprep.subr.bf16.mxu1 %v3278_v44  ;;  %v742_v32 = vld [vmem:[#allocation6 + $0x7d8] sm:$0xff]  ;;  %v3296_v39 = vpack.c.bf16 %v725_v30, %v717_v29  ;;  %v520_v40 = vld [vmem:[#allocation6 + $0xe8] sm:$0xff]  ;;  %v733_v42 = vld [vmem:[#allocation6 + $0x790] sm:$0xff] }
  0x91   : > { %v3298_v41 = vpack.c.bf16 %v742_v32, %v734_v31  ;;  %v741_v43 = vld [vmem:[#allocation6 + $0x7d0] sm:$0xff]  ;;  %v498_v44 = vld [vmem:[#allocation6 + $0x38] sm:$0xff]  ;;  %v4683_v46 = vld [vmem:[#allocation2] sm:$0xff] }
  0x92   : > { %3217 = vmatpush1.bf16.msra.mxu0 %v3216_v37  ;;  %v503_v37 = vld [vmem:[#allocation6 + $0x60] sm:$0xff]  ;;  %v506_v45 = vld [vmem:[#allocation6 + $0x78] sm:$0xff]  ;;  %v528_v51 = vld [vmem:[#allocation6 + $0x128] sm:$0xff]  ;;  %v3300_v52 = vpack.c.bf16 %v741_v43, %v733_v42 }
  0x93   : > { %3219 = vmatprep.subr.bf16.mxu0 %v3218_v38  ;;  %3281 = vmatpush1.bf16.msra.mxu1 %v3280_v54  ;;  %v512_v38 = vld [vmem:[#allocation6 + $0xa8] sm:$0xff]  ;;  %v3304_v47 = vpack.c.bf16 %v503_v37, %v495_v36  ;;  %v3366_v54 = vpack.c.bf16 %v506_v45, %v498_v44  ;;  %v497_v55 = vld [vmem:[#allocation6 + $0x30] sm:$0xff]  ;;  %v514_v57 = vld [vmem:[#allocation6 + $0xb8] sm:$0xff] }
  0x94   : > { %3283 = vmatprep.subr.bf16.mxu1 %v3282_v56  ;;  %v3306_v48 = vpack.c.bf16 %v520_v40, %v512_v38  ;;  %v536_v53 = vld [vmem:[#allocation6 + $0x168] sm:$0xff]  ;;  %v505_v56 = vld [vmem:[#allocation6 + $0x70] sm:$0xff]  ;;  %v522_v58 = vld [vmem:[#allocation6 + $0xf8] sm:$0xff] }
  0x95   : > { %v3310_v60 = vpack.c.bf16 %v536_v53, %v528_v51  ;;  %v544_v63 = vld [vmem:[#allocation6 + $0x1a8] sm:$0xff]  ;;  %v3368_v0 = vpack.c.bf16 %v505_v56, %v497_v55  ;;  %v513_v3 = vld [vmem:[#allocation6 + $0xb0] sm:$0xff]  ;;  %v530_v5 = vld [vmem:[#allocation6 + $0x138] sm:$0xff] }
  0x96   : > { %3221 = vmatpush1.bf16.msra.mxu0 %v3220_v49  ;;  %v511_v49 = vld [vmem:[#allocation6 + $0xa0] sm:$0xff]  ;;  %v552_v1 = vld [vmem:[#allocation6 + $0x1e8] sm:$0xff]  ;;  %v538_v6 = vld [vmem:[#allocation6 + $0x178] sm:$0xff] }
  0x97   : > { %3223 = vmatprep.subr.bf16.mxu0 %v3222_v50  ;;  %3285 = vmatpush1.bf16.msra.mxu1 %v3284_v2  ;;  %v519_v50 = vld [vmem:[#allocation6 + $0xe0] sm:$0xff]  ;;  %v3370_v2 = vpack.c.bf16 %v522_v58, %v514_v57  ;;  %v3314_v8 = vpack.c.bf16 %v552_v1, %v544_v63  ;;  %v560_v11 = vld [vmem:[#allocation6 + $0x228] sm:$0xff]  ;;  %v529_v15 = vld [vmem:[#allocation6 + $0x130] sm:$0xff] }
  0x98   : > { %3287 = vmatprep.subr.bf16.mxu1 %v3286_v4  ;;  %v3308_v59 = vpack.c.bf16 %v519_v50, %v511_v49  ;;  %v521_v4 = vld [vmem:[#allocation6 + $0xf0] sm:$0xff]  ;;  %v568_v13 = vld [vmem:[#allocation6 + $0x268] sm:$0xff]  ;;  %v546_v17 = vld [vmem:[#allocation6 + $0x1b8] sm:$0xff] }
  0x99   : > { %v3372_v12 = vpack.c.bf16 %v521_v4, %v513_v3  ;;  %v554_v18 = vld [vmem:[#allocation6 + $0x1f8] sm:$0xff]  ;;  %v3318_v20 = vpack.c.bf16 %v568_v13, %v560_v11  ;;  %v576_v23 = vld [vmem:[#allocation6 + $0x2a8] sm:$0xff]  ;;  %v545_v27 = vld [vmem:[#allocation6 + $0x1b0] sm:$0xff] }
  0x9a   : > { %3225 = vmatpush1.bf16.msra.mxu0 %v3224_v61  ;;  %v527_v61 = vld [vmem:[#allocation6 + $0x120] sm:$0xff]  ;;  %v584_v25 = vld [vmem:[#allocation6 + $0x2e8] sm:$0xff]  ;;  %v562_v29 = vld [vmem:[#allocation6 + $0x238] sm:$0xff] }
  0x9b   : > { %3227 = vmatprep.subr.bf16.mxu0 %v3226_v62  ;;  %3289 = vmatpush1.bf16.msra.mxu1 %v3288_v14  ;;  %v535_v62 = vld [vmem:[#allocation6 + $0x160] sm:$0xff]  ;;  %v3374_v14 = vpack.c.bf16 %v538_v6, %v530_v5  ;;  %v570_v30 = vld [vmem:[#allocation6 + $0x278] sm:$0xff]  ;;  %v3322_v31 = vpack.c.bf16 %v584_v25, %v576_v23  ;;  %v600_v37 = vld [vmem:[#allocation6 + $0x368] sm:$0xff] }
  0x9c   : > { %3291 = vmatprep.subr.bf16.mxu1 %v3290_v16  ;;  %v3312_v7 = vpack.c.bf16 %v535_v62, %v527_v61  ;;  %v537_v16 = vld [vmem:[#allocation6 + $0x170] sm:$0xff]  ;;  %v575_v32 = vld [vmem:[#allocation6 + $0x2a0] sm:$0xff]  ;;  %v3382_v38 = vpack.c.bf16 %v570_v30, %v562_v29  ;;  %v586_v42 = vld [vmem:[#allocation6 + $0x2f8] sm:$0xff] }
  0x9d   : > { %v3376_v24 = vpack.c.bf16 %v537_v16, %v529_v15  ;;  %v569_v40 = vld [vmem:[#allocation6 + $0x270] sm:$0xff]  ;;  %v591_v45 = vld [vmem:[#allocation6 + $0x320] sm:$0xff]  ;;  %v616_v50 = vld [vmem:[#allocation6 + $0x3e8] sm:$0xff] }
  0x9e   : > { %3229 = vmatpush1.bf16.msra.mxu0 %v3228_v9  ;;  %v543_v9 = vld [vmem:[#allocation6 + $0x1a0] sm:$0xff]  ;;  %v585_v53 = vld [vmem:[#allocation6 + $0x2f0] sm:$0xff]  ;;  %v602_v55 = vld [vmem:[#allocation6 + $0x378] sm:$0xff] }
  0x9f   : > { %3231 = vmatprep.subr.bf16.mxu0 %v3230_v10  ;;  %3293 = vmatpush1.bf16.msra.mxu1 %v3292_v26  ;;  %v551_v10 = vld [vmem:[#allocation6 + $0x1e0] sm:$0xff]  ;;  %v3378_v26 = vpack.c.bf16 %v554_v18, %v546_v17  ;;  %v632_v62 = vld [vmem:[#allocation6 + $0x468] sm:$0xff]  ;;  %v601_v1 = vld [vmem:[#allocation6 + $0x370] sm:$0xff] }
  0xa0   : > { %3295 = vmatprep.subr.bf16.mxu1 %v3294_v28  ;;  %v3316_v19 = vpack.c.bf16 %v551_v10, %v543_v9  ;;  %v553_v28 = vld [vmem:[#allocation6 + $0x1f0] sm:$0xff]  ;;  %v607_v58 = vld [vmem:[#allocation6 + $0x3a0] sm:$0xff]  ;;  %v618_v3 = vld [vmem:[#allocation6 + $0x3f8] sm:$0xff] }
  0xa1   : > { %v3380_v36 = vpack.c.bf16 %v553_v28, %v545_v27  ;;  %v623_v6 = vld [vmem:[#allocation6 + $0x420] sm:$0xff]  ;;  %v648_v10 = vld [vmem:[#allocation6 + $0x4e8] sm:$0xff]  ;;  %v617_v13 = vld [vmem:[#allocation6 + $0x3f0] sm:$0xff] }
  0xa2   : > { %3233 = vmatpush1.bf16.msra.mxu0 %v3232_v21  ;;  %v559_v21 = vld [vmem:[#allocation6 + $0x220] sm:$0xff]  ;;  %v634_v15 = vld [vmem:[#allocation6 + $0x478] sm:$0xff]  ;;  %v633_v25 = vld [vmem:[#allocation6 + $0x470] sm:$0xff] }
  0xa3   : > { %3235 = vmatprep.subr.bf16.mxu0 %v3234_v22  ;;  %3297 = vmatpush1.bf16.msra.mxu1 %v3296_v39  ;;  %v567_v22 = vld [vmem:[#allocation6 + $0x260] sm:$0xff]  ;;  %v561_v39 = vld [vmem:[#allocation6 + $0x230] sm:$0xff]  ;;  %v650_v27 = vld [vmem:[#allocation6 + $0x4f8] sm:$0xff] }
  0xa4   : > { %3299 = vmatprep.subr.bf16.mxu1 %v3298_v41  ;;  %v578_v41 = vld [vmem:[#allocation6 + $0x2b8] sm:$0xff]  ;;  %v3384_v49 = vpack.c.bf16 %v569_v40, %v561_v39  ;;  %v639_v18 = vld [vmem:[#allocation6 + $0x4a0] sm:$0xff] }
  0xa5   : > { %v3386_v51 = vpack.c.bf16 %v586_v42, %v578_v41  ;;  %v655_v30 = vld [vmem:[#allocation6 + $0x520] sm:$0xff]  ;;  %v666_v39 = vld [vmem:[#allocation6 + $0x578] sm:$0xff] }
  0xa6   : > { %3237 = vmatpush1.bf16.msra.mxu0 %v3236_v33  ;;  %v583_v33 = vld [vmem:[#allocation6 + $0x2e0] sm:$0xff] }
  0xa7   : > { %3303 = vmatprep.subr.bf16.mxu0 %v3302_v35  ;;  %3301 = vmatpush1.bf16.msra.mxu1 %v3300_v52  ;;  %v592_v35 = vld [vmem:[#allocation6 + $0x328] sm:$0xff]  ;;  %v3324_v43 = vpack.c.bf16 %v583_v33, %v575_v32  ;;  %v577_v52 = vld [vmem:[#allocation6 + $0x2b0] sm:$0xff]  ;;  %v671_v42 = vld [vmem:[#allocation6 + $0x5a0] sm:$0xff] }
  0xa8   : > { %3367 = vmatprep.subr.bf16.mxu1 %v3366_v54  ;;  %v3326_v44 = vpack.c.bf16 %v600_v37, %v592_v35  ;;  %v594_v54 = vld [vmem:[#allocation6 + $0x338] sm:$0xff]  ;;  %v3388_v61 = vpack.c.bf16 %v585_v53, %v577_v52  ;;  %v680_v33 = vld [vmem:[#allocation6 + $0x5e8] sm:$0xff]  ;;  %v649_v37 = vld [vmem:[#allocation6 + $0x4f0] sm:$0xff] }
  0xa9   : > { %812 = vmatmul.mubr.f32.vlgmr.msra.gmra.mrb[0].mxu0 %v4683_v46  ;;  %v3390_v63 = vpack.c.bf16 %v602_v55, %v594_v54  ;;  %v682_v52 = vld [vmem:[#allocation6 + $0x5f8] sm:$0xff]  ;;  %v687_v55 = vld [vmem:[#allocation6 + $0x620] sm:$0xff] }
  0xaa   : > { %3305 = vmatpush1.bf16.msra.mxu0 %v3304_v47  ;;  %953 = vmatprep.mubr.f32.mxu0 %v4679_v34  ;;  %v599_v47 = vld [vmem:[#allocation6 + $0x360] sm:$0xff] }
  0xab   : > { %3307 = vmatprep.subr.bf16.mxu0 %v3306_v48  ;;  %883 = vmatmul.mubr.f32.vlgmr.msra.gmra.mrb[0].mxu1 %v4683_v46  ;;  %v608_v48 = vld [vmem:[#allocation6 + $0x3a8] sm:$0xff]  ;;  %v3328_v56 = vpack.c.bf16 %v599_v47, %v591_v45 }
  0xac   : > { %3369 = vmatpush1.bf16.msra.mxu1 %v3368_v0  ;;  %1024 = vmatprep.mubr.f32.mxu1 %v4679_v34  ;;  %v3320_v34 = vpack.c.bf16 %v567_v22, %v559_v21  ;;  %v3330_v57 = vpack.c.bf16 %v616_v50, %v608_v48  ;;  %v593_v0 = vld [vmem:[#allocation6 + $0x330] sm:$0xff]  ;;  %v664_v22 = vld [vmem:[#allocation6 + $0x568] sm:$0xff] }
  0xad   : > { %3371 = vmatprep.subr.bf16.mxu1 %v3370_v2  ;;  %v610_v2 = vld [vmem:[#allocation6 + $0x3b8] sm:$0xff]  ;;  %v3392_v9 = vpack.c.bf16 %v601_v1, %v593_v0  ;;  %v696_v47 = vld [vmem:[#allocation6 + $0x668] sm:$0xff]  ;;  %v665_v50 = vld [vmem:[#allocation6 + $0x570] sm:$0xff] }
  0xae   : > { %3309 = vmatpush1.bf16.msra.mxu0 %v3308_v59  ;;  %v615_v59 = vld [vmem:[#allocation6 + $0x3e0] sm:$0xff]  ;;  %v3394_v11 = vpack.c.bf16 %v618_v3, %v610_v2  ;;  %v698_v0 = vld [vmem:[#allocation6 + $0x678] sm:$0xff] }
  0xaf   : > { %3311 = vmatprep.subr.bf16.mxu0 %v3310_v60  ;;  %v624_v60 = vld [vmem:[#allocation6 + $0x428] sm:$0xff]  ;;  %v3332_v4 = vpack.c.bf16 %v615_v59, %v607_v58  ;;  %v703_v3 = vld [vmem:[#allocation6 + $0x6a0] sm:$0xff] }
  0xb0   : > { %3373 = vmatpush1.bf16.msra.mxu1 %v3372_v12  ;;  %v3334_v5 = vpack.c.bf16 %v632_v62, %v624_v60  ;;  %v609_v12 = vld [vmem:[#allocation6 + $0x3b0] sm:$0xff]  ;;  %v712_v59 = vld [vmem:[#allocation6 + $0x6e8] sm:$0xff] }
  0xb1   : > { %3375 = vmatprep.subr.bf16.mxu1 %v3374_v14  ;;  %v626_v14 = vld [vmem:[#allocation6 + $0x438] sm:$0xff]  ;;  %v3396_v21 = vpack.c.bf16 %v617_v13, %v609_v12  ;;  %v681_v62 = vld [vmem:[#allocation6 + $0x5f0] sm:$0xff] }
  0xb2   : > { %3313 = vmatpush1.bf16.msra.mxu0 %v3312_v7  ;;  %v631_v7 = vld [vmem:[#allocation6 + $0x460] sm:$0xff]  ;;  %v3398_v23 = vpack.c.bf16 %v634_v15, %v626_v14  ;;  %v714_v12 = vld [vmem:[#allocation6 + $0x6f8] sm:$0xff] }
  0xb3   : > { %3315 = vmatprep.subr.bf16.mxu0 %v3314_v8  ;;  %v640_v8 = vld [vmem:[#allocation6 + $0x4a8] sm:$0xff]  ;;  %v3336_v16 = vpack.c.bf16 %v631_v7, %v623_v6  ;;  %v719_v15 = vld [vmem:[#allocation6 + $0x720] sm:$0xff] }
  0xb4   : > { %3377 = vmatpush1.bf16.msra.mxu1 %v3376_v24  ;;  %v3338_v17 = vpack.c.bf16 %v648_v10, %v640_v8  ;;  %v625_v24 = vld [vmem:[#allocation6 + $0x430] sm:$0xff]  ;;  %v728_v7 = vld [vmem:[#allocation6 + $0x768] sm:$0xff] }
  0xb5   : > { %3379 = vmatprep.subr.bf16.mxu1 %v3378_v26  ;;  %v642_v26 = vld [vmem:[#allocation6 + $0x4b8] sm:$0xff]  ;;  %v3400_v32 = vpack.c.bf16 %v633_v25, %v625_v24  ;;  %v697_v10 = vld [vmem:[#allocation6 + $0x670] sm:$0xff] }
  0xb6   : > { %3317 = vmatpush1.bf16.msra.mxu0 %v3316_v19  ;;  %v647_v19 = vld [vmem:[#allocation6 + $0x4e0] sm:$0xff]  ;;  %v3402_v35 = vpack.c.bf16 %v650_v27, %v642_v26  ;;  %v730_v24 = vld [vmem:[#allocation6 + $0x778] sm:$0xff] }
  0xb7   : > { %3319 = vmatprep.subr.bf16.mxu0 %v3318_v20  ;;  %v656_v20 = vld [vmem:[#allocation6 + $0x528] sm:$0xff]  ;;  %v3340_v28 = vpack.c.bf16 %v647_v19, %v639_v18  ;;  %v735_v27 = vld [vmem:[#allocation6 + $0x7a0] sm:$0xff] }
  0xb8   : > { %3381 = vmatpush1.bf16.msra.mxu1 %v3380_v36  ;;  %v3342_v29 = vpack.c.bf16 %v664_v22, %v656_v20  ;;  %v641_v36 = vld [vmem:[#allocation6 + $0x4b0] sm:$0xff]  ;;  %v744_v19 = vld [vmem:[#allocation6 + $0x7e8] sm:$0xff] }
  0xb9   : > { %3383 = vmatprep.subr.bf16.mxu1 %v3382_v38  ;;  %v658_v38 = vld [vmem:[#allocation6 + $0x538] sm:$0xff]  ;;  %v3404_v45 = vpack.c.bf16 %v649_v37, %v641_v36  ;;  %v713_v22 = vld [vmem:[#allocation6 + $0x6f0] sm:$0xff] }
  0xba   : > { %3321 = vmatpush1.bf16.msra.mxu0 %v3320_v34  ;;  %v663_v34 = vld [vmem:[#allocation6 + $0x560] sm:$0xff]  ;;  %v3406_v48 = vpack.c.bf16 %v666_v39, %v658_v38  ;;  %v737_v38 = vld [vmem:[#allocation6 + $0x7b0] sm:$0xff] }
  0xbb   : > { %3323 = vmatprep.subr.bf16.mxu0 %v3322_v31  ;;  %v672_v31 = vld [vmem:[#allocation6 + $0x5a8] sm:$0xff]  ;;  %v3344_v40 = vpack.c.bf16 %v663_v34, %v655_v30  ;;  %v721_v34 = vld [vmem:[#allocation6 + $0x730] sm:$0xff] }
  0xbc   : > { %3385 = vmatpush1.bf16.msra.mxu1 %v3384_v49  ;;  %v3346_v41 = vpack.c.bf16 %v680_v33, %v672_v31  ;;  %v657_v49 = vld [vmem:[#allocation6 + $0x530] sm:$0xff]  ;;  %v746_v33 = vld [vmem:[#allocation6 + $0x7f8] sm:$0xff] }
  0xbd   : > { %3387 = vmatprep.subr.bf16.mxu1 %v3386_v51  ;;  %v674_v51 = vld [vmem:[#allocation6 + $0x5b8] sm:$0xff]  ;;  %v3408_v58 = vpack.c.bf16 %v665_v50, %v657_v49  ;;  %v729_v31 = vld [vmem:[#allocation6 + $0x770] sm:$0xff] }
  0xbe   : > { %3325 = vmatpush1.bf16.msra.mxu0 %v3324_v43  ;;  %v679_v43 = vld [vmem:[#allocation6 + $0x5e0] sm:$0xff]  ;;  %v3410_v60 = vpack.c.bf16 %v682_v52, %v674_v51  ;;  %v3424_v36 = vpack.c.bf16 %v729_v31, %v721_v34  ;;  %v745_v39 = vld [vmem:[#allocation6 + $0x7f0] sm:$0xff] }
  0xbf   : > { %3327 = vmatprep.subr.bf16.mxu0 %v3326_v44  ;;  %v688_v44 = vld [vmem:[#allocation6 + $0x628] sm:$0xff]  ;;  %v3348_v53 = vpack.c.bf16 %v679_v43, %v671_v42  ;;  %v1103_v43 = vld [vmem:[#allocation6 + $0x18] sm:$0xff]  ;;  %v1102_v51 = vld [vmem:[#allocation6 + $0x10] sm:$0xff] }
  0xc0   : > { %3389 = vmatpush1.bf16.msra.mxu1 %v3388_v61  ;;  %v3350_v54 = vpack.c.bf16 %v696_v47, %v688_v44  ;;  %v673_v61 = vld [vmem:[#allocation6 + $0x5b0] sm:$0xff]  ;;  %v1109_v42 = vld [vmem:[#allocation6 + $0x48] sm:$0xff]  ;;  %v1100_v47 = vld [vmem:[#allocation6] sm:$0xff] }
  0xc1   : > { %3391 = vmatprep.subr.bf16.mxu1 %v3390_v63  ;;  %v690_v63 = vld [vmem:[#allocation6 + $0x638] sm:$0xff]  ;;  %v3412_v6 = vpack.c.bf16 %v681_v62, %v673_v61  ;;  %v1110_v52 = vld [vmem:[#allocation6 + $0x50] sm:$0xff]  ;;  %v1164_v34 = vld [vmem:[#allocation6 + $0x200] sm:$0xff] }
  0xc2   : > { %3329 = vmatpush1.bf16.msra.mxu0 %v3328_v56  ;;  %v695_v56 = vld [vmem:[#allocation6 + $0x660] sm:$0xff]  ;;  %v3414_v8 = vpack.c.bf16 %v698_v0, %v690_v63  ;;  %v1118_v61 = vld [vmem:[#allocation6 + $0x90] sm:$0xff]  ;;  %v1133_v0 = vld [vmem:[#allocation6 + $0x108] sm:$0xff] }
  0xc3   : > { %3331 = vmatprep.subr.bf16.mxu0 %v3330_v57  ;;  %v704_v57 = vld [vmem:[#allocation6 + $0x6a8] sm:$0xff]  ;;  %v3352_v1 = vpack.c.bf16 %v695_v56, %v687_v55  ;;  %v1119_v56 = vld [vmem:[#allocation6 + $0x98] sm:$0xff]  ;;  %v1126_v63 = vld [vmem:[#allocation6 + $0xd0] sm:$0xff] }
  0xc4   : > { %3393 = vmatpush1.bf16.msra.mxu1 %v3392_v9  ;;  %v3354_v2 = vpack.c.bf16 %v712_v59, %v704_v57  ;;  %v689_v9 = vld [vmem:[#allocation6 + $0x630] sm:$0xff]  ;;  %v1125_v55 = vld [vmem:[#allocation6 + $0xc8] sm:$0xff]  ;;  %v1127_v57 = vld [vmem:[#allocation6 + $0xd8] sm:$0xff] }
  0xc5   : > { %3395 = vmatprep.subr.bf16.mxu1 %v3394_v11  ;;  %v706_v11 = vld [vmem:[#allocation6 + $0x6b8] sm:$0xff]  ;;  %v3416_v18 = vpack.c.bf16 %v697_v10, %v689_v9  ;;  %v1116_v59 = vld [vmem:[#allocation6 + $0x80] sm:$0xff]  ;;  %v1134_v9 = vld [vmem:[#allocation6 + $0x110] sm:$0xff] }
  0xc6   : > { %3333 = vmatpush1.bf16.msra.mxu0 %v3332_v4  ;;  %v711_v4 = vld [vmem:[#allocation6 + $0x6e0] sm:$0xff]  ;;  %v3418_v20 = vpack.c.bf16 %v714_v12, %v706_v11  ;;  %v1142_v10 = vld [vmem:[#allocation6 + $0x150] sm:$0xff]  ;;  %v1149_v12 = vld [vmem:[#allocation6 + $0x188] sm:$0xff] }
  0xc7   : > { %3335 = vmatprep.subr.bf16.mxu0 %v3334_v5  ;;  %v720_v5 = vld [vmem:[#allocation6 + $0x728] sm:$0xff]  ;;  %v3356_v13 = vpack.c.bf16 %v711_v4, %v703_v3  ;;  %v1135_v4 = vld [vmem:[#allocation6 + $0x118] sm:$0xff]  ;;  %v1172_v31 = vld [vmem:[#allocation6 + $0x240] sm:$0xff] }
  0xc8   : > { %3397 = vmatpush1.bf16.msra.mxu1 %v3396_v21  ;;  %v3358_v14 = vpack.c.bf16 %v728_v7, %v720_v5  ;;  %v705_v21 = vld [vmem:[#allocation6 + $0x6b0] sm:$0xff]  ;;  %v1143_v5 = vld [vmem:[#allocation6 + $0x158] sm:$0xff] }
  0xc9   : > { %3399 = vmatprep.subr.bf16.mxu1 %v3398_v23  ;;  %v722_v23 = vld [vmem:[#allocation6 + $0x738] sm:$0xff]  ;;  %v3502_v7 = vpack.c.bf16 %v1143_v5, %v1135_v4 }
  0xca   : > { %3337 = vmatpush1.bf16.msra.mxu0 %v3336_v16  ;;  %v727_v16 = vld [vmem:[#allocation6 + $0x760] sm:$0xff]  ;;  %v3422_v30 = vpack.c.bf16 %v730_v24, %v722_v23  ;;  %v1165_v23 = vld [vmem:[#allocation6 + $0x208] sm:$0xff] }
  0xcb   : > { %3339 = vmatprep.subr.bf16.mxu0 %v3338_v17  ;;  %v736_v17 = vld [vmem:[#allocation6 + $0x7a8] sm:$0xff]  ;;  %v3360_v25 = vpack.c.bf16 %v727_v16, %v719_v15  ;;  %v3504_v15 = vpack.c.bf16 %v1142_v10, %v1134_v9 }
  0xcc   : > { %3401 = vmatpush1.bf16.msra.mxu1 %v3400_v32  ;;  %v3362_v26 = vpack.c.bf16 %v744_v19, %v736_v17  ;;  %v738_v32 = vld [vmem:[#allocation6 + $0x7b8] sm:$0xff]  ;;  %v1156_v19 = vld [vmem:[#allocation6 + $0x1c0] sm:$0xff]  ;;  %v1173_v24 = vld [vmem:[#allocation6 + $0x248] sm:$0xff] }
  0xcd   : > { %3403 = vmatprep.subr.bf16.mxu1 %v3402_v35  ;;  %v3426_v37 = vpack.c.bf16 %v746_v33, %v738_v32  ;;  %v1159_v17 = vld [vmem:[#allocation6 + $0x1d8] sm:$0xff]  ;;  %v1166_v32 = vld [vmem:[#allocation6 + $0x210] sm:$0xff]  ;;  %v3448_v33 = vpack.c.bf16 %v1172_v31, %v1164_v34  ;;  %v1229_v9 = vld [vmem:[#allocation6 + $0x408] sm:$0xff] }
  0xce   : > { %3341 = vmatpush1.bf16.msra.mxu0 %v3340_v28  ;;  %v743_v28 = vld [vmem:[#allocation6 + $0x7e0] sm:$0xff]  ;;  %v1237_v10 = vld [vmem:[#allocation6 + $0x448] sm:$0xff]  ;;  %v1254_v34 = vld [vmem:[#allocation6 + $0x4d0] sm:$0xff] }
  0xcf   : > { %3343 = vmatprep.subr.bf16.mxu0 %v3342_v29  ;;  %v3420_v29 = vpack.c.bf16 %v713_v22, %v705_v21  ;;  %v3364_v35 = vpack.c.bf16 %v743_v28, %v735_v27  ;;  %v1150_v21 = vld [vmem:[#allocation6 + $0x190] sm:$0xff] }
  0xd0   : > { %3405 = vmatpush1.bf16.msra.mxu1 %v3404_v45  ;;  %v1111_v45 = vld [vmem:[#allocation6 + $0x58] sm:$0xff]  ;;  %v1158_v22 = vld [vmem:[#allocation6 + $0x1d0] sm:$0xff] }
  0xd1   : > { %3407 = vmatprep.subr.bf16.mxu1 %v3406_v48  ;;  %v1108_v48 = vld [vmem:[#allocation6 + $0x40] sm:$0xff]  ;;  %v3494_v49 = vpack.c.bf16 %v1111_v45, %v1103_v43  ;;  %v3508_v28 = vpack.c.bf16 %v1158_v22, %v1150_v21  ;;  %v1182_v45 = vld [vmem:[#allocation6 + $0x290] sm:$0xff]  ;;  %v1245_v21 = vld [vmem:[#allocation6 + $0x488] sm:$0xff] }
  0xd2   : > { %3345 = vmatpush1.bf16.msra.mxu0 %v3344_v40  ;;  %v3428_v40 = vpack.c.bf16 %v745_v39, %v737_v38  ;;  %v3432_v50 = vpack.c.bf16 %v1108_v48, %v1100_v47  ;;  %v1189_v38 = vld [vmem:[#allocation6 + $0x2c8] sm:$0xff]  ;;  %v1183_v39 = vld [vmem:[#allocation6 + $0x298] sm:$0xff]  ;;  %v1190_v47 = vld [vmem:[#allocation6 + $0x2d0] sm:$0xff] }
  0xd3   : > { %3347 = vmatprep.subr.bf16.mxu0 %v3346_v41  ;;  %v1101_v41 = vld [vmem:[#allocation6 + $0x8] sm:$0xff] }
  0xd4   : > { %3409 = vmatpush1.bf16.msra.mxu1 %v3408_v58  ;;  %v3430_v44 = vpack.c.bf16 %v1109_v42, %v1101_v41  ;;  %v3498_v58 = vpack.c.bf16 %v1127_v57, %v1119_v56  ;;  %v1191_v41 = vld [vmem:[#allocation6 + $0x2d8] sm:$0xff]  ;;  %v1180_v42 = vld [vmem:[#allocation6 + $0x280] sm:$0xff]  ;;  %v1253_v22 = vld [vmem:[#allocation6 + $0x4c8] sm:$0xff] }
  0xd5   : > { %3411 = vmatprep.subr.bf16.mxu1 %v3410_v60  ;;  %v1124_v60 = vld [vmem:[#allocation6 + $0xc0] sm:$0xff]  ;;  %v3514_v43 = vpack.c.bf16 %v1191_v41, %v1183_v39 }
  0xd6   : > { %3349 = vmatpush1.bf16.msra.mxu0 %v3348_v53  ;;  %v1117_v53 = vld [vmem:[#allocation6 + $0x88] sm:$0xff]  ;;  %v3436_v62 = vpack.c.bf16 %v1124_v60, %v1116_v59  ;;  %v1204_v56 = vld [vmem:[#allocation6 + $0x340] sm:$0xff]  ;;  %v1206_v59 = vld [vmem:[#allocation6 + $0x350] sm:$0xff] }
  0xd7   : > { %3351 = vmatprep.subr.bf16.mxu0 %v3350_v54  ;;  %v3496_v54 = vpack.c.bf16 %v1110_v52, %v1102_v51  ;;  %v1205_v51 = vld [vmem:[#allocation6 + $0x348] sm:$0xff]  ;;  %v1199_v52 = vld [vmem:[#allocation6 + $0x318] sm:$0xff]  ;;  %v1268_v39 = vld [vmem:[#allocation6 + $0x540] sm:$0xff] }
  0xd8   : > { %3413 = vmatpush1.bf16.msra.mxu1 %v3412_v6  ;;  %v1132_v6 = vld [vmem:[#allocation6 + $0x100] sm:$0xff] }
  0xd9   : > { %3415 = vmatprep.subr.bf16.mxu1 %v3414_v8  ;;  %v1140_v8 = vld [vmem:[#allocation6 + $0x140] sm:$0xff] }
  0xda   : > { %3353 = vmatpush1.bf16.msra.mxu0 %v3352_v1  ;;  %v1141_v1 = vld [vmem:[#allocation6 + $0x148] sm:$0xff]  ;;  %v3440_v11 = vpack.c.bf16 %v1140_v8, %v1132_v6  ;;  %v1214_v6 = vld [vmem:[#allocation6 + $0x390] sm:$0xff] }
  0xdb   : > { %3355 = vmatprep.subr.bf16.mxu0 %v3354_v2  ;;  %v3500_v2 = vpack.c.bf16 %v1126_v63, %v1118_v61  ;;  %v3438_v3 = vpack.c.bf16 %v1141_v1, %v1133_v0  ;;  %v1213_v61 = vld [vmem:[#allocation6 + $0x388] sm:$0xff]  ;;  %v1215_v63 = vld [vmem:[#allocation6 + $0x398] sm:$0xff] }
  0xdc   : > { %3417 = vmatpush1.bf16.msra.mxu1 %v3416_v18  ;;  %v1148_v18 = vld [vmem:[#allocation6 + $0x180] sm:$0xff]  ;;  %v1223_v1 = vld [vmem:[#allocation6 + $0x3d8] sm:$0xff] }
  0xdd   : > { %3419 = vmatprep.subr.bf16.mxu1 %v3418_v20  ;;  %v3444_v27 = vpack.c.bf16 %v1156_v19, %v1148_v18  ;;  %v3522_v4 = vpack.c.bf16 %v1223_v1, %v1215_v63  ;;  %v1230_v18 = vld [vmem:[#allocation6 + $0x410] sm:$0xff]  ;;  %v1300_v63 = vld [vmem:[#allocation6 + $0x640] sm:$0xff] }
  0xde   : > { %3357 = vmatpush1.bf16.msra.mxu0 %v3356_v13  ;;  %v1157_v13 = vld [vmem:[#allocation6 + $0x1c8] sm:$0xff]  ;;  %v1238_v19 = vld [vmem:[#allocation6 + $0x450] sm:$0xff] }
  0xdf   : > { %3359 = vmatprep.subr.bf16.mxu0 %v3358_v14  ;;  %v1151_v14 = vld [vmem:[#allocation6 + $0x198] sm:$0xff]  ;;  %v3442_v16 = vpack.c.bf16 %v1157_v13, %v1149_v12  ;;  %v3462_v12 = vpack.c.bf16 %v1237_v10, %v1229_v9  ;;  %v1308_v10 = vld [vmem:[#allocation6 + $0x680] sm:$0xff] }
  0xe0   : > { %3421 = vmatpush1.bf16.msra.mxu1 %v3420_v29  ;;  %v3506_v20 = vpack.c.bf16 %v1159_v17, %v1151_v14  ;;  %v3446_v29 = vpack.c.bf16 %v1173_v24, %v1165_v23  ;;  %v1239_v13 = vld [vmem:[#allocation6 + $0x458] sm:$0xff]  ;;  %v1228_v14 = vld [vmem:[#allocation6 + $0x400] sm:$0xff]  ;;  %v3466_v24 = vpack.c.bf16 %v1253_v22, %v1245_v21 }
  0xe1   : > { %3423 = vmatprep.subr.bf16.mxu1 %v3422_v30  ;;  %v1247_v23 = vld [vmem:[#allocation6 + $0x498] sm:$0xff] }
  0xe2   : > { %3361 = vmatpush1.bf16.msra.mxu0 %v3360_v25  ;;  %v1167_v25 = vld [vmem:[#allocation6 + $0x218] sm:$0xff] }
  0xe3   : > { %3363 = vmatprep.subr.bf16.mxu0 %v3362_v26  ;;  %v1175_v26 = vld [vmem:[#allocation6 + $0x258] sm:$0xff] }
  0xe4   : > { %3425 = vmatpush1.bf16.msra.mxu1 %v3424_v36  ;;  %v3510_v30 = vpack.c.bf16 %v1175_v26, %v1167_v25  ;;  %v1255_v25 = vld [vmem:[#allocation6 + $0x4d8] sm:$0xff]  ;;  %v1244_v26 = vld [vmem:[#allocation6 + $0x480] sm:$0xff] }
  0xe5   : > { %3427 = vmatprep.subr.bf16.mxu1 %v3426_v37  ;;  %v1181_v37 = vld [vmem:[#allocation6 + $0x288] sm:$0xff]  ;;  %v1319_v9 = vld [vmem:[#allocation6 + $0x6d8] sm:$0xff] }
  0xe6   : > { %3365 = vmatpush1.bf16.msra.mxu0 %v3364_v35  ;;  %v1174_v35 = vld [vmem:[#allocation6 + $0x250] sm:$0xff] }
  0xe7   : > { %3431 = vmatprep.subr.bf16.mxu0 %v3430_v44  ;;  %v3512_v36 = vpack.c.bf16 %v1174_v35, %v1166_v32  ;;  %v1188_v44 = vld [vmem:[#allocation6 + $0x2c0] sm:$0xff]  ;;  %v1261_v32 = vld [vmem:[#allocation6 + $0x508] sm:$0xff]  ;;  %v1263_v35 = vld [vmem:[#allocation6 + $0x518] sm:$0xff] }
  0xe8   : > { %3429 = vmatpush1.bf16.msra.mxu1 %v3428_v40  ;;  %v3450_v40 = vpack.c.bf16 %v1189_v38, %v1181_v37  ;;  %v3452_v48 = vpack.c.bf16 %v1188_v44, %v1180_v42  ;;  %v1271_v37 = vld [vmem:[#allocation6 + $0x558] sm:$0xff]  ;;  %v1260_v38 = vld [vmem:[#allocation6 + $0x500] sm:$0xff]  ;;  %v1262_v42 = vld [vmem:[#allocation6 + $0x510] sm:$0xff] }
  0xe9   : > { %954 = vmatmul.mubr.f32.vlgmr.msra.gmra.mrb[2].mxu0 %v4683_v46  ;;  %3495 = vmatprep.subr.bf16.mxu1 %v3494_v49  ;;  %v3516_v49 = vpack.c.bf16 %v1190_v47, %v1182_v45  ;;  %v3472_v41 = vpack.c.bf16 %v1268_v39, %v1260_v38  ;;  %v1277_v45 = vld [vmem:[#allocation6 + $0x588] sm:$0xff]  ;;  %v1350_v38 = vld [vmem:[#allocation6 + $0x7d0] sm:$0xff] }
  0xea   : > { %3433 = vmatpush1.bf16.msra.mxu0 %v3432_v50  ;;  %v1197_v50 = vld [vmem:[#allocation6 + $0x308] sm:$0xff] }
  0xeb   : > { %1025 = vmatmul.mubr.f32.vlgmr.msra.gmra.mrb[2].mxu1 %v4683_v46  ;;  %v3434_v46 = vpack.c.bf16 %v1125_v55, %v1117_v53  ;;  %v3454_v53 = vpack.c.bf16 %v1205_v51, %v1197_v50  ;;  %v1196_v55 = vld [vmem:[#allocation6 + $0x300] sm:$0xff]  ;;  %v1285_v47 = vld [vmem:[#allocation6 + $0x5c8] sm:$0xff]  ;;  %v1287_v50 = vld [vmem:[#allocation6 + $0x5d8] sm:$0xff] }
  0xec   : > { %3497 = vmatpush1.bf16.msra.mxu1 %v3496_v54  ;;  %v1207_v54 = vld [vmem:[#allocation6 + $0x358] sm:$0xff]  ;;  %v1276_v51 = vld [vmem:[#allocation6 + $0x580] sm:$0xff] }
  0xed   : > { %3435 = vmatprep.subr.bf16.mxu0 %v3434_v46  ;;  %3499 = vmatprep.subr.bf16.mxu1 %v3498_v58  ;;  %v3518_v57 = vpack.c.bf16 %v1207_v54, %v1199_v52  ;;  %v3456_v46 = vpack.c.bf16 %v1204_v56, %v1196_v55  ;;  %v1198_v58 = vld [vmem:[#allocation6 + $0x310] sm:$0xff]  ;;  %v1284_v52 = vld [vmem:[#allocation6 + $0x5c0] sm:$0xff] }
  0xee   : > { %3437 = vmatpush1.bf16.msra.mxu0 %v3436_v62  ;;  %v3520_v60 = vpack.c.bf16 %v1206_v59, %v1198_v58  ;;  %v1221_v62 = vld [vmem:[#allocation6 + $0x3c8] sm:$0xff]  ;;  %v3476_v54 = vpack.c.bf16 %v1284_v52, %v1276_v51  ;;  %v1278_v55 = vld [vmem:[#allocation6 + $0x590] sm:$0xff]  ;;  %v1295_v59 = vld [vmem:[#allocation6 + $0x618] sm:$0xff] }
  0xef   : > { %3439 = vmatprep.subr.bf16.mxu0 %v3438_v3  ;;  %v3458_v0 = vpack.c.bf16 %v1221_v62, %v1213_v61  ;;  %v1220_v3 = vld [vmem:[#allocation6 + $0x3c0] sm:$0xff]  ;;  %v1286_v56 = vld [vmem:[#allocation6 + $0x5d0] sm:$0xff]  ;;  %v1301_v58 = vld [vmem:[#allocation6 + $0x648] sm:$0xff] }
  0xf0   : > { %3501 = vmatpush1.bf16.msra.mxu1 %v3500_v2  ;;  %v1212_v2 = vld [vmem:[#allocation6 + $0x380] sm:$0xff]  ;;  %v1303_v61 = vld [vmem:[#allocation6 + $0x658] sm:$0xff] }
  0xf1   : > { %3503 = vmatprep.subr.bf16.mxu1 %v3502_v7  ;;  %v3460_v5 = vpack.c.bf16 %v1220_v3, %v1212_v2  ;;  %v1222_v7 = vld [vmem:[#allocation6 + $0x3d0] sm:$0xff]  ;;  %v1292_v62 = vld [vmem:[#allocation6 + $0x600] sm:$0xff] }
  0xf2   : > { %3441 = vmatpush1.bf16.msra.mxu0 %v3440_v11  ;;  %v3524_v8 = vpack.c.bf16 %v1222_v7, %v1214_v6  ;;  %v1231_v11 = vld [vmem:[#allocation6 + $0x418] sm:$0xff]  ;;  %v3480_v1 = vpack.c.bf16 %v1300_v63, %v1292_v62  ;;  %v1294_v2 = vld [vmem:[#allocation6 + $0x610] sm:$0xff]  ;;  %v1317_v6 = vld [vmem:[#allocation6 + $0x6c8] sm:$0xff] }
  0xf3   : > { %3443 = vmatprep.subr.bf16.mxu0 %v3442_v16  ;;  %v3526_v16 = vpack.c.bf16 %v1239_v13, %v1231_v11  ;;  %v1302_v3 = vld [vmem:[#allocation6 + $0x650] sm:$0xff]  ;;  %v1311_v7 = vld [vmem:[#allocation6 + $0x698] sm:$0xff]  ;;  %v1316_v11 = vld [vmem:[#allocation6 + $0x6c0] sm:$0xff] }
  0xf4   : > { %3505 = vmatpush1.bf16.msra.mxu1 %v3504_v15  ;;  %v1236_v15 = vld [vmem:[#allocation6 + $0x440] sm:$0xff]  ;;  %v3484_v13 = vpack.c.bf16 %v1316_v11, %v1308_v10 }
  0xf5   : > { %3507 = vmatprep.subr.bf16.mxu1 %v3506_v20  ;;  %v3464_v17 = vpack.c.bf16 %v1236_v15, %v1228_v14  ;;  %v3528_v20 = vpack.c.bf16 %v1238_v19, %v1230_v18  ;;  %v1310_v14 = vld [vmem:[#allocation6 + $0x690] sm:$0xff]  ;;  %v1333_v18 = vld [vmem:[#allocation6 + $0x748] sm:$0xff]  ;;  %v1327_v19 = vld [vmem:[#allocation6 + $0x718] sm:$0xff] }
  0xf6   : > { %3445 = vmatpush1.bf16.msra.mxu0 %v3444_v27  ;;  %v1252_v27 = vld [vmem:[#allocation6 + $0x4c0] sm:$0xff]  ;;  %v1318_v15 = vld [vmem:[#allocation6 + $0x6d0] sm:$0xff] }
  0xf7   : > { %3447 = vmatprep.subr.bf16.mxu0 %v3446_v29  ;;  %v3468_v29 = vpack.c.bf16 %v1252_v27, %v1244_v26  ;;  %v1334_v27 = vld [vmem:[#allocation6 + $0x750] sm:$0xff] }
  0xf8   : > { %3509 = vmatpush1.bf16.msra.mxu1 %v3508_v28  ;;  %v3530_v28 = vpack.c.bf16 %v1255_v25, %v1247_v23  ;;  %v1324_v23 = vld [vmem:[#allocation6 + $0x700] sm:$0xff]  ;;  %v1326_v25 = vld [vmem:[#allocation6 + $0x710] sm:$0xff] }
  0xf9   : > { %3511 = vmatprep.subr.bf16.mxu1 %v3510_v30  ;;  %v1246_v30 = vld [vmem:[#allocation6 + $0x490] sm:$0xff] }
  0xfa   : > { %3449 = vmatpush1.bf16.msra.mxu0 %v3448_v33  ;;  %v3532_v31 = vpack.c.bf16 %v1254_v34, %v1246_v30  ;;  %v1269_v33 = vld [vmem:[#allocation6 + $0x548] sm:$0xff]  ;;  %v3552_v30 = vpack.c.bf16 %v1334_v27, %v1326_v25 }
  0xfb   : > { %3451 = vmatprep.subr.bf16.mxu0 %v3450_v40  ;;  %v3534_v40 = vpack.c.bf16 %v1271_v37, %v1263_v35  ;;  %v1342_v37 = vld [vmem:[#allocation6 + $0x790] sm:$0xff] }
  0xfc   : > { %3513 = vmatpush1.bf16.msra.mxu1 %v3512_v36  ;;  %v3470_v36 = vpack.c.bf16 %v1269_v33, %v1261_v32  ;;  %v1351_v32 = vld [vmem:[#allocation6 + $0x7d8] sm:$0xff]  ;;  %v1340_v33 = vld [vmem:[#allocation6 + $0x780] sm:$0xff] }
  0xfd   : > { %3515 = vmatprep.subr.bf16.mxu1 %v3514_v43  ;;  %v1270_v43 = vld [vmem:[#allocation6 + $0x550] sm:$0xff] }
  0xfe   : > { %3453 = vmatpush1.bf16.msra.mxu0 %v3452_v48  ;;  %v3536_v44 = vpack.c.bf16 %v1270_v43, %v1262_v42  ;;  %v1279_v48 = vld [vmem:[#allocation6 + $0x598] sm:$0xff]  ;;  %v1113_v42 = vld [vmem:[#allocation6 + $0x68] sm:$0xff] }
  0xff   : > { %3455 = vmatprep.subr.bf16.mxu0 %v3454_v53  ;;  %v3538_v53 = vpack.c.bf16 %v1287_v50, %v1279_v48  ;;  %v1107_v43 = vld [vmem:[#allocation6 + $0x38] sm:$0xff]  ;;  %v482_v48 = vld [vmem:[%s4645_s19] sm:$0xff] }
 0x100   : > { %3517 = vmatpush1.bf16.msra.mxu1 %v3516_v49  ;;  %v3474_v49 = vpack.c.bf16 %v1285_v47, %v1277_v45  ;;  %v1115_v45 = vld [vmem:[#allocation6 + $0x78] sm:$0xff] }
 0x101   : > { %3519 = vmatprep.subr.bf16.mxu1 %v3518_v57  ;;  %v3540_v57 = vpack.c.bf16 %v1286_v56, %v1278_v55  ;;  %v3622_v47 = vpack.c.bf16 %v1115_v45, %v1107_v43  ;;  %v484_v56 = vld [vmem:[%s4645_s19 + $0x10] sm:$0xff] }
 0x102   : > { %3457 = vmatpush1.bf16.msra.mxu0 %v3456_v46  ;;  %v1293_v46 = vld [vmem:[#allocation6 + $0x608] sm:$0xff]  ;;  %v1106_v45 = vld [vmem:[#allocation6 + $0x30] sm:$0xff] }
 0x103   : > { %3459 = vmatprep.subr.bf16.mxu0 %v3458_v0  ;;  %v3542_v0 = vpack.c.bf16 %v1303_v61, %v1295_v59  ;;  %v485_v59 = vld [vmem:[%s4645_s19 + $0x18] sm:$0xff] }
 0x104   : > { %3521 = vmatpush1.bf16.msra.mxu1 %v3520_v60  ;;  %v3478_v60 = vpack.c.bf16 %v1301_v58, %v1293_v46 }
 0x105   : > { %3523 = vmatprep.subr.bf16.mxu1 %v3522_v4  ;;  %v3544_v4 = vpack.c.bf16 %v1302_v3, %v1294_v2 }
 0x106   : > { %3461 = vmatpush1.bf16.msra.mxu0 %v3460_v5  ;;  %v1309_v5 = vld [vmem:[#allocation6 + $0x688] sm:$0xff] }
 0x107   : > { %3463 = vmatprep.subr.bf16.mxu0 %v3462_v12  ;;  %v3546_v12 = vpack.c.bf16 %v1319_v9, %v1311_v7 }
 0x108   : > { %3525 = vmatpush1.bf16.msra.mxu1 %v3524_v8  ;;  %v3482_v8 = vpack.c.bf16 %v1317_v6, %v1309_v5 }
 0x109   : > { %3527 = vmatprep.subr.bf16.mxu1 %v3526_v16  ;;  %v1325_v16 = vld [vmem:[#allocation6 + $0x708] sm:$0xff] }
 0x10a   : > { %3465 = vmatpush1.bf16.msra.mxu0 %v3464_v17  ;;  %v3548_v17 = vpack.c.bf16 %v1318_v15, %v1310_v14  ;;  %v3486_v21 = vpack.c.bf16 %v1333_v18, %v1325_v16  ;;  %v3114_v14 = vld [vmem:[%s4647_s23 + $0x60] sm:$0xff]  ;;  %v3115_v15 = vld [vmem:[%s4647_s23 + $0x68] sm:$0xff] }
 0x10b   : > { %3467 = vmatprep.subr.bf16.mxu0 %v3466_v24  ;;  %v1332_v24 = vld [vmem:[#allocation6 + $0x740] sm:$0xff] }
 0x10c   : > { %3529 = vmatpush1.bf16.msra.mxu1 %v3528_v20  ;;  %v1335_v20 = vld [vmem:[#allocation6 + $0x758] sm:$0xff]  ;;  %v3488_v26 = vpack.c.bf16 %v1332_v24, %v1324_v23 }
 0x10d   : > { %3531 = vmatprep.subr.bf16.mxu1 %v3530_v28  ;;  %v3550_v22 = vpack.c.bf16 %v1335_v20, %v1327_v19  ;;  %v1341_v28 = vld [vmem:[#allocation6 + $0x788] sm:$0xff] }
 0x10e   : > { %3469 = vmatpush1.bf16.msra.mxu0 %v3468_v29  ;;  %v1349_v29 = vld [vmem:[#allocation6 + $0x7c8] sm:$0xff] }
 0x10f   : > { %3471 = vmatprep.subr.bf16.mxu0 %v3470_v36  ;;  %v3490_v34 = vpack.c.bf16 %v1349_v29, %v1341_v28  ;;  %v1348_v36 = vld [vmem:[#allocation6 + $0x7c0] sm:$0xff] }
 0x110   : > { %3533 = vmatpush1.bf16.msra.mxu1 %v3532_v31  ;;  %v1343_v31 = vld [vmem:[#allocation6 + $0x798] sm:$0xff]  ;;  %v3492_v39 = vpack.c.bf16 %v1348_v36, %v1340_v33 }
 0x111   : > { %3535 = vmatprep.subr.bf16.mxu1 %v3534_v40  ;;  %v3554_v35 = vpack.c.bf16 %v1351_v32, %v1343_v31  ;;  %v3556_v40 = vpack.c.bf16 %v1350_v38, %v1342_v37 }
 0x112   : > { %3473 = vmatpush1.bf16.msra.mxu0 %v3472_v41  ;;  %v1105_v41 = vld [vmem:[#allocation6 + $0x28] sm:$0xff] }
 0x113   : > { %3475 = vmatprep.subr.bf16.mxu0 %v3474_v49  ;;  %v483_v49 = vld [vmem:[%s4645_s19 + $0x8] sm:$0xff] }
 0x114   : > { %3537 = vmatpush1.bf16.msra.mxu1 %v3536_v44  ;;  %v3558_v44 = vpack.c.bf16 %v1113_v42, %v1105_v41  ;;  %v1104_v42 = vld [vmem:[#allocation6 + $0x20] sm:$0xff] }
 0x115   : > { %3539 = vmatprep.subr.bf16.mxu1 %v3538_v53 }
 0x116   : > { %3477 = vmatpush1.bf16.msra.mxu0 %v3476_v54 }
 0x117   : > { %3479 = vmatprep.subr.bf16.mxu0 %v3478_v60 }
 0x118   : > { %3541 = vmatpush1.bf16.msra.mxu1 %v3540_v57 }
 0x119   : > { %3543 = vmatprep.subr.bf16.mxu1 %v3542_v0 }
 0x11a   : > { %3481 = vmatpush1.bf16.msra.mxu0 %v3480_v1 }
 0x11b   : > { %3483 = vmatprep.subr.bf16.mxu0 %v3482_v8 }
 0x11c   : > { %3545 = vmatpush1.bf16.msra.mxu1 %v3544_v4  ;;  %v477_v4 = vld [vmem:[#allocation3] sm:$0xff] }
 0x11d   : > { %3547 = vmatprep.subr.bf16.mxu1 %v3546_v12 }
 0x11e   : > { %3485 = vmatpush1.bf16.msra.mxu0 %v3484_v13 }
 0x11f   : > { %3487 = vmatprep.subr.bf16.mxu0 %v3486_v21 }
 0x120   : > { %3549 = vmatpush1.bf16.msra.mxu1 %v3548_v17 }
 0x121   : > { %3551 = vmatprep.subr.bf16.mxu1 %v3550_v22  ;;  %v3116_v22 = vld [vmem:[%s4647_s23 + $0x70] sm:$0xff] }
 0x122   : > { %3489 = vmatpush1.bf16.msra.mxu0 %v3488_v26  ;;  %v3117_v26 = vld [vmem:[%s4647_s23 + $0x78] sm:$0xff] }
 0x123   : > { %3491 = vmatprep.subr.bf16.mxu0 %v3490_v34 }
 0x124   : > { %3553 = vmatpush1.bf16.msra.mxu1 %v3552_v30 }
 0x125   : > { %3555 = vmatprep.subr.bf16.mxu1 %v3554_v35  ;;  %v481_v35 = vld [vmem:[#allocation3 + $0x8] sm:$0xff] }
 0x126   : > { %3493 = vmatpush1.bf16.msra.mxu0 %v3492_v39 }
 0x127   : > { %3559 = vmatprep.subr.bf16.mxu0 %v3558_v44  ;;  %v1112_v44 = vld [vmem:[#allocation6 + $0x60] sm:$0xff] }
 0x128   : > { %3557 = vmatpush1.bf16.msra.mxu1 %v3556_v40 }
 0x129   : > { %3623 = vmatprep.subr.bf16.mxu1 %v3622_v47  ;;  %v1114_v47 = vld [vmem:[#allocation6 + $0x70] sm:$0xff] }
 0x17c   : > { %v813_v50 = vpop.f32.mrb[0].mxu0 }
 0x17d   : > { %v1031_v51 = vadd.f32 %v813_v50, %v482_v48  ;;  %v815_v52 = vpop.f32.mrb[1].mxu0  ;;  %v1121_v48 = vld [vmem:[#allocation6 + $0xa8] sm:$0xff] }
 0x17e   : > { %v1032_v53 = vadd.f32 %v815_v52, %v483_v49  ;;  %v884_v57 = vpop.f32.mrb[0].mxu1  ;;  %v1129_v50 = vld [vmem:[#allocation6 + $0xe8] sm:$0xff]  ;;  %v1131_v52 = vld [vmem:[#allocation6 + $0xf8] sm:$0xff] }
 0x17f   : > { %v3118_v54 = vmul.f32 -1.442695, %v1031_v51  ;;  %v886_v46 = vpop.f32.mrb[1].mxu1  ;;  %v1033_v58 = vadd.f32 %v884_v57, %v484_v56  ;;  %v1123_v51 = vld [vmem:[#allocation6 + $0xb8] sm:$0xff]  ;;  %v1120_v56 = vld [vmem:[#allocation6 + $0xa0] sm:$0xff] }
 0x180   : > { %v3119_v55 = vmul.f32 -1.442695, %v1032_v53  ;;  %v1034_v61 = vadd.f32 %v886_v46, %v485_v59  ;;  %v1128_v57 = vld [vmem:[#allocation6 + $0xe0] sm:$0xff]  ;;  %v1122_v46 = vld [vmem:[#allocation6 + $0xb0] sm:$0xff]  ;;  %v1137_v59 = vld [vmem:[#allocation6 + $0x128] sm:$0xff] }
 0x181   : > { %4251 = vpow2.f32 %v3118_v54  ;;  %v3120_v60 = vmul.f32 -1.442695, %v1033_v58  ;;  %v3560_v54 = vpack.c.bf16 %v1112_v44, %v1104_v42  ;;  %v1130_v58 = vld [vmem:[#allocation6 + $0xf0] sm:$0xff]  ;;  %v1184_v42 = vld [vmem:[#allocation6 + $0x2a0] sm:$0xff] }
 0x182   : > { %4253 = vpow2.f32 %v3119_v55  ;;  %v3624_v55 = vpack.c.bf16 %v1114_v47, %v1106_v45  ;;  %v1186_v47 = vld [vmem:[#allocation6 + $0x2b0] sm:$0xff] }
 0x183   : > { %4255 = vpow2.f32 %v3120_v60  ;;  %v3562_v60 = vpack.c.bf16 %v1129_v50, %v1121_v48  ;;  %v1194_v48 = vld [vmem:[#allocation6 + $0x2f0] sm:$0xff]  ;;  %v1209_v50 = vld [vmem:[#allocation6 + $0x368] sm:$0xff] }
 0x184   : > { %4257 = vtanh.f32 %v1034_v61  ;;  %v3626_v61 = vpack.c.bf16 %v1131_v52, %v1123_v51  ;;  %v1203_v51 = vld [vmem:[#allocation6 + $0x338] sm:$0xff] }
 0x185   : > { %v1211_v52 = vld [vmem:[#allocation6 + $0x378] sm:$0xff] }
 0x18b   : > { %v4252_v62 = vpop.eup %4251 }
 0x18c   : > { %v4254_v63 = vpop.eup %4253  ;;  %v1048_v0 = vadd.f32 1.0, %v4252_v62  ;;  %v1145_v62 = vld [vmem:[#allocation6 + $0x168] sm:$0xff] }
 0x18d   : > { %v1049_v1 = vadd.f32 1.0, %v4254_v63  ;;  %v4256_v2 = vpop.eup %4255  ;;  %v1139_v63 = vld [vmem:[#allocation6 + $0x138] sm:$0xff] }
 0x18e   : > { %4259 = vrcp.f32 %v1048_v0  ;;  %v4258_v3 = vpop.eup %4257  ;;  %v1050_v6 = vadd.f32 1.0, %v4256_v2  ;;  %v1147_v0 = vld [vmem:[#allocation6 + $0x178] sm:$0xff]  ;;  %v3628_v2 = vpack.c.bf16 %v1130_v58, %v1122_v46  ;;  %v3646_v46 = vpack.c.bf16 %v1211_v52, %v1203_v51  ;;  %v1202_v58 = vld [vmem:[#allocation6 + $0x330] sm:$0xff] }
 0x18f   : > { %4261 = vrcp.f32 %v1049_v1  ;;  %v3564_v1 = vpack.c.bf16 %v1128_v57, %v1120_v56  ;;  %v1208_v56 = vld [vmem:[#allocation6 + $0x360] sm:$0xff]  ;;  %v1291_v51 = vld [vmem:[#allocation6 + $0x5f8] sm:$0xff] }
 0x190   : > { %4263 = vrcp.f32 %v1050_v6  ;;  %v3630_v6 = vpack.c.bf16 %v1147_v0, %v1139_v63  ;;  %v1227_v63 = vld [vmem:[#allocation6 + $0x3f8] sm:$0xff] }
 0x198   : > { %v4260_v5 = vpop.eup %4259 }
 0x199   : > { %v4262_v7 = vpop.eup %4261  ;;  %v1059_v8 = vmul.f32 %v4260_v5, %v4258_v3  ;;  %v1136_v3 = vld [vmem:[#allocation6 + $0x120] sm:$0xff]  ;;  %v3566_v5 = vpack.c.bf16 %v1145_v62, %v1137_v59  ;;  %v1210_v59 = vld [vmem:[#allocation6 + $0x370] sm:$0xff]  ;;  %v1219_v62 = vld [vmem:[#allocation6 + $0x3b8] sm:$0xff] }
 0x19a   : > { %v1058_v9 = vmul.f32 %v4262_v7, %v477_v4  ;;  %v4264_v11 = vpop.eup %4263  ;;  %v1144_v4 = vld [vmem:[#allocation6 + $0x160] sm:$0xff]  ;;  %v1138_v7 = vld [vmem:[#allocation6 + $0x130] sm:$0xff] }
 0x19c   : > { %v4695_v10 = vadd.f32 %v1059_v8, %v1058_v9  ;;  %v1146_v8 = vld [vmem:[#allocation6 + $0x170] sm:$0xff]  ;;  %v1153_v9 = vld [vmem:[#allocation6 + $0x1a8] sm:$0xff] }
 0x19e   : > { %4265 = vtanh.f32 %v4695_v10 }
 0x1a8   : > { %v4266_v12 = vpop.eup %4265 }
 0x1a9   : > { %v4698_v13 = vmul.f32 %v4266_v12, %v4264_v11  ;;  %v1161_v11 = vld [vmem:[#allocation6 + $0x1e8] sm:$0xff]  ;;  %v1155_v12 = vld [vmem:[#allocation6 + $0x1b8] sm:$0xff] }
 0x1ab   : > { %1087 = vst [vmem:[%s4658_s25] sm:$0xff] %v4698_v13 }
 0x1bc   : > { %v955_v16 = vpop.f32.mrb[2].mxu0 }
 0x1bd   : > { %v1035_v17 = vadd.f32 %v3114_v14, %v955_v16  ;;  %v957_v18 = vpop.f32.mrb[3].mxu0  ;;  %v1163_v14 = vld [vmem:[#allocation6 + $0x1f8] sm:$0xff]  ;;  %v3632_v16 = vpack.c.bf16 %v1146_v8, %v1138_v7  ;;  %v1226_v7 = vld [vmem:[#allocation6 + $0x3f0] sm:$0xff]  ;;  %v1233_v8 = vld [vmem:[#allocation6 + $0x428] sm:$0xff] }
 0x1be   : > { %v1036_v19 = vadd.f32 %v3115_v15, %v957_v18  ;;  %v1026_v23 = vpop.f32.mrb[2].mxu1  ;;  %v3568_v15 = vpack.c.bf16 %v1144_v4, %v1136_v3  ;;  %v1160_v18 = vld [vmem:[#allocation6 + $0x1e0] sm:$0xff] }
 0x1bf   : > { %v3121_v20 = vmul.f32 -1.442695, %v1035_v17  ;;  %v1028_v24 = vpop.f32.mrb[3].mxu1  ;;  %v1037_v25 = vadd.f32 %v3116_v22, %v1026_v23  ;;  %v1152_v17 = vld [vmem:[#allocation6 + $0x1a0] sm:$0xff]  ;;  %v1162_v22 = vld [vmem:[#allocation6 + $0x1f0] sm:$0xff]  ;;  %v1169_v23 = vld [vmem:[#allocation6 + $0x228] sm:$0xff] }
 0x1c0   : > { %v3122_v21 = vmul.f32 -1.442695, %v1036_v19  ;;  %v1038_v28 = vadd.f32 %v3117_v26, %v1028_v24  ;;  %v3570_v19 = vpack.c.bf16 %v1161_v11, %v1153_v9  ;;  %v1177_v24 = vld [vmem:[#allocation6 + $0x268] sm:$0xff]  ;;  %v1179_v26 = vld [vmem:[#allocation6 + $0x278] sm:$0xff]  ;;  %v1224_v3 = vld [vmem:[#allocation6 + $0x3e0] sm:$0xff] }
 0x1c1   : > { %4267 = vpow2.f32 %v3121_v20  ;;  %v3123_v27 = vmul.f32 -1.442695, %v1037_v25  ;;  %v3634_v20 = vpack.c.bf16 %v1163_v14, %v1155_v12  ;;  %v1171_v25 = vld [vmem:[#allocation6 + $0x238] sm:$0xff]  ;;  %v1241_v9 = vld [vmem:[#allocation6 + $0x468] sm:$0xff] }
 0x1c2   : > { %4269 = vpow2.f32 %v3122_v21  ;;  %v1154_v21 = vld [vmem:[#allocation6 + $0x1b0] sm:$0xff]  ;;  %v1235_v11 = vld [vmem:[#allocation6 + $0x438] sm:$0xff] }
 0x1c3   : > { %4271 = vpow2.f32 %v3123_v27  ;;  %v3572_v27 = vpack.c.bf16 %v1160_v18, %v1152_v17  ;;  %v1243_v12 = vld [vmem:[#allocation6 + $0x478] sm:$0xff]  ;;  %v1240_v17 = vld [vmem:[#allocation6 + $0x460] sm:$0xff]  ;;  %v3590_v18 = vpack.c.bf16 %v1241_v9, %v1233_v8  ;;  %v1321_v8 = vld [vmem:[#allocation6 + $0x6e8] sm:$0xff] }
 0x1c4   : > { %4273 = vtanh.f32 %v1038_v28  ;;  %v3636_v28 = vpack.c.bf16 %v1162_v22, %v1154_v21  ;;  %v1242_v21 = vld [vmem:[#allocation6 + $0x470] sm:$0xff]  ;;  %v1249_v22 = vld [vmem:[#allocation6 + $0x4a8] sm:$0xff]  ;;  %v1315_v9 = vld [vmem:[#allocation6 + $0x6b8] sm:$0xff] }
 0x1cb   : > { %v4268_v29 = vpop.eup %4267 }
 0x1cc   : > { %v4270_v30 = vpop.eup %4269  ;;  %v1072_v34 = vadd.f32 1.0, %v4268_v29  ;;  %v1168_v29 = vld [vmem:[#allocation6 + $0x220] sm:$0xff] }
 0x1cd   : > { %v1073_v31 = vadd.f32 1.0, %v4270_v30  ;;  %v4272_v32 = vpop.eup %4271  ;;  %v1176_v30 = vld [vmem:[#allocation6 + $0x260] sm:$0xff] }
 0x1ce   : > { %4275 = vrcp.f32 %v1072_v34  ;;  %v4274_v33 = vpop.eup %4273  ;;  %v1074_v37 = vadd.f32 1.0, %v4272_v32  ;;  %v3574_v34 = vpack.c.bf16 %v1177_v24, %v1169_v23  ;;  %v1170_v32 = vld [vmem:[#allocation6 + $0x230] sm:$0xff]  ;;  %v1257_v23 = vld [vmem:[#allocation6 + $0x4e8] sm:$0xff]  ;;  %v1251_v24 = vld [vmem:[#allocation6 + $0x4b8] sm:$0xff] }
 0x1cf   : > { %4277 = vrcp.f32 %v1073_v31  ;;  %v3638_v31 = vpack.c.bf16 %v1179_v26, %v1171_v25  ;;  %v1259_v25 = vld [vmem:[#allocation6 + $0x4f8] sm:$0xff] }
 0x1d0   : > { %4279 = vrcp.f32 %v1074_v37  ;;  %v1187_v37 = vld [vmem:[#allocation6 + $0x2b8] sm:$0xff] }
 0x1d8   : > { %v4276_v36 = vpop.eup %4275 }
 0x1d9   : > { %v4278_v38 = vpop.eup %4277  ;;  %v1083_v39 = vmul.f32 %v4276_v36, %v4274_v33  ;;  %v1178_v33 = vld [vmem:[#allocation6 + $0x270] sm:$0xff]  ;;  %v1193_v36 = vld [vmem:[#allocation6 + $0x2e8] sm:$0xff] }
 0x1da   : > { %v1082_v40 = vmul.f32 %v4278_v38, %v481_v35  ;;  %v4280_v43 = vpop.eup %4279  ;;  %v1185_v35 = vld [vmem:[#allocation6 + $0x2a8] sm:$0xff]  ;;  %v1195_v38 = vld [vmem:[#allocation6 + $0x2f8] sm:$0xff] }
 0x1db   : > { %v3578_v44 = vpack.c.bf16 %v1193_v36, %v1185_v35  ;;  %v3642_v45 = vpack.c.bf16 %v1195_v38, %v1187_v37  ;;  %v1273_v35 = vld [vmem:[#allocation6 + $0x568] sm:$0xff]  ;;  %v1267_v36 = vld [vmem:[#allocation6 + $0x538] sm:$0xff] }
 0x1dc   : > { %v4706_v41 = vadd.f32 %v1083_v39, %v1082_v40  ;;  %v3576_v39 = vpack.c.bf16 %v1176_v30, %v1168_v29  ;;  %v3640_v40 = vpack.c.bf16 %v1178_v33, %v1170_v32  ;;  %v1256_v29 = vld [vmem:[#allocation6 + $0x4e0] sm:$0xff]  ;;  %v3594_v30 = vpack.c.bf16 %v1257_v23, %v1249_v22  ;;  %v1258_v32 = vld [vmem:[#allocation6 + $0x4f0] sm:$0xff]  ;;  %v1265_v33 = vld [vmem:[#allocation6 + $0x528] sm:$0xff] }
 0x1dd   : > { %v1275_v37 = vld [vmem:[#allocation6 + $0x578] sm:$0xff]  ;;  %v1337_v22 = vld [vmem:[#allocation6 + $0x768] sm:$0xff] }
 0x1de   : > { %4281 = vtanh.f32 %v4706_v41  ;;  %v1331_v23 = vld [vmem:[#allocation6 + $0x738] sm:$0xff] }
 0x1e8   : > { %v4282_v49 = vpop.eup %4281 }
 0x1e9   : > { %v1086_v53 = vmul.f32 %v4282_v49, %v4280_v43  ;;  %v1192_v43 = vld [vmem:[#allocation6 + $0x2e0] sm:$0xff]  ;;  %v1201_v49 = vld [vmem:[#allocation6 + $0x328] sm:$0xff] }
 0x1ea   : > { %v3582_v57 = vpack.c.bf16 %v1209_v50, %v1201_v49  ;;  %v1289_v49 = vld [vmem:[#allocation6 + $0x5e8] sm:$0xff]  ;;  %v1283_v50 = vld [vmem:[#allocation6 + $0x5b8] sm:$0xff] }
 0x1eb   : > { %3124 = vst [vmem:[%s4663_s18 + $0x18] sm:$0xff] %v1086_v53  ;;  %1420 = vmatprep.mubr.f32.mxu0 %v1086_v53  ;;  %1491 = vmatprep.mubr.f32.mxu1 %v1086_v53 }
 0x1ec   : > { %1421 = vmatmul.mubr.f32.vlgmr.msra.gmra.mrb[4].mxu0 %v4698_v13  ;;  %1492 = vmatmul.mubr.f32.vlgmr.msra.gmra.mrb[4].mxu1 %v4698_v13 }
 0x1ed   : > { %3561 = vmatpush1.bf16.msra.mxu0 %v3560_v54  ;;  %3625 = vmatpush1.bf16.msra.mxu1 %v3624_v55  ;;  %v3644_v54 = vpack.c.bf16 %v1194_v48, %v1186_v47  ;;  %v1200_v55 = vld [vmem:[#allocation6 + $0x320] sm:$0xff]  ;;  %v1274_v47 = vld [vmem:[#allocation6 + $0x570] sm:$0xff]  ;;  %v1281_v48 = vld [vmem:[#allocation6 + $0x5a8] sm:$0xff] }
 0x1ee   : > { %1562 = vmatprep.mubr.f32.mxu0 %v1086_v53  ;;  %1633 = vmatprep.mubr.f32.mxu1 %v1086_v53  ;;  %v3580_v53 = vpack.c.bf16 %v1192_v43, %v1184_v42  ;;  %v3584_v0 = vpack.c.bf16 %v1208_v56, %v1200_v55  ;;  %v1272_v42 = vld [vmem:[#allocation6 + $0x560] sm:$0xff]  ;;  %v3598_v43 = vpack.c.bf16 %v1273_v35, %v1265_v33  ;;  %v1353_v33 = vld [vmem:[#allocation6 + $0x7e8] sm:$0xff]  ;;  %v1347_v35 = vld [vmem:[#allocation6 + $0x7b8] sm:$0xff] }
 0x1ef   : > { %3563 = vmatprep.subr.bf16.mxu0 %v3562_v60  ;;  %3627 = vmatprep.subr.bf16.mxu1 %v3626_v61  ;;  %v1217_v60 = vld [vmem:[#allocation6 + $0x3a8] sm:$0xff]  ;;  %v1288_v55 = vld [vmem:[#allocation6 + $0x5e0] sm:$0xff]  ;;  %v3602_v56 = vpack.c.bf16 %v1289_v49, %v1281_v48 }
 0x1f0   : > { %v1225_v61 = vld [vmem:[#allocation6 + $0x3e8] sm:$0xff] }
 0x1f1   : > { %3565 = vmatpush1.bf16.msra.mxu0 %v3564_v1  ;;  %3629 = vmatpush1.bf16.msra.mxu1 %v3628_v2  ;;  %v3648_v1 = vpack.c.bf16 %v1210_v59, %v1202_v58  ;;  %v1216_v2 = vld [vmem:[#allocation6 + $0x3a0] sm:$0xff]  ;;  %v3586_v4 = vpack.c.bf16 %v1225_v61, %v1217_v60  ;;  %v1290_v58 = vld [vmem:[#allocation6 + $0x5f0] sm:$0xff]  ;;  %v1297_v59 = vld [vmem:[#allocation6 + $0x628] sm:$0xff] }
 0x1f2   : > { %3567 = vmatprep.subr.bf16.mxu0 %v3566_v5  ;;  %3631 = vmatprep.subr.bf16.mxu1 %v3630_v6  ;;  %v3650_v5 = vpack.c.bf16 %v1227_v63, %v1219_v62  ;;  %v1218_v6 = vld [vmem:[#allocation6 + $0x3b0] sm:$0xff]  ;;  %v3588_v14 = vpack.c.bf16 %v1224_v3, %v1216_v2  ;;  %v1305_v60 = vld [vmem:[#allocation6 + $0x668] sm:$0xff]  ;;  %v1299_v61 = vld [vmem:[#allocation6 + $0x638] sm:$0xff] }
 0x1f3   : > { %v1307_v62 = vld [vmem:[#allocation6 + $0x678] sm:$0xff]  ;;  %v1304_v2 = vld [vmem:[#allocation6 + $0x660] sm:$0xff]  ;;  %v3606_v3 = vpack.c.bf16 %v1305_v60, %v1297_v59  ;;  %v1711_v49 = vld [vmem:[#allocation6 + $0x8] sm:$0xff] }
 0x1f4   : > { %v1727_v59 = vld [vmem:[#allocation6 + $0x88] sm:$0xff] }
 0x1f5   : > { %3569 = vmatpush1.bf16.msra.mxu0 %v3568_v15  ;;  %3633 = vmatpush1.bf16.msra.mxu1 %v3632_v16  ;;  %v3652_v15 = vpack.c.bf16 %v1226_v7, %v1218_v6  ;;  %v1232_v16 = vld [vmem:[#allocation6 + $0x420] sm:$0xff]  ;;  %v1306_v6 = vld [vmem:[#allocation6 + $0x670] sm:$0xff]  ;;  %v1313_v7 = vld [vmem:[#allocation6 + $0x6a8] sm:$0xff] }
 0x1f6   : > { %3571 = vmatprep.subr.bf16.mxu0 %v3570_v19  ;;  %3635 = vmatprep.subr.bf16.mxu1 %v3634_v20  ;;  %v3654_v19 = vpack.c.bf16 %v1243_v12, %v1235_v11  ;;  %v1234_v20 = vld [vmem:[#allocation6 + $0x430] sm:$0xff]  ;;  %v3592_v26 = vpack.c.bf16 %v1240_v17, %v1232_v16  ;;  %v1323_v11 = vld [vmem:[#allocation6 + $0x6f8] sm:$0xff]  ;;  %v1320_v16 = vld [vmem:[#allocation6 + $0x6e0] sm:$0xff]  ;;  %v3610_v17 = vpack.c.bf16 %v1321_v8, %v1313_v7 }
 0x1f7   : > { %v1751_v7 = vld [vmem:[#allocation6 + $0x148] sm:$0xff] }
 0x1f9   : > { %3573 = vmatpush1.bf16.msra.mxu0 %v3572_v27  ;;  %3637 = vmatpush1.bf16.msra.mxu1 %v3636_v28  ;;  %v3656_v27 = vpack.c.bf16 %v1242_v21, %v1234_v20  ;;  %v1248_v28 = vld [vmem:[#allocation6 + $0x4a0] sm:$0xff]  ;;  %v1322_v20 = vld [vmem:[#allocation6 + $0x6f0] sm:$0xff]  ;;  %v1329_v21 = vld [vmem:[#allocation6 + $0x728] sm:$0xff] }
 0x1fa   : > { %3575 = vmatprep.subr.bf16.mxu0 %v3574_v34  ;;  %3639 = vmatprep.subr.bf16.mxu1 %v3638_v31  ;;  %v3658_v34 = vpack.c.bf16 %v1259_v25, %v1251_v24  ;;  %v1250_v31 = vld [vmem:[#allocation6 + $0x4b0] sm:$0xff]  ;;  %v3596_v38 = vpack.c.bf16 %v1256_v29, %v1248_v28  ;;  %v1339_v24 = vld [vmem:[#allocation6 + $0x778] sm:$0xff]  ;;  %v1336_v28 = vld [vmem:[#allocation6 + $0x760] sm:$0xff]  ;;  %v3614_v29 = vpack.c.bf16 %v1337_v22, %v1329_v21 }
 0x1fb   : > { %v1767_v21 = vld [vmem:[#allocation6 + $0x1c8] sm:$0xff]  ;;  %v1761_v22 = vld [vmem:[#allocation6 + $0x198] sm:$0xff] }
 0x1fd   : > { %3577 = vmatpush1.bf16.msra.mxu0 %v3576_v39  ;;  %3641 = vmatpush1.bf16.msra.mxu1 %v3640_v40  ;;  %v3660_v39 = vpack.c.bf16 %v1258_v32, %v1250_v31  ;;  %v1264_v40 = vld [vmem:[#allocation6 + $0x520] sm:$0xff]  ;;  %v1338_v31 = vld [vmem:[#allocation6 + $0x770] sm:$0xff]  ;;  %v1345_v32 = vld [vmem:[#allocation6 + $0x7a8] sm:$0xff] }
 0x1fe   : > { %3579 = vmatprep.subr.bf16.mxu0 %v3578_v44  ;;  %3643 = vmatprep.subr.bf16.mxu1 %v3642_v45  ;;  %v3662_v44 = vpack.c.bf16 %v1275_v37, %v1267_v36  ;;  %v1266_v45 = vld [vmem:[#allocation6 + $0x530] sm:$0xff]  ;;  %v3600_v52 = vpack.c.bf16 %v1272_v42, %v1264_v40  ;;  %v1355_v36 = vld [vmem:[#allocation6 + $0x7f8] sm:$0xff]  ;;  %v3618_v40 = vpack.c.bf16 %v1353_v33, %v1345_v32 }
 0x1ff   : > { %v3682_v42 = vpack.c.bf16 %v1355_v36, %v1347_v35  ;;  %v1777_v32 = vld [vmem:[#allocation6 + $0x218] sm:$0xff] }
 0x200   : > { %v1785_v33 = vld [vmem:[#allocation6 + $0x258] sm:$0xff] }
 0x201   : > { %3581 = vmatpush1.bf16.msra.mxu0 %v3580_v53  ;;  %3645 = vmatpush1.bf16.msra.mxu1 %v3644_v54  ;;  %v3664_v53 = vpack.c.bf16 %v1274_v47, %v1266_v45  ;;  %v1280_v54 = vld [vmem:[#allocation6 + $0x5a0] sm:$0xff]  ;;  %v1354_v45 = vld [vmem:[#allocation6 + $0x7f0] sm:$0xff] }
 0x202   : > { %3583 = vmatprep.subr.bf16.mxu0 %v3582_v57  ;;  %3647 = vmatprep.subr.bf16.mxu1 %v3646_v46  ;;  %v3666_v57 = vpack.c.bf16 %v1291_v51, %v1283_v50  ;;  %v1282_v46 = vld [vmem:[#allocation6 + $0x5b0] sm:$0xff]  ;;  %v3604_v63 = vpack.c.bf16 %v1288_v55, %v1280_v54  ;;  %v1719_v50 = vld [vmem:[#allocation6 + $0x48] sm:$0xff]  ;;  %v1713_v51 = vld [vmem:[#allocation6 + $0x18] sm:$0xff] }
 0x203   : > { %v1710_v54 = vld [vmem:[#allocation6] sm:$0xff] }
 0x204   : > { %v1718_v55 = vld [vmem:[#allocation6 + $0x40] sm:$0xff] }
 0x205   : > { %3585 = vmatpush1.bf16.msra.mxu0 %v3584_v0  ;;  %3649 = vmatpush1.bf16.msra.mxu1 %v3648_v1  ;;  %v3668_v0 = vpack.c.bf16 %v1290_v58, %v1282_v46  ;;  %v1296_v1 = vld [vmem:[#allocation6 + $0x620] sm:$0xff]  ;;  %v1712_v46 = vld [vmem:[#allocation6 + $0x10] sm:$0xff] }
 0x206   : > { %3587 = vmatprep.subr.bf16.mxu0 %v3586_v4  ;;  %3651 = vmatprep.subr.bf16.mxu1 %v3650_v5  ;;  %v3670_v4 = vpack.c.bf16 %v1307_v62, %v1299_v61  ;;  %v1298_v5 = vld [vmem:[#allocation6 + $0x630] sm:$0xff]  ;;  %v3608_v12 = vpack.c.bf16 %v1304_v2, %v1296_v1  ;;  %v1735_v61 = vld [vmem:[#allocation6 + $0xc8] sm:$0xff]  ;;  %v1729_v62 = vld [vmem:[#allocation6 + $0x98] sm:$0xff] }
 0x207   : > { %v1720_v58 = vld [vmem:[#allocation6 + $0x50] sm:$0xff]  ;;  %v1726_v1 = vld [vmem:[#allocation6 + $0x80] sm:$0xff] }
 0x208   : > { %v3752_v60 = vpack.c.bf16 %v1720_v58, %v1712_v46  ;;  %v1734_v2 = vld [vmem:[#allocation6 + $0xc0] sm:$0xff]  ;;  %v1807_v58 = vld [vmem:[#allocation6 + $0x308] sm:$0xff] }
 0x209   : > { %3589 = vmatpush1.bf16.msra.mxu0 %v3588_v14  ;;  %3653 = vmatpush1.bf16.msra.mxu1 %v3652_v15  ;;  %v3672_v14 = vpack.c.bf16 %v1306_v6, %v1298_v5  ;;  %v1312_v15 = vld [vmem:[#allocation6 + $0x6a0] sm:$0xff]  ;;  %v1736_v5 = vld [vmem:[#allocation6 + $0xd0] sm:$0xff]  ;;  %v1743_v6 = vld [vmem:[#allocation6 + $0x108] sm:$0xff] }
 0x20a   : > { %3591 = vmatprep.subr.bf16.mxu0 %v3590_v18  ;;  %3655 = vmatprep.subr.bf16.mxu1 %v3654_v19  ;;  %v3674_v18 = vpack.c.bf16 %v1323_v11, %v1315_v9  ;;  %v1314_v19 = vld [vmem:[#allocation6 + $0x6b0] sm:$0xff]  ;;  %v3612_v25 = vpack.c.bf16 %v1320_v16, %v1312_v15  ;;  %v3694_v9 = vpack.c.bf16 %v1751_v7, %v1743_v6  ;;  %v1745_v11 = vld [vmem:[#allocation6 + $0x118] sm:$0xff]  ;;  %v1750_v16 = vld [vmem:[#allocation6 + $0x140] sm:$0xff] }
 0x20b   : > { %v1831_v6 = vld [vmem:[#allocation6 + $0x3c8] sm:$0xff]  ;;  %v1825_v7 = vld [vmem:[#allocation6 + $0x398] sm:$0xff] }
 0x20d   : > { %3593 = vmatpush1.bf16.msra.mxu0 %v3592_v26  ;;  %3657 = vmatpush1.bf16.msra.mxu1 %v3656_v27  ;;  %v3676_v26 = vpack.c.bf16 %v1322_v20, %v1314_v19  ;;  %v1328_v27 = vld [vmem:[#allocation6 + $0x720] sm:$0xff]  ;;  %v1759_v20 = vld [vmem:[#allocation6 + $0x188] sm:$0xff] }
 0x20e   : > { %3595 = vmatprep.subr.bf16.mxu0 %v3594_v30  ;;  %3659 = vmatprep.subr.bf16.mxu1 %v3658_v34  ;;  %v3678_v30 = vpack.c.bf16 %v1339_v24, %v1331_v23  ;;  %v1330_v34 = vld [vmem:[#allocation6 + $0x730] sm:$0xff]  ;;  %v3616_v37 = vpack.c.bf16 %v1336_v28, %v1328_v27  ;;  %v3698_v24 = vpack.c.bf16 %v1767_v21, %v1759_v20  ;;  %v1766_v27 = vld [vmem:[#allocation6 + $0x1c0] sm:$0xff]  ;;  %v1847_v20 = vld [vmem:[#allocation6 + $0x448] sm:$0xff] }
 0x20f   : > { %v1841_v21 = vld [vmem:[#allocation6 + $0x418] sm:$0xff] }
 0x211   : > { %3597 = vmatpush1.bf16.msra.mxu0 %v3596_v38  ;;  %3661 = vmatpush1.bf16.msra.mxu1 %v3660_v39  ;;  %v3680_v38 = vpack.c.bf16 %v1338_v31, %v1330_v34  ;;  %v1344_v39 = vld [vmem:[#allocation6 + $0x7a0] sm:$0xff]  ;;  %v1775_v34 = vld [vmem:[#allocation6 + $0x208] sm:$0xff] }
 0x212   : > { %3599 = vmatprep.subr.bf16.mxu0 %v3598_v43  ;;  %3663 = vmatprep.subr.bf16.mxu1 %v3662_v44  ;;  %v1352_v43 = vld [vmem:[#allocation6 + $0x7e0] sm:$0xff]  ;;  %v1346_v44 = vld [vmem:[#allocation6 + $0x7b0] sm:$0xff]  ;;  %v1783_v31 = vld [vmem:[#allocation6 + $0x248] sm:$0xff] }
 0x213   : > { %v3620_v47 = vpack.c.bf16 %v1352_v43, %v1344_v39  ;;  %v3684_v48 = vpack.c.bf16 %v1354_v45, %v1346_v44  ;;  %v1774_v39 = vld [vmem:[#allocation6 + $0x200] sm:$0xff]  ;;  %v1784_v44 = vld [vmem:[#allocation6 + $0x250] sm:$0xff] }
 0x215   : > { %3601 = vmatpush1.bf16.msra.mxu0 %v3600_v52  ;;  %3665 = vmatpush1.bf16.msra.mxu1 %v3664_v53  ;;  %v3686_v52 = vpack.c.bf16 %v1719_v50, %v1711_v49  ;;  %v1721_v53 = vld [vmem:[#allocation6 + $0x58] sm:$0xff] }
 0x216   : > { %3603 = vmatprep.subr.bf16.mxu0 %v3602_v56  ;;  %3667 = vmatprep.subr.bf16.mxu1 %v3666_v57  ;;  %v3750_v56 = vpack.c.bf16 %v1721_v53, %v1713_v51  ;;  %v3688_v57 = vpack.c.bf16 %v1718_v55, %v1710_v54  ;;  %v1793_v49 = vld [vmem:[#allocation6 + $0x298] sm:$0xff]  ;;  %v1790_v53 = vld [vmem:[#allocation6 + $0x280] sm:$0xff]  ;;  %v1792_v55 = vld [vmem:[#allocation6 + $0x290] sm:$0xff] }
 0x217   : > { %v1801_v51 = vld [vmem:[#allocation6 + $0x2d8] sm:$0xff]  ;;  %v1798_v54 = vld [vmem:[#allocation6 + $0x2c0] sm:$0xff] }
 0x219   : > { %3605 = vmatpush1.bf16.msra.mxu0 %v3604_v63  ;;  %3669 = vmatpush1.bf16.msra.mxu1 %v3668_v0  ;;  %v1737_v63 = vld [vmem:[#allocation6 + $0xd8] sm:$0xff] }
 0x21a   : > { %3607 = vmatprep.subr.bf16.mxu0 %v3606_v3  ;;  %3671 = vmatprep.subr.bf16.mxu1 %v3670_v4  ;;  %v3754_v0 = vpack.c.bf16 %v1737_v63, %v1729_v62  ;;  %v1728_v3 = vld [vmem:[#allocation6 + $0x90] sm:$0xff]  ;;  %v3692_v4 = vpack.c.bf16 %v1734_v2, %v1726_v1  ;;  %v1817_v62 = vld [vmem:[#allocation6 + $0x358] sm:$0xff]  ;;  %v1806_v63 = vld [vmem:[#allocation6 + $0x300] sm:$0xff] }
 0x21b   : > { %v3756_v8 = vpack.c.bf16 %v1736_v5, %v1728_v3  ;;  %v1808_v2 = vld [vmem:[#allocation6 + $0x310] sm:$0xff]  ;;  %v1823_v5 = vld [vmem:[#allocation6 + $0x388] sm:$0xff] }
 0x21c   : > { %v1816_v3 = vld [vmem:[#allocation6 + $0x350] sm:$0xff] }
 0x21d   : > { %3609 = vmatpush1.bf16.msra.mxu0 %v3608_v12  ;;  %3673 = vmatpush1.bf16.msra.mxu1 %v3672_v14  ;;  %v1753_v12 = vld [vmem:[#allocation6 + $0x158] sm:$0xff]  ;;  %v1742_v14 = vld [vmem:[#allocation6 + $0x100] sm:$0xff] }
 0x21e   : > { %3611 = vmatprep.subr.bf16.mxu0 %v3610_v17  ;;  %3675 = vmatprep.subr.bf16.mxu1 %v3674_v18  ;;  %v3758_v15 = vpack.c.bf16 %v1753_v12, %v1745_v11  ;;  %v1744_v17 = vld [vmem:[#allocation6 + $0x110] sm:$0xff]  ;;  %v3696_v19 = vpack.c.bf16 %v1750_v16, %v1742_v14  ;;  %v1822_v11 = vld [vmem:[#allocation6 + $0x380] sm:$0xff] }
 0x21f   : > { %v1752_v18 = vld [vmem:[#allocation6 + $0x150] sm:$0xff]  ;;  %v1830_v12 = vld [vmem:[#allocation6 + $0x3c0] sm:$0xff] }
 0x220   : > { %v3760_v23 = vpack.c.bf16 %v1752_v18, %v1744_v17  ;;  %v1824_v16 = vld [vmem:[#allocation6 + $0x390] sm:$0xff] }
 0x221   : > { %3613 = vmatpush1.bf16.msra.mxu0 %v3612_v25  ;;  %3677 = vmatpush1.bf16.msra.mxu1 %v3676_v26  ;;  %v1769_v25 = vld [vmem:[#allocation6 + $0x1d8] sm:$0xff]  ;;  %v1758_v26 = vld [vmem:[#allocation6 + $0x180] sm:$0xff]  ;;  %v1832_v17 = vld [vmem:[#allocation6 + $0x3d0] sm:$0xff] }
 0x222   : > { %3615 = vmatprep.subr.bf16.mxu0 %v3614_v29  ;;  %3679 = vmatprep.subr.bf16.mxu1 %v3678_v30  ;;  %v3762_v28 = vpack.c.bf16 %v1769_v25, %v1761_v22  ;;  %v1760_v29 = vld [vmem:[#allocation6 + $0x190] sm:$0xff]  ;;  %v3700_v35 = vpack.c.bf16 %v1766_v27, %v1758_v26  ;;  %v3780_v18 = vpack.c.bf16 %v1832_v17, %v1824_v16  ;;  %v1846_v25 = vld [vmem:[#allocation6 + $0x440] sm:$0xff]  ;;  %v1919_v17 = vld [vmem:[#allocation6 + $0x688] sm:$0xff] }
 0x223   : > { %v1768_v30 = vld [vmem:[#allocation6 + $0x1d0] sm:$0xff] }
 0x224   : > { %v3764_v36 = vpack.c.bf16 %v1768_v30, %v1760_v29  ;;  %v1848_v29 = vld [vmem:[#allocation6 + $0x450] sm:$0xff] }
 0x225   : > { %3617 = vmatpush1.bf16.msra.mxu0 %v3616_v37  ;;  %3681 = vmatpush1.bf16.msra.mxu1 %v3680_v38  ;;  %v3702_v37 = vpack.c.bf16 %v1783_v31, %v1775_v34  ;;  %v3766_v38 = vpack.c.bf16 %v1785_v33, %v1777_v32  ;;  %v1855_v34 = vld [vmem:[#allocation6 + $0x488] sm:$0xff]  ;;  %v1857_v32 = vld [vmem:[#allocation6 + $0x498] sm:$0xff] }
 0x226   : > { %3619 = vmatprep.subr.bf16.mxu0 %v3618_v40  ;;  %3683 = vmatprep.subr.bf16.mxu1 %v3682_v42  ;;  %v1782_v40 = vld [vmem:[#allocation6 + $0x240] sm:$0xff]  ;;  %v1776_v42 = vld [vmem:[#allocation6 + $0x210] sm:$0xff]  ;;  %v1863_v31 = vld [vmem:[#allocation6 + $0x4c8] sm:$0xff] }
 0x227   : > { %v3704_v43 = vpack.c.bf16 %v1782_v40, %v1774_v39  ;;  %v3768_v45 = vpack.c.bf16 %v1784_v44, %v1776_v42  ;;  %v3722_v33 = vpack.c.bf16 %v1863_v31, %v1855_v34  ;;  %v1856_v40 = vld [vmem:[#allocation6 + $0x490] sm:$0xff]  ;;  %v1871_v44 = vld [vmem:[#allocation6 + $0x508] sm:$0xff]  ;;  %v1937_v34 = vld [vmem:[#allocation6 + $0x718] sm:$0xff] }
 0x228   : > { %v1864_v42 = vld [vmem:[#allocation6 + $0x4d0] sm:$0xff]  ;;  %v1945_v31 = vld [vmem:[#allocation6 + $0x758] sm:$0xff] }
 0x229   : > { %3621 = vmatpush1.bf16.msra.mxu0 %v3620_v47  ;;  %3685 = vmatpush1.bf16.msra.mxu1 %v3684_v48  ;;  %v1791_v47 = vld [vmem:[#allocation6 + $0x288] sm:$0xff] }
 0x22a   : > { %3687 = vmatprep.subr.bf16.mxu0 %v3686_v52  ;;  %3751 = vmatprep.subr.bf16.mxu1 %v3750_v56  ;;  %v1799_v48 = vld [vmem:[#allocation6 + $0x2c8] sm:$0xff]  ;;  %v3770_v52 = vpack.c.bf16 %v1801_v51, %v1793_v49  ;;  %v3708_v56 = vpack.c.bf16 %v1798_v54, %v1790_v53  ;;  %v1881_v49 = vld [vmem:[#allocation6 + $0x558] sm:$0xff]  ;;  %v1878_v51 = vld [vmem:[#allocation6 + $0x540] sm:$0xff] }
 0x22b   : > { %v3706_v50 = vpack.c.bf16 %v1799_v48, %v1791_v47  ;;  %v1873_v47 = vld [vmem:[#allocation6 + $0x518] sm:$0xff]  ;;  %v1872_v54 = vld [vmem:[#allocation6 + $0x510] sm:$0xff] }
 0x22c   : > { %1563 = vmatmul.mubr.f32.vlgmr.msra.gmra.mrb[6].mxu0 %v4698_v13  ;;  %1634 = vmatmul.mubr.f32.vlgmr.msra.gmra.mrb[6].mxu1 %v4698_v13  ;;  %v3690_v13 = vpack.c.bf16 %v1735_v61, %v1727_v59  ;;  %v1815_v59 = vld [vmem:[#allocation6 + $0x348] sm:$0xff] }
 0x22d   : > { %3689 = vmatpush1.bf16.msra.mxu0 %v3688_v57  ;;  %3753 = vmatpush1.bf16.msra.mxu1 %v3752_v60  ;;  %v1800_v57 = vld [vmem:[#allocation6 + $0x2d0] sm:$0xff]  ;;  %v1809_v60 = vld [vmem:[#allocation6 + $0x318] sm:$0xff]  ;;  %v3710_v61 = vpack.c.bf16 %v1815_v59, %v1807_v58 }
 0x22e   : > { %3691 = vmatprep.subr.bf16.mxu0 %v3690_v13  ;;  %3755 = vmatprep.subr.bf16.mxu1 %v3754_v0  ;;  %v3772_v46 = vpack.c.bf16 %v1800_v57, %v1792_v55  ;;  %v1814_v13 = vld [vmem:[#allocation6 + $0x340] sm:$0xff]  ;;  %v3774_v0 = vpack.c.bf16 %v1817_v62, %v1809_v60  ;;  %v1880_v55 = vld [vmem:[#allocation6 + $0x550] sm:$0xff]  ;;  %v1887_v57 = vld [vmem:[#allocation6 + $0x588] sm:$0xff] }
 0x22f   : > { %v3712_v1 = vpack.c.bf16 %v1814_v13, %v1806_v63  ;;  %v1889_v58 = vld [vmem:[#allocation6 + $0x598] sm:$0xff]  ;;  %v1894_v62 = vld [vmem:[#allocation6 + $0x5c0] sm:$0xff] }
 0x230   : > { %v1897_v60 = vld [vmem:[#allocation6 + $0x5d8] sm:$0xff] }
 0x231   : > { %3693 = vmatpush1.bf16.msra.mxu0 %v3692_v4  ;;  %3757 = vmatpush1.bf16.msra.mxu1 %v3756_v8  ;;  %v3776_v4 = vpack.c.bf16 %v1816_v3, %v1808_v2  ;;  %v3714_v8 = vpack.c.bf16 %v1831_v6, %v1823_v5  ;;  %v3794_v63 = vpack.c.bf16 %v1897_v60, %v1889_v58  ;;  %v1903_v3 = vld [vmem:[#allocation6 + $0x608] sm:$0xff]  ;;  %v1905_v5 = vld [vmem:[#allocation6 + $0x618] sm:$0xff]  ;;  %v3125_v60 = vld [vmem:[%s4645_s19 + $0x20] sm:$0xff] }
 0x232   : > { %3695 = vmatprep.subr.bf16.mxu0 %v3694_v9  ;;  %3759 = vmatprep.subr.bf16.mxu1 %v3758_v15  ;;  %v1833_v9 = vld [vmem:[#allocation6 + $0x3d8] sm:$0xff]  ;;  %v3716_v15 = vpack.c.bf16 %v1830_v12, %v1822_v11 }
 0x233   : > { %v3778_v14 = vpack.c.bf16 %v1833_v9, %v1825_v7  ;;  %v1913_v7 = vld [vmem:[#allocation6 + $0x658] sm:$0xff]  ;;  %v1910_v9 = vld [vmem:[#allocation6 + $0x640] sm:$0xff] }
 0x234   : > { %v3798_v11 = vpack.c.bf16 %v1913_v7, %v1905_v5  ;;  %v1725_v58 = vld [vmem:[#allocation6 + $0x78] sm:$0xff]  ;;  %v3127_v5 = vld [vmem:[%s4645_s19 + $0x30] sm:$0xff] }
 0x235   : > { %3697 = vmatpush1.bf16.msra.mxu0 %v3696_v19  ;;  %3761 = vmatpush1.bf16.msra.mxu1 %v3760_v23  ;;  %v1839_v19 = vld [vmem:[#allocation6 + $0x408] sm:$0xff]  ;;  %v1849_v23 = vld [vmem:[#allocation6 + $0x458] sm:$0xff] }
 0x236   : > { %3699 = vmatprep.subr.bf16.mxu0 %v3698_v24  ;;  %3763 = vmatprep.subr.bf16.mxu1 %v3762_v28  ;;  %v3718_v22 = vpack.c.bf16 %v1847_v20, %v1839_v19  ;;  %v1838_v24 = vld [vmem:[#allocation6 + $0x400] sm:$0xff]  ;;  %v3782_v26 = vpack.c.bf16 %v1849_v23, %v1841_v21  ;;  %v1840_v28 = vld [vmem:[#allocation6 + $0x410] sm:$0xff]  ;;  %v1921_v19 = vld [vmem:[#allocation6 + $0x698] sm:$0xff] }
 0x237   : > { %v3720_v27 = vpack.c.bf16 %v1846_v25, %v1838_v24  ;;  %v3784_v30 = vpack.c.bf16 %v1848_v29, %v1840_v28  ;;  %v1929_v21 = vld [vmem:[#allocation6 + $0x6d8] sm:$0xff]  ;;  %v1926_v23 = vld [vmem:[#allocation6 + $0x6c0] sm:$0xff]  ;;  %v1935_v28 = vld [vmem:[#allocation6 + $0x708] sm:$0xff] }
 0x238   : > { %v3802_v24 = vpack.c.bf16 %v1929_v21, %v1921_v19  ;;  %v3128_v7 = vld [vmem:[%s4645_s19 + $0x38] sm:$0xff] }
 0x239   : > { %3701 = vmatpush1.bf16.msra.mxu0 %v3700_v35  ;;  %3765 = vmatpush1.bf16.msra.mxu1 %v3764_v36  ;;  %v1865_v35 = vld [vmem:[#allocation6 + $0x4d8] sm:$0xff]  ;;  %v1854_v36 = vld [vmem:[#allocation6 + $0x480] sm:$0xff] }
 0x23a   : > { %3703 = vmatprep.subr.bf16.mxu0 %v3702_v37  ;;  %3767 = vmatprep.subr.bf16.mxu1 %v3766_v38  ;;  %v1862_v37 = vld [vmem:[#allocation6 + $0x4c0] sm:$0xff]  ;;  %v3786_v38 = vpack.c.bf16 %v1865_v35, %v1857_v32 }
 0x23b   : > { %v3724_v39 = vpack.c.bf16 %v1862_v37, %v1854_v36  ;;  %v1934_v35 = vld [vmem:[#allocation6 + $0x700] sm:$0xff]  ;;  %v1936_v37 = vld [vmem:[#allocation6 + $0x710] sm:$0xff] }
 0x23c   : > { %v1942_v36 = vld [vmem:[#allocation6 + $0x740] sm:$0xff] }
 0x23d   : > { %3705 = vmatpush1.bf16.msra.mxu0 %v3704_v43  ;;  %3769 = vmatpush1.bf16.msra.mxu1 %v3768_v45  ;;  %v3788_v43 = vpack.c.bf16 %v1864_v42, %v1856_v40  ;;  %v1879_v45 = vld [vmem:[#allocation6 + $0x548] sm:$0xff] }
 0x23e   : > { %3707 = vmatprep.subr.bf16.mxu0 %v3706_v50  ;;  %3771 = vmatprep.subr.bf16.mxu1 %v3770_v52  ;;  %v3726_v48 = vpack.c.bf16 %v1879_v45, %v1871_v44  ;;  %v1870_v50 = vld [vmem:[#allocation6 + $0x500] sm:$0xff]  ;;  %v3790_v52 = vpack.c.bf16 %v1881_v49, %v1873_v47  ;;  %v1951_v40 = vld [vmem:[#allocation6 + $0x788] sm:$0xff]  ;;  %v1953_v45 = vld [vmem:[#allocation6 + $0x798] sm:$0xff] }
 0x23f   : > { %v3728_v53 = vpack.c.bf16 %v1878_v51, %v1870_v50  ;;  %v1959_v42 = vld [vmem:[#allocation6 + $0x7c8] sm:$0xff]  ;;  %v1961_v47 = vld [vmem:[#allocation6 + $0x7d8] sm:$0xff]  ;;  %v1958_v50 = vld [vmem:[#allocation6 + $0x7c0] sm:$0xff] }
 0x240   : > { %v3746_v44 = vpack.c.bf16 %v1959_v42, %v1951_v40  ;;  %v3810_v49 = vpack.c.bf16 %v1961_v47, %v1953_v45  ;;  %v1952_v51 = vld [vmem:[#allocation6 + $0x790] sm:$0xff] }
 0x241   : > { %3709 = vmatpush1.bf16.msra.mxu0 %v3708_v56  ;;  %3773 = vmatpush1.bf16.msra.mxu1 %v3772_v46  ;;  %v3792_v56 = vpack.c.bf16 %v1880_v55, %v1872_v54  ;;  %v1895_v46 = vld [vmem:[#allocation6 + $0x5c8] sm:$0xff] }
 0x242   : > { %3711 = vmatprep.subr.bf16.mxu0 %v3710_v61  ;;  %3775 = vmatprep.subr.bf16.mxu1 %v3774_v0  ;;  %v3730_v59 = vpack.c.bf16 %v1895_v46, %v1887_v57  ;;  %v1886_v61 = vld [vmem:[#allocation6 + $0x580] sm:$0xff]  ;;  %v1888_v0 = vld [vmem:[#allocation6 + $0x590] sm:$0xff]  ;;  %v1715_v55 = vld [vmem:[#allocation6 + $0x28] sm:$0xff] }
 0x243   : > { %v3732_v13 = vpack.c.bf16 %v1894_v62, %v1886_v61  ;;  %v1717_v57 = vld [vmem:[#allocation6 + $0x38] sm:$0xff]  ;;  %v3126_v61 = vld [vmem:[%s4645_s19 + $0x28] sm:$0xff] }
 0x245   : > { %3713 = vmatpush1.bf16.msra.mxu0 %v3712_v1  ;;  %3777 = vmatpush1.bf16.msra.mxu1 %v3776_v4  ;;  %v1896_v1 = vld [vmem:[#allocation6 + $0x5d0] sm:$0xff]  ;;  %v1911_v4 = vld [vmem:[#allocation6 + $0x648] sm:$0xff] }
 0x246   : > { %3715 = vmatprep.subr.bf16.mxu0 %v3714_v8  ;;  %3779 = vmatprep.subr.bf16.mxu1 %v3778_v14  ;;  %v3796_v2 = vpack.c.bf16 %v1896_v1, %v1888_v0  ;;  %v3734_v6 = vpack.c.bf16 %v1911_v4, %v1903_v3  ;;  %v1902_v8 = vld [vmem:[#allocation6 + $0x600] sm:$0xff]  ;;  %v1904_v14 = vld [vmem:[#allocation6 + $0x610] sm:$0xff] }
 0x247   : > { %v3736_v12 = vpack.c.bf16 %v1910_v9, %v1902_v8 }
 0x249   : > { %3717 = vmatpush1.bf16.msra.mxu0 %v3716_v15  ;;  %3781 = vmatpush1.bf16.msra.mxu1 %v3780_v18  ;;  %v1912_v15 = vld [vmem:[#allocation6 + $0x650] sm:$0xff]  ;;  %v1927_v18 = vld [vmem:[#allocation6 + $0x6c8] sm:$0xff] }
 0x24a   : > { %3719 = vmatprep.subr.bf16.mxu0 %v3718_v22  ;;  %3783 = vmatprep.subr.bf16.mxu1 %v3782_v26  ;;  %v3800_v16 = vpack.c.bf16 %v1912_v15, %v1904_v14  ;;  %v3738_v20 = vpack.c.bf16 %v1927_v18, %v1919_v17  ;;  %v1918_v22 = vld [vmem:[#allocation6 + $0x680] sm:$0xff]  ;;  %v1920_v26 = vld [vmem:[#allocation6 + $0x690] sm:$0xff] }
 0x24b   : > { %v3740_v25 = vpack.c.bf16 %v1926_v23, %v1918_v22 }
 0x24d   : > { %3721 = vmatpush1.bf16.msra.mxu0 %v3720_v27  ;;  %3785 = vmatpush1.bf16.msra.mxu1 %v3784_v30  ;;  %v1928_v27 = vld [vmem:[#allocation6 + $0x6d0] sm:$0xff]  ;;  %v1943_v30 = vld [vmem:[#allocation6 + $0x748] sm:$0xff] }
 0x24e   : > { %3723 = vmatprep.subr.bf16.mxu0 %v3722_v33  ;;  %3787 = vmatprep.subr.bf16.mxu1 %v3786_v38  ;;  %v3804_v29 = vpack.c.bf16 %v1928_v27, %v1920_v26  ;;  %v3742_v32 = vpack.c.bf16 %v1943_v30, %v1935_v28  ;;  %v3806_v33 = vpack.c.bf16 %v1945_v31, %v1937_v34  ;;  %v3129_v27 = vld [vmem:[%s4647_s23 + $0x40] sm:$0xff]  ;;  %v3130_v28 = vld [vmem:[%s4647_s23 + $0x48] sm:$0xff] }
 0x24f   : > { %v3744_v38 = vpack.c.bf16 %v1942_v36, %v1934_v35  ;;  %v3131_v36 = vld [vmem:[%s4647_s23 + $0x50] sm:$0xff] }
 0x251   : > { %3725 = vmatpush1.bf16.msra.mxu0 %v3724_v39  ;;  %3789 = vmatpush1.bf16.msra.mxu1 %v3788_v43  ;;  %v1944_v39 = vld [vmem:[#allocation6 + $0x750] sm:$0xff] }
 0x252   : > { %3727 = vmatprep.subr.bf16.mxu0 %v3726_v48  ;;  %3791 = vmatprep.subr.bf16.mxu1 %v3790_v52  ;;  %v3808_v43 = vpack.c.bf16 %v1944_v39, %v1936_v37  ;;  %v1950_v48 = vld [vmem:[#allocation6 + $0x780] sm:$0xff]  ;;  %v1960_v52 = vld [vmem:[#allocation6 + $0x7d0] sm:$0xff] }
 0x253   : > { %v3812_v54 = vpack.c.bf16 %v1960_v52, %v1952_v51 }
 0x255   : > { %3729 = vmatpush1.bf16.msra.mxu0 %v3728_v53  ;;  %3793 = vmatpush1.bf16.msra.mxu1 %v3792_v56  ;;  %v3748_v53 = vpack.c.bf16 %v1958_v50, %v1950_v48  ;;  %v1723_v56 = vld [vmem:[#allocation6 + $0x68] sm:$0xff] }
 0x256   : > { %3731 = vmatprep.subr.bf16.mxu0 %v3730_v59  ;;  %3795 = vmatprep.subr.bf16.mxu1 %v3794_v63  ;;  %v3814_v46 = vpack.c.bf16 %v1723_v56, %v1715_v55  ;;  %v3878_v59 = vpack.c.bf16 %v1725_v58, %v1717_v57  ;;  %v1714_v55 = vld [vmem:[#allocation6 + $0x20] sm:$0xff]  ;;  %v1716_v57 = vld [vmem:[#allocation6 + $0x30] sm:$0xff] }
 0x257   : > { %v1722_v56 = vld [vmem:[#allocation6 + $0x60] sm:$0xff] }
 0x259   : > { %3733 = vmatpush1.bf16.msra.mxu0 %v3732_v13  ;;  %3797 = vmatpush1.bf16.msra.mxu1 %v3796_v2 }
 0x25a   : > { %3735 = vmatprep.subr.bf16.mxu0 %v3734_v6  ;;  %3799 = vmatprep.subr.bf16.mxu1 %v3798_v11 }
 0x25d   : > { %3737 = vmatpush1.bf16.msra.mxu0 %v3736_v12  ;;  %3801 = vmatpush1.bf16.msra.mxu1 %v3800_v16 }
 0x25e   : > { %3739 = vmatprep.subr.bf16.mxu0 %v3738_v20  ;;  %3803 = vmatprep.subr.bf16.mxu1 %v3802_v24 }
 0x261   : > { %3741 = vmatpush1.bf16.msra.mxu0 %v3740_v25  ;;  %3805 = vmatpush1.bf16.msra.mxu1 %v3804_v29 }
 0x262   : > { %3743 = vmatprep.subr.bf16.mxu0 %v3742_v32  ;;  %3807 = vmatprep.subr.bf16.mxu1 %v3806_v33 }
 0x265   : > { %3745 = vmatpush1.bf16.msra.mxu0 %v3744_v38  ;;  %3809 = vmatpush1.bf16.msra.mxu1 %v3808_v43  ;;  %v3132_v38 = vld [vmem:[%s4647_s23 + $0x58] sm:$0xff] }
 0x266   : > { %3747 = vmatprep.subr.bf16.mxu0 %v3746_v44  ;;  %3811 = vmatprep.subr.bf16.mxu1 %v3810_v49 }
 0x269   : > { %3749 = vmatpush1.bf16.msra.mxu0 %v3748_v53  ;;  %3813 = vmatpush1.bf16.msra.mxu1 %v3812_v54 }
 0x26a   : > { %3815 = vmatprep.subr.bf16.mxu0 %v3814_v46  ;;  %3879 = vmatprep.subr.bf16.mxu1 %v3878_v59  ;;  %v1724_v46 = vld [vmem:[#allocation6 + $0x70] sm:$0xff]  ;;  %v1731_v59 = vld [vmem:[#allocation6 + $0xa8] sm:$0xff] }
 0x2bf   : > { %v1422_v62 = vpop.f32.mrb[4].mxu0  ;;  %v1493_v63 = vpop.f32.mrb[4].mxu1 }
 0x2c0   : > { %v1640_v13 = vadd.f32 %v3125_v60, %v1422_v62  ;;  %v1424_v0 = vpop.f32.mrb[5].mxu0  ;;  %v1495_v1 = vpop.f32.mrb[5].mxu1  ;;  %v1642_v6 = vadd.f32 %v3127_v5, %v1493_v63  ;;  %v1733_v62 = vld [vmem:[#allocation6 + $0xb8] sm:$0xff]  ;;  %v1747_v5 = vld [vmem:[#allocation6 + $0x128] sm:$0xff] }
 0x2c1   : > { %v1641_v2 = vadd.f32 %v3126_v61, %v1424_v0  ;;  %v1643_v8 = vadd.f32 %v3128_v7, %v1495_v1  ;;  %v1739_v61 = vld [vmem:[#allocation6 + $0xe8] sm:$0xff]  ;;  %v1741_v63 = vld [vmem:[#allocation6 + $0xf8] sm:$0xff]  ;;  %v3816_v0 = vpack.c.bf16 %v1722_v56, %v1714_v55  ;;  %v3880_v1 = vpack.c.bf16 %v1724_v46, %v1716_v57  ;;  %v1794_v55 = vld [vmem:[#allocation6 + $0x2a0] sm:$0xff] }
 0x2c2   : > { %v3133_v3 = vmul.f32 -1.442695, %v1640_v13  ;;  %v3135_v9 = vmul.f32 -1.442695, %v1642_v6  ;;  %v3818_v6 = vpack.c.bf16 %v1739_v61, %v1731_v59  ;;  %v3882_v7 = vpack.c.bf16 %v1741_v63, %v1733_v62  ;;  %v1802_v56 = vld [vmem:[#allocation6 + $0x2e0] sm:$0xff]  ;;  %v1804_v59 = vld [vmem:[#allocation6 + $0x2f0] sm:$0xff] }
 0x2c3   : > { %v3134_v4 = vmul.f32 -1.442695, %v1641_v2  ;;  %v1738_v2 = vld [vmem:[#allocation6 + $0xe0] sm:$0xff]  ;;  %v1819_v61 = vld [vmem:[#allocation6 + $0x368] sm:$0xff]  ;;  %v1813_v62 = vld [vmem:[#allocation6 + $0x338] sm:$0xff] }
 0x2c4   : > { %4283 = vpow2.f32 %v3133_v3  ;;  %v1732_v3 = vld [vmem:[#allocation6 + $0xb0] sm:$0xff]  ;;  %v1821_v63 = vld [vmem:[#allocation6 + $0x378] sm:$0xff] }
 0x2c5   : > { %4285 = vpow2.f32 %v3134_v4  ;;  %v1740_v4 = vld [vmem:[#allocation6 + $0xf0] sm:$0xff] }
 0x2c6   : > { %4287 = vtanh.f32 %v1643_v8  ;;  %v1755_v8 = vld [vmem:[#allocation6 + $0x168] sm:$0xff] }
 0x2c7   : > { %4289 = vpow2.f32 %v3135_v9  ;;  %v1749_v9 = vld [vmem:[#allocation6 + $0x138] sm:$0xff] }
 0x2ce   : > { %v4284_v11 = vpop.eup %4283 }
 0x2cf   : > { %v1657_v12 = vadd.f32 1.0, %v4284_v11  ;;  %v4286_v14 = vpop.eup %4285  ;;  %v1757_v11 = vld [vmem:[#allocation6 + $0x178] sm:$0xff] }
 0x2d0   : > { %v1658_v15 = vadd.f32 1.0, %v4286_v14  ;;  %v4288_v16 = vpop.eup %4287  ;;  %v3884_v14 = vpack.c.bf16 %v1740_v4, %v1732_v3  ;;  %v3902_v3 = vpack.c.bf16 %v1821_v63, %v1813_v62  ;;  %v1812_v4 = vld [vmem:[#allocation6 + $0x330] sm:$0xff]  ;;  %v1901_v62 = vld [vmem:[#allocation6 + $0x5f8] sm:$0xff] }
 0x2d1   : > { %4291 = vrcp.f32 %v1657_v12  ;;  %v4290_v17 = vpop.eup %4289 }
 0x2d2   : > { %4293 = vrcp.f32 %v1658_v15  ;;  %v1659_v21 = vadd.f32 1.0, %v4290_v17  ;;  %v1746_v15 = vld [vmem:[#allocation6 + $0x120] sm:$0xff]  ;;  %v3822_v17 = vpack.c.bf16 %v1755_v8, %v1747_v5  ;;  %v1820_v5 = vld [vmem:[#allocation6 + $0x370] sm:$0xff]  ;;  %v1829_v8 = vld [vmem:[#allocation6 + $0x3b8] sm:$0xff] }
 0x2d4   : > { %4295 = vrcp.f32 %v1659_v21  ;;  %v1763_v21 = vld [vmem:[#allocation6 + $0x1a8] sm:$0xff] }
 0x2db   : > { %v4292_v18 = vpop.eup %4291 }
 0x2dc   : > { %v1668_v19 = vmul.f32 %v4292_v18, %v4288_v16  ;;  %v4294_v20 = vpop.eup %4293  ;;  %v1754_v16 = vld [vmem:[#allocation6 + $0x160] sm:$0xff]  ;;  %v3886_v18 = vpack.c.bf16 %v1757_v11, %v1749_v9  ;;  %v1837_v9 = vld [vmem:[#allocation6 + $0x3f8] sm:$0xff] }
 0x2dd   : > { %v1667_v22 = vmul.f32 %v4294_v20, %v4695_v10  ;;  %v1756_v20 = vld [vmem:[#allocation6 + $0x170] sm:$0xff] }
 0x2de   : > { %v4296_v24 = vpop.eup %4295 }
 0x2df   : > { %v4719_v23 = vadd.f32 %v1668_v19, %v1667_v22  ;;  %v1748_v19 = vld [vmem:[#allocation6 + $0x130] sm:$0xff]  ;;  %v1771_v22 = vld [vmem:[#allocation6 + $0x1e8] sm:$0xff] }
 0x2e1   : > { %4297 = vtanh.f32 %v4719_v23 }
 0x2eb   : > { %v4298_v25 = vpop.eup %4297 }
 0x2ec   : > { %v4722_v26 = vmul.f32 %v4298_v25, %v4296_v24  ;;  %v1765_v24 = vld [vmem:[#allocation6 + $0x1b8] sm:$0xff] }
 0x2ed   : > { %v1773_v25 = vld [vmem:[#allocation6 + $0x1f8] sm:$0xff] }
 0x2ee   : > { %3139 = vst [vmem:[%s4658_s25 + $0x8] sm:$0xff] %v4722_v26 }
 0x2ff   : > { %v1564_v29 = vpop.f32.mrb[6].mxu0  ;;  %v1635_v30 = vpop.f32.mrb[6].mxu1 }
 0x300   : > { %v1644_v34 = vadd.f32 %v3129_v27, %v1564_v29  ;;  %v1566_v31 = vpop.f32.mrb[7].mxu0  ;;  %v1637_v10 = vpop.f32.mrb[7].mxu1  ;;  %v1646_v37 = vadd.f32 %v3131_v36, %v1635_v30  ;;  %v3824_v27 = vpack.c.bf16 %v1754_v16, %v1746_v15  ;;  %v1762_v29 = vld [vmem:[#allocation6 + $0x1a0] sm:$0xff]  ;;  %v1781_v36 = vld [vmem:[#allocation6 + $0x238] sm:$0xff] }
 0x301   : > { %v1645_v32 = vadd.f32 %v3130_v28, %v1566_v31  ;;  %v1647_v39 = vadd.f32 %v3132_v38, %v1637_v10  ;;  %v3888_v28 = vpack.c.bf16 %v1756_v20, %v1748_v19  ;;  %v1770_v30 = vld [vmem:[#allocation6 + $0x1e0] sm:$0xff]  ;;  %v3890_v31 = vpack.c.bf16 %v1773_v25, %v1765_v24  ;;  %v1764_v10 = vld [vmem:[#allocation6 + $0x1b0] sm:$0xff]  ;;  %v1843_v20 = vld [vmem:[#allocation6 + $0x428] sm:$0xff] }
 0x302   : > { %v3136_v33 = vmul.f32 -1.442695, %v1644_v34  ;;  %v3138_v40 = vmul.f32 -1.442695, %v1646_v37  ;;  %v3826_v34 = vpack.c.bf16 %v1771_v22, %v1763_v21  ;;  %v1789_v37 = vld [vmem:[#allocation6 + $0x278] sm:$0xff]  ;;  %v3828_v38 = vpack.c.bf16 %v1770_v30, %v1762_v29  ;;  %v1834_v15 = vld [vmem:[#allocation6 + $0x3e0] sm:$0xff] }
 0x303   : > { %v3137_v35 = vmul.f32 -1.442695, %v1645_v32  ;;  %v1772_v32 = vld [vmem:[#allocation6 + $0x1f0] sm:$0xff]  ;;  %v1851_v21 = vld [vmem:[#allocation6 + $0x468] sm:$0xff]  ;;  %v1845_v22 = vld [vmem:[#allocation6 + $0x438] sm:$0xff] }
 0x304   : > { %4299 = vpow2.f32 %v3136_v33  ;;  %v1779_v33 = vld [vmem:[#allocation6 + $0x228] sm:$0xff]  ;;  %v1836_v19 = vld [vmem:[#allocation6 + $0x3f0] sm:$0xff]  ;;  %v1853_v24 = vld [vmem:[#allocation6 + $0x478] sm:$0xff]  ;;  %v3846_v30 = vpack.c.bf16 %v1851_v21, %v1843_v20 }
 0x305   : > { %4301 = vpow2.f32 %v3137_v35  ;;  %v1787_v35 = vld [vmem:[#allocation6 + $0x268] sm:$0xff]  ;;  %v1850_v29 = vld [vmem:[#allocation6 + $0x460] sm:$0xff]  ;;  %v1925_v21 = vld [vmem:[#allocation6 + $0x6b8] sm:$0xff] }
 0x306   : > { %4303 = vtanh.f32 %v1647_v39  ;;  %v3892_v39 = vpack.c.bf16 %v1772_v32, %v1764_v10  ;;  %v1852_v10 = vld [vmem:[#allocation6 + $0x470] sm:$0xff]  ;;  %v1859_v32 = vld [vmem:[#allocation6 + $0x4a8] sm:$0xff] }
 0x307   : > { %4305 = vpow2.f32 %v3138_v40  ;;  %v1778_v40 = vld [vmem:[#allocation6 + $0x220] sm:$0xff]  ;;  %v1931_v20 = vld [vmem:[#allocation6 + $0x6e8] sm:$0xff] }
 0x30e   : > { %v4300_v42 = vpop.eup %4299 }
 0x30f   : > { %v1681_v43 = vadd.f32 1.0, %v4300_v42  ;;  %v4302_v44 = vpop.eup %4301  ;;  %v1786_v42 = vld [vmem:[#allocation6 + $0x260] sm:$0xff] }
 0x310   : > { %v1682_v45 = vadd.f32 1.0, %v4302_v44  ;;  %v4304_v47 = vpop.eup %4303  ;;  %v3894_v44 = vpack.c.bf16 %v1789_v37, %v1781_v36  ;;  %v1869_v36 = vld [vmem:[#allocation6 + $0x4f8] sm:$0xff] }
 0x311   : > { %4307 = vrcp.f32 %v1681_v43  ;;  %v4306_v48 = vpop.eup %4305  ;;  %v3830_v43 = vpack.c.bf16 %v1787_v35, %v1779_v33  ;;  %v1867_v33 = vld [vmem:[#allocation6 + $0x4e8] sm:$0xff]  ;;  %v1861_v35 = vld [vmem:[#allocation6 + $0x4b8] sm:$0xff] }
 0x312   : > { %4309 = vrcp.f32 %v1682_v45  ;;  %v1683_v52 = vadd.f32 1.0, %v4306_v48  ;;  %v1780_v45 = vld [vmem:[#allocation6 + $0x230] sm:$0xff]  ;;  %v1795_v48 = vld [vmem:[#allocation6 + $0x2a8] sm:$0xff] }
 0x314   : > { %4311 = vrcp.f32 %v1683_v52  ;;  %v3832_v52 = vpack.c.bf16 %v1786_v42, %v1778_v40  ;;  %v1866_v40 = vld [vmem:[#allocation6 + $0x4e0] sm:$0xff]  ;;  %v3850_v42 = vpack.c.bf16 %v1867_v33, %v1859_v32  ;;  %v1947_v32 = vld [vmem:[#allocation6 + $0x768] sm:$0xff]  ;;  %v1941_v33 = vld [vmem:[#allocation6 + $0x738] sm:$0xff] }
 0x31b   : > { %v4308_v49 = vpop.eup %4307 }
 0x31c   : > { %v1692_v50 = vmul.f32 %v4308_v49, %v4304_v47  ;;  %v4310_v51 = vpop.eup %4309  ;;  %v1788_v47 = vld [vmem:[#allocation6 + $0x270] sm:$0xff]  ;;  %v1803_v49 = vld [vmem:[#allocation6 + $0x2e8] sm:$0xff] }
 0x31d   : > { %v1691_v53 = vmul.f32 %v4310_v51, %v4706_v41  ;;  %v1730_v41 = vld [vmem:[#allocation6 + $0xa0] sm:$0xff]  ;;  %v1805_v51 = vld [vmem:[#allocation6 + $0x2f8] sm:$0xff]  ;;  %v3834_v57 = vpack.c.bf16 %v1803_v49, %v1795_v48  ;;  %v1883_v48 = vld [vmem:[#allocation6 + $0x568] sm:$0xff] }
 0x31e   : > { %v4312_v58 = vpop.eup %4311  ;;  %v3820_v12 = vpack.c.bf16 %v1738_v2, %v1730_v41  ;;  %v1818_v41 = vld [vmem:[#allocation6 + $0x360] sm:$0xff]  ;;  %v1877_v49 = vld [vmem:[#allocation6 + $0x538] sm:$0xff] }
 0x31f   : > { %v4731_v54 = vadd.f32 %v1692_v50, %v1691_v53  ;;  %v1797_v50 = vld [vmem:[#allocation6 + $0x2b8] sm:$0xff]  ;;  %v3896_v53 = vpack.c.bf16 %v1788_v47, %v1780_v45  ;;  %v1868_v45 = vld [vmem:[#allocation6 + $0x4f0] sm:$0xff]  ;;  %v1875_v47 = vld [vmem:[#allocation6 + $0x528] sm:$0xff] }
 0x320   : > { %v3898_v46 = vpack.c.bf16 %v1805_v51, %v1797_v50  ;;  %v1885_v50 = vld [vmem:[#allocation6 + $0x578] sm:$0xff] }
 0x321   : > { %4313 = vtanh.f32 %v4731_v54 }
 0x32b   : > { %v4314_v60 = vpop.eup %4313 }
 0x32c   : > { %v1695_v13 = vmul.f32 %v4314_v60, %v4312_v58  ;;  %v1796_v58 = vld [vmem:[#allocation6 + $0x2b0] sm:$0xff]  ;;  %v1811_v60 = vld [vmem:[#allocation6 + $0x328] sm:$0xff] }
 0x32d   : > { %v3838_v2 = vpack.c.bf16 %v1819_v61, %v1811_v60  ;;  %v1899_v60 = vld [vmem:[#allocation6 + $0x5e8] sm:$0xff]  ;;  %v1893_v61 = vld [vmem:[#allocation6 + $0x5b8] sm:$0xff] }
 0x32e   : > { %3140 = vst [vmem:[%s4663_s18 + $0x10] sm:$0xff] %v1695_v13  ;;  %2030 = vmatprep.mubr.f32.mxu0 %v1695_v13  ;;  %2101 = vmatprep.mubr.f32.mxu1 %v1695_v13 }
 0x32f   : > { %2031 = vmatmul.mubr.f32.vlgmr.msra.gmra.mrb[8].mxu0 %v4722_v26  ;;  %2102 = vmatmul.mubr.f32.vlgmr.msra.gmra.mrb[8].mxu1 %v4722_v26 }
 0x330   : > { %3817 = vmatpush1.bf16.msra.mxu0 %v3816_v0  ;;  %3881 = vmatpush1.bf16.msra.mxu1 %v3880_v1  ;;  %v3900_v0 = vpack.c.bf16 %v1804_v59, %v1796_v58  ;;  %v1810_v1 = vld [vmem:[#allocation6 + $0x320] sm:$0xff]  ;;  %v1884_v58 = vld [vmem:[#allocation6 + $0x570] sm:$0xff]  ;;  %v1891_v59 = vld [vmem:[#allocation6 + $0x5a8] sm:$0xff] }
 0x331   : > { %2172 = vmatprep.mubr.f32.mxu0 %v1695_v13  ;;  %2243 = vmatprep.mubr.f32.mxu1 %v1695_v13  ;;  %v3836_v13 = vpack.c.bf16 %v1802_v56, %v1794_v55  ;;  %v3840_v11 = vpack.c.bf16 %v1818_v41, %v1810_v1  ;;  %v1882_v55 = vld [vmem:[#allocation6 + $0x560] sm:$0xff]  ;;  %v3854_v56 = vpack.c.bf16 %v1883_v48, %v1875_v47  ;;  %v1963_v47 = vld [vmem:[#allocation6 + $0x7e8] sm:$0xff]  ;;  %v1957_v48 = vld [vmem:[#allocation6 + $0x7b8] sm:$0xff] }
 0x332   : > { %3819 = vmatprep.subr.bf16.mxu0 %v3818_v6  ;;  %3883 = vmatprep.subr.bf16.mxu1 %v3882_v7  ;;  %v1827_v6 = vld [vmem:[#allocation6 + $0x3a8] sm:$0xff]  ;;  %v1898_v1 = vld [vmem:[#allocation6 + $0x5e0] sm:$0xff]  ;;  %v3858_v41 = vpack.c.bf16 %v1899_v60, %v1891_v59 }
 0x333   : > { %v1835_v7 = vld [vmem:[#allocation6 + $0x3e8] sm:$0xff] }
 0x334   : > { %3821 = vmatpush1.bf16.msra.mxu0 %v3820_v12  ;;  %3885 = vmatpush1.bf16.msra.mxu1 %v3884_v14  ;;  %v3904_v12 = vpack.c.bf16 %v1820_v5, %v1812_v4  ;;  %v1826_v14 = vld [vmem:[#allocation6 + $0x3a0] sm:$0xff]  ;;  %v3842_v16 = vpack.c.bf16 %v1835_v7, %v1827_v6  ;;  %v1900_v4 = vld [vmem:[#allocation6 + $0x5f0] sm:$0xff]  ;;  %v1907_v5 = vld [vmem:[#allocation6 + $0x628] sm:$0xff] }
 0x335   : > { %3823 = vmatprep.subr.bf16.mxu0 %v3822_v17  ;;  %3887 = vmatprep.subr.bf16.mxu1 %v3886_v18  ;;  %v3906_v17 = vpack.c.bf16 %v1837_v9, %v1829_v8  ;;  %v1828_v18 = vld [vmem:[#allocation6 + $0x3b0] sm:$0xff]  ;;  %v3844_v25 = vpack.c.bf16 %v1834_v15, %v1826_v14  ;;  %v1915_v6 = vld [vmem:[#allocation6 + $0x668] sm:$0xff]  ;;  %v1909_v7 = vld [vmem:[#allocation6 + $0x638] sm:$0xff] }
 0x336   : > { %v1917_v8 = vld [vmem:[#allocation6 + $0x678] sm:$0xff]  ;;  %v1914_v14 = vld [vmem:[#allocation6 + $0x660] sm:$0xff]  ;;  %v3862_v15 = vpack.c.bf16 %v1915_v6, %v1907_v5  ;;  %v2320_v60 = vld [vmem:[#allocation6 + $0x8] sm:$0xff] }
 0x337   : > { %v2336_v5 = vld [vmem:[#allocation6 + $0x88] sm:$0xff] }
 0x338   : > { %3825 = vmatpush1.bf16.msra.mxu0 %v3824_v27  ;;  %3889 = vmatpush1.bf16.msra.mxu1 %v3888_v28  ;;  %v3908_v27 = vpack.c.bf16 %v1836_v19, %v1828_v18  ;;  %v1842_v28 = vld [vmem:[#allocation6 + $0x420] sm:$0xff]  ;;  %v1916_v18 = vld [vmem:[#allocation6 + $0x670] sm:$0xff]  ;;  %v1923_v19 = vld [vmem:[#allocation6 + $0x6a8] sm:$0xff] }
 0x339   : > { %3827 = vmatprep.subr.bf16.mxu0 %v3826_v34  ;;  %3891 = vmatprep.subr.bf16.mxu1 %v3890_v31  ;;  %v3910_v34 = vpack.c.bf16 %v1853_v24, %v1845_v22  ;;  %v1844_v31 = vld [vmem:[#allocation6 + $0x430] sm:$0xff]  ;;  %v3848_v37 = vpack.c.bf16 %v1850_v29, %v1842_v28  ;;  %v1933_v22 = vld [vmem:[#allocation6 + $0x6f8] sm:$0xff]  ;;  %v1930_v28 = vld [vmem:[#allocation6 + $0x6e0] sm:$0xff]  ;;  %v3866_v29 = vpack.c.bf16 %v1931_v20, %v1923_v19 }
 0x33a   : > { %v2360_v19 = vld [vmem:[#allocation6 + $0x148] sm:$0xff] }
 0x33c   : > { %3829 = vmatpush1.bf16.msra.mxu0 %v3828_v38  ;;  %3893 = vmatpush1.bf16.msra.mxu1 %v3892_v39  ;;  %v3912_v38 = vpack.c.bf16 %v1852_v10, %v1844_v31  ;;  %v1858_v39 = vld [vmem:[#allocation6 + $0x4a0] sm:$0xff]  ;;  %v1932_v31 = vld [vmem:[#allocation6 + $0x6f0] sm:$0xff]  ;;  %v1939_v10 = vld [vmem:[#allocation6 + $0x728] sm:$0xff] }
 0x33d   : > { %3831 = vmatprep.subr.bf16.mxu0 %v3830_v43  ;;  %3895 = vmatprep.subr.bf16.mxu1 %v3894_v44  ;;  %v3914_v43 = vpack.c.bf16 %v1869_v36, %v1861_v35  ;;  %v1860_v44 = vld [vmem:[#allocation6 + $0x4b0] sm:$0xff]  ;;  %v3852_v51 = vpack.c.bf16 %v1866_v40, %v1858_v39  ;;  %v1949_v35 = vld [vmem:[#allocation6 + $0x778] sm:$0xff]  ;;  %v1946_v39 = vld [vmem:[#allocation6 + $0x760] sm:$0xff]  ;;  %v3870_v40 = vpack.c.bf16 %v1947_v32, %v1939_v10 }
 0x33e   : > { %v2376_v10 = vld [vmem:[#allocation6 + $0x1c8] sm:$0xff]  ;;  %v2370_v32 = vld [vmem:[#allocation6 + $0x198] sm:$0xff] }
 0x340   : > { %3833 = vmatpush1.bf16.msra.mxu0 %v3832_v52  ;;  %3897 = vmatpush1.bf16.msra.mxu1 %v3896_v53  ;;  %v3916_v52 = vpack.c.bf16 %v1868_v45, %v1860_v44  ;;  %v1874_v53 = vld [vmem:[#allocation6 + $0x520] sm:$0xff]  ;;  %v1948_v44 = vld [vmem:[#allocation6 + $0x770] sm:$0xff]  ;;  %v1955_v45 = vld [vmem:[#allocation6 + $0x7a8] sm:$0xff] }
 0x341   : > { %3835 = vmatprep.subr.bf16.mxu0 %v3834_v57  ;;  %3899 = vmatprep.subr.bf16.mxu1 %v3898_v46  ;;  %v3918_v57 = vpack.c.bf16 %v1885_v50, %v1877_v49  ;;  %v1876_v46 = vld [vmem:[#allocation6 + $0x530] sm:$0xff]  ;;  %v3856_v63 = vpack.c.bf16 %v1882_v55, %v1874_v53  ;;  %v1965_v49 = vld [vmem:[#allocation6 + $0x7f8] sm:$0xff]  ;;  %v3874_v53 = vpack.c.bf16 %v1963_v47, %v1955_v45 }
 0x342   : > { %v3938_v55 = vpack.c.bf16 %v1965_v49, %v1957_v48  ;;  %v2386_v45 = vld [vmem:[#allocation6 + $0x218] sm:$0xff] }
 0x343   : > { %v2394_v47 = vld [vmem:[#allocation6 + $0x258] sm:$0xff] }
 0x344   : > { %3837 = vmatpush1.bf16.msra.mxu0 %v3836_v13  ;;  %3901 = vmatpush1.bf16.msra.mxu1 %v3900_v0  ;;  %v3920_v13 = vpack.c.bf16 %v1884_v58, %v1876_v46  ;;  %v1890_v0 = vld [vmem:[#allocation6 + $0x5a0] sm:$0xff]  ;;  %v1964_v46 = vld [vmem:[#allocation6 + $0x7f0] sm:$0xff] }
 0x345   : > { %3839 = vmatprep.subr.bf16.mxu0 %v3838_v2  ;;  %3903 = vmatprep.subr.bf16.mxu1 %v3902_v3  ;;  %v3922_v2 = vpack.c.bf16 %v1901_v62, %v1893_v61  ;;  %v1892_v3 = vld [vmem:[#allocation6 + $0x5b0] sm:$0xff]  ;;  %v3860_v9 = vpack.c.bf16 %v1898_v1, %v1890_v0  ;;  %v2328_v61 = vld [vmem:[#allocation6 + $0x48] sm:$0xff]  ;;  %v2322_v62 = vld [vmem:[#allocation6 + $0x18] sm:$0xff] }
 0x346   : > { %v2319_v0 = vld [vmem:[#allocation6] sm:$0xff] }
 0x347   : > { %v2327_v1 = vld [vmem:[#allocation6 + $0x40] sm:$0xff] }
 0x348   : > { %3841 = vmatpush1.bf16.msra.mxu0 %v3840_v11  ;;  %3905 = vmatpush1.bf16.msra.mxu1 %v3904_v12  ;;  %v3924_v11 = vpack.c.bf16 %v1900_v4, %v1892_v3  ;;  %v1906_v12 = vld [vmem:[#allocation6 + $0x620] sm:$0xff]  ;;  %v2321_v3 = vld [vmem:[#allocation6 + $0x10] sm:$0xff] }
 0x349   : > { %3843 = vmatprep.subr.bf16.mxu0 %v3842_v16  ;;  %3907 = vmatprep.subr.bf16.mxu1 %v3906_v17  ;;  %v3926_v16 = vpack.c.bf16 %v1917_v8, %v1909_v7  ;;  %v1908_v17 = vld [vmem:[#allocation6 + $0x630] sm:$0xff]  ;;  %v3864_v24 = vpack.c.bf16 %v1914_v14, %v1906_v12  ;;  %v2344_v7 = vld [vmem:[#allocation6 + $0xc8] sm:$0xff]  ;;  %v2338_v8 = vld [vmem:[#allocation6 + $0x98] sm:$0xff] }
 0x34a   : > { %v2329_v4 = vld [vmem:[#allocation6 + $0x50] sm:$0xff]  ;;  %v2335_v12 = vld [vmem:[#allocation6 + $0x80] sm:$0xff] }
 0x34b   : > { %v4008_v6 = vpack.c.bf16 %v2329_v4, %v2321_v3  ;;  %v2343_v14 = vld [vmem:[#allocation6 + $0xc0] sm:$0xff]  ;;  %v2416_v4 = vld [vmem:[#allocation6 + $0x308] sm:$0xff] }
 0x34c   : > { %3845 = vmatpush1.bf16.msra.mxu0 %v3844_v25  ;;  %3909 = vmatpush1.bf16.msra.mxu1 %v3908_v27  ;;  %v3928_v25 = vpack.c.bf16 %v1916_v18, %v1908_v17  ;;  %v1922_v27 = vld [vmem:[#allocation6 + $0x6a0] sm:$0xff]  ;;  %v2345_v17 = vld [vmem:[#allocation6 + $0xd0] sm:$0xff]  ;;  %v2352_v18 = vld [vmem:[#allocation6 + $0x108] sm:$0xff] }
 0x34d   : > { %3847 = vmatprep.subr.bf16.mxu0 %v3846_v30  ;;  %3911 = vmatprep.subr.bf16.mxu1 %v3910_v34  ;;  %v3930_v30 = vpack.c.bf16 %v1933_v22, %v1925_v21  ;;  %v1924_v34 = vld [vmem:[#allocation6 + $0x6b0] sm:$0xff]  ;;  %v3868_v36 = vpack.c.bf16 %v1930_v28, %v1922_v27  ;;  %v3950_v21 = vpack.c.bf16 %v2360_v19, %v2352_v18  ;;  %v2354_v22 = vld [vmem:[#allocation6 + $0x118] sm:$0xff]  ;;  %v2359_v28 = vld [vmem:[#allocation6 + $0x140] sm:$0xff] }
 0x34e   : > { %v2440_v18 = vld [vmem:[#allocation6 + $0x3c8] sm:$0xff]  ;;  %v2434_v19 = vld [vmem:[#allocation6 + $0x398] sm:$0xff] }
 0x350   : > { %3849 = vmatpush1.bf16.msra.mxu0 %v3848_v37  ;;  %3913 = vmatpush1.bf16.msra.mxu1 %v3912_v38  ;;  %v3932_v37 = vpack.c.bf16 %v1932_v31, %v1924_v34  ;;  %v1938_v38 = vld [vmem:[#allocation6 + $0x720] sm:$0xff]  ;;  %v2368_v31 = vld [vmem:[#allocation6 + $0x188] sm:$0xff] }
 0x351   : > { %3851 = vmatprep.subr.bf16.mxu0 %v3850_v42  ;;  %3915 = vmatprep.subr.bf16.mxu1 %v3914_v43  ;;  %v3934_v42 = vpack.c.bf16 %v1949_v35, %v1941_v33  ;;  %v1940_v43 = vld [vmem:[#allocation6 + $0x730] sm:$0xff]  ;;  %v3872_v50 = vpack.c.bf16 %v1946_v39, %v1938_v38  ;;  %v3954_v35 = vpack.c.bf16 %v2376_v10, %v2368_v31  ;;  %v2375_v38 = vld [vmem:[#allocation6 + $0x1c0] sm:$0xff]  ;;  %v2456_v31 = vld [vmem:[#allocation6 + $0x448] sm:$0xff] }
 0x352   : > { %v2450_v10 = vld [vmem:[#allocation6 + $0x418] sm:$0xff] }
 0x354   : > { %3853 = vmatpush1.bf16.msra.mxu0 %v3852_v51  ;;  %3917 = vmatpush1.bf16.msra.mxu1 %v3916_v52  ;;  %v3936_v51 = vpack.c.bf16 %v1948_v44, %v1940_v43  ;;  %v1954_v52 = vld [vmem:[#allocation6 + $0x7a0] sm:$0xff]  ;;  %v2384_v43 = vld [vmem:[#allocation6 + $0x208] sm:$0xff] }
 0x355   : > { %3855 = vmatprep.subr.bf16.mxu0 %v3854_v56  ;;  %3919 = vmatprep.subr.bf16.mxu1 %v3918_v57  ;;  %v1962_v56 = vld [vmem:[#allocation6 + $0x7e0] sm:$0xff]  ;;  %v1956_v57 = vld [vmem:[#allocation6 + $0x7b0] sm:$0xff]  ;;  %v2392_v44 = vld [vmem:[#allocation6 + $0x248] sm:$0xff] }
 0x356   : > { %v3876_v58 = vpack.c.bf16 %v1962_v56, %v1954_v52  ;;  %v3940_v59 = vpack.c.bf16 %v1964_v46, %v1956_v57  ;;  %v2383_v52 = vld [vmem:[#allocation6 + $0x200] sm:$0xff]  ;;  %v2393_v57 = vld [vmem:[#allocation6 + $0x250] sm:$0xff] }
 0x358   : > { %3857 = vmatpush1.bf16.msra.mxu0 %v3856_v63  ;;  %3921 = vmatpush1.bf16.msra.mxu1 %v3920_v13  ;;  %v3942_v63 = vpack.c.bf16 %v2328_v61, %v2320_v60  ;;  %v2330_v13 = vld [vmem:[#allocation6 + $0x58] sm:$0xff] }
 0x359   : > { %3859 = vmatprep.subr.bf16.mxu0 %v3858_v41  ;;  %3923 = vmatprep.subr.bf16.mxu1 %v3922_v2  ;;  %v4006_v41 = vpack.c.bf16 %v2330_v13, %v2322_v62  ;;  %v3944_v2 = vpack.c.bf16 %v2327_v1, %v2319_v0  ;;  %v2402_v60 = vld [vmem:[#allocation6 + $0x298] sm:$0xff]  ;;  %v2399_v13 = vld [vmem:[#allocation6 + $0x280] sm:$0xff]  ;;  %v2401_v1 = vld [vmem:[#allocation6 + $0x290] sm:$0xff] }
 0x35a   : > { %v2410_v62 = vld [vmem:[#allocation6 + $0x2d8] sm:$0xff]  ;;  %v2407_v0 = vld [vmem:[#allocation6 + $0x2c0] sm:$0xff] }
 0x35c   : > { %3861 = vmatpush1.bf16.msra.mxu0 %v3860_v9  ;;  %3925 = vmatpush1.bf16.msra.mxu1 %v3924_v11  ;;  %v2346_v9 = vld [vmem:[#allocation6 + $0xd8] sm:$0xff] }
 0x35d   : > { %3863 = vmatprep.subr.bf16.mxu0 %v3862_v15  ;;  %3927 = vmatprep.subr.bf16.mxu1 %v3926_v16  ;;  %v4010_v11 = vpack.c.bf16 %v2346_v9, %v2338_v8  ;;  %v2337_v15 = vld [vmem:[#allocation6 + $0x90] sm:$0xff]  ;;  %v3948_v16 = vpack.c.bf16 %v2343_v14, %v2335_v12  ;;  %v2426_v8 = vld [vmem:[#allocation6 + $0x358] sm:$0xff]  ;;  %v2415_v9 = vld [vmem:[#allocation6 + $0x300] sm:$0xff] }
 0x35e   : > { %v4012_v20 = vpack.c.bf16 %v2345_v17, %v2337_v15  ;;  %v2417_v14 = vld [vmem:[#allocation6 + $0x310] sm:$0xff]  ;;  %v2432_v17 = vld [vmem:[#allocation6 + $0x388] sm:$0xff] }
 0x35f   : > { %v2425_v15 = vld [vmem:[#allocation6 + $0x350] sm:$0xff] }
 0x360   : > { %3865 = vmatpush1.bf16.msra.mxu0 %v3864_v24  ;;  %3929 = vmatpush1.bf16.msra.mxu1 %v3928_v25  ;;  %v2362_v24 = vld [vmem:[#allocation6 + $0x158] sm:$0xff]  ;;  %v2351_v25 = vld [vmem:[#allocation6 + $0x100] sm:$0xff] }
 0x361   : > { %3867 = vmatprep.subr.bf16.mxu0 %v3866_v29  ;;  %3931 = vmatprep.subr.bf16.mxu1 %v3930_v30  ;;  %v4014_v27 = vpack.c.bf16 %v2362_v24, %v2354_v22  ;;  %v2353_v29 = vld [vmem:[#allocation6 + $0x110] sm:$0xff]  ;;  %v3952_v34 = vpack.c.bf16 %v2359_v28, %v2351_v25  ;;  %v2431_v22 = vld [vmem:[#allocation6 + $0x380] sm:$0xff] }
 0x362   : > { %v2361_v30 = vld [vmem:[#allocation6 + $0x150] sm:$0xff]  ;;  %v2439_v24 = vld [vmem:[#allocation6 + $0x3c0] sm:$0xff] }
 0x363   : > { %v4016_v33 = vpack.c.bf16 %v2361_v30, %v2353_v29  ;;  %v2433_v28 = vld [vmem:[#allocation6 + $0x390] sm:$0xff] }
 0x364   : > { %3869 = vmatpush1.bf16.msra.mxu0 %v3868_v36  ;;  %3933 = vmatpush1.bf16.msra.mxu1 %v3932_v37  ;;  %v2378_v36 = vld [vmem:[#allocation6 + $0x1d8] sm:$0xff]  ;;  %v2367_v37 = vld [vmem:[#allocation6 + $0x180] sm:$0xff]  ;;  %v2441_v29 = vld [vmem:[#allocation6 + $0x3d0] sm:$0xff] }
 0x365   : > { %3871 = vmatprep.subr.bf16.mxu0 %v3870_v40  ;;  %3935 = vmatprep.subr.bf16.mxu1 %v3934_v42  ;;  %v4018_v39 = vpack.c.bf16 %v2378_v36, %v2370_v32  ;;  %v2369_v40 = vld [vmem:[#allocation6 + $0x190] sm:$0xff]  ;;  %v3956_v48 = vpack.c.bf16 %v2375_v38, %v2367_v37  ;;  %v4036_v30 = vpack.c.bf16 %v2441_v29, %v2433_v28  ;;  %v2455_v36 = vld [vmem:[#allocation6 + $0x440] sm:$0xff]  ;;  %v2528_v29 = vld [vmem:[#allocation6 + $0x688] sm:$0xff] }
 0x366   : > { %v2377_v42 = vld [vmem:[#allocation6 + $0x1d0] sm:$0xff] }
 0x367   : > { %v4020_v49 = vpack.c.bf16 %v2377_v42, %v2369_v40  ;;  %v2457_v40 = vld [vmem:[#allocation6 + $0x450] sm:$0xff] }
 0x368   : > { %3873 = vmatpush1.bf16.msra.mxu0 %v3872_v50  ;;  %3937 = vmatpush1.bf16.msra.mxu1 %v3936_v51  ;;  %v3958_v50 = vpack.c.bf16 %v2392_v44, %v2384_v43  ;;  %v4022_v51 = vpack.c.bf16 %v2394_v47, %v2386_v45  ;;  %v2464_v43 = vld [vmem:[#allocation6 + $0x488] sm:$0xff]  ;;  %v2466_v45 = vld [vmem:[#allocation6 + $0x498] sm:$0xff] }
 0x369   : > { %3875 = vmatprep.subr.bf16.mxu0 %v3874_v53  ;;  %3939 = vmatprep.subr.bf16.mxu1 %v3938_v55  ;;  %v2391_v53 = vld [vmem:[#allocation6 + $0x240] sm:$0xff]  ;;  %v2385_v55 = vld [vmem:[#allocation6 + $0x210] sm:$0xff]  ;;  %v2472_v44 = vld [vmem:[#allocation6 + $0x4c8] sm:$0xff] }
 0x36a   : > { %v3960_v56 = vpack.c.bf16 %v2391_v53, %v2383_v52  ;;  %v4024_v46 = vpack.c.bf16 %v2393_v57, %v2385_v55  ;;  %v3978_v47 = vpack.c.bf16 %v2472_v44, %v2464_v43  ;;  %v2465_v53 = vld [vmem:[#allocation6 + $0x490] sm:$0xff]  ;;  %v2480_v57 = vld [vmem:[#allocation6 + $0x508] sm:$0xff]  ;;  %v2546_v43 = vld [vmem:[#allocation6 + $0x718] sm:$0xff] }
 0x36b   : > { %v2473_v55 = vld [vmem:[#allocation6 + $0x4d0] sm:$0xff]  ;;  %v2554_v44 = vld [vmem:[#allocation6 + $0x758] sm:$0xff] }
 0x36c   : > { %3877 = vmatpush1.bf16.msra.mxu0 %v3876_v58  ;;  %3941 = vmatpush1.bf16.msra.mxu1 %v3940_v59  ;;  %v2400_v58 = vld [vmem:[#allocation6 + $0x288] sm:$0xff] }
 0x36d   : > { %3943 = vmatprep.subr.bf16.mxu0 %v3942_v63  ;;  %4007 = vmatprep.subr.bf16.mxu1 %v4006_v41  ;;  %v2408_v59 = vld [vmem:[#allocation6 + $0x2c8] sm:$0xff]  ;;  %v4026_v63 = vpack.c.bf16 %v2410_v62, %v2402_v60  ;;  %v3964_v41 = vpack.c.bf16 %v2407_v0, %v2399_v13  ;;  %v2490_v60 = vld [vmem:[#allocation6 + $0x558] sm:$0xff]  ;;  %v2487_v62 = vld [vmem:[#allocation6 + $0x540] sm:$0xff] }
 0x36e   : > { %v3962_v61 = vpack.c.bf16 %v2408_v59, %v2400_v58  ;;  %v2482_v58 = vld [vmem:[#allocation6 + $0x518] sm:$0xff]  ;;  %v2481_v0 = vld [vmem:[#allocation6 + $0x510] sm:$0xff] }
 0x36f   : > { %2173 = vmatmul.mubr.f32.vlgmr.msra.gmra.mrb[10].mxu0 %v4722_v26  ;;  %2244 = vmatmul.mubr.f32.vlgmr.msra.gmra.mrb[10].mxu1 %v4722_v26  ;;  %v3946_v26 = vpack.c.bf16 %v2344_v7, %v2336_v5  ;;  %v2424_v5 = vld [vmem:[#allocation6 + $0x348] sm:$0xff] }
 0x370   : > { %3945 = vmatpush1.bf16.msra.mxu0 %v3944_v2  ;;  %4009 = vmatpush1.bf16.msra.mxu1 %v4008_v6  ;;  %v2409_v2 = vld [vmem:[#allocation6 + $0x2d0] sm:$0xff]  ;;  %v2418_v6 = vld [vmem:[#allocation6 + $0x318] sm:$0xff]  ;;  %v3966_v7 = vpack.c.bf16 %v2424_v5, %v2416_v4 }
 0x371   : > { %3947 = vmatprep.subr.bf16.mxu0 %v3946_v26  ;;  %4011 = vmatprep.subr.bf16.mxu1 %v4010_v11  ;;  %v4028_v3 = vpack.c.bf16 %v2409_v2, %v2401_v1  ;;  %v2423_v26 = vld [vmem:[#allocation6 + $0x340] sm:$0xff]  ;;  %v4030_v11 = vpack.c.bf16 %v2426_v8, %v2418_v6  ;;  %v2489_v1 = vld [vmem:[#allocation6 + $0x550] sm:$0xff]  ;;  %v2496_v2 = vld [vmem:[#allocation6 + $0x588] sm:$0xff] }
 0x372   : > { %v3968_v12 = vpack.c.bf16 %v2423_v26, %v2415_v9  ;;  %v2498_v4 = vld [vmem:[#allocation6 + $0x598] sm:$0xff]  ;;  %v2503_v8 = vld [vmem:[#allocation6 + $0x5c0] sm:$0xff] }
 0x373   : > { %v2506_v6 = vld [vmem:[#allocation6 + $0x5d8] sm:$0xff] }
 0x374   : > { %3949 = vmatpush1.bf16.msra.mxu0 %v3948_v16  ;;  %4013 = vmatpush1.bf16.msra.mxu1 %v4012_v20  ;;  %v4032_v16 = vpack.c.bf16 %v2425_v15, %v2417_v14  ;;  %v3970_v20 = vpack.c.bf16 %v2440_v18, %v2432_v17  ;;  %v4050_v9 = vpack.c.bf16 %v2506_v6, %v2498_v4  ;;  %v2512_v15 = vld [vmem:[#allocation6 + $0x608] sm:$0xff]  ;;  %v2514_v17 = vld [vmem:[#allocation6 + $0x618] sm:$0xff]  ;;  %v3141_v6 = vld [vmem:[%s4645_s19 + $0x40] sm:$0xff] }
 0x375   : > { %3951 = vmatprep.subr.bf16.mxu0 %v3950_v21  ;;  %4015 = vmatprep.subr.bf16.mxu1 %v4014_v27  ;;  %v2442_v21 = vld [vmem:[#allocation6 + $0x3d8] sm:$0xff]  ;;  %v3972_v27 = vpack.c.bf16 %v2439_v24, %v2431_v22 }
 0x376   : > { %v4034_v25 = vpack.c.bf16 %v2442_v21, %v2434_v19  ;;  %v2522_v19 = vld [vmem:[#allocation6 + $0x658] sm:$0xff]  ;;  %v2519_v21 = vld [vmem:[#allocation6 + $0x640] sm:$0xff] }
 0x377   : > { %v4054_v22 = vpack.c.bf16 %v2522_v19, %v2514_v17  ;;  %v2334_v4 = vld [vmem:[#allocation6 + $0x78] sm:$0xff]  ;;  %v3143_v17 = vld [vmem:[%s4645_s19 + $0x50] sm:$0xff] }
 0x378   : > { %3953 = vmatpush1.bf16.msra.mxu0 %v3952_v34  ;;  %4017 = vmatpush1.bf16.msra.mxu1 %v4016_v33  ;;  %v2448_v34 = vld [vmem:[#allocation6 + $0x408] sm:$0xff]  ;;  %v2458_v33 = vld [vmem:[#allocation6 + $0x458] sm:$0xff] }
 0x379   : > { %3955 = vmatprep.subr.bf16.mxu0 %v3954_v35  ;;  %4019 = vmatprep.subr.bf16.mxu1 %v4018_v39  ;;  %v3974_v32 = vpack.c.bf16 %v2456_v31, %v2448_v34  ;;  %v2447_v35 = vld [vmem:[#allocation6 + $0x400] sm:$0xff]  ;;  %v4038_v37 = vpack.c.bf16 %v2458_v33, %v2450_v10  ;;  %v2449_v39 = vld [vmem:[#allocation6 + $0x410] sm:$0xff]  ;;  %v2530_v34 = vld [vmem:[#allocation6 + $0x698] sm:$0xff] }
 0x37a   : > { %v3976_v38 = vpack.c.bf16 %v2455_v36, %v2447_v35  ;;  %v4040_v42 = vpack.c.bf16 %v2457_v40, %v2449_v39  ;;  %v2538_v10 = vld [vmem:[#allocation6 + $0x6d8] sm:$0xff]  ;;  %v2535_v33 = vld [vmem:[#allocation6 + $0x6c0] sm:$0xff]  ;;  %v2544_v39 = vld [vmem:[#allocation6 + $0x708] sm:$0xff] }
 0x37b   : > { %v4058_v35 = vpack.c.bf16 %v2538_v10, %v2530_v34  ;;  %v3144_v19 = vld [vmem:[%s4645_s19 + $0x58] sm:$0xff] }
 0x37c   : > { %3957 = vmatpush1.bf16.msra.mxu0 %v3956_v48  ;;  %4021 = vmatpush1.bf16.msra.mxu1 %v4020_v49  ;;  %v2474_v48 = vld [vmem:[#allocation6 + $0x4d8] sm:$0xff]  ;;  %v2463_v49 = vld [vmem:[#allocation6 + $0x480] sm:$0xff] }
 0x37d   : > { %3959 = vmatprep.subr.bf16.mxu0 %v3958_v50  ;;  %4023 = vmatprep.subr.bf16.mxu1 %v4022_v51  ;;  %v2471_v50 = vld [vmem:[#allocation6 + $0x4c0] sm:$0xff]  ;;  %v4042_v51 = vpack.c.bf16 %v2474_v48, %v2466_v45 }
 0x37e   : > { %v3980_v52 = vpack.c.bf16 %v2471_v50, %v2463_v49  ;;  %v2543_v48 = vld [vmem:[#allocation6 + $0x700] sm:$0xff]  ;;  %v2545_v50 = vld [vmem:[#allocation6 + $0x710] sm:$0xff] }
 0x37f   : > { %v2551_v49 = vld [vmem:[#allocation6 + $0x740] sm:$0xff] }
 0x380   : > { %3961 = vmatpush1.bf16.msra.mxu0 %v3960_v56  ;;  %4025 = vmatpush1.bf16.msra.mxu1 %v4024_v46  ;;  %v4044_v56 = vpack.c.bf16 %v2473_v55, %v2465_v53  ;;  %v2488_v46 = vld [vmem:[#allocation6 + $0x548] sm:$0xff] }
 0x381   : > { %3963 = vmatprep.subr.bf16.mxu0 %v3962_v61  ;;  %4027 = vmatprep.subr.bf16.mxu1 %v4026_v63  ;;  %v3982_v59 = vpack.c.bf16 %v2488_v46, %v2480_v57  ;;  %v2479_v61 = vld [vmem:[#allocation6 + $0x500] sm:$0xff]  ;;  %v4046_v63 = vpack.c.bf16 %v2490_v60, %v2482_v58  ;;  %v2560_v53 = vld [vmem:[#allocation6 + $0x788] sm:$0xff]  ;;  %v2562_v46 = vld [vmem:[#allocation6 + $0x798] sm:$0xff] }
 0x382   : > { %v3984_v13 = vpack.c.bf16 %v2487_v62, %v2479_v61  ;;  %v2568_v55 = vld [vmem:[#allocation6 + $0x7c8] sm:$0xff]  ;;  %v2570_v58 = vld [vmem:[#allocation6 + $0x7d8] sm:$0xff]  ;;  %v2567_v61 = vld [vmem:[#allocation6 + $0x7c0] sm:$0xff] }
 0x383   : > { %v4002_v57 = vpack.c.bf16 %v2568_v55, %v2560_v53  ;;  %v4066_v60 = vpack.c.bf16 %v2570_v58, %v2562_v46  ;;  %v2561_v62 = vld [vmem:[#allocation6 + $0x790] sm:$0xff] }
 0x384   : > { %3965 = vmatpush1.bf16.msra.mxu0 %v3964_v41  ;;  %4029 = vmatpush1.bf16.msra.mxu1 %v4028_v3  ;;  %v4048_v41 = vpack.c.bf16 %v2489_v1, %v2481_v0  ;;  %v2504_v3 = vld [vmem:[#allocation6 + $0x5c8] sm:$0xff] }
 0x385   : > { %3967 = vmatprep.subr.bf16.mxu0 %v3966_v7  ;;  %4031 = vmatprep.subr.bf16.mxu1 %v4030_v11  ;;  %v3986_v5 = vpack.c.bf16 %v2504_v3, %v2496_v2  ;;  %v2495_v7 = vld [vmem:[#allocation6 + $0x580] sm:$0xff]  ;;  %v2497_v11 = vld [vmem:[#allocation6 + $0x590] sm:$0xff]  ;;  %v2324_v1 = vld [vmem:[#allocation6 + $0x28] sm:$0xff] }
 0x386   : > { %v3988_v26 = vpack.c.bf16 %v2503_v8, %v2495_v7  ;;  %v2326_v2 = vld [vmem:[#allocation6 + $0x38] sm:$0xff]  ;;  %v3142_v7 = vld [vmem:[%s4645_s19 + $0x48] sm:$0xff] }
 0x388   : > { %3969 = vmatpush1.bf16.msra.mxu0 %v3968_v12  ;;  %4033 = vmatpush1.bf16.msra.mxu1 %v4032_v16  ;;  %v2505_v12 = vld [vmem:[#allocation6 + $0x5d0] sm:$0xff]  ;;  %v2520_v16 = vld [vmem:[#allocation6 + $0x648] sm:$0xff] }
 0x389   : > { %3971 = vmatprep.subr.bf16.mxu0 %v3970_v20  ;;  %4035 = vmatprep.subr.bf16.mxu1 %v4034_v25  ;;  %v4052_v14 = vpack.c.bf16 %v2505_v12, %v2497_v11  ;;  %v3990_v18 = vpack.c.bf16 %v2520_v16, %v2512_v15  ;;  %v2511_v20 = vld [vmem:[#allocation6 + $0x600] sm:$0xff]  ;;  %v2513_v25 = vld [vmem:[#allocation6 + $0x610] sm:$0xff] }
 0x38a   : > { %v3992_v24 = vpack.c.bf16 %v2519_v21, %v2511_v20 }
 0x38c   : > { %3973 = vmatpush1.bf16.msra.mxu0 %v3972_v27  ;;  %4037 = vmatpush1.bf16.msra.mxu1 %v4036_v30  ;;  %v2521_v27 = vld [vmem:[#allocation6 + $0x650] sm:$0xff]  ;;  %v2536_v30 = vld [vmem:[#allocation6 + $0x6c8] sm:$0xff] }
 0x38d   : > { %3975 = vmatprep.subr.bf16.mxu0 %v3974_v32  ;;  %4039 = vmatprep.subr.bf16.mxu1 %v4038_v37  ;;  %v4056_v28 = vpack.c.bf16 %v2521_v27, %v2513_v25  ;;  %v3994_v31 = vpack.c.bf16 %v2536_v30, %v2528_v29  ;;  %v2527_v32 = vld [vmem:[#allocation6 + $0x680] sm:$0xff]  ;;  %v2529_v37 = vld [vmem:[#allocation6 + $0x690] sm:$0xff] }
 0x38e   : > { %v3996_v36 = vpack.c.bf16 %v2535_v33, %v2527_v32 }
 0x390   : > { %3977 = vmatpush1.bf16.msra.mxu0 %v3976_v38  ;;  %4041 = vmatpush1.bf16.msra.mxu1 %v4040_v42  ;;  %v2537_v38 = vld [vmem:[#allocation6 + $0x6d0] sm:$0xff]  ;;  %v2552_v42 = vld [vmem:[#allocation6 + $0x748] sm:$0xff] }
 0x391   : > { %3979 = vmatprep.subr.bf16.mxu0 %v3978_v47  ;;  %4043 = vmatprep.subr.bf16.mxu1 %v4042_v51  ;;  %v4060_v40 = vpack.c.bf16 %v2537_v38, %v2529_v37  ;;  %v3998_v45 = vpack.c.bf16 %v2552_v42, %v2544_v39  ;;  %v4062_v47 = vpack.c.bf16 %v2554_v44, %v2546_v43  ;;  %v3145_v38 = vld [vmem:[%s4647_s23 + $0x20] sm:$0xff]  ;;  %v3146_v39 = vld [vmem:[%s4647_s23 + $0x28] sm:$0xff] }
 0x392   : > { %v4000_v51 = vpack.c.bf16 %v2551_v49, %v2543_v48  ;;  %v3147_v49 = vld [vmem:[%s4647_s23 + $0x30] sm:$0xff] }
 0x394   : > { %3981 = vmatpush1.bf16.msra.mxu0 %v3980_v52  ;;  %4045 = vmatpush1.bf16.msra.mxu1 %v4044_v56  ;;  %v2553_v52 = vld [vmem:[#allocation6 + $0x750] sm:$0xff] }
 0x395   : > { %3983 = vmatprep.subr.bf16.mxu0 %v3982_v59  ;;  %4047 = vmatprep.subr.bf16.mxu1 %v4046_v63  ;;  %v4064_v56 = vpack.c.bf16 %v2553_v52, %v2545_v50  ;;  %v2559_v59 = vld [vmem:[#allocation6 + $0x780] sm:$0xff]  ;;  %v2569_v63 = vld [vmem:[#allocation6 + $0x7d0] sm:$0xff] }
 0x396   : > { %v4068_v0 = vpack.c.bf16 %v2569_v63, %v2561_v62 }
 0x398   : > { %3985 = vmatpush1.bf16.msra.mxu0 %v3984_v13  ;;  %4049 = vmatpush1.bf16.msra.mxu1 %v4048_v41  ;;  %v4004_v13 = vpack.c.bf16 %v2567_v61, %v2559_v59  ;;  %v2332_v41 = vld [vmem:[#allocation6 + $0x68] sm:$0xff] }
 0x399   : > { %3987 = vmatprep.subr.bf16.mxu0 %v3986_v5  ;;  %4051 = vmatprep.subr.bf16.mxu1 %v4050_v9  ;;  %v4070_v3 = vpack.c.bf16 %v2332_v41, %v2324_v1  ;;  %v4134_v5 = vpack.c.bf16 %v2334_v4, %v2326_v2  ;;  %v2323_v1 = vld [vmem:[#allocation6 + $0x20] sm:$0xff]  ;;  %v2325_v2 = vld [vmem:[#allocation6 + $0x30] sm:$0xff] }
 0x39a   : > { %v2331_v41 = vld [vmem:[#allocation6 + $0x60] sm:$0xff] }
 0x39c   : > { %3989 = vmatpush1.bf16.msra.mxu0 %v3988_v26  ;;  %4053 = vmatpush1.bf16.msra.mxu1 %v4052_v14 }
 0x39d   : > { %3991 = vmatprep.subr.bf16.mxu0 %v3990_v18  ;;  %4055 = vmatprep.subr.bf16.mxu1 %v4054_v22 }
 0x3a0   : > { %3993 = vmatpush1.bf16.msra.mxu0 %v3992_v24  ;;  %4057 = vmatpush1.bf16.msra.mxu1 %v4056_v28 }
 0x3a1   : > { %3995 = vmatprep.subr.bf16.mxu0 %v3994_v31  ;;  %4059 = vmatprep.subr.bf16.mxu1 %v4058_v35 }
 0x3a4   : > { %3997 = vmatpush1.bf16.msra.mxu0 %v3996_v36  ;;  %4061 = vmatpush1.bf16.msra.mxu1 %v4060_v40 }
 0x3a5   : > { %3999 = vmatprep.subr.bf16.mxu0 %v3998_v45  ;;  %4063 = vmatprep.subr.bf16.mxu1 %v4062_v47 }
 0x3a8   : > { %4001 = vmatpush1.bf16.msra.mxu0 %v4000_v51  ;;  %4065 = vmatpush1.bf16.msra.mxu1 %v4064_v56  ;;  %v3148_v51 = vld [vmem:[%s4647_s23 + $0x38] sm:$0xff] }
 0x3a9   : > { %4003 = vmatprep.subr.bf16.mxu0 %v4002_v57  ;;  %4067 = vmatprep.subr.bf16.mxu1 %v4066_v60 }
 0x3ac   : > { %4005 = vmatpush1.bf16.msra.mxu0 %v4004_v13  ;;  %4069 = vmatpush1.bf16.msra.mxu1 %v4068_v0 }
 0x3ad   : > { %4071 = vmatprep.subr.bf16.mxu0 %v4070_v3  ;;  %4135 = vmatprep.subr.bf16.mxu1 %v4134_v5  ;;  %v2333_v3 = vld [vmem:[#allocation6 + $0x70] sm:$0xff]  ;;  %v2340_v5 = vld [vmem:[#allocation6 + $0xa8] sm:$0xff] }
 0x402   : > { %v2032_v8 = vpop.f32.mrb[8].mxu0  ;;  %v2103_v9 = vpop.f32.mrb[8].mxu1 }
 0x403   : > { %v2250_v26 = vadd.f32 %v3141_v6, %v2032_v8  ;;  %v2034_v11 = vpop.f32.mrb[9].mxu0  ;;  %v2105_v12 = vpop.f32.mrb[9].mxu1  ;;  %v2252_v18 = vadd.f32 %v3143_v17, %v2103_v9  ;;  %v2342_v8 = vld [vmem:[#allocation6 + $0xb8] sm:$0xff]  ;;  %v2356_v17 = vld [vmem:[#allocation6 + $0x128] sm:$0xff] }
 0x404   : > { %v2251_v14 = vadd.f32 %v3142_v7, %v2034_v11  ;;  %v2253_v20 = vadd.f32 %v3144_v19, %v2105_v12  ;;  %v2348_v7 = vld [vmem:[#allocation6 + $0xe8] sm:$0xff]  ;;  %v2350_v9 = vld [vmem:[#allocation6 + $0xf8] sm:$0xff]  ;;  %v4072_v11 = vpack.c.bf16 %v2331_v41, %v2323_v1  ;;  %v4136_v12 = vpack.c.bf16 %v2333_v3, %v2325_v2  ;;  %v2403_v1 = vld [vmem:[#allocation6 + $0x2a0] sm:$0xff] }
 0x405   : > { %v3149_v15 = vmul.f32 -1.442695, %v2250_v26  ;;  %v3151_v21 = vmul.f32 -1.442695, %v2252_v18  ;;  %v4074_v18 = vpack.c.bf16 %v2348_v7, %v2340_v5  ;;  %v4138_v19 = vpack.c.bf16 %v2350_v9, %v2342_v8  ;;  %v2411_v41 = vld [vmem:[#allocation6 + $0x2e0] sm:$0xff]  ;;  %v2413_v5 = vld [vmem:[#allocation6 + $0x2f0] sm:$0xff] }
 0x406   : > { %v3150_v16 = vmul.f32 -1.442695, %v2251_v14  ;;  %v2347_v14 = vld [vmem:[#allocation6 + $0xe0] sm:$0xff]  ;;  %v2428_v7 = vld [vmem:[#allocation6 + $0x368] sm:$0xff]  ;;  %v2422_v8 = vld [vmem:[#allocation6 + $0x338] sm:$0xff] }
 0x407   : > { %4315 = vpow2.f32 %v3149_v15  ;;  %v2341_v15 = vld [vmem:[#allocation6 + $0xb0] sm:$0xff]  ;;  %v2430_v9 = vld [vmem:[#allocation6 + $0x378] sm:$0xff] }
 0x408   : > { %4317 = vpow2.f32 %v3150_v16  ;;  %v2349_v16 = vld [vmem:[#allocation6 + $0xf0] sm:$0xff] }
 0x409   : > { %4319 = vtanh.f32 %v2253_v20  ;;  %v2364_v20 = vld [vmem:[#allocation6 + $0x168] sm:$0xff] }
 0x40a   : > { %4321 = vpow2.f32 %v3151_v21  ;;  %v2358_v21 = vld [vmem:[#allocation6 + $0x138] sm:$0xff] }
 0x411   : > { %v4316_v22 = vpop.eup %4315 }
 0x412   : > { %v2267_v24 = vadd.f32 1.0, %v4316_v22  ;;  %v4318_v25 = vpop.eup %4317  ;;  %v2366_v22 = vld [vmem:[#allocation6 + $0x178] sm:$0xff] }
 0x413   : > { %v2268_v27 = vadd.f32 1.0, %v4318_v25  ;;  %v4320_v28 = vpop.eup %4319  ;;  %v4140_v25 = vpack.c.bf16 %v2349_v16, %v2341_v15  ;;  %v4158_v15 = vpack.c.bf16 %v2430_v9, %v2422_v8  ;;  %v2421_v16 = vld [vmem:[#allocation6 + $0x330] sm:$0xff]  ;;  %v2510_v8 = vld [vmem:[#allocation6 + $0x5f8] sm:$0xff] }
 0x414   : > { %4323 = vrcp.f32 %v2267_v24  ;;  %v4322_v29 = vpop.eup %4321 }
 0x415   : > { %4325 = vrcp.f32 %v2268_v27  ;;  %v2269_v10 = vadd.f32 1.0, %v4322_v29  ;;  %v2355_v27 = vld [vmem:[#allocation6 + $0x120] sm:$0xff]  ;;  %v4078_v29 = vpack.c.bf16 %v2364_v20, %v2356_v17  ;;  %v2429_v17 = vld [vmem:[#allocation6 + $0x370] sm:$0xff]  ;;  %v2438_v20 = vld [vmem:[#allocation6 + $0x3b8] sm:$0xff] }
 0x417   : > { %4327 = vrcp.f32 %v2269_v10  ;;  %v2372_v10 = vld [vmem:[#allocation6 + $0x1a8] sm:$0xff] }
 0x41e   : > { %v4324_v30 = vpop.eup %4323 }
 0x41f   : > { %v2278_v34 = vmul.f32 %v4324_v30, %v4320_v28  ;;  %v4326_v31 = vpop.eup %4325  ;;  %v2363_v28 = vld [vmem:[#allocation6 + $0x160] sm:$0xff]  ;;  %v4142_v30 = vpack.c.bf16 %v2366_v22, %v2358_v21  ;;  %v2446_v21 = vld [vmem:[#allocation6 + $0x3f8] sm:$0xff] }
 0x420   : > { %v2277_v32 = vmul.f32 %v4326_v31, %v4719_v23  ;;  %v2365_v31 = vld [vmem:[#allocation6 + $0x170] sm:$0xff] }
 0x421   : > { %v4328_v35 = vpop.eup %4327 }
 0x422   : > { %v4744_v33 = vadd.f32 %v2278_v34, %v2277_v32  ;;  %v2357_v34 = vld [vmem:[#allocation6 + $0x130] sm:$0xff]  ;;  %v2380_v32 = vld [vmem:[#allocation6 + $0x1e8] sm:$0xff] }
 0x424   : > { %4329 = vtanh.f32 %v4744_v33 }
 0x42e   : > { %v4330_v36 = vpop.eup %4329 }
 0x42f   : > { %v4747_v37 = vmul.f32 %v4330_v36, %v4328_v35  ;;  %v2374_v35 = vld [vmem:[#allocation6 + $0x1b8] sm:$0xff] }
 0x430   : > { %v2382_v36 = vld [vmem:[#allocation6 + $0x1f8] sm:$0xff] }
 0x431   : > { %3155 = vst [vmem:[%s4658_s25 + $0x10] sm:$0xff] %v4747_v37 }
 0x442   : > { %v2174_v40 = vpop.f32.mrb[10].mxu0  ;;  %v2245_v42 = vpop.f32.mrb[10].mxu1 }
 0x443   : > { %v2254_v43 = vadd.f32 %v3145_v38, %v2174_v40  ;;  %v2176_v44 = vpop.f32.mrb[11].mxu0  ;;  %v2247_v23 = vpop.f32.mrb[11].mxu1  ;;  %v2256_v50 = vadd.f32 %v3147_v49, %v2245_v42  ;;  %v4080_v38 = vpack.c.bf16 %v2363_v28, %v2355_v27  ;;  %v2371_v40 = vld [vmem:[#allocation6 + $0x1a0] sm:$0xff]  ;;  %v2390_v49 = vld [vmem:[#allocation6 + $0x238] sm:$0xff] }
 0x444   : > { %v2255_v45 = vadd.f32 %v3146_v39, %v2176_v44  ;;  %v2257_v52 = vadd.f32 %v3148_v51, %v2247_v23  ;;  %v4144_v39 = vpack.c.bf16 %v2365_v31, %v2357_v34  ;;  %v2379_v42 = vld [vmem:[#allocation6 + $0x1e0] sm:$0xff]  ;;  %v4146_v44 = vpack.c.bf16 %v2382_v36, %v2374_v35  ;;  %v2373_v23 = vld [vmem:[#allocation6 + $0x1b0] sm:$0xff]  ;;  %v2452_v31 = vld [vmem:[#allocation6 + $0x428] sm:$0xff] }
 0x445   : > { %v3152_v47 = vmul.f32 -1.442695, %v2254_v43  ;;  %v3154_v53 = vmul.f32 -1.442695, %v2256_v50  ;;  %v4082_v43 = vpack.c.bf16 %v2380_v32, %v2372_v10  ;;  %v2398_v50 = vld [vmem:[#allocation6 + $0x278] sm:$0xff]  ;;  %v4084_v51 = vpack.c.bf16 %v2379_v42, %v2371_v40  ;;  %v2443_v27 = vld [vmem:[#allocation6 + $0x3e0] sm:$0xff] }
 0x446   : > { %v3153_v48 = vmul.f32 -1.442695, %v2255_v45  ;;  %v2381_v45 = vld [vmem:[#allocation6 + $0x1f0] sm:$0xff]  ;;  %v2460_v10 = vld [vmem:[#allocation6 + $0x468] sm:$0xff]  ;;  %v2454_v32 = vld [vmem:[#allocation6 + $0x438] sm:$0xff] }
 0x447   : > { %4331 = vpow2.f32 %v3152_v47  ;;  %v2388_v47 = vld [vmem:[#allocation6 + $0x228] sm:$0xff]  ;;  %v2445_v34 = vld [vmem:[#allocation6 + $0x3f0] sm:$0xff]  ;;  %v2462_v35 = vld [vmem:[#allocation6 + $0x478] sm:$0xff]  ;;  %v4102_v42 = vpack.c.bf16 %v2460_v10, %v2452_v31 }
 0x448   : > { %4333 = vpow2.f32 %v3153_v48  ;;  %v2396_v48 = vld [vmem:[#allocation6 + $0x268] sm:$0xff]  ;;  %v2459_v40 = vld [vmem:[#allocation6 + $0x460] sm:$0xff]  ;;  %v2534_v10 = vld [vmem:[#allocation6 + $0x6b8] sm:$0xff] }
 0x449   : > { %4335 = vtanh.f32 %v2257_v52  ;;  %v4148_v52 = vpack.c.bf16 %v2381_v45, %v2373_v23  ;;  %v2461_v23 = vld [vmem:[#allocation6 + $0x470] sm:$0xff]  ;;  %v2468_v45 = vld [vmem:[#allocation6 + $0x4a8] sm:$0xff] }
 0x44a   : > { %4337 = vpow2.f32 %v3154_v53  ;;  %v2387_v53 = vld [vmem:[#allocation6 + $0x220] sm:$0xff]  ;;  %v2540_v31 = vld [vmem:[#allocation6 + $0x6e8] sm:$0xff] }
 0x451   : > { %v4332_v55 = vpop.eup %4331 }
 0x452   : > { %v2291_v56 = vadd.f32 1.0, %v4332_v55  ;;  %v4334_v57 = vpop.eup %4333  ;;  %v2395_v55 = vld [vmem:[#allocation6 + $0x260] sm:$0xff] }
 0x453   : > { %v2292_v46 = vadd.f32 1.0, %v4334_v57  ;;  %v4336_v58 = vpop.eup %4335  ;;  %v4150_v57 = vpack.c.bf16 %v2398_v50, %v2390_v49  ;;  %v2478_v49 = vld [vmem:[#allocation6 + $0x4f8] sm:$0xff] }
 0x454   : > { %4339 = vrcp.f32 %v2291_v56  ;;  %v4338_v59 = vpop.eup %4337  ;;  %v4086_v56 = vpack.c.bf16 %v2396_v48, %v2388_v47  ;;  %v2476_v47 = vld [vmem:[#allocation6 + $0x4e8] sm:$0xff]  ;;  %v2470_v48 = vld [vmem:[#allocation6 + $0x4b8] sm:$0xff] }
 0x455   : > { %4341 = vrcp.f32 %v2292_v46  ;;  %v2293_v63 = vadd.f32 1.0, %v4338_v59  ;;  %v2389_v46 = vld [vmem:[#allocation6 + $0x230] sm:$0xff]  ;;  %v2404_v59 = vld [vmem:[#allocation6 + $0x2a8] sm:$0xff] }
 0x457   : > { %4343 = vrcp.f32 %v2293_v63  ;;  %v4088_v63 = vpack.c.bf16 %v2395_v55, %v2387_v53  ;;  %v2475_v53 = vld [vmem:[#allocation6 + $0x4e0] sm:$0xff]  ;;  %v4106_v55 = vpack.c.bf16 %v2476_v47, %v2468_v45  ;;  %v2556_v45 = vld [vmem:[#allocation6 + $0x768] sm:$0xff]  ;;  %v2550_v47 = vld [vmem:[#allocation6 + $0x738] sm:$0xff] }
 0x45e   : > { %v4340_v60 = vpop.eup %4339 }
 0x45f   : > { %v2302_v61 = vmul.f32 %v4340_v60, %v4336_v58  ;;  %v4342_v62 = vpop.eup %4341  ;;  %v2397_v58 = vld [vmem:[#allocation6 + $0x270] sm:$0xff]  ;;  %v2412_v60 = vld [vmem:[#allocation6 + $0x2e8] sm:$0xff] }
 0x460   : > { %v2301_v13 = vmul.f32 %v4342_v62, %v4731_v54  ;;  %v2339_v54 = vld [vmem:[#allocation6 + $0xa0] sm:$0xff]  ;;  %v2414_v62 = vld [vmem:[#allocation6 + $0x2f8] sm:$0xff]  ;;  %v4090_v2 = vpack.c.bf16 %v2412_v60, %v2404_v59  ;;  %v2492_v59 = vld [vmem:[#allocation6 + $0x568] sm:$0xff] }
 0x461   : > { %v4344_v4 = vpop.eup %4343  ;;  %v4076_v24 = vpack.c.bf16 %v2347_v14, %v2339_v54  ;;  %v2427_v54 = vld [vmem:[#allocation6 + $0x360] sm:$0xff]  ;;  %v2486_v60 = vld [vmem:[#allocation6 + $0x538] sm:$0xff] }
 0x462   : > { %v4756_v0 = vadd.f32 %v2302_v61, %v2301_v13  ;;  %v2406_v61 = vld [vmem:[#allocation6 + $0x2b8] sm:$0xff]  ;;  %v4152_v13 = vpack.c.bf16 %v2397_v58, %v2389_v46  ;;  %v2477_v46 = vld [vmem:[#allocation6 + $0x4f0] sm:$0xff]  ;;  %v2484_v58 = vld [vmem:[#allocation6 + $0x528] sm:$0xff] }
 0x463   : > { %v4154_v3 = vpack.c.bf16 %v2414_v62, %v2406_v61  ;;  %v2494_v61 = vld [vmem:[#allocation6 + $0x578] sm:$0xff] }
 0x464   : > { %4345 = vtanh.f32 %v4756_v0 }
 0x46e   : > { %v4346_v6 = vpop.eup %4345 }
 0x46f   : > { %v2305_v26 = vmul.f32 %v4346_v6, %v4344_v4  ;;  %v2405_v4 = vld [vmem:[#allocation6 + $0x2b0] sm:$0xff]  ;;  %v2420_v6 = vld [vmem:[#allocation6 + $0x328] sm:$0xff] }
 0x470   : > { %v4094_v14 = vpack.c.bf16 %v2428_v7, %v2420_v6  ;;  %v2508_v6 = vld [vmem:[#allocation6 + $0x5e8] sm:$0xff]  ;;  %v2502_v7 = vld [vmem:[#allocation6 + $0x5b8] sm:$0xff] }
 0x471   : > { %3156 = vst [vmem:[%s4663_s18 + $0x8] sm:$0xff] %v2305_v26  ;;  %2639 = vmatprep.mubr.f32.mxu0 %v2305_v26  ;;  %2710 = vmatprep.mubr.f32.mxu1 %v2305_v26 }
 0x472   : > { %2640 = vmatmul.mubr.f32.vlgmr.msra.gmra.mrb[12].mxu0 %v4747_v37  ;;  %2711 = vmatmul.mubr.f32.vlgmr.msra.gmra.mrb[12].mxu1 %v4747_v37 }
 0x473   : > { %4073 = vmatpush1.bf16.msra.mxu0 %v4072_v11  ;;  %4137 = vmatpush1.bf16.msra.mxu1 %v4136_v12  ;;  %v4156_v11 = vpack.c.bf16 %v2413_v5, %v2405_v4  ;;  %v2419_v12 = vld [vmem:[#allocation6 + $0x320] sm:$0xff]  ;;  %v2493_v4 = vld [vmem:[#allocation6 + $0x570] sm:$0xff]  ;;  %v2500_v5 = vld [vmem:[#allocation6 + $0x5a8] sm:$0xff] }
 0x474   : > { %2781 = vmatprep.mubr.f32.mxu0 %v2305_v26  ;;  %2852 = vmatprep.mubr.f32.mxu1 %v2305_v26  ;;  %v4092_v26 = vpack.c.bf16 %v2411_v41, %v2403_v1  ;;  %v4096_v22 = vpack.c.bf16 %v2427_v54, %v2419_v12  ;;  %v2491_v1 = vld [vmem:[#allocation6 + $0x560] sm:$0xff]  ;;  %v4110_v41 = vpack.c.bf16 %v2492_v59, %v2484_v58  ;;  %v2572_v58 = vld [vmem:[#allocation6 + $0x7e8] sm:$0xff]  ;;  %v2566_v59 = vld [vmem:[#allocation6 + $0x7b8] sm:$0xff] }
 0x475   : > { %4075 = vmatprep.subr.bf16.mxu0 %v4074_v18  ;;  %4139 = vmatprep.subr.bf16.mxu1 %v4138_v19  ;;  %v2436_v18 = vld [vmem:[#allocation6 + $0x3a8] sm:$0xff]  ;;  %v2507_v12 = vld [vmem:[#allocation6 + $0x5e0] sm:$0xff]  ;;  %v4114_v54 = vpack.c.bf16 %v2508_v6, %v2500_v5 }
 0x476   : > { %v2444_v19 = vld [vmem:[#allocation6 + $0x3e8] sm:$0xff]  ;;  %v3157_v6 = vld [vmem:[%s4645_s19 + $0x60] sm:$0xff] }
 0x477   : > { %4077 = vmatpush1.bf16.msra.mxu0 %v4076_v24  ;;  %4141 = vmatpush1.bf16.msra.mxu1 %v4140_v25  ;;  %v4160_v24 = vpack.c.bf16 %v2429_v17, %v2421_v16  ;;  %v2435_v25 = vld [vmem:[#allocation6 + $0x3a0] sm:$0xff]  ;;  %v4098_v28 = vpack.c.bf16 %v2444_v19, %v2436_v18  ;;  %v2509_v16 = vld [vmem:[#allocation6 + $0x5f0] sm:$0xff]  ;;  %v2516_v17 = vld [vmem:[#allocation6 + $0x628] sm:$0xff] }
 0x478   : > { %4079 = vmatprep.subr.bf16.mxu0 %v4078_v29  ;;  %4143 = vmatprep.subr.bf16.mxu1 %v4142_v30  ;;  %v4162_v29 = vpack.c.bf16 %v2446_v21, %v2438_v20  ;;  %v2437_v30 = vld [vmem:[#allocation6 + $0x3b0] sm:$0xff]  ;;  %v4100_v36 = vpack.c.bf16 %v2443_v27, %v2435_v25  ;;  %v2524_v18 = vld [vmem:[#allocation6 + $0x668] sm:$0xff]  ;;  %v2518_v19 = vld [vmem:[#allocation6 + $0x638] sm:$0xff] }
 0x479   : > { %v2526_v20 = vld [vmem:[#allocation6 + $0x678] sm:$0xff]  ;;  %v2523_v25 = vld [vmem:[#allocation6 + $0x660] sm:$0xff]  ;;  %v4118_v27 = vpack.c.bf16 %v2524_v18, %v2516_v17 }
 0x47a   : > { %v3160_v18 = vld [vmem:[%s4645_s19 + $0x78] sm:$0xff] }
 0x47b   : > { %4081 = vmatpush1.bf16.msra.mxu0 %v4080_v38  ;;  %4145 = vmatpush1.bf16.msra.mxu1 %v4144_v39  ;;  %v4164_v38 = vpack.c.bf16 %v2445_v34, %v2437_v30  ;;  %v2451_v39 = vld [vmem:[#allocation6 + $0x420] sm:$0xff]  ;;  %v2525_v30 = vld [vmem:[#allocation6 + $0x670] sm:$0xff]  ;;  %v2532_v34 = vld [vmem:[#allocation6 + $0x6a8] sm:$0xff] }
 0x47c   : > { %4083 = vmatprep.subr.bf16.mxu0 %v4082_v43  ;;  %4147 = vmatprep.subr.bf16.mxu1 %v4146_v44  ;;  %v4166_v43 = vpack.c.bf16 %v2462_v35, %v2454_v32  ;;  %v2453_v44 = vld [vmem:[#allocation6 + $0x430] sm:$0xff]  ;;  %v4104_v50 = vpack.c.bf16 %v2459_v40, %v2451_v39  ;;  %v2542_v32 = vld [vmem:[#allocation6 + $0x6f8] sm:$0xff]  ;;  %v2539_v39 = vld [vmem:[#allocation6 + $0x6e0] sm:$0xff]  ;;  %v4122_v40 = vpack.c.bf16 %v2540_v31, %v2532_v34 }
 0x47f   : > { %4085 = vmatpush1.bf16.msra.mxu0 %v4084_v51  ;;  %4149 = vmatpush1.bf16.msra.mxu1 %v4148_v52  ;;  %v4168_v51 = vpack.c.bf16 %v2461_v23, %v2453_v44  ;;  %v2467_v52 = vld [vmem:[#allocation6 + $0x4a0] sm:$0xff]  ;;  %v2541_v44 = vld [vmem:[#allocation6 + $0x6f0] sm:$0xff]  ;;  %v2548_v23 = vld [vmem:[#allocation6 + $0x728] sm:$0xff] }
 0x480   : > { %4087 = vmatprep.subr.bf16.mxu0 %v4086_v56  ;;  %4151 = vmatprep.subr.bf16.mxu1 %v4150_v57  ;;  %v4170_v56 = vpack.c.bf16 %v2478_v49, %v2470_v48  ;;  %v2469_v57 = vld [vmem:[#allocation6 + $0x4b0] sm:$0xff]  ;;  %v4108_v62 = vpack.c.bf16 %v2475_v53, %v2467_v52  ;;  %v2558_v48 = vld [vmem:[#allocation6 + $0x778] sm:$0xff]  ;;  %v2555_v52 = vld [vmem:[#allocation6 + $0x760] sm:$0xff]  ;;  %v4126_v53 = vpack.c.bf16 %v2556_v45, %v2548_v23 }
 0x483   : > { %4089 = vmatpush1.bf16.msra.mxu0 %v4088_v63  ;;  %4153 = vmatpush1.bf16.msra.mxu1 %v4152_v13  ;;  %v4172_v63 = vpack.c.bf16 %v2477_v46, %v2469_v57  ;;  %v2483_v13 = vld [vmem:[#allocation6 + $0x520] sm:$0xff]  ;;  %v2557_v57 = vld [vmem:[#allocation6 + $0x770] sm:$0xff]  ;;  %v2564_v46 = vld [vmem:[#allocation6 + $0x7a8] sm:$0xff] }
 0x484   : > { %4091 = vmatprep.subr.bf16.mxu0 %v4090_v2  ;;  %4155 = vmatprep.subr.bf16.mxu1 %v4154_v3  ;;  %v4174_v2 = vpack.c.bf16 %v2494_v61, %v2486_v60  ;;  %v2485_v3 = vld [vmem:[#allocation6 + $0x530] sm:$0xff]  ;;  %v4112_v9 = vpack.c.bf16 %v2491_v1, %v2483_v13  ;;  %v2574_v60 = vld [vmem:[#allocation6 + $0x7f8] sm:$0xff]  ;;  %v4130_v13 = vpack.c.bf16 %v2572_v58, %v2564_v46 }
 0x485   : > { %v4194_v1 = vpack.c.bf16 %v2574_v60, %v2566_v59 }
 0x487   : > { %4093 = vmatpush1.bf16.msra.mxu0 %v4092_v26  ;;  %4157 = vmatpush1.bf16.msra.mxu1 %v4156_v11  ;;  %v4176_v26 = vpack.c.bf16 %v2493_v4, %v2485_v3  ;;  %v2499_v11 = vld [vmem:[#allocation6 + $0x5a0] sm:$0xff]  ;;  %v2573_v3 = vld [vmem:[#allocation6 + $0x7f0] sm:$0xff] }
 0x488   : > { %4095 = vmatprep.subr.bf16.mxu0 %v4094_v14  ;;  %4159 = vmatprep.subr.bf16.mxu1 %v4158_v15  ;;  %v4178_v14 = vpack.c.bf16 %v2510_v8, %v2502_v7  ;;  %v2501_v15 = vld [vmem:[#allocation6 + $0x5b0] sm:$0xff]  ;;  %v4116_v21 = vpack.c.bf16 %v2507_v12, %v2499_v11  ;;  %v3158_v7 = vld [vmem:[%s4645_s19 + $0x68] sm:$0xff] }
 0x48b   : > { %4097 = vmatpush1.bf16.msra.mxu0 %v4096_v22  ;;  %4161 = vmatpush1.bf16.msra.mxu1 %v4160_v24  ;;  %v4180_v22 = vpack.c.bf16 %v2509_v16, %v2501_v15  ;;  %v2515_v24 = vld [vmem:[#allocation6 + $0x620] sm:$0xff]  ;;  %v3159_v16 = vld [vmem:[%s4645_s19 + $0x70] sm:$0xff] }
 0x48c   : > { %4099 = vmatprep.subr.bf16.mxu0 %v4098_v28  ;;  %4163 = vmatprep.subr.bf16.mxu1 %v4162_v29  ;;  %v4182_v28 = vpack.c.bf16 %v2526_v20, %v2518_v19  ;;  %v2517_v29 = vld [vmem:[#allocation6 + $0x630] sm:$0xff]  ;;  %v4120_v35 = vpack.c.bf16 %v2523_v25, %v2515_v24 }
 0x48f   : > { %4101 = vmatpush1.bf16.msra.mxu0 %v4100_v36  ;;  %4165 = vmatpush1.bf16.msra.mxu1 %v4164_v38  ;;  %v4184_v36 = vpack.c.bf16 %v2525_v30, %v2517_v29  ;;  %v2531_v38 = vld [vmem:[#allocation6 + $0x6a0] sm:$0xff] }
 0x490   : > { %4103 = vmatprep.subr.bf16.mxu0 %v4102_v42  ;;  %4167 = vmatprep.subr.bf16.mxu1 %v4166_v43  ;;  %v4186_v42 = vpack.c.bf16 %v2542_v32, %v2534_v10  ;;  %v2533_v43 = vld [vmem:[#allocation6 + $0x6b0] sm:$0xff]  ;;  %v4124_v49 = vpack.c.bf16 %v2539_v39, %v2531_v38  ;;  %v2315_v38 = vld [vmem:[%s4647_s23] sm:$0xff]  ;;  %v2316_v39 = vld [vmem:[%s4647_s23 + $0x8] sm:$0xff] }
 0x493   : > { %4105 = vmatpush1.bf16.msra.mxu0 %v4104_v50  ;;  %4169 = vmatpush1.bf16.msra.mxu1 %v4168_v51  ;;  %v4188_v50 = vpack.c.bf16 %v2541_v44, %v2533_v43  ;;  %v2547_v51 = vld [vmem:[#allocation6 + $0x720] sm:$0xff] }
 0x494   : > { %4107 = vmatprep.subr.bf16.mxu0 %v4106_v55  ;;  %4171 = vmatprep.subr.bf16.mxu1 %v4170_v56  ;;  %v4190_v55 = vpack.c.bf16 %v2558_v48, %v2550_v47  ;;  %v2549_v56 = vld [vmem:[#allocation6 + $0x730] sm:$0xff]  ;;  %v4128_v61 = vpack.c.bf16 %v2555_v52, %v2547_v51 }
 0x495   : > { %v2317_v48 = vld [vmem:[%s4647_s23 + $0x10] sm:$0xff] }
 0x497   : > { %4109 = vmatpush1.bf16.msra.mxu0 %v4108_v62  ;;  %4173 = vmatpush1.bf16.msra.mxu1 %v4172_v63  ;;  %v4192_v62 = vpack.c.bf16 %v2557_v57, %v2549_v56  ;;  %v2563_v63 = vld [vmem:[#allocation6 + $0x7a0] sm:$0xff] }
 0x498   : > { %4111 = vmatprep.subr.bf16.mxu0 %v4110_v41  ;;  %4175 = vmatprep.subr.bf16.mxu1 %v4174_v2  ;;  %v2571_v41 = vld [vmem:[#allocation6 + $0x7e0] sm:$0xff]  ;;  %v2565_v2 = vld [vmem:[#allocation6 + $0x7b0] sm:$0xff] }
 0x499   : > { %v4132_v4 = vpack.c.bf16 %v2571_v41, %v2563_v63  ;;  %v4196_v5 = vpack.c.bf16 %v2573_v3, %v2565_v2 }
 0x49b   : > { %4113 = vmatpush1.bf16.msra.mxu0 %v4112_v9  ;;  %4177 = vmatpush1.bf16.msra.mxu1 %v4176_v26 }
 0x49c   : > { %4115 = vmatprep.subr.bf16.mxu0 %v4114_v54  ;;  %4179 = vmatprep.subr.bf16.mxu1 %v4178_v14 }
 0x49f   : > { %4117 = vmatpush1.bf16.msra.mxu0 %v4116_v21  ;;  %4181 = vmatpush1.bf16.msra.mxu1 %v4180_v22 }
 0x4a0   : > { %4119 = vmatprep.subr.bf16.mxu0 %v4118_v27  ;;  %4183 = vmatprep.subr.bf16.mxu1 %v4182_v28 }
 0x4a3   : > { %4121 = vmatpush1.bf16.msra.mxu0 %v4120_v35  ;;  %4185 = vmatpush1.bf16.msra.mxu1 %v4184_v36 }
 0x4a4   : > { %4123 = vmatprep.subr.bf16.mxu0 %v4122_v40  ;;  %4187 = vmatprep.subr.bf16.mxu1 %v4186_v42 }
 0x4a7   : > { %4125 = vmatpush1.bf16.msra.mxu0 %v4124_v49  ;;  %4189 = vmatpush1.bf16.msra.mxu1 %v4188_v50  ;;  %v2318_v50 = vld [vmem:[%s4647_s23 + $0x18] sm:$0xff] }
 0x4a8   : > { %4127 = vmatprep.subr.bf16.mxu0 %v4126_v53  ;;  %4191 = vmatprep.subr.bf16.mxu1 %v4190_v55 }
 0x4ab   : > { %4129 = vmatpush1.bf16.msra.mxu0 %v4128_v61  ;;  %4193 = vmatpush1.bf16.msra.mxu1 %v4192_v62 }
 0x4ac   : > { %4131 = vmatprep.subr.bf16.mxu0 %v4130_v13  ;;  %4195 = vmatprep.subr.bf16.mxu1 %v4194_v1 }
 0x4af   : > { %4133 = vmatpush1.bf16.msra.mxu0 %v4132_v4  ;;  %4197 = vmatpush1.bf16.msra.mxu1 %v4196_v5 }
 0x4b2   : > { %2782 = vmatmul.mubr.f32.vlgmr.msra.gmra.mrb[14].mxu0 %v4747_v37  ;;  %2853 = vmatmul.mubr.f32.vlgmr.msra.gmra.mrb[14].mxu1 %v4747_v37 }
 0x545   : > { %v2641_v8 = vpop.f32.mrb[12].mxu0  ;;  %v2712_v9 = vpop.f32.mrb[12].mxu1 }
 0x546   : > { %v2859_v26 = vadd.f32 %v3157_v6, %v2641_v8  ;;  %v2643_v11 = vpop.f32.mrb[13].mxu0  ;;  %v2714_v12 = vpop.f32.mrb[13].mxu1  ;;  %v2861_v17 = vadd.f32 %v3159_v16, %v2712_v9 }
 0x547   : > { %v2860_v54 = vadd.f32 %v3158_v7, %v2643_v11  ;;  %v2862_v19 = vadd.f32 %v3160_v18, %v2714_v12 }
 0x548   : > { %v3161_v14 = vmul.f32 -1.442695, %v2859_v26  ;;  %v3163_v20 = vmul.f32 -1.442695, %v2861_v17 }
 0x549   : > { %v3162_v15 = vmul.f32 -1.442695, %v2860_v54 }
 0x54a   : > { %4347 = vpow2.f32 %v3161_v14 }
 0x54b   : > { %4349 = vpow2.f32 %v3162_v15 }
 0x54c   : > { %4351 = vtanh.f32 %v2862_v19 }
 0x54d   : > { %4353 = vpow2.f32 %v3163_v20 }
 0x554   : > { %v4348_v21 = vpop.eup %4347 }
 0x555   : > { %v2876_v22 = vadd.f32 1.0, %v4348_v21  ;;  %v4350_v37 = vpop.eup %4349 }
 0x556   : > { %v2877_v24 = vadd.f32 1.0, %v4350_v37  ;;  %v4352_v25 = vpop.eup %4351 }
 0x557   : > { %4355 = vrcp.f32 %v2876_v22  ;;  %v4354_v27 = vpop.eup %4353 }
 0x558   : > { %4357 = vrcp.f32 %v2877_v24  ;;  %v2878_v34 = vadd.f32 1.0, %v4354_v27 }
 0x55a   : > { %4359 = vrcp.f32 %v2878_v34 }
 0x561   : > { %v4356_v28 = vpop.eup %4355 }
 0x562   : > { %v2887_v29 = vmul.f32 %v4356_v28, %v4352_v25  ;;  %v4358_v30 = vpop.eup %4357 }
 0x563   : > { %v2886_v31 = vmul.f32 %v4358_v30, %v4744_v33 }
 0x564   : > { %v4360_v32 = vpop.eup %4359 }
 0x565   : > { %v2888_v10 = vadd.f32 %v2887_v29, %v2886_v31 }
 0x567   : > { %4361 = vtanh.f32 %v2888_v10  ;;  %2919 = vst [vmem:[#allocation3] sm:$0xff] %v2888_v10 }
 0x56e   : > { %v2930_v5 = vld [vmem:[#allocation3] sm:$0xff] (!%p3168_p4) }
 0x56f   : > { %2932 = vst [vmem:[%s4813_s8] sm:$0xff] (!%p3168_p4), %v2930_v5 }
 0x571   : > { %v4362_v35 = vpop.eup %4361 }
 0x572   : > { %v2890_v36 = vmul.f32 %v4362_v35, %v4360_v32 }
 0x574   : > { %3167 = vst [vmem:[%s4658_s25 + $0x18] sm:$0xff] %v2890_v36  ;;  %2918 = vst [vmem:[#allocation2] sm:$0xff] %v2890_v36 }
 0x57b   : > { %v2926_v3 = vld [vmem:[#allocation2] sm:$0xff] (!%p3168_p4) }
 0x57c   : > { %2928 = vst [vmem:[%s4812_s7] sm:$0xff] (!%p3168_p4), %v2926_v3 }
 0x585   : > { %v2783_v40 = vpop.f32.mrb[14].mxu0  ;;  %v2854_v42 = vpop.f32.mrb[14].mxu1 }
 0x586   : > { %v2863_v43 = vadd.f32 %v2783_v40, %v2315_v38  ;;  %v2785_v44 = vpop.f32.mrb[15].mxu0  ;;  %v2856_v23 = vpop.f32.mrb[15].mxu1  ;;  %v2865_v49 = vadd.f32 %v2854_v42, %v2317_v48 }
 0x587   : > { %v2864_v45 = vadd.f32 %v2785_v44, %v2316_v39  ;;  %v2866_v51 = vadd.f32 %v2856_v23, %v2318_v50 }
 0x588   : > { %v3164_v33 = vmul.f32 -1.442695, %v2863_v43  ;;  %v3166_v52 = vmul.f32 -1.442695, %v2865_v49 }
 0x589   : > { %v3165_v47 = vmul.f32 -1.442695, %v2864_v45 }
 0x58a   : > { %4363 = vpow2.f32 %v3164_v33 }
 0x58b   : > { %4365 = vpow2.f32 %v3165_v47 }
 0x58c   : > { %4367 = vtanh.f32 %v2866_v51 }
 0x58d   : > { %4369 = vpow2.f32 %v3166_v52 }
 0x594   : > { %v4364_v53 = vpop.eup %4363 }
 0x595   : > { %v2900_v55 = vadd.f32 1.0, %v4364_v53  ;;  %v4366_v56 = vpop.eup %4365 }
 0x596   : > { %v2901_v57 = vadd.f32 1.0, %v4366_v56  ;;  %v4368_v46 = vpop.eup %4367 }
 0x597   : > { %4371 = vrcp.f32 %v2900_v55  ;;  %v4370_v58 = vpop.eup %4369 }
 0x598   : > { %4373 = vrcp.f32 %v2901_v57  ;;  %v2902_v62 = vadd.f32 1.0, %v4370_v58 }
 0x59a   : > { %4375 = vrcp.f32 %v2902_v62 }
 0x5a1   : > { %v4372_v59 = vpop.eup %4371 }
 0x5a2   : > { %v2911_v60 = vmul.f32 %v4372_v59, %v4368_v46  ;;  %v4374_v61 = vpop.eup %4373 }
 0x5a3   : > { %v2910_v63 = vmul.f32 %v4374_v61, %v4756_v0 }
 0x5a4   : > { %v4376_v1 = vpop.eup %4375 }
 0x5a5   : > { %v2912_v13 = vadd.f32 %v2911_v60, %v2910_v63 }
 0x5a7   : > { %4377 = vtanh.f32 %v2912_v13  ;;  %2921 = vst [vmem:[#allocation3 + $0x8] sm:$0xff] %v2912_v13 }
 0x5ae   : > { %2925 = sbr.rel (%p3168_p4) target bundleno = 1469 (0x5bd), region = 98  ;;  %v2931_v0 = vld [vmem:[#allocation3 + $0x8] sm:$0xff] (!%p3168_p4) }
 0x5af   : > { %2933 = vst [vmem:[%s4813_s8 + $0x8] sm:$0xff] (!%p3168_p4), %v2931_v0 }
 0x5b1   : > { %v4378_v41 = vpop.eup %4377 }
 0x5b2   : > { %v2914_v2 = vmul.f32 %v4378_v41, %v4376_v1 }
 0x5b4   : > { %2917 = vst [vmem:[%s4663_s18] sm:$0xff] %v2914_v2  ;;  %2920 = vst [vmem:[#allocation2 + $0x8] sm:$0xff] %v2914_v2 }
 0x5bb   : > { %v2927_v4 = vld [vmem:[#allocation2 + $0x8] sm:$0xff] }
 0x5bc   : > { %2929 = vst [vmem:[%s4812_s7 + $0x8] sm:$0xff] %v2927_v4 }
 0x5bd PF: > { %s4830_s10 = sld [smem:[#allocation10_spill]]  ;;  %s4831_s17 = sld [smem:[#allocation9_spill]] }
 0x5be   : > { %p17_p5 = scmp.ge.s32.totalorder %s4528_s11, 4   ;;  %s4832_s27 = smov %s4437_s28 }
 0x5bf   : > { %s4834_s29 = smov %s4445_s30  ;;  %s4836_s9 = smov %s4528_s11 }
 0x5c0   :  { %19 = sbr.rel (!%p17_p5) target bundleno = 3 (0x3), region = 184 }
 0x5c3   : > { %s4833_s28 = smov %s4830_s10  ;;  %s4835_s30 = smov %s4831_s17 }
 0x5c7   :  { %2988 = vsyncpa [#allocation7], 1 }
 0x5c8   :  { %2990 = vsyncpa [#allocation7 + $0x1], 1 }

</bundles_post_ra>
